<compile_context>
chip_gen: v7x
topology: tpu7x:2x2x1
jax: 0.10.0
libtpu: 0.0.40
codegen_flags: <defaults>
</compile_context>

<pallas_src>
import jax
import jax.numpy as jnp
from jax.experimental import pallas as pl
from jax.experimental.pallas import tpu as pltpu


# ----------------------------- static model dims --------------------------- #
N, CIN, COUT = 2, 3, 3
D = H = W = 7
K = 3                               # 3x3x3 conv kernel, stride 1, padding 0
DO = HO = WO = D - K + 1            # 5
HW = H * W                          # 49
DP = HP = WP = DO // 2              # 2   MaxPool3d(2), floor mode
SEG = (HO - 1) * W + WO + (K - 1)   # 35  per-co lane segment (33 valid + kw slack)
LANES = COUT * SEG                  # 105 packed lane width (<= 128)
L_HW = LANES - 1 - W                # 97  lane width after w/h pair maxima
CKKK = CIN * K * K * K              # 81  weight stride per output channel


# ------------------------------- fused kernel ------------------------------ #
def fused_conv_hswish_pool_kernel(x9_ref, w_ref, b_ref, o_ref):
    """x9_ref: (K*K, CIN, N, D, LANES) f32 VMEM -- per-(kh,kw) input window,
               replicated across the three COUT lane segments.
       w_ref : (COUT*CIN*K*K*K,) f32 SMEM  (PyTorch (co,ci,kd,kh,kw) row-major)
       b_ref : (COUT,) f32 SMEM
       o_ref : (N, DO-1, L_HW) f32 VMEM -- gated + (w,h,d)-pair-maxed conv out"""
    # Hoisted lane masks selecting the co segment: [0,SEG) co=0, [SEG,2SEG) co=1, rest co=2.
    lane = jax.lax.broadcasted_iota(jnp.int32, (DO, LANES), 1)
    m0 = lane < SEG
    m1 = lane < 2 * SEG

    # Accumulator (N, DO, LANES): lane SEG*co + h_o*W + w_o holds the conv output
    # for (co, h_o, w_o); initialized with the per-segment bias.
    bias = jnp.where(m0, b_ref[0], jnp.where(m1, b_ref[1], b_ref[2]))
    acc = jnp.broadcast_to(bias, (N, DO, LANES))

    # 81 vector FMAs; every x load is a static, lane-aligned ref load.
    for ci in range(CIN):
        for kd in range(K):
            for kh in range(K):
                for kw in range(K):
                    xs = x9_ref[kh * K + kw, ci, :, kd:kd + DO, :]   # (N, DO, LANES)
                    base = (ci * K + kd) * K * K + kh * K + kw       # tap index per co
                    wvec = jnp.where(
                        m0, w_ref[base],
                        jnp.where(m1, w_ref[CKKK + base], w_ref[2 * CKKK + base]))
                    acc = acc + wvec * xs

    # hardswish-style gate
    v6 = acc * jnp.clip(acc + 3.0, 0.0, 6.0) * (1.0 / 6.0)

    # 2x2x2 max pool (floor mode) as pairwise maxima over shifted slices.
    # Lane q of hmax = max over v6 lanes {q, q+1, q+W, q+W+1}; every lane read at
    # the gathered pool corners is a valid conv output (no wrap hazard).
    wmax = jnp.maximum(v6[:, :, 0:LANES - 1], v6[:, :, 1:LANES])       # (N, DO, 104)
    hmax = jnp.maximum(wmax[:, :, 0:L_HW], wmax[:, :, W:W + L_HW])     # (N, DO, 97)
    dmax = jnp.maximum(hmax[:, 0:DO - 1, :], hmax[:, 1:DO, :])         # (N, 4, 97)
    o_ref[...] = dmax


# ------------------------------ JAX wrapper -------------------------------- #
@jax.jit
def model_forward(x, conv_w, conv_b):
    """x: (N, Cin, D, H, W)  conv_w: (Cout, Cin, 3, 3, 3)  conv_b: (Cout,)"""
    # Layout plumbing (one small fused XLA op): (h,w) flat on lanes, then the
    # 35-lane window for each (kh,kw) tap, replicated across the 3 co segments.
    x_l = jnp.transpose(x, (1, 0, 2, 3, 4)).reshape(CIN, N, D, HW).astype(jnp.float32)
    pad = (K - 1) * W + (K - 1) + SEG - HW                            # 2
    x_pad = jnp.pad(x_l, ((0, 0), (0, 0), (0, 0), (0, pad)))          # (CIN,N,D,51)
    wins = jnp.stack([x_pad[:, :, :, kh * W + kw: kh * W + kw + SEG]
                      for kh in range(K) for kw in range(K)], axis=0)  # (9,CIN,N,D,35)
    x9 = jnp.tile(wins, (1, 1, 1, 1, COUT))                            # (9,CIN,N,D,105)

    w_flat = conv_w.astype(jnp.float32).reshape(-1)                    # (243,)
    b = conv_b.astype(jnp.float32)

    slab = pl.pallas_call(
        fused_conv_hswish_pool_kernel,
        out_shape=jax.ShapeDtypeStruct((N, DO - 1, L_HW), jnp.float32),
        in_specs=[
            pl.BlockSpec(memory_space=pltpu.MemorySpace.VMEM),   # x9  (9,3,2,7,105)
            pl.BlockSpec(memory_space=pltpu.MemorySpace.SMEM),   # w   (243,)
            pl.BlockSpec(memory_space=pltpu.MemorySpace.SMEM),   # b   (3,)
        ],
        out_specs=pl.BlockSpec(memory_space=pltpu.MemorySpace.VMEM),
    )(x9, w_flat, b)

    # 48-element gather/reshape at the consumer (review option (b); effectively free).
    # rows 0,2 of the slab hold dp=0,1; lane SEG*co + 2*W*hp + 2*wp holds (co,hp,wp).
    lane_idx = jnp.array([SEG * co + 2 * W * hp + 2 * wp
                          for co in range(COUT) for hp in range(HP) for wp in range(WP)],
                         dtype=jnp.int32)                               # (12,)
    picked = jnp.take(slab[:, 0:2 * DP:2, :], lane_idx, axis=2)         # (N, DP, 12)
    out = picked.reshape(N, DP, COUT, HP, WP)
    return jnp.transpose(out, (0, 2, 1, 3, 4))                          # (N, COUT, DP, HP, WP)


# ------------------------- pure-JAX reference (check) ----------------------- #
def reference_forward(x, conv_w, conv_b):
    v1 = jax.lax.conv_general_dilated(
        x, conv_w, window_strides=(1, 1, 1), padding="VALID",
        dimension_numbers=("NCDHW", "OIDHW", "NCDHW"))
    v1 = v1 + conv_b.reshape(1, -1, 1, 1, 1)
    v6 = v1 * jnp.clip(v1 + 3.0, 0.0, 6.0) / 6.0
    return jax.lax.reduce_window(v6, -jnp.inf, jax.lax.max,
                                 (1, 1, 2, 2, 2), (1, 1, 2, 2, 2), "VALID")


# --------------------------------- driver ----------------------------------- #
if __name__ == "__main__":
    key = jax.random.PRNGKey(0)
    k_x, k_w, k_b = jax.random.split(key, 3)

    # matches x1 = torch.randn(2, 3, 7, 7, 7)
    x = jax.random.normal(k_x, (N, CIN, D, H, W), dtype=jnp.float32)

    # Conv3d(3, 3, 3) parameters, PyTorch-style uniform(-1/sqrt(fan_in), +)
    fan_in = CIN * K * K * K
    bound = 1.0 / (fan_in ** 0.5)
    conv_w = jax.random.uniform(k_w, (COUT, CIN, K, K, K), jnp.float32, -bound, bound)
    conv_b = jax.random.uniform(k_b, (COUT,), jnp.float32, -bound, bound)

    out = model_forward(x, conv_w, conv_b)
    jax.block_until_ready(out)

    assert out.shape == (N, COUT, DP, HP, WP), out.shape
    ref = reference_forward(x, conv_w, conv_b)
    assert jnp.allclose(out, ref, atol=1e-4, rtol=1e-4), float(jnp.max(jnp.abs(out - ref)))
    print("KERNEL_OK")
</pallas_src>

<mosaic_0001>
module attributes {stable_mosaic.version = 11 : i64} {
  func.func @fused_conv_hswish_pool_kernel(%arg0: memref<9x3x2x7x105xf32, #tpu.memory_space<vmem>>, %arg1: memref<243xf32, #tpu.memory_space<smem>>, %arg2: memref<3xf32, #tpu.memory_space<smem>>, %arg3: memref<2x4x97xf32, #tpu.memory_space<vmem>>) attributes {dimension_semantics = [], scalar_prefetch = 0 : i64, scratch_operands = 0 : i64, tpu.core_type = #tpu.core_type<tc>} {
    %0 = tpu.iota {dimensions = array<i32: 1>} : vector<5x105xi32>
    %c35_i32 = arith.constant 35 : i32
    %1 = vector.broadcast %c35_i32 : i32 to vector<5x105xi32>
    %2 = arith.cmpi slt, %0, %1 : vector<5x105xi32>
    %c70_i32 = arith.constant 70 : i32
    %3 = vector.broadcast %c70_i32 : i32 to vector<5x105xi32>
    %4 = arith.cmpi slt, %0, %3 : vector<5x105xi32>
    %c0 = arith.constant 0 : index
    %5 = memref.load %arg2[%c0] : memref<3xf32, #tpu.memory_space<smem>>
    %c1 = arith.constant 1 : index
    %6 = memref.load %arg2[%c1] : memref<3xf32, #tpu.memory_space<smem>>
    %c2 = arith.constant 2 : index
    %7 = memref.load %arg2[%c2] : memref<3xf32, #tpu.memory_space<smem>>
    %8 = vector.broadcast %6 : f32 to vector<5x105xf32>
    %9 = vector.broadcast %7 : f32 to vector<5x105xf32>
    %10 = arith.select %4, %8, %9 : vector<5x105xi1>, vector<5x105xf32>
    %11 = vector.broadcast %5 : f32 to vector<5x105xf32>
    %12 = arith.select %2, %11, %10 : vector<5x105xi1>, vector<5x105xf32>
    %13 = vector.shape_cast %12 : vector<5x105xf32> to vector<1x5x105xf32>
    %14 = vector.broadcast %13 : vector<1x5x105xf32> to vector<2x5x105xf32>
    %c0_0 = arith.constant 0 : index
    %c0_1 = arith.constant 0 : index
    %c0_2 = arith.constant 0 : index
    %c0_3 = arith.constant 0 : index
    %c0_4 = arith.constant 0 : index
    %15 = vector.load %arg0[%c0_0, %c0_1, %c0_2, %c0_3, %c0_4] : memref<9x3x2x7x105xf32, #tpu.memory_space<vmem>>, vector<1x1x2x5x105xf32>
    %16 = vector.shape_cast %15 : vector<1x1x2x5x105xf32> to vector<2x5x105xf32>
    %c0_5 = arith.constant 0 : index
    %17 = memref.load %arg1[%c0_5] : memref<243xf32, #tpu.memory_space<smem>>
    %c81 = arith.constant 81 : index
    %18 = memref.load %arg1[%c81] : memref<243xf32, #tpu.memory_space<smem>>
    %c162 = arith.constant 162 : index
    %19 = memref.load %arg1[%c162] : memref<243xf32, #tpu.memory_space<smem>>
    %20 = vector.broadcast %18 : f32 to vector<5x105xf32>
    %21 = vector.broadcast %19 : f32 to vector<5x105xf32>
    %22 = arith.select %4, %20, %21 : vector<5x105xi1>, vector<5x105xf32>
    %23 = vector.broadcast %17 : f32 to vector<5x105xf32>
    %24 = arith.select %2, %23, %22 : vector<5x105xi1>, vector<5x105xf32>
    %25 = vector.shape_cast %24 : vector<5x105xf32> to vector<1x5x105xf32>
    %26 = vector.broadcast %25 : vector<1x5x105xf32> to vector<2x5x105xf32>
    %27 = arith.mulf %26, %16 : vector<2x5x105xf32>
    %28 = arith.addf %14, %27 : vector<2x5x105xf32>
    %c1_6 = arith.constant 1 : index
    %c0_7 = arith.constant 0 : index
    %c0_8 = arith.constant 0 : index
    %c0_9 = arith.constant 0 : index
    %c0_10 = arith.constant 0 : index
    %29 = vector.load %arg0[%c1_6, %c0_7, %c0_8, %c0_9, %c0_10] : memref<9x3x2x7x105xf32, #tpu.memory_space<vmem>>, vector<1x1x2x5x105xf32>
    %30 = vector.shape_cast %29 : vector<1x1x2x5x105xf32> to vector<2x5x105xf32>
    %c1_11 = arith.constant 1 : index
    %31 = memref.load %arg1[%c1_11] : memref<243xf32, #tpu.memory_space<smem>>
    %c82 = arith.constant 82 : index
    %32 = memref.load %arg1[%c82] : memref<243xf32, #tpu.memory_space<smem>>
    %c163 = arith.constant 163 : index
    %33 = memref.load %arg1[%c163] : memref<243xf32, #tpu.memory_space<smem>>
    %34 = vector.broadcast %32 : f32 to vector<5x105xf32>
    %35 = vector.broadcast %33 : f32 to vector<5x105xf32>
    %36 = arith.select %4, %34, %35 : vector<5x105xi1>, vector<5x105xf32>
    %37 = vector.broadcast %31 : f32 to vector<5x105xf32>
    %38 = arith.select %2, %37, %36 : vector<5x105xi1>, vector<5x105xf32>
    %39 = vector.shape_cast %38 : vector<5x105xf32> to vector<1x5x105xf32>
    %40 = vector.broadcast %39 : vector<1x5x105xf32> to vector<2x5x105xf32>
    %41 = arith.mulf %40, %30 : vector<2x5x105xf32>
    %42 = arith.addf %28, %41 : vector<2x5x105xf32>
    %c2_12 = arith.constant 2 : index
    %c0_13 = arith.constant 0 : index
    %c0_14 = arith.constant 0 : index
    %c0_15 = arith.constant 0 : index
    %c0_16 = arith.constant 0 : index
    %43 = vector.load %arg0[%c2_12, %c0_13, %c0_14, %c0_15, %c0_16] : memref<9x3x2x7x105xf32, #tpu.memory_space<vmem>>, vector<1x1x2x5x105xf32>
    %44 = vector.shape_cast %43 : vector<1x1x2x5x105xf32> to vector<2x5x105xf32>
    %c2_17 = arith.constant 2 : index
    %45 = memref.load %arg1[%c2_17] : memref<243xf32, #tpu.memory_space<smem>>
    %c83 = arith.constant 83 : index
    %46 = memref.load %arg1[%c83] : memref<243xf32, #tpu.memory_space<smem>>
    %c164 = arith.constant 164 : index
    %47 = memref.load %arg1[%c164] : memref<243xf32, #tpu.memory_space<smem>>
    %48 = vector.broadcast %46 : f32 to vector<5x105xf32>
    %49 = vector.broadcast %47 : f32 to vector<5x105xf32>
    %50 = arith.select %4, %48, %49 : vector<5x105xi1>, vector<5x105xf32>
    %51 = vector.broadcast %45 : f32 to vector<5x105xf32>
    %52 = arith.select %2, %51, %50 : vector<5x105xi1>, vector<5x105xf32>
    %53 = vector.shape_cast %52 : vector<5x105xf32> to vector<1x5x105xf32>
    %54 = vector.broadcast %53 : vector<1x5x105xf32> to vector<2x5x105xf32>
    %55 = arith.mulf %54, %44 : vector<2x5x105xf32>
    %56 = arith.addf %42, %55 : vector<2x5x105xf32>
    %c3 = arith.constant 3 : index
    %c0_18 = arith.constant 0 : index
    %c0_19 = arith.constant 0 : index
    %c0_20 = arith.constant 0 : index
    %c0_21 = arith.constant 0 : index
    %57 = vector.load %arg0[%c3, %c0_18, %c0_19, %c0_20, %c0_21] : memref<9x3x2x7x105xf32, #tpu.memory_space<vmem>>, vector<1x1x2x5x105xf32>
    %58 = vector.shape_cast %57 : vector<1x1x2x5x105xf32> to vector<2x5x105xf32>
    %c3_22 = arith.constant 3 : index
    %59 = memref.load %arg1[%c3_22] : memref<243xf32, #tpu.memory_space<smem>>
    %c84 = arith.constant 84 : index
    %60 = memref.load %arg1[%c84] : memref<243xf32, #tpu.memory_space<smem>>
    %c165 = arith.constant 165 : index
    %61 = memref.load %arg1[%c165] : memref<243xf32, #tpu.memory_space<smem>>
    %62 = vector.broadcast %60 : f32 to vector<5x105xf32>
    %63 = vector.broadcast %61 : f32 to vector<5x105xf32>
    %64 = arith.select %4, %62, %63 : vector<5x105xi1>, vector<5x105xf32>
    %65 = vector.broadcast %59 : f32 to vector<5x105xf32>
    %66 = arith.select %2, %65, %64 : vector<5x105xi1>, vector<5x105xf32>
    %67 = vector.shape_cast %66 : vector<5x105xf32> to vector<1x5x105xf32>
    %68 = vector.broadcast %67 : vector<1x5x105xf32> to vector<2x5x105xf32>
    %69 = arith.mulf %68, %58 : vector<2x5x105xf32>
    %70 = arith.addf %56, %69 : vector<2x5x105xf32>
    %c4 = arith.constant 4 : index
    %c0_23 = arith.constant 0 : index
    %c0_24 = arith.constant 0 : index
    %c0_25 = arith.constant 0 : index
    %c0_26 = arith.constant 0 : index
    %71 = vector.load %arg0[%c4, %c0_23, %c0_24, %c0_25, %c0_26] : memref<9x3x2x7x105xf32, #tpu.memory_space<vmem>>, vector<1x1x2x5x105xf32>
    %72 = vector.shape_cast %71 : vector<1x1x2x5x105xf32> to vector<2x5x105xf32>
    %c4_27 = arith.constant 4 : index
    %73 = memref.load %arg1[%c4_27] : memref<243xf32, #tpu.memory_space<smem>>
    %c85 = arith.constant 85 : index
    %74 = memref.load %arg1[%c85] : memref<243xf32, #tpu.memory_space<smem>>
    %c166 = arith.constant 166 : index
    %75 = memref.load %arg1[%c166] : memref<243xf32, #tpu.memory_space<smem>>
    %76 = vector.broadcast %74 : f32 to vector<5x105xf32>
    %77 = vector.broadcast %75 : f32 to vector<5x105xf32>
    %78 = arith.select %4, %76, %77 : vector<5x105xi1>, vector<5x105xf32>
    %79 = vector.broadcast %73 : f32 to vector<5x105xf32>
    %80 = arith.select %2, %79, %78 : vector<5x105xi1>, vector<5x105xf32>
    %81 = vector.shape_cast %80 : vector<5x105xf32> to vector<1x5x105xf32>
    %82 = vector.broadcast %81 : vector<1x5x105xf32> to vector<2x5x105xf32>
    %83 = arith.mulf %82, %72 : vector<2x5x105xf32>
    %84 = arith.addf %70, %83 : vector<2x5x105xf32>
    %c5 = arith.constant 5 : index
    %c0_28 = arith.constant 0 : index
    %c0_29 = arith.constant 0 : index
    %c0_30 = arith.constant 0 : index
    %c0_31 = arith.constant 0 : index
    %85 = vector.load %arg0[%c5, %c0_28, %c0_29, %c0_30, %c0_31] : memref<9x3x2x7x105xf32, #tpu.memory_space<vmem>>, vector<1x1x2x5x105xf32>
    %86 = vector.shape_cast %85 : vector<1x1x2x5x105xf32> to vector<2x5x105xf32>
    %c5_32 = arith.constant 5 : index
    %87 = memref.load %arg1[%c5_32] : memref<243xf32, #tpu.memory_space<smem>>
    %c86 = arith.constant 86 : index
    %88 = memref.load %arg1[%c86] : memref<243xf32, #tpu.memory_space<smem>>
    %c167 = arith.constant 167 : index
    %89 = memref.load %arg1[%c167] : memref<243xf32, #tpu.memory_space<smem>>
    %90 = vector.broadcast %88 : f32 to vector<5x105xf32>
    %91 = vector.broadcast %89 : f32 to vector<5x105xf32>
    %92 = arith.select %4, %90, %91 : vector<5x105xi1>, vector<5x105xf32>
    %93 = vector.broadcast %87 : f32 to vector<5x105xf32>
    %94 = arith.select %2, %93, %92 : vector<5x105xi1>, vector<5x105xf32>
    %95 = vector.shape_cast %94 : vector<5x105xf32> to vector<1x5x105xf32>
    %96 = vector.broadcast %95 : vector<1x5x105xf32> to vector<2x5x105xf32>
    %97 = arith.mulf %96, %86 : vector<2x5x105xf32>
    %98 = arith.addf %84, %97 : vector<2x5x105xf32>
    %c6 = arith.constant 6 : index
    %c0_33 = arith.constant 0 : index
    %c0_34 = arith.constant 0 : index
    %c0_35 = arith.constant 0 : index
    %c0_36 = arith.constant 0 : index
    %99 = vector.load %arg0[%c6, %c0_33, %c0_34, %c0_35, %c0_36] : memref<9x3x2x7x105xf32, #tpu.memory_space<vmem>>, vector<1x1x2x5x105xf32>
    %100 = vector.shape_cast %99 : vector<1x1x2x5x105xf32> to vector<2x5x105xf32>
    %c6_37 = arith.constant 6 : index
    %101 = memref.load %arg1[%c6_37] : memref<243xf32, #tpu.memory_space<smem>>
    %c87 = arith.constant 87 : index
    %102 = memref.load %arg1[%c87] : memref<243xf32, #tpu.memory_space<smem>>
    %c168 = arith.constant 168 : index
    %103 = memref.load %arg1[%c168] : memref<243xf32, #tpu.memory_space<smem>>
    %104 = vector.broadcast %102 : f32 to vector<5x105xf32>
    %105 = vector.broadcast %103 : f32 to vector<5x105xf32>
    %106 = arith.select %4, %104, %105 : vector<5x105xi1>, vector<5x105xf32>
    %107 = vector.broadcast %101 : f32 to vector<5x105xf32>
    %108 = arith.select %2, %107, %106 : vector<5x105xi1>, vector<5x105xf32>
    %109 = vector.shape_cast %108 : vector<5x105xf32> to vector<1x5x105xf32>
    %110 = vector.broadcast %109 : vector<1x5x105xf32> to vector<2x5x105xf32>
    %111 = arith.mulf %110, %100 : vector<2x5x105xf32>
    %112 = arith.addf %98, %111 : vector<2x5x105xf32>
    %c7 = arith.constant 7 : index
    %c0_38 = arith.constant 0 : index
    %c0_39 = arith.constant 0 : index
    %c0_40 = arith.constant 0 : index
    %c0_41 = arith.constant 0 : index
    %113 = vector.load %arg0[%c7, %c0_38, %c0_39, %c0_40, %c0_41] : memref<9x3x2x7x105xf32, #tpu.memory_space<vmem>>, vector<1x1x2x5x105xf32>
    %114 = vector.shape_cast %113 : vector<1x1x2x5x105xf32> to vector<2x5x105xf32>
    %c7_42 = arith.constant 7 : index
    %115 = memref.load %arg1[%c7_42] : memref<243xf32, #tpu.memory_space<smem>>
    %c88 = arith.constant 88 : index
    %116 = memref.load %arg1[%c88] : memref<243xf32, #tpu.memory_space<smem>>
    %c169 = arith.constant 169 : index
    %117 = memref.load %arg1[%c169] : memref<243xf32, #tpu.memory_space<smem>>
    %118 = vector.broadcast %116 : f32 to vector<5x105xf32>
    %119 = vector.broadcast %117 : f32 to vector<5x105xf32>
    %120 = arith.select %4, %118, %119 : vector<5x105xi1>, vector<5x105xf32>
    %121 = vector.broadcast %115 : f32 to vector<5x105xf32>
    %122 = arith.select %2, %121, %120 : vector<5x105xi1>, vector<5x105xf32>
    %123 = vector.shape_cast %122 : vector<5x105xf32> to vector<1x5x105xf32>
    %124 = vector.broadcast %123 : vector<1x5x105xf32> to vector<2x5x105xf32>
    %125 = arith.mulf %124, %114 : vector<2x5x105xf32>
    %126 = arith.addf %112, %125 : vector<2x5x105xf32>
    %c8 = arith.constant 8 : index
    %c0_43 = arith.constant 0 : index
    %c0_44 = arith.constant 0 : index
    %c0_45 = arith.constant 0 : index
    %c0_46 = arith.constant 0 : index
    %127 = vector.load %arg0[%c8, %c0_43, %c0_44, %c0_45, %c0_46] : memref<9x3x2x7x105xf32, #tpu.memory_space<vmem>>, vector<1x1x2x5x105xf32>
    %128 = vector.shape_cast %127 : vector<1x1x2x5x105xf32> to vector<2x5x105xf32>
    %c8_47 = arith.constant 8 : index
    %129 = memref.load %arg1[%c8_47] : memref<243xf32, #tpu.memory_space<smem>>
    %c89 = arith.constant 89 : index
    %130 = memref.load %arg1[%c89] : memref<243xf32, #tpu.memory_space<smem>>
    %c170 = arith.constant 170 : index
    %131 = memref.load %arg1[%c170] : memref<243xf32, #tpu.memory_space<smem>>
    %132 = vector.broadcast %130 : f32 to vector<5x105xf32>
    %133 = vector.broadcast %131 : f32 to vector<5x105xf32>
    %134 = arith.select %4, %132, %133 : vector<5x105xi1>, vector<5x105xf32>
    %135 = vector.broadcast %129 : f32 to vector<5x105xf32>
    %136 = arith.select %2, %135, %134 : vector<5x105xi1>, vector<5x105xf32>
    %137 = vector.shape_cast %136 : vector<5x105xf32> to vector<1x5x105xf32>
    %138 = vector.broadcast %137 : vector<1x5x105xf32> to vector<2x5x105xf32>
    %139 = arith.mulf %138, %128 : vector<2x5x105xf32>
    %140 = arith.addf %126, %139 : vector<2x5x105xf32>
    %c0_48 = arith.constant 0 : index
    %c0_49 = arith.constant 0 : index
    %c0_50 = arith.constant 0 : index
    %c1_51 = arith.constant 1 : index
    %c0_52 = arith.constant 0 : index
    %141 = vector.load %arg0[%c0_48, %c0_49, %c0_50, %c1_51, %c0_52] : memref<9x3x2x7x105xf32, #tpu.memory_space<vmem>>, vector<1x1x2x5x105xf32>
    %142 = vector.shape_cast %141 : vector<1x1x2x5x105xf32> to vector<2x5x105xf32>
    %c9 = arith.constant 9 : index
    %143 = memref.load %arg1[%c9] : memref<243xf32, #tpu.memory_space<smem>>
    %c90 = arith.constant 90 : index
    %144 = memref.load %arg1[%c90] : memref<243xf32, #tpu.memory_space<smem>>
    %c171 = arith.constant 171 : index
    %145 = memref.load %arg1[%c171] : memref<243xf32, #tpu.memory_space<smem>>
    %146 = vector.broadcast %144 : f32 to vector<5x105xf32>
    %147 = vector.broadcast %145 : f32 to vector<5x105xf32>
    %148 = arith.select %4, %146, %147 : vector<5x105xi1>, vector<5x105xf32>
    %149 = vector.broadcast %143 : f32 to vector<5x105xf32>
    %150 = arith.select %2, %149, %148 : vector<5x105xi1>, vector<5x105xf32>
    %151 = vector.shape_cast %150 : vector<5x105xf32> to vector<1x5x105xf32>
    %152 = vector.broadcast %151 : vector<1x5x105xf32> to vector<2x5x105xf32>
    %153 = arith.mulf %152, %142 : vector<2x5x105xf32>
    %154 = arith.addf %140, %153 : vector<2x5x105xf32>
    %c1_53 = arith.constant 1 : index
    %c0_54 = arith.constant 0 : index
    %c0_55 = arith.constant 0 : index
    %c1_56 = arith.constant 1 : index
    %c0_57 = arith.constant 0 : index
    %155 = vector.load %arg0[%c1_53, %c0_54, %c0_55, %c1_56, %c0_57] : memref<9x3x2x7x105xf32, #tpu.memory_space<vmem>>, vector<1x1x2x5x105xf32>
    %156 = vector.shape_cast %155 : vector<1x1x2x5x105xf32> to vector<2x5x105xf32>
    %c10 = arith.constant 10 : index
    %157 = memref.load %arg1[%c10] : memref<243xf32, #tpu.memory_space<smem>>
    %c91 = arith.constant 91 : index
    %158 = memref.load %arg1[%c91] : memref<243xf32, #tpu.memory_space<smem>>
    %c172 = arith.constant 172 : index
    %159 = memref.load %arg1[%c172] : memref<243xf32, #tpu.memory_space<smem>>
    %160 = vector.broadcast %158 : f32 to vector<5x105xf32>
    %161 = vector.broadcast %159 : f32 to vector<5x105xf32>
    %162 = arith.select %4, %160, %161 : vector<5x105xi1>, vector<5x105xf32>
    %163 = vector.broadcast %157 : f32 to vector<5x105xf32>
    %164 = arith.select %2, %163, %162 : vector<5x105xi1>, vector<5x105xf32>
    %165 = vector.shape_cast %164 : vector<5x105xf32> to vector<1x5x105xf32>
    %166 = vector.broadcast %165 : vector<1x5x105xf32> to vector<2x5x105xf32>
    %167 = arith.mulf %166, %156 : vector<2x5x105xf32>
    %168 = arith.addf %154, %167 : vector<2x5x105xf32>
    %c2_58 = arith.constant 2 : index
    %c0_59 = arith.constant 0 : index
    %c0_60 = arith.constant 0 : index
    %c1_61 = arith.constant 1 : index
    %c0_62 = arith.constant 0 : index
    %169 = vector.load %arg0[%c2_58, %c0_59, %c0_60, %c1_61, %c0_62] : memref<9x3x2x7x105xf32, #tpu.memory_space<vmem>>, vector<1x1x2x5x105xf32>
    %170 = vector.shape_cast %169 : vector<1x1x2x5x105xf32> to vector<2x5x105xf32>
    %c11 = arith.constant 11 : index
    %171 = memref.load %arg1[%c11] : memref<243xf32, #tpu.memory_space<smem>>
    %c92 = arith.constant 92 : index
    %172 = memref.load %arg1[%c92] : memref<243xf32, #tpu.memory_space<smem>>
    %c173 = arith.constant 173 : index
    %173 = memref.load %arg1[%c173] : memref<243xf32, #tpu.memory_space<smem>>
    %174 = vector.broadcast %172 : f32 to vector<5x105xf32>
    %175 = vector.broadcast %173 : f32 to vector<5x105xf32>
    %176 = arith.select %4, %174, %175 : vector<5x105xi1>, vector<5x105xf32>
    %177 = vector.broadcast %171 : f32 to vector<5x105xf32>
    %178 = arith.select %2, %177, %176 : vector<5x105xi1>, vector<5x105xf32>
    %179 = vector.shape_cast %178 : vector<5x105xf32> to vector<1x5x105xf32>
    %180 = vector.broadcast %179 : vector<1x5x105xf32> to vector<2x5x105xf32>
    %181 = arith.mulf %180, %170 : vector<2x5x105xf32>
    %182 = arith.addf %168, %181 : vector<2x5x105xf32>
    %c3_63 = arith.constant 3 : index
    %c0_64 = arith.constant 0 : index
    %c0_65 = arith.constant 0 : index
    %c1_66 = arith.constant 1 : index
    %c0_67 = arith.constant 0 : index
    %183 = vector.load %arg0[%c3_63, %c0_64, %c0_65, %c1_66, %c0_67] : memref<9x3x2x7x105xf32, #tpu.memory_space<vmem>>, vector<1x1x2x5x105xf32>
    %184 = vector.shape_cast %183 : vector<1x1x2x5x105xf32> to vector<2x5x105xf32>
    %c12 = arith.constant 12 : index
    %185 = memref.load %arg1[%c12] : memref<243xf32, #tpu.memory_space<smem>>
    %c93 = arith.constant 93 : index
    %186 = memref.load %arg1[%c93] : memref<243xf32, #tpu.memory_space<smem>>
    %c174 = arith.constant 174 : index
    %187 = memref.load %arg1[%c174] : memref<243xf32, #tpu.memory_space<smem>>
    %188 = vector.broadcast %186 : f32 to vector<5x105xf32>
    %189 = vector.broadcast %187 : f32 to vector<5x105xf32>
    %190 = arith.select %4, %188, %189 : vector<5x105xi1>, vector<5x105xf32>
    %191 = vector.broadcast %185 : f32 to vector<5x105xf32>
    %192 = arith.select %2, %191, %190 : vector<5x105xi1>, vector<5x105xf32>
    %193 = vector.shape_cast %192 : vector<5x105xf32> to vector<1x5x105xf32>
    %194 = vector.broadcast %193 : vector<1x5x105xf32> to vector<2x5x105xf32>
    %195 = arith.mulf %194, %184 : vector<2x5x105xf32>
    %196 = arith.addf %182, %195 : vector<2x5x105xf32>
    %c4_68 = arith.constant 4 : index
    %c0_69 = arith.constant 0 : index
    %c0_70 = arith.constant 0 : index
    %c1_71 = arith.constant 1 : index
    %c0_72 = arith.constant 0 : index
    %197 = vector.load %arg0[%c4_68, %c0_69, %c0_70, %c1_71, %c0_72] : memref<9x3x2x7x105xf32, #tpu.memory_space<vmem>>, vector<1x1x2x5x105xf32>
    %198 = vector.shape_cast %197 : vector<1x1x2x5x105xf32> to vector<2x5x105xf32>
    %c13 = arith.constant 13 : index
    %199 = memref.load %arg1[%c13] : memref<243xf32, #tpu.memory_space<smem>>
    %c94 = arith.constant 94 : index
    %200 = memref.load %arg1[%c94] : memref<243xf32, #tpu.memory_space<smem>>
    %c175 = arith.constant 175 : index
    %201 = memref.load %arg1[%c175] : memref<243xf32, #tpu.memory_space<smem>>
    %202 = vector.broadcast %200 : f32 to vector<5x105xf32>
    %203 = vector.broadcast %201 : f32 to vector<5x105xf32>
    %204 = arith.select %4, %202, %203 : vector<5x105xi1>, vector<5x105xf32>
    %205 = vector.broadcast %199 : f32 to vector<5x105xf32>
    %206 = arith.select %2, %205, %204 : vector<5x105xi1>, vector<5x105xf32>
    %207 = vector.shape_cast %206 : vector<5x105xf32> to vector<1x5x105xf32>
    %208 = vector.broadcast %207 : vector<1x5x105xf32> to vector<2x5x105xf32>
    %209 = arith.mulf %208, %198 : vector<2x5x105xf32>
    %210 = arith.addf %196, %209 : vector<2x5x105xf32>
    %c5_73 = arith.constant 5 : index
    %c0_74 = arith.constant 0 : index
    %c0_75 = arith.constant 0 : index
    %c1_76 = arith.constant 1 : index
    %c0_77 = arith.constant 0 : index
    %211 = vector.load %arg0[%c5_73, %c0_74, %c0_75, %c1_76, %c0_77] : memref<9x3x2x7x105xf32, #tpu.memory_space<vmem>>, vector<1x1x2x5x105xf32>
    %212 = vector.shape_cast %211 : vector<1x1x2x5x105xf32> to vector<2x5x105xf32>
    %c14 = arith.constant 14 : index
    %213 = memref.load %arg1[%c14] : memref<243xf32, #tpu.memory_space<smem>>
    %c95 = arith.constant 95 : index
    %214 = memref.load %arg1[%c95] : memref<243xf32, #tpu.memory_space<smem>>
    %c176 = arith.constant 176 : index
    %215 = memref.load %arg1[%c176] : memref<243xf32, #tpu.memory_space<smem>>
    %216 = vector.broadcast %214 : f32 to vector<5x105xf32>
    %217 = vector.broadcast %215 : f32 to vector<5x105xf32>
    %218 = arith.select %4, %216, %217 : vector<5x105xi1>, vector<5x105xf32>
    %219 = vector.broadcast %213 : f32 to vector<5x105xf32>
    %220 = arith.select %2, %219, %218 : vector<5x105xi1>, vector<5x105xf32>
    %221 = vector.shape_cast %220 : vector<5x105xf32> to vector<1x5x105xf32>
    %222 = vector.broadcast %221 : vector<1x5x105xf32> to vector<2x5x105xf32>
    %223 = arith.mulf %222, %212 : vector<2x5x105xf32>
    %224 = arith.addf %210, %223 : vector<2x5x105xf32>
    %c6_78 = arith.constant 6 : index
    %c0_79 = arith.constant 0 : index
    %c0_80 = arith.constant 0 : index
    %c1_81 = arith.constant 1 : index
    %c0_82 = arith.constant 0 : index
    %225 = vector.load %arg0[%c6_78, %c0_79, %c0_80, %c1_81, %c0_82] : memref<9x3x2x7x105xf32, #tpu.memory_space<vmem>>, vector<1x1x2x5x105xf32>
    %226 = vector.shape_cast %225 : vector<1x1x2x5x105xf32> to vector<2x5x105xf32>
    %c15 = arith.constant 15 : index
    %227 = memref.load %arg1[%c15] : memref<243xf32, #tpu.memory_space<smem>>
    %c96 = arith.constant 96 : index
    %228 = memref.load %arg1[%c96] : memref<243xf32, #tpu.memory_space<smem>>
    %c177 = arith.constant 177 : index
    %229 = memref.load %arg1[%c177] : memref<243xf32, #tpu.memory_space<smem>>
    %230 = vector.broadcast %228 : f32 to vector<5x105xf32>
    %231 = vector.broadcast %229 : f32 to vector<5x105xf32>
    %232 = arith.select %4, %230, %231 : vector<5x105xi1>, vector<5x105xf32>
    %233 = vector.broadcast %227 : f32 to vector<5x105xf32>
    %234 = arith.select %2, %233, %232 : vector<5x105xi1>, vector<5x105xf32>
    %235 = vector.shape_cast %234 : vector<5x105xf32> to vector<1x5x105xf32>
    %236 = vector.broadcast %235 : vector<1x5x105xf32> to vector<2x5x105xf32>
    %237 = arith.mulf %236, %226 : vector<2x5x105xf32>
    %238 = arith.addf %224, %237 : vector<2x5x105xf32>
    %c7_83 = arith.constant 7 : index
    %c0_84 = arith.constant 0 : index
    %c0_85 = arith.constant 0 : index
    %c1_86 = arith.constant 1 : index
    %c0_87 = arith.constant 0 : index
    %239 = vector.load %arg0[%c7_83, %c0_84, %c0_85, %c1_86, %c0_87] : memref<9x3x2x7x105xf32, #tpu.memory_space<vmem>>, vector<1x1x2x5x105xf32>
    %240 = vector.shape_cast %239 : vector<1x1x2x5x105xf32> to vector<2x5x105xf32>
    %c16 = arith.constant 16 : index
    %241 = memref.load %arg1[%c16] : memref<243xf32, #tpu.memory_space<smem>>
    %c97 = arith.constant 97 : index
    %242 = memref.load %arg1[%c97] : memref<243xf32, #tpu.memory_space<smem>>
    %c178 = arith.constant 178 : index
    %243 = memref.load %arg1[%c178] : memref<243xf32, #tpu.memory_space<smem>>
    %244 = vector.broadcast %242 : f32 to vector<5x105xf32>
    %245 = vector.broadcast %243 : f32 to vector<5x105xf32>
    %246 = arith.select %4, %244, %245 : vector<5x105xi1>, vector<5x105xf32>
    %247 = vector.broadcast %241 : f32 to vector<5x105xf32>
    %248 = arith.select %2, %247, %246 : vector<5x105xi1>, vector<5x105xf32>
    %249 = vector.shape_cast %248 : vector<5x105xf32> to vector<1x5x105xf32>
    %250 = vector.broadcast %249 : vector<1x5x105xf32> to vector<2x5x105xf32>
    %251 = arith.mulf %250, %240 : vector<2x5x105xf32>
    %252 = arith.addf %238, %251 : vector<2x5x105xf32>
    %c8_88 = arith.constant 8 : index
    %c0_89 = arith.constant 0 : index
    %c0_90 = arith.constant 0 : index
    %c1_91 = arith.constant 1 : index
    %c0_92 = arith.constant 0 : index
    %253 = vector.load %arg0[%c8_88, %c0_89, %c0_90, %c1_91, %c0_92] : memref<9x3x2x7x105xf32, #tpu.memory_space<vmem>>, vector<1x1x2x5x105xf32>
    %254 = vector.shape_cast %253 : vector<1x1x2x5x105xf32> to vector<2x5x105xf32>
    %c17 = arith.constant 17 : index
    %255 = memref.load %arg1[%c17] : memref<243xf32, #tpu.memory_space<smem>>
    %c98 = arith.constant 98 : index
    %256 = memref.load %arg1[%c98] : memref<243xf32, #tpu.memory_space<smem>>
    %c179 = arith.constant 179 : index
    %257 = memref.load %arg1[%c179] : memref<243xf32, #tpu.memory_space<smem>>
    %258 = vector.broadcast %256 : f32 to vector<5x105xf32>
    %259 = vector.broadcast %257 : f32 to vector<5x105xf32>
    %260 = arith.select %4, %258, %259 : vector<5x105xi1>, vector<5x105xf32>
    %261 = vector.broadcast %255 : f32 to vector<5x105xf32>
    %262 = arith.select %2, %261, %260 : vector<5x105xi1>, vector<5x105xf32>
    %263 = vector.shape_cast %262 : vector<5x105xf32> to vector<1x5x105xf32>
    %264 = vector.broadcast %263 : vector<1x5x105xf32> to vector<2x5x105xf32>
    %265 = arith.mulf %264, %254 : vector<2x5x105xf32>
    %266 = arith.addf %252, %265 : vector<2x5x105xf32>
    %c0_93 = arith.constant 0 : index
    %c0_94 = arith.constant 0 : index
    %c0_95 = arith.constant 0 : index
    %c2_96 = arith.constant 2 : index
    %c0_97 = arith.constant 0 : index
    %267 = vector.load %arg0[%c0_93, %c0_94, %c0_95, %c2_96, %c0_97] : memref<9x3x2x7x105xf32, #tpu.memory_space<vmem>>, vector<1x1x2x5x105xf32>
    %268 = vector.shape_cast %267 : vector<1x1x2x5x105xf32> to vector<2x5x105xf32>
    %c18 = arith.constant 18 : index
    %269 = memref.load %arg1[%c18] : memref<243xf32, #tpu.memory_space<smem>>
    %c99 = arith.constant 99 : index
    %270 = memref.load %arg1[%c99] : memref<243xf32, #tpu.memory_space<smem>>
    %c180 = arith.constant 180 : index
    %271 = memref.load %arg1[%c180] : memref<243xf32, #tpu.memory_space<smem>>
    %272 = vector.broadcast %270 : f32 to vector<5x105xf32>
    %273 = vector.broadcast %271 : f32 to vector<5x105xf32>
    %274 = arith.select %4, %272, %273 : vector<5x105xi1>, vector<5x105xf32>
    %275 = vector.broadcast %269 : f32 to vector<5x105xf32>
    %276 = arith.select %2, %275, %274 : vector<5x105xi1>, vector<5x105xf32>
    %277 = vector.shape_cast %276 : vector<5x105xf32> to vector<1x5x105xf32>
    %278 = vector.broadcast %277 : vector<1x5x105xf32> to vector<2x5x105xf32>
    %279 = arith.mulf %278, %268 : vector<2x5x105xf32>
    %280 = arith.addf %266, %279 : vector<2x5x105xf32>
    %c1_98 = arith.constant 1 : index
    %c0_99 = arith.constant 0 : index
    %c0_100 = arith.constant 0 : index
    %c2_101 = arith.constant 2 : index
    %c0_102 = arith.constant 0 : index
    %281 = vector.load %arg0[%c1_98, %c0_99, %c0_100, %c2_101, %c0_102] : memref<9x3x2x7x105xf32, #tpu.memory_space<vmem>>, vector<1x1x2x5x105xf32>
    %282 = vector.shape_cast %281 : vector<1x1x2x5x105xf32> to vector<2x5x105xf32>
    %c19 = arith.constant 19 : index
    %283 = memref.load %arg1[%c19] : memref<243xf32, #tpu.memory_space<smem>>
    %c100 = arith.constant 100 : index
    %284 = memref.load %arg1[%c100] : memref<243xf32, #tpu.memory_space<smem>>
    %c181 = arith.constant 181 : index
    %285 = memref.load %arg1[%c181] : memref<243xf32, #tpu.memory_space<smem>>
    %286 = vector.broadcast %284 : f32 to vector<5x105xf32>
    %287 = vector.broadcast %285 : f32 to vector<5x105xf32>
    %288 = arith.select %4, %286, %287 : vector<5x105xi1>, vector<5x105xf32>
    %289 = vector.broadcast %283 : f32 to vector<5x105xf32>
    %290 = arith.select %2, %289, %288 : vector<5x105xi1>, vector<5x105xf32>
    %291 = vector.shape_cast %290 : vector<5x105xf32> to vector<1x5x105xf32>
    %292 = vector.broadcast %291 : vector<1x5x105xf32> to vector<2x5x105xf32>
    %293 = arith.mulf %292, %282 : vector<2x5x105xf32>
    %294 = arith.addf %280, %293 : vector<2x5x105xf32>
    %c2_103 = arith.constant 2 : index
    %c0_104 = arith.constant 0 : index
    %c0_105 = arith.constant 0 : index
    %c2_106 = arith.constant 2 : index
    %c0_107 = arith.constant 0 : index
    %295 = vector.load %arg0[%c2_103, %c0_104, %c0_105, %c2_106, %c0_107] : memref<9x3x2x7x105xf32, #tpu.memory_space<vmem>>, vector<1x1x2x5x105xf32>
    %296 = vector.shape_cast %295 : vector<1x1x2x5x105xf32> to vector<2x5x105xf32>
    %c20 = arith.constant 20 : index
    %297 = memref.load %arg1[%c20] : memref<243xf32, #tpu.memory_space<smem>>
    %c101 = arith.constant 101 : index
    %298 = memref.load %arg1[%c101] : memref<243xf32, #tpu.memory_space<smem>>
    %c182 = arith.constant 182 : index
    %299 = memref.load %arg1[%c182] : memref<243xf32, #tpu.memory_space<smem>>
    %300 = vector.broadcast %298 : f32 to vector<5x105xf32>
    %301 = vector.broadcast %299 : f32 to vector<5x105xf32>
    %302 = arith.select %4, %300, %301 : vector<5x105xi1>, vector<5x105xf32>
    %303 = vector.broadcast %297 : f32 to vector<5x105xf32>
    %304 = arith.select %2, %303, %302 : vector<5x105xi1>, vector<5x105xf32>
    %305 = vector.shape_cast %304 : vector<5x105xf32> to vector<1x5x105xf32>
    %306 = vector.broadcast %305 : vector<1x5x105xf32> to vector<2x5x105xf32>
    %307 = arith.mulf %306, %296 : vector<2x5x105xf32>
    %308 = arith.addf %294, %307 : vector<2x5x105xf32>
    %c3_108 = arith.constant 3 : index
    %c0_109 = arith.constant 0 : index
    %c0_110 = arith.constant 0 : index
    %c2_111 = arith.constant 2 : index
    %c0_112 = arith.constant 0 : index
    %309 = vector.load %arg0[%c3_108, %c0_109, %c0_110, %c2_111, %c0_112] : memref<9x3x2x7x105xf32, #tpu.memory_space<vmem>>, vector<1x1x2x5x105xf32>
    %310 = vector.shape_cast %309 : vector<1x1x2x5x105xf32> to vector<2x5x105xf32>
    %c21 = arith.constant 21 : index
    %311 = memref.load %arg1[%c21] : memref<243xf32, #tpu.memory_space<smem>>
    %c102 = arith.constant 102 : index
    %312 = memref.load %arg1[%c102] : memref<243xf32, #tpu.memory_space<smem>>
    %c183 = arith.constant 183 : index
    %313 = memref.load %arg1[%c183] : memref<243xf32, #tpu.memory_space<smem>>
    %314 = vector.broadcast %312 : f32 to vector<5x105xf32>
    %315 = vector.broadcast %313 : f32 to vector<5x105xf32>
    %316 = arith.select %4, %314, %315 : vector<5x105xi1>, vector<5x105xf32>
    %317 = vector.broadcast %311 : f32 to vector<5x105xf32>
    %318 = arith.select %2, %317, %316 : vector<5x105xi1>, vector<5x105xf32>
    %319 = vector.shape_cast %318 : vector<5x105xf32> to vector<1x5x105xf32>
    %320 = vector.broadcast %319 : vector<1x5x105xf32> to vector<2x5x105xf32>
    %321 = arith.mulf %320, %310 : vector<2x5x105xf32>
    %322 = arith.addf %308, %321 : vector<2x5x105xf32>
    %c4_113 = arith.constant 4 : index
    %c0_114 = arith.constant 0 : index
    %c0_115 = arith.constant 0 : index
    %c2_116 = arith.constant 2 : index
    %c0_117 = arith.constant 0 : index
    %323 = vector.load %arg0[%c4_113, %c0_114, %c0_115, %c2_116, %c0_117] : memref<9x3x2x7x105xf32, #tpu.memory_space<vmem>>, vector<1x1x2x5x105xf32>
    %324 = vector.shape_cast %323 : vector<1x1x2x5x105xf32> to vector<2x5x105xf32>
    %c22 = arith.constant 22 : index
    %325 = memref.load %arg1[%c22] : memref<243xf32, #tpu.memory_space<smem>>
    %c103 = arith.constant 103 : index
    %326 = memref.load %arg1[%c103] : memref<243xf32, #tpu.memory_space<smem>>
    %c184 = arith.constant 184 : index
    %327 = memref.load %arg1[%c184] : memref<243xf32, #tpu.memory_space<smem>>
    %328 = vector.broadcast %326 : f32 to vector<5x105xf32>
    %329 = vector.broadcast %327 : f32 to vector<5x105xf32>
    %330 = arith.select %4, %328, %329 : vector<5x105xi1>, vector<5x105xf32>
    %331 = vector.broadcast %325 : f32 to vector<5x105xf32>
    %332 = arith.select %2, %331, %330 : vector<5x105xi1>, vector<5x105xf32>
    %333 = vector.shape_cast %332 : vector<5x105xf32> to vector<1x5x105xf32>
    %334 = vector.broadcast %333 : vector<1x5x105xf32> to vector<2x5x105xf32>
    %335 = arith.mulf %334, %324 : vector<2x5x105xf32>
    %336 = arith.addf %322, %335 : vector<2x5x105xf32>
    %c5_118 = arith.constant 5 : index
    %c0_119 = arith.constant 0 : index
    %c0_120 = arith.constant 0 : index
    %c2_121 = arith.constant 2 : index
    %c0_122 = arith.constant 0 : index
    %337 = vector.load %arg0[%c5_118, %c0_119, %c0_120, %c2_121, %c0_122] : memref<9x3x2x7x105xf32, #tpu.memory_space<vmem>>, vector<1x1x2x5x105xf32>
    %338 = vector.shape_cast %337 : vector<1x1x2x5x105xf32> to vector<2x5x105xf32>
    %c23 = arith.constant 23 : index
    %339 = memref.load %arg1[%c23] : memref<243xf32, #tpu.memory_space<smem>>
    %c104 = arith.constant 104 : index
    %340 = memref.load %arg1[%c104] : memref<243xf32, #tpu.memory_space<smem>>
    %c185 = arith.constant 185 : index
    %341 = memref.load %arg1[%c185] : memref<243xf32, #tpu.memory_space<smem>>
    %342 = vector.broadcast %340 : f32 to vector<5x105xf32>
    %343 = vector.broadcast %341 : f32 to vector<5x105xf32>
    %344 = arith.select %4, %342, %343 : vector<5x105xi1>, vector<5x105xf32>
    %345 = vector.broadcast %339 : f32 to vector<5x105xf32>
    %346 = arith.select %2, %345, %344 : vector<5x105xi1>, vector<5x105xf32>
    %347 = vector.shape_cast %346 : vector<5x105xf32> to vector<1x5x105xf32>
    %348 = vector.broadcast %347 : vector<1x5x105xf32> to vector<2x5x105xf32>
    %349 = arith.mulf %348, %338 : vector<2x5x105xf32>
    %350 = arith.addf %336, %349 : vector<2x5x105xf32>
    %c6_123 = arith.constant 6 : index
    %c0_124 = arith.constant 0 : index
    %c0_125 = arith.constant 0 : index
    %c2_126 = arith.constant 2 : index
    %c0_127 = arith.constant 0 : index
    %351 = vector.load %arg0[%c6_123, %c0_124, %c0_125, %c2_126, %c0_127] : memref<9x3x2x7x105xf32, #tpu.memory_space<vmem>>, vector<1x1x2x5x105xf32>
    %352 = vector.shape_cast %351 : vector<1x1x2x5x105xf32> to vector<2x5x105xf32>
    %c24 = arith.constant 24 : index
    %353 = memref.load %arg1[%c24] : memref<243xf32, #tpu.memory_space<smem>>
    %c105 = arith.constant 105 : index
    %354 = memref.load %arg1[%c105] : memref<243xf32, #tpu.memory_space<smem>>
    %c186 = arith.constant 186 : index
    %355 = memref.load %arg1[%c186] : memref<243xf32, #tpu.memory_space<smem>>
    %356 = vector.broadcast %354 : f32 to vector<5x105xf32>
    %357 = vector.broadcast %355 : f32 to vector<5x105xf32>
    %358 = arith.select %4, %356, %357 : vector<5x105xi1>, vector<5x105xf32>
    %359 = vector.broadcast %353 : f32 to vector<5x105xf32>
    %360 = arith.select %2, %359, %358 : vector<5x105xi1>, vector<5x105xf32>
    %361 = vector.shape_cast %360 : vector<5x105xf32> to vector<1x5x105xf32>
    %362 = vector.broadcast %361 : vector<1x5x105xf32> to vector<2x5x105xf32>
    %363 = arith.mulf %362, %352 : vector<2x5x105xf32>
    %364 = arith.addf %350, %363 : vector<2x5x105xf32>
    %c7_128 = arith.constant 7 : index
    %c0_129 = arith.constant 0 : index
    %c0_130 = arith.constant 0 : index
    %c2_131 = arith.constant 2 : index
    %c0_132 = arith.constant 0 : index
    %365 = vector.load %arg0[%c7_128, %c0_129, %c0_130, %c2_131, %c0_132] : memref<9x3x2x7x105xf32, #tpu.memory_space<vmem>>, vector<1x1x2x5x105xf32>
    %366 = vector.shape_cast %365 : vector<1x1x2x5x105xf32> to vector<2x5x105xf32>
    %c25 = arith.constant 25 : index
    %367 = memref.load %arg1[%c25] : memref<243xf32, #tpu.memory_space<smem>>
    %c106 = arith.constant 106 : index
    %368 = memref.load %arg1[%c106] : memref<243xf32, #tpu.memory_space<smem>>
    %c187 = arith.constant 187 : index
    %369 = memref.load %arg1[%c187] : memref<243xf32, #tpu.memory_space<smem>>
    %370 = vector.broadcast %368 : f32 to vector<5x105xf32>
    %371 = vector.broadcast %369 : f32 to vector<5x105xf32>
    %372 = arith.select %4, %370, %371 : vector<5x105xi1>, vector<5x105xf32>
    %373 = vector.broadcast %367 : f32 to vector<5x105xf32>
    %374 = arith.select %2, %373, %372 : vector<5x105xi1>, vector<5x105xf32>
    %375 = vector.shape_cast %374 : vector<5x105xf32> to vector<1x5x105xf32>
    %376 = vector.broadcast %375 : vector<1x5x105xf32> to vector<2x5x105xf32>
    %377 = arith.mulf %376, %366 : vector<2x5x105xf32>
    %378 = arith.addf %364, %377 : vector<2x5x105xf32>
    %c8_133 = arith.constant 8 : index
    %c0_134 = arith.constant 0 : index
    %c0_135 = arith.constant 0 : index
    %c2_136 = arith.constant 2 : index
    %c0_137 = arith.constant 0 : index
    %379 = vector.load %arg0[%c8_133, %c0_134, %c0_135, %c2_136, %c0_137] : memref<9x3x2x7x105xf32, #tpu.memory_space<vmem>>, vector<1x1x2x5x105xf32>
    %380 = vector.shape_cast %379 : vector<1x1x2x5x105xf32> to vector<2x5x105xf32>
    %c26 = arith.constant 26 : index
    %381 = memref.load %arg1[%c26] : memref<243xf32, #tpu.memory_space<smem>>
    %c107 = arith.constant 107 : index
    %382 = memref.load %arg1[%c107] : memref<243xf32, #tpu.memory_space<smem>>
    %c188 = arith.constant 188 : index
    %383 = memref.load %arg1[%c188] : memref<243xf32, #tpu.memory_space<smem>>
    %384 = vector.broadcast %382 : f32 to vector<5x105xf32>
    %385 = vector.broadcast %383 : f32 to vector<5x105xf32>
    %386 = arith.select %4, %384, %385 : vector<5x105xi1>, vector<5x105xf32>
    %387 = vector.broadcast %381 : f32 to vector<5x105xf32>
    %388 = arith.select %2, %387, %386 : vector<5x105xi1>, vector<5x105xf32>
    %389 = vector.shape_cast %388 : vector<5x105xf32> to vector<1x5x105xf32>
    %390 = vector.broadcast %389 : vector<1x5x105xf32> to vector<2x5x105xf32>
    %391 = arith.mulf %390, %380 : vector<2x5x105xf32>
    %392 = arith.addf %378, %391 : vector<2x5x105xf32>
    %c0_138 = arith.constant 0 : index
    %c1_139 = arith.constant 1 : index
    %c0_140 = arith.constant 0 : index
    %c0_141 = arith.constant 0 : index
    %c0_142 = arith.constant 0 : index
    %393 = vector.load %arg0[%c0_138, %c1_139, %c0_140, %c0_141, %c0_142] : memref<9x3x2x7x105xf32, #tpu.memory_space<vmem>>, vector<1x1x2x5x105xf32>
    %394 = vector.shape_cast %393 : vector<1x1x2x5x105xf32> to vector<2x5x105xf32>
    %c27 = arith.constant 27 : index
    %395 = memref.load %arg1[%c27] : memref<243xf32, #tpu.memory_space<smem>>
    %c108 = arith.constant 108 : index
    %396 = memref.load %arg1[%c108] : memref<243xf32, #tpu.memory_space<smem>>
    %c189 = arith.constant 189 : index
    %397 = memref.load %arg1[%c189] : memref<243xf32, #tpu.memory_space<smem>>
    %398 = vector.broadcast %396 : f32 to vector<5x105xf32>
    %399 = vector.broadcast %397 : f32 to vector<5x105xf32>
    %400 = arith.select %4, %398, %399 : vector<5x105xi1>, vector<5x105xf32>
    %401 = vector.broadcast %395 : f32 to vector<5x105xf32>
    %402 = arith.select %2, %401, %400 : vector<5x105xi1>, vector<5x105xf32>
    %403 = vector.shape_cast %402 : vector<5x105xf32> to vector<1x5x105xf32>
    %404 = vector.broadcast %403 : vector<1x5x105xf32> to vector<2x5x105xf32>
    %405 = arith.mulf %404, %394 : vector<2x5x105xf32>
    %406 = arith.addf %392, %405 : vector<2x5x105xf32>
    %c1_143 = arith.constant 1 : index
    %c1_144 = arith.constant 1 : index
    %c0_145 = arith.constant 0 : index
    %c0_146 = arith.constant 0 : index
    %c0_147 = arith.constant 0 : index
    %407 = vector.load %arg0[%c1_143, %c1_144, %c0_145, %c0_146, %c0_147] : memref<9x3x2x7x105xf32, #tpu.memory_space<vmem>>, vector<1x1x2x5x105xf32>
    %408 = vector.shape_cast %407 : vector<1x1x2x5x105xf32> to vector<2x5x105xf32>
    %c28 = arith.constant 28 : index
    %409 = memref.load %arg1[%c28] : memref<243xf32, #tpu.memory_space<smem>>
    %c109 = arith.constant 109 : index
    %410 = memref.load %arg1[%c109] : memref<243xf32, #tpu.memory_space<smem>>
    %c190 = arith.constant 190 : index
    %411 = memref.load %arg1[%c190] : memref<243xf32, #tpu.memory_space<smem>>
    %412 = vector.broadcast %410 : f32 to vector<5x105xf32>
    %413 = vector.broadcast %411 : f32 to vector<5x105xf32>
    %414 = arith.select %4, %412, %413 : vector<5x105xi1>, vector<5x105xf32>
    %415 = vector.broadcast %409 : f32 to vector<5x105xf32>
    %416 = arith.select %2, %415, %414 : vector<5x105xi1>, vector<5x105xf32>
    %417 = vector.shape_cast %416 : vector<5x105xf32> to vector<1x5x105xf32>
    %418 = vector.broadcast %417 : vector<1x5x105xf32> to vector<2x5x105xf32>
    %419 = arith.mulf %418, %408 : vector<2x5x105xf32>
    %420 = arith.addf %406, %419 : vector<2x5x105xf32>
    %c2_148 = arith.constant 2 : index
    %c1_149 = arith.constant 1 : index
    %c0_150 = arith.constant 0 : index
    %c0_151 = arith.constant 0 : index
    %c0_152 = arith.constant 0 : index
    %421 = vector.load %arg0[%c2_148, %c1_149, %c0_150, %c0_151, %c0_152] : memref<9x3x2x7x105xf32, #tpu.memory_space<vmem>>, vector<1x1x2x5x105xf32>
    %422 = vector.shape_cast %421 : vector<1x1x2x5x105xf32> to vector<2x5x105xf32>
    %c29 = arith.constant 29 : index
    %423 = memref.load %arg1[%c29] : memref<243xf32, #tpu.memory_space<smem>>
    %c110 = arith.constant 110 : index
    %424 = memref.load %arg1[%c110] : memref<243xf32, #tpu.memory_space<smem>>
    %c191 = arith.constant 191 : index
    %425 = memref.load %arg1[%c191] : memref<243xf32, #tpu.memory_space<smem>>
    %426 = vector.broadcast %424 : f32 to vector<5x105xf32>
    %427 = vector.broadcast %425 : f32 to vector<5x105xf32>
    %428 = arith.select %4, %426, %427 : vector<5x105xi1>, vector<5x105xf32>
    %429 = vector.broadcast %423 : f32 to vector<5x105xf32>
    %430 = arith.select %2, %429, %428 : vector<5x105xi1>, vector<5x105xf32>
    %431 = vector.shape_cast %430 : vector<5x105xf32> to vector<1x5x105xf32>
    %432 = vector.broadcast %431 : vector<1x5x105xf32> to vector<2x5x105xf32>
    %433 = arith.mulf %432, %422 : vector<2x5x105xf32>
    %434 = arith.addf %420, %433 : vector<2x5x105xf32>
    %c3_153 = arith.constant 3 : index
    %c1_154 = arith.constant 1 : index
    %c0_155 = arith.constant 0 : index
    %c0_156 = arith.constant 0 : index
    %c0_157 = arith.constant 0 : index
    %435 = vector.load %arg0[%c3_153, %c1_154, %c0_155, %c0_156, %c0_157] : memref<9x3x2x7x105xf32, #tpu.memory_space<vmem>>, vector<1x1x2x5x105xf32>
    %436 = vector.shape_cast %435 : vector<1x1x2x5x105xf32> to vector<2x5x105xf32>
    %c30 = arith.constant 30 : index
    %437 = memref.load %arg1[%c30] : memref<243xf32, #tpu.memory_space<smem>>
    %c111 = arith.constant 111 : index
    %438 = memref.load %arg1[%c111] : memref<243xf32, #tpu.memory_space<smem>>
    %c192 = arith.constant 192 : index
    %439 = memref.load %arg1[%c192] : memref<243xf32, #tpu.memory_space<smem>>
    %440 = vector.broadcast %438 : f32 to vector<5x105xf32>
    %441 = vector.broadcast %439 : f32 to vector<5x105xf32>
    %442 = arith.select %4, %440, %441 : vector<5x105xi1>, vector<5x105xf32>
    %443 = vector.broadcast %437 : f32 to vector<5x105xf32>
    %444 = arith.select %2, %443, %442 : vector<5x105xi1>, vector<5x105xf32>
    %445 = vector.shape_cast %444 : vector<5x105xf32> to vector<1x5x105xf32>
    %446 = vector.broadcast %445 : vector<1x5x105xf32> to vector<2x5x105xf32>
    %447 = arith.mulf %446, %436 : vector<2x5x105xf32>
    %448 = arith.addf %434, %447 : vector<2x5x105xf32>
    %c4_158 = arith.constant 4 : index
    %c1_159 = arith.constant 1 : index
    %c0_160 = arith.constant 0 : index
    %c0_161 = arith.constant 0 : index
    %c0_162 = arith.constant 0 : index
    %449 = vector.load %arg0[%c4_158, %c1_159, %c0_160, %c0_161, %c0_162] : memref<9x3x2x7x105xf32, #tpu.memory_space<vmem>>, vector<1x1x2x5x105xf32>
    %450 = vector.shape_cast %449 : vector<1x1x2x5x105xf32> to vector<2x5x105xf32>
    %c31 = arith.constant 31 : index
    %451 = memref.load %arg1[%c31] : memref<243xf32, #tpu.memory_space<smem>>
    %c112 = arith.constant 112 : index
    %452 = memref.load %arg1[%c112] : memref<243xf32, #tpu.memory_space<smem>>
    %c193 = arith.constant 193 : index
    %453 = memref.load %arg1[%c193] : memref<243xf32, #tpu.memory_space<smem>>
    %454 = vector.broadcast %452 : f32 to vector<5x105xf32>
    %455 = vector.broadcast %453 : f32 to vector<5x105xf32>
    %456 = arith.select %4, %454, %455 : vector<5x105xi1>, vector<5x105xf32>
    %457 = vector.broadcast %451 : f32 to vector<5x105xf32>
    %458 = arith.select %2, %457, %456 : vector<5x105xi1>, vector<5x105xf32>
    %459 = vector.shape_cast %458 : vector<5x105xf32> to vector<1x5x105xf32>
    %460 = vector.broadcast %459 : vector<1x5x105xf32> to vector<2x5x105xf32>
    %461 = arith.mulf %460, %450 : vector<2x5x105xf32>
    %462 = arith.addf %448, %461 : vector<2x5x105xf32>
    %c5_163 = arith.constant 5 : index
    %c1_164 = arith.constant 1 : index
    %c0_165 = arith.constant 0 : index
    %c0_166 = arith.constant 0 : index
    %c0_167 = arith.constant 0 : index
    %463 = vector.load %arg0[%c5_163, %c1_164, %c0_165, %c0_166, %c0_167] : memref<9x3x2x7x105xf32, #tpu.memory_space<vmem>>, vector<1x1x2x5x105xf32>
    %464 = vector.shape_cast %463 : vector<1x1x2x5x105xf32> to vector<2x5x105xf32>
    %c32 = arith.constant 32 : index
    %465 = memref.load %arg1[%c32] : memref<243xf32, #tpu.memory_space<smem>>
    %c113 = arith.constant 113 : index
    %466 = memref.load %arg1[%c113] : memref<243xf32, #tpu.memory_space<smem>>
    %c194 = arith.constant 194 : index
    %467 = memref.load %arg1[%c194] : memref<243xf32, #tpu.memory_space<smem>>
    %468 = vector.broadcast %466 : f32 to vector<5x105xf32>
    %469 = vector.broadcast %467 : f32 to vector<5x105xf32>
    %470 = arith.select %4, %468, %469 : vector<5x105xi1>, vector<5x105xf32>
    %471 = vector.broadcast %465 : f32 to vector<5x105xf32>
    %472 = arith.select %2, %471, %470 : vector<5x105xi1>, vector<5x105xf32>
    %473 = vector.shape_cast %472 : vector<5x105xf32> to vector<1x5x105xf32>
    %474 = vector.broadcast %473 : vector<1x5x105xf32> to vector<2x5x105xf32>
    %475 = arith.mulf %474, %464 : vector<2x5x105xf32>
    %476 = arith.addf %462, %475 : vector<2x5x105xf32>
    %c6_168 = arith.constant 6 : index
    %c1_169 = arith.constant 1 : index
    %c0_170 = arith.constant 0 : index
    %c0_171 = arith.constant 0 : index
    %c0_172 = arith.constant 0 : index
    %477 = vector.load %arg0[%c6_168, %c1_169, %c0_170, %c0_171, %c0_172] : memref<9x3x2x7x105xf32, #tpu.memory_space<vmem>>, vector<1x1x2x5x105xf32>
    %478 = vector.shape_cast %477 : vector<1x1x2x5x105xf32> to vector<2x5x105xf32>
    %c33 = arith.constant 33 : index
    %479 = memref.load %arg1[%c33] : memref<243xf32, #tpu.memory_space<smem>>
    %c114 = arith.constant 114 : index
    %480 = memref.load %arg1[%c114] : memref<243xf32, #tpu.memory_space<smem>>
    %c195 = arith.constant 195 : index
    %481 = memref.load %arg1[%c195] : memref<243xf32, #tpu.memory_space<smem>>
    %482 = vector.broadcast %480 : f32 to vector<5x105xf32>
    %483 = vector.broadcast %481 : f32 to vector<5x105xf32>
    %484 = arith.select %4, %482, %483 : vector<5x105xi1>, vector<5x105xf32>
    %485 = vector.broadcast %479 : f32 to vector<5x105xf32>
    %486 = arith.select %2, %485, %484 : vector<5x105xi1>, vector<5x105xf32>
    %487 = vector.shape_cast %486 : vector<5x105xf32> to vector<1x5x105xf32>
    %488 = vector.broadcast %487 : vector<1x5x105xf32> to vector<2x5x105xf32>
    %489 = arith.mulf %488, %478 : vector<2x5x105xf32>
    %490 = arith.addf %476, %489 : vector<2x5x105xf32>
    %c7_173 = arith.constant 7 : index
    %c1_174 = arith.constant 1 : index
    %c0_175 = arith.constant 0 : index
    %c0_176 = arith.constant 0 : index
    %c0_177 = arith.constant 0 : index
    %491 = vector.load %arg0[%c7_173, %c1_174, %c0_175, %c0_176, %c0_177] : memref<9x3x2x7x105xf32, #tpu.memory_space<vmem>>, vector<1x1x2x5x105xf32>
    %492 = vector.shape_cast %491 : vector<1x1x2x5x105xf32> to vector<2x5x105xf32>
    %c34 = arith.constant 34 : index
    %493 = memref.load %arg1[%c34] : memref<243xf32, #tpu.memory_space<smem>>
    %c115 = arith.constant 115 : index
    %494 = memref.load %arg1[%c115] : memref<243xf32, #tpu.memory_space<smem>>
    %c196 = arith.constant 196 : index
    %495 = memref.load %arg1[%c196] : memref<243xf32, #tpu.memory_space<smem>>
    %496 = vector.broadcast %494 : f32 to vector<5x105xf32>
    %497 = vector.broadcast %495 : f32 to vector<5x105xf32>
    %498 = arith.select %4, %496, %497 : vector<5x105xi1>, vector<5x105xf32>
    %499 = vector.broadcast %493 : f32 to vector<5x105xf32>
    %500 = arith.select %2, %499, %498 : vector<5x105xi1>, vector<5x105xf32>
    %501 = vector.shape_cast %500 : vector<5x105xf32> to vector<1x5x105xf32>
    %502 = vector.broadcast %501 : vector<1x5x105xf32> to vector<2x5x105xf32>
    %503 = arith.mulf %502, %492 : vector<2x5x105xf32>
    %504 = arith.addf %490, %503 : vector<2x5x105xf32>
    %c8_178 = arith.constant 8 : index
    %c1_179 = arith.constant 1 : index
    %c0_180 = arith.constant 0 : index
    %c0_181 = arith.constant 0 : index
    %c0_182 = arith.constant 0 : index
    %505 = vector.load %arg0[%c8_178, %c1_179, %c0_180, %c0_181, %c0_182] : memref<9x3x2x7x105xf32, #tpu.memory_space<vmem>>, vector<1x1x2x5x105xf32>
    %506 = vector.shape_cast %505 : vector<1x1x2x5x105xf32> to vector<2x5x105xf32>
    %c35 = arith.constant 35 : index
    %507 = memref.load %arg1[%c35] : memref<243xf32, #tpu.memory_space<smem>>
    %c116 = arith.constant 116 : index
    %508 = memref.load %arg1[%c116] : memref<243xf32, #tpu.memory_space<smem>>
    %c197 = arith.constant 197 : index
    %509 = memref.load %arg1[%c197] : memref<243xf32, #tpu.memory_space<smem>>
    %510 = vector.broadcast %508 : f32 to vector<5x105xf32>
    %511 = vector.broadcast %509 : f32 to vector<5x105xf32>
    %512 = arith.select %4, %510, %511 : vector<5x105xi1>, vector<5x105xf32>
    %513 = vector.broadcast %507 : f32 to vector<5x105xf32>
    %514 = arith.select %2, %513, %512 : vector<5x105xi1>, vector<5x105xf32>
    %515 = vector.shape_cast %514 : vector<5x105xf32> to vector<1x5x105xf32>
    %516 = vector.broadcast %515 : vector<1x5x105xf32> to vector<2x5x105xf32>
    %517 = arith.mulf %516, %506 : vector<2x5x105xf32>
    %518 = arith.addf %504, %517 : vector<2x5x105xf32>
    %c0_183 = arith.constant 0 : index
    %c1_184 = arith.constant 1 : index
    %c0_185 = arith.constant 0 : index
    %c1_186 = arith.constant 1 : index
    %c0_187 = arith.constant 0 : index
    %519 = vector.load %arg0[%c0_183, %c1_184, %c0_185, %c1_186, %c0_187] : memref<9x3x2x7x105xf32, #tpu.memory_space<vmem>>, vector<1x1x2x5x105xf32>
    %520 = vector.shape_cast %519 : vector<1x1x2x5x105xf32> to vector<2x5x105xf32>
    %c36 = arith.constant 36 : index
    %521 = memref.load %arg1[%c36] : memref<243xf32, #tpu.memory_space<smem>>
    %c117 = arith.constant 117 : index
    %522 = memref.load %arg1[%c117] : memref<243xf32, #tpu.memory_space<smem>>
    %c198 = arith.constant 198 : index
    %523 = memref.load %arg1[%c198] : memref<243xf32, #tpu.memory_space<smem>>
    %524 = vector.broadcast %522 : f32 to vector<5x105xf32>
    %525 = vector.broadcast %523 : f32 to vector<5x105xf32>
    %526 = arith.select %4, %524, %525 : vector<5x105xi1>, vector<5x105xf32>
    %527 = vector.broadcast %521 : f32 to vector<5x105xf32>
    %528 = arith.select %2, %527, %526 : vector<5x105xi1>, vector<5x105xf32>
    %529 = vector.shape_cast %528 : vector<5x105xf32> to vector<1x5x105xf32>
    %530 = vector.broadcast %529 : vector<1x5x105xf32> to vector<2x5x105xf32>
    %531 = arith.mulf %530, %520 : vector<2x5x105xf32>
    %532 = arith.addf %518, %531 : vector<2x5x105xf32>
    %c1_188 = arith.constant 1 : index
    %c1_189 = arith.constant 1 : index
    %c0_190 = arith.constant 0 : index
    %c1_191 = arith.constant 1 : index
    %c0_192 = arith.constant 0 : index
    %533 = vector.load %arg0[%c1_188, %c1_189, %c0_190, %c1_191, %c0_192] : memref<9x3x2x7x105xf32, #tpu.memory_space<vmem>>, vector<1x1x2x5x105xf32>
    %534 = vector.shape_cast %533 : vector<1x1x2x5x105xf32> to vector<2x5x105xf32>
    %c37 = arith.constant 37 : index
    %535 = memref.load %arg1[%c37] : memref<243xf32, #tpu.memory_space<smem>>
    %c118 = arith.constant 118 : index
    %536 = memref.load %arg1[%c118] : memref<243xf32, #tpu.memory_space<smem>>
    %c199 = arith.constant 199 : index
    %537 = memref.load %arg1[%c199] : memref<243xf32, #tpu.memory_space<smem>>
    %538 = vector.broadcast %536 : f32 to vector<5x105xf32>
    %539 = vector.broadcast %537 : f32 to vector<5x105xf32>
    %540 = arith.select %4, %538, %539 : vector<5x105xi1>, vector<5x105xf32>
    %541 = vector.broadcast %535 : f32 to vector<5x105xf32>
    %542 = arith.select %2, %541, %540 : vector<5x105xi1>, vector<5x105xf32>
    %543 = vector.shape_cast %542 : vector<5x105xf32> to vector<1x5x105xf32>
    %544 = vector.broadcast %543 : vector<1x5x105xf32> to vector<2x5x105xf32>
    %545 = arith.mulf %544, %534 : vector<2x5x105xf32>
    %546 = arith.addf %532, %545 : vector<2x5x105xf32>
    %c2_193 = arith.constant 2 : index
    %c1_194 = arith.constant 1 : index
    %c0_195 = arith.constant 0 : index
    %c1_196 = arith.constant 1 : index
    %c0_197 = arith.constant 0 : index
    %547 = vector.load %arg0[%c2_193, %c1_194, %c0_195, %c1_196, %c0_197] : memref<9x3x2x7x105xf32, #tpu.memory_space<vmem>>, vector<1x1x2x5x105xf32>
    %548 = vector.shape_cast %547 : vector<1x1x2x5x105xf32> to vector<2x5x105xf32>
    %c38 = arith.constant 38 : index
    %549 = memref.load %arg1[%c38] : memref<243xf32, #tpu.memory_space<smem>>
    %c119 = arith.constant 119 : index
    %550 = memref.load %arg1[%c119] : memref<243xf32, #tpu.memory_space<smem>>
    %c200 = arith.constant 200 : index
    %551 = memref.load %arg1[%c200] : memref<243xf32, #tpu.memory_space<smem>>
    %552 = vector.broadcast %550 : f32 to vector<5x105xf32>
    %553 = vector.broadcast %551 : f32 to vector<5x105xf32>
    %554 = arith.select %4, %552, %553 : vector<5x105xi1>, vector<5x105xf32>
    %555 = vector.broadcast %549 : f32 to vector<5x105xf32>
    %556 = arith.select %2, %555, %554 : vector<5x105xi1>, vector<5x105xf32>
    %557 = vector.shape_cast %556 : vector<5x105xf32> to vector<1x5x105xf32>
    %558 = vector.broadcast %557 : vector<1x5x105xf32> to vector<2x5x105xf32>
    %559 = arith.mulf %558, %548 : vector<2x5x105xf32>
    %560 = arith.addf %546, %559 : vector<2x5x105xf32>
    %c3_198 = arith.constant 3 : index
    %c1_199 = arith.constant 1 : index
    %c0_200 = arith.constant 0 : index
    %c1_201 = arith.constant 1 : index
    %c0_202 = arith.constant 0 : index
    %561 = vector.load %arg0[%c3_198, %c1_199, %c0_200, %c1_201, %c0_202] : memref<9x3x2x7x105xf32, #tpu.memory_space<vmem>>, vector<1x1x2x5x105xf32>
    %562 = vector.shape_cast %561 : vector<1x1x2x5x105xf32> to vector<2x5x105xf32>
    %c39 = arith.constant 39 : index
    %563 = memref.load %arg1[%c39] : memref<243xf32, #tpu.memory_space<smem>>
    %c120 = arith.constant 120 : index
    %564 = memref.load %arg1[%c120] : memref<243xf32, #tpu.memory_space<smem>>
    %c201 = arith.constant 201 : index
    %565 = memref.load %arg1[%c201] : memref<243xf32, #tpu.memory_space<smem>>
    %566 = vector.broadcast %564 : f32 to vector<5x105xf32>
    %567 = vector.broadcast %565 : f32 to vector<5x105xf32>
    %568 = arith.select %4, %566, %567 : vector<5x105xi1>, vector<5x105xf32>
    %569 = vector.broadcast %563 : f32 to vector<5x105xf32>
    %570 = arith.select %2, %569, %568 : vector<5x105xi1>, vector<5x105xf32>
    %571 = vector.shape_cast %570 : vector<5x105xf32> to vector<1x5x105xf32>
    %572 = vector.broadcast %571 : vector<1x5x105xf32> to vector<2x5x105xf32>
    %573 = arith.mulf %572, %562 : vector<2x5x105xf32>
    %574 = arith.addf %560, %573 : vector<2x5x105xf32>
    %c4_203 = arith.constant 4 : index
    %c1_204 = arith.constant 1 : index
    %c0_205 = arith.constant 0 : index
    %c1_206 = arith.constant 1 : index
    %c0_207 = arith.constant 0 : index
    %575 = vector.load %arg0[%c4_203, %c1_204, %c0_205, %c1_206, %c0_207] : memref<9x3x2x7x105xf32, #tpu.memory_space<vmem>>, vector<1x1x2x5x105xf32>
    %576 = vector.shape_cast %575 : vector<1x1x2x5x105xf32> to vector<2x5x105xf32>
    %c40 = arith.constant 40 : index
    %577 = memref.load %arg1[%c40] : memref<243xf32, #tpu.memory_space<smem>>
    %c121 = arith.constant 121 : index
    %578 = memref.load %arg1[%c121] : memref<243xf32, #tpu.memory_space<smem>>
    %c202 = arith.constant 202 : index
    %579 = memref.load %arg1[%c202] : memref<243xf32, #tpu.memory_space<smem>>
    %580 = vector.broadcast %578 : f32 to vector<5x105xf32>
    %581 = vector.broadcast %579 : f32 to vector<5x105xf32>
    %582 = arith.select %4, %580, %581 : vector<5x105xi1>, vector<5x105xf32>
    %583 = vector.broadcast %577 : f32 to vector<5x105xf32>
    %584 = arith.select %2, %583, %582 : vector<5x105xi1>, vector<5x105xf32>
    %585 = vector.shape_cast %584 : vector<5x105xf32> to vector<1x5x105xf32>
    %586 = vector.broadcast %585 : vector<1x5x105xf32> to vector<2x5x105xf32>
    %587 = arith.mulf %586, %576 : vector<2x5x105xf32>
    %588 = arith.addf %574, %587 : vector<2x5x105xf32>
    %c5_208 = arith.constant 5 : index
    %c1_209 = arith.constant 1 : index
    %c0_210 = arith.constant 0 : index
    %c1_211 = arith.constant 1 : index
    %c0_212 = arith.constant 0 : index
    %589 = vector.load %arg0[%c5_208, %c1_209, %c0_210, %c1_211, %c0_212] : memref<9x3x2x7x105xf32, #tpu.memory_space<vmem>>, vector<1x1x2x5x105xf32>
    %590 = vector.shape_cast %589 : vector<1x1x2x5x105xf32> to vector<2x5x105xf32>
    %c41 = arith.constant 41 : index
    %591 = memref.load %arg1[%c41] : memref<243xf32, #tpu.memory_space<smem>>
    %c122 = arith.constant 122 : index
    %592 = memref.load %arg1[%c122] : memref<243xf32, #tpu.memory_space<smem>>
    %c203 = arith.constant 203 : index
    %593 = memref.load %arg1[%c203] : memref<243xf32, #tpu.memory_space<smem>>
    %594 = vector.broadcast %592 : f32 to vector<5x105xf32>
    %595 = vector.broadcast %593 : f32 to vector<5x105xf32>
    %596 = arith.select %4, %594, %595 : vector<5x105xi1>, vector<5x105xf32>
    %597 = vector.broadcast %591 : f32 to vector<5x105xf32>
    %598 = arith.select %2, %597, %596 : vector<5x105xi1>, vector<5x105xf32>
    %599 = vector.shape_cast %598 : vector<5x105xf32> to vector<1x5x105xf32>
    %600 = vector.broadcast %599 : vector<1x5x105xf32> to vector<2x5x105xf32>
    %601 = arith.mulf %600, %590 : vector<2x5x105xf32>
    %602 = arith.addf %588, %601 : vector<2x5x105xf32>
    %c6_213 = arith.constant 6 : index
    %c1_214 = arith.constant 1 : index
    %c0_215 = arith.constant 0 : index
    %c1_216 = arith.constant 1 : index
    %c0_217 = arith.constant 0 : index
    %603 = vector.load %arg0[%c6_213, %c1_214, %c0_215, %c1_216, %c0_217] : memref<9x3x2x7x105xf32, #tpu.memory_space<vmem>>, vector<1x1x2x5x105xf32>
    %604 = vector.shape_cast %603 : vector<1x1x2x5x105xf32> to vector<2x5x105xf32>
    %c42 = arith.constant 42 : index
    %605 = memref.load %arg1[%c42] : memref<243xf32, #tpu.memory_space<smem>>
    %c123 = arith.constant 123 : index
    %606 = memref.load %arg1[%c123] : memref<243xf32, #tpu.memory_space<smem>>
    %c204 = arith.constant 204 : index
    %607 = memref.load %arg1[%c204] : memref<243xf32, #tpu.memory_space<smem>>
    %608 = vector.broadcast %606 : f32 to vector<5x105xf32>
    %609 = vector.broadcast %607 : f32 to vector<5x105xf32>
    %610 = arith.select %4, %608, %609 : vector<5x105xi1>, vector<5x105xf32>
    %611 = vector.broadcast %605 : f32 to vector<5x105xf32>
    %612 = arith.select %2, %611, %610 : vector<5x105xi1>, vector<5x105xf32>
    %613 = vector.shape_cast %612 : vector<5x105xf32> to vector<1x5x105xf32>
    %614 = vector.broadcast %613 : vector<1x5x105xf32> to vector<2x5x105xf32>
    %615 = arith.mulf %614, %604 : vector<2x5x105xf32>
    %616 = arith.addf %602, %615 : vector<2x5x105xf32>
    %c7_218 = arith.constant 7 : index
    %c1_219 = arith.constant 1 : index
    %c0_220 = arith.constant 0 : index
    %c1_221 = arith.constant 1 : index
    %c0_222 = arith.constant 0 : index
    %617 = vector.load %arg0[%c7_218, %c1_219, %c0_220, %c1_221, %c0_222] : memref<9x3x2x7x105xf32, #tpu.memory_space<vmem>>, vector<1x1x2x5x105xf32>
    %618 = vector.shape_cast %617 : vector<1x1x2x5x105xf32> to vector<2x5x105xf32>
    %c43 = arith.constant 43 : index
    %619 = memref.load %arg1[%c43] : memref<243xf32, #tpu.memory_space<smem>>
    %c124 = arith.constant 124 : index
    %620 = memref.load %arg1[%c124] : memref<243xf32, #tpu.memory_space<smem>>
    %c205 = arith.constant 205 : index
    %621 = memref.load %arg1[%c205] : memref<243xf32, #tpu.memory_space<smem>>
    %622 = vector.broadcast %620 : f32 to vector<5x105xf32>
    %623 = vector.broadcast %621 : f32 to vector<5x105xf32>
    %624 = arith.select %4, %622, %623 : vector<5x105xi1>, vector<5x105xf32>
    %625 = vector.broadcast %619 : f32 to vector<5x105xf32>
    %626 = arith.select %2, %625, %624 : vector<5x105xi1>, vector<5x105xf32>
    %627 = vector.shape_cast %626 : vector<5x105xf32> to vector<1x5x105xf32>
    %628 = vector.broadcast %627 : vector<1x5x105xf32> to vector<2x5x105xf32>
    %629 = arith.mulf %628, %618 : vector<2x5x105xf32>
    %630 = arith.addf %616, %629 : vector<2x5x105xf32>
    %c8_223 = arith.constant 8 : index
    %c1_224 = arith.constant 1 : index
    %c0_225 = arith.constant 0 : index
    %c1_226 = arith.constant 1 : index
    %c0_227 = arith.constant 0 : index
    %631 = vector.load %arg0[%c8_223, %c1_224, %c0_225, %c1_226, %c0_227] : memref<9x3x2x7x105xf32, #tpu.memory_space<vmem>>, vector<1x1x2x5x105xf32>
    %632 = vector.shape_cast %631 : vector<1x1x2x5x105xf32> to vector<2x5x105xf32>
    %c44 = arith.constant 44 : index
    %633 = memref.load %arg1[%c44] : memref<243xf32, #tpu.memory_space<smem>>
    %c125 = arith.constant 125 : index
    %634 = memref.load %arg1[%c125] : memref<243xf32, #tpu.memory_space<smem>>
    %c206 = arith.constant 206 : index
    %635 = memref.load %arg1[%c206] : memref<243xf32, #tpu.memory_space<smem>>
    %636 = vector.broadcast %634 : f32 to vector<5x105xf32>
    %637 = vector.broadcast %635 : f32 to vector<5x105xf32>
    %638 = arith.select %4, %636, %637 : vector<5x105xi1>, vector<5x105xf32>
    %639 = vector.broadcast %633 : f32 to vector<5x105xf32>
    %640 = arith.select %2, %639, %638 : vector<5x105xi1>, vector<5x105xf32>
    %641 = vector.shape_cast %640 : vector<5x105xf32> to vector<1x5x105xf32>
    %642 = vector.broadcast %641 : vector<1x5x105xf32> to vector<2x5x105xf32>
    %643 = arith.mulf %642, %632 : vector<2x5x105xf32>
    %644 = arith.addf %630, %643 : vector<2x5x105xf32>
    %c0_228 = arith.constant 0 : index
    %c1_229 = arith.constant 1 : index
    %c0_230 = arith.constant 0 : index
    %c2_231 = arith.constant 2 : index
    %c0_232 = arith.constant 0 : index
    %645 = vector.load %arg0[%c0_228, %c1_229, %c0_230, %c2_231, %c0_232] : memref<9x3x2x7x105xf32, #tpu.memory_space<vmem>>, vector<1x1x2x5x105xf32>
    %646 = vector.shape_cast %645 : vector<1x1x2x5x105xf32> to vector<2x5x105xf32>
    %c45 = arith.constant 45 : index
    %647 = memref.load %arg1[%c45] : memref<243xf32, #tpu.memory_space<smem>>
    %c126 = arith.constant 126 : index
    %648 = memref.load %arg1[%c126] : memref<243xf32, #tpu.memory_space<smem>>
    %c207 = arith.constant 207 : index
    %649 = memref.load %arg1[%c207] : memref<243xf32, #tpu.memory_space<smem>>
    %650 = vector.broadcast %648 : f32 to vector<5x105xf32>
    %651 = vector.broadcast %649 : f32 to vector<5x105xf32>
    %652 = arith.select %4, %650, %651 : vector<5x105xi1>, vector<5x105xf32>
    %653 = vector.broadcast %647 : f32 to vector<5x105xf32>
    %654 = arith.select %2, %653, %652 : vector<5x105xi1>, vector<5x105xf32>
    %655 = vector.shape_cast %654 : vector<5x105xf32> to vector<1x5x105xf32>
    %656 = vector.broadcast %655 : vector<1x5x105xf32> to vector<2x5x105xf32>
    %657 = arith.mulf %656, %646 : vector<2x5x105xf32>
    %658 = arith.addf %644, %657 : vector<2x5x105xf32>
    %c1_233 = arith.constant 1 : index
    %c1_234 = arith.constant 1 : index
    %c0_235 = arith.constant 0 : index
    %c2_236 = arith.constant 2 : index
    %c0_237 = arith.constant 0 : index
    %659 = vector.load %arg0[%c1_233, %c1_234, %c0_235, %c2_236, %c0_237] : memref<9x3x2x7x105xf32, #tpu.memory_space<vmem>>, vector<1x1x2x5x105xf32>
    %660 = vector.shape_cast %659 : vector<1x1x2x5x105xf32> to vector<2x5x105xf32>
    %c46 = arith.constant 46 : index
    %661 = memref.load %arg1[%c46] : memref<243xf32, #tpu.memory_space<smem>>
    %c127 = arith.constant 127 : index
    %662 = memref.load %arg1[%c127] : memref<243xf32, #tpu.memory_space<smem>>
    %c208 = arith.constant 208 : index
    %663 = memref.load %arg1[%c208] : memref<243xf32, #tpu.memory_space<smem>>
    %664 = vector.broadcast %662 : f32 to vector<5x105xf32>
    %665 = vector.broadcast %663 : f32 to vector<5x105xf32>
    %666 = arith.select %4, %664, %665 : vector<5x105xi1>, vector<5x105xf32>
    %667 = vector.broadcast %661 : f32 to vector<5x105xf32>
    %668 = arith.select %2, %667, %666 : vector<5x105xi1>, vector<5x105xf32>
    %669 = vector.shape_cast %668 : vector<5x105xf32> to vector<1x5x105xf32>
    %670 = vector.broadcast %669 : vector<1x5x105xf32> to vector<2x5x105xf32>
    %671 = arith.mulf %670, %660 : vector<2x5x105xf32>
    %672 = arith.addf %658, %671 : vector<2x5x105xf32>
    %c2_238 = arith.constant 2 : index
    %c1_239 = arith.constant 1 : index
    %c0_240 = arith.constant 0 : index
    %c2_241 = arith.constant 2 : index
    %c0_242 = arith.constant 0 : index
    %673 = vector.load %arg0[%c2_238, %c1_239, %c0_240, %c2_241, %c0_242] : memref<9x3x2x7x105xf32, #tpu.memory_space<vmem>>, vector<1x1x2x5x105xf32>
    %674 = vector.shape_cast %673 : vector<1x1x2x5x105xf32> to vector<2x5x105xf32>
    %c47 = arith.constant 47 : index
    %675 = memref.load %arg1[%c47] : memref<243xf32, #tpu.memory_space<smem>>
    %c128 = arith.constant 128 : index
    %676 = memref.load %arg1[%c128] : memref<243xf32, #tpu.memory_space<smem>>
    %c209 = arith.constant 209 : index
    %677 = memref.load %arg1[%c209] : memref<243xf32, #tpu.memory_space<smem>>
    %678 = vector.broadcast %676 : f32 to vector<5x105xf32>
    %679 = vector.broadcast %677 : f32 to vector<5x105xf32>
    %680 = arith.select %4, %678, %679 : vector<5x105xi1>, vector<5x105xf32>
    %681 = vector.broadcast %675 : f32 to vector<5x105xf32>
    %682 = arith.select %2, %681, %680 : vector<5x105xi1>, vector<5x105xf32>
    %683 = vector.shape_cast %682 : vector<5x105xf32> to vector<1x5x105xf32>
    %684 = vector.broadcast %683 : vector<1x5x105xf32> to vector<2x5x105xf32>
    %685 = arith.mulf %684, %674 : vector<2x5x105xf32>
    %686 = arith.addf %672, %685 : vector<2x5x105xf32>
    %c3_243 = arith.constant 3 : index
    %c1_244 = arith.constant 1 : index
    %c0_245 = arith.constant 0 : index
    %c2_246 = arith.constant 2 : index
    %c0_247 = arith.constant 0 : index
    %687 = vector.load %arg0[%c3_243, %c1_244, %c0_245, %c2_246, %c0_247] : memref<9x3x2x7x105xf32, #tpu.memory_space<vmem>>, vector<1x1x2x5x105xf32>
    %688 = vector.shape_cast %687 : vector<1x1x2x5x105xf32> to vector<2x5x105xf32>
    %c48 = arith.constant 48 : index
    %689 = memref.load %arg1[%c48] : memref<243xf32, #tpu.memory_space<smem>>
    %c129 = arith.constant 129 : index
    %690 = memref.load %arg1[%c129] : memref<243xf32, #tpu.memory_space<smem>>
    %c210 = arith.constant 210 : index
    %691 = memref.load %arg1[%c210] : memref<243xf32, #tpu.memory_space<smem>>
    %692 = vector.broadcast %690 : f32 to vector<5x105xf32>
    %693 = vector.broadcast %691 : f32 to vector<5x105xf32>
    %694 = arith.select %4, %692, %693 : vector<5x105xi1>, vector<5x105xf32>
    %695 = vector.broadcast %689 : f32 to vector<5x105xf32>
    %696 = arith.select %2, %695, %694 : vector<5x105xi1>, vector<5x105xf32>
    %697 = vector.shape_cast %696 : vector<5x105xf32> to vector<1x5x105xf32>
    %698 = vector.broadcast %697 : vector<1x5x105xf32> to vector<2x5x105xf32>
    %699 = arith.mulf %698, %688 : vector<2x5x105xf32>
    %700 = arith.addf %686, %699 : vector<2x5x105xf32>
    %c4_248 = arith.constant 4 : index
    %c1_249 = arith.constant 1 : index
    %c0_250 = arith.constant 0 : index
    %c2_251 = arith.constant 2 : index
    %c0_252 = arith.constant 0 : index
    %701 = vector.load %arg0[%c4_248, %c1_249, %c0_250, %c2_251, %c0_252] : memref<9x3x2x7x105xf32, #tpu.memory_space<vmem>>, vector<1x1x2x5x105xf32>
    %702 = vector.shape_cast %701 : vector<1x1x2x5x105xf32> to vector<2x5x105xf32>
    %c49 = arith.constant 49 : index
    %703 = memref.load %arg1[%c49] : memref<243xf32, #tpu.memory_space<smem>>
    %c130 = arith.constant 130 : index
    %704 = memref.load %arg1[%c130] : memref<243xf32, #tpu.memory_space<smem>>
    %c211 = arith.constant 211 : index
    %705 = memref.load %arg1[%c211] : memref<243xf32, #tpu.memory_space<smem>>
    %706 = vector.broadcast %704 : f32 to vector<5x105xf32>
    %707 = vector.broadcast %705 : f32 to vector<5x105xf32>
    %708 = arith.select %4, %706, %707 : vector<5x105xi1>, vector<5x105xf32>
    %709 = vector.broadcast %703 : f32 to vector<5x105xf32>
    %710 = arith.select %2, %709, %708 : vector<5x105xi1>, vector<5x105xf32>
    %711 = vector.shape_cast %710 : vector<5x105xf32> to vector<1x5x105xf32>
    %712 = vector.broadcast %711 : vector<1x5x105xf32> to vector<2x5x105xf32>
    %713 = arith.mulf %712, %702 : vector<2x5x105xf32>
    %714 = arith.addf %700, %713 : vector<2x5x105xf32>
    %c5_253 = arith.constant 5 : index
    %c1_254 = arith.constant 1 : index
    %c0_255 = arith.constant 0 : index
    %c2_256 = arith.constant 2 : index
    %c0_257 = arith.constant 0 : index
    %715 = vector.load %arg0[%c5_253, %c1_254, %c0_255, %c2_256, %c0_257] : memref<9x3x2x7x105xf32, #tpu.memory_space<vmem>>, vector<1x1x2x5x105xf32>
    %716 = vector.shape_cast %715 : vector<1x1x2x5x105xf32> to vector<2x5x105xf32>
    %c50 = arith.constant 50 : index
    %717 = memref.load %arg1[%c50] : memref<243xf32, #tpu.memory_space<smem>>
    %c131 = arith.constant 131 : index
    %718 = memref.load %arg1[%c131] : memref<243xf32, #tpu.memory_space<smem>>
    %c212 = arith.constant 212 : index
    %719 = memref.load %arg1[%c212] : memref<243xf32, #tpu.memory_space<smem>>
    %720 = vector.broadcast %718 : f32 to vector<5x105xf32>
    %721 = vector.broadcast %719 : f32 to vector<5x105xf32>
    %722 = arith.select %4, %720, %721 : vector<5x105xi1>, vector<5x105xf32>
    %723 = vector.broadcast %717 : f32 to vector<5x105xf32>
    %724 = arith.select %2, %723, %722 : vector<5x105xi1>, vector<5x105xf32>
    %725 = vector.shape_cast %724 : vector<5x105xf32> to vector<1x5x105xf32>
    %726 = vector.broadcast %725 : vector<1x5x105xf32> to vector<2x5x105xf32>
    %727 = arith.mulf %726, %716 : vector<2x5x105xf32>
    %728 = arith.addf %714, %727 : vector<2x5x105xf32>
    %c6_258 = arith.constant 6 : index
    %c1_259 = arith.constant 1 : index
    %c0_260 = arith.constant 0 : index
    %c2_261 = arith.constant 2 : index
    %c0_262 = arith.constant 0 : index
    %729 = vector.load %arg0[%c6_258, %c1_259, %c0_260, %c2_261, %c0_262] : memref<9x3x2x7x105xf32, #tpu.memory_space<vmem>>, vector<1x1x2x5x105xf32>
    %730 = vector.shape_cast %729 : vector<1x1x2x5x105xf32> to vector<2x5x105xf32>
    %c51 = arith.constant 51 : index
    %731 = memref.load %arg1[%c51] : memref<243xf32, #tpu.memory_space<smem>>
    %c132 = arith.constant 132 : index
    %732 = memref.load %arg1[%c132] : memref<243xf32, #tpu.memory_space<smem>>
    %c213 = arith.constant 213 : index
    %733 = memref.load %arg1[%c213] : memref<243xf32, #tpu.memory_space<smem>>
    %734 = vector.broadcast %732 : f32 to vector<5x105xf32>
    %735 = vector.broadcast %733 : f32 to vector<5x105xf32>
    %736 = arith.select %4, %734, %735 : vector<5x105xi1>, vector<5x105xf32>
    %737 = vector.broadcast %731 : f32 to vector<5x105xf32>
    %738 = arith.select %2, %737, %736 : vector<5x105xi1>, vector<5x105xf32>
    %739 = vector.shape_cast %738 : vector<5x105xf32> to vector<1x5x105xf32>
    %740 = vector.broadcast %739 : vector<1x5x105xf32> to vector<2x5x105xf32>
    %741 = arith.mulf %740, %730 : vector<2x5x105xf32>
    %742 = arith.addf %728, %741 : vector<2x5x105xf32>
    %c7_263 = arith.constant 7 : index
    %c1_264 = arith.constant 1 : index
    %c0_265 = arith.constant 0 : index
    %c2_266 = arith.constant 2 : index
    %c0_267 = arith.constant 0 : index
    %743 = vector.load %arg0[%c7_263, %c1_264, %c0_265, %c2_266, %c0_267] : memref<9x3x2x7x105xf32, #tpu.memory_space<vmem>>, vector<1x1x2x5x105xf32>
    %744 = vector.shape_cast %743 : vector<1x1x2x5x105xf32> to vector<2x5x105xf32>
    %c52 = arith.constant 52 : index
    %745 = memref.load %arg1[%c52] : memref<243xf32, #tpu.memory_space<smem>>
    %c133 = arith.constant 133 : index
    %746 = memref.load %arg1[%c133] : memref<243xf32, #tpu.memory_space<smem>>
    %c214 = arith.constant 214 : index
    %747 = memref.load %arg1[%c214] : memref<243xf32, #tpu.memory_space<smem>>
    %748 = vector.broadcast %746 : f32 to vector<5x105xf32>
    %749 = vector.broadcast %747 : f32 to vector<5x105xf32>
    %750 = arith.select %4, %748, %749 : vector<5x105xi1>, vector<5x105xf32>
    %751 = vector.broadcast %745 : f32 to vector<5x105xf32>
    %752 = arith.select %2, %751, %750 : vector<5x105xi1>, vector<5x105xf32>
    %753 = vector.shape_cast %752 : vector<5x105xf32> to vector<1x5x105xf32>
    %754 = vector.broadcast %753 : vector<1x5x105xf32> to vector<2x5x105xf32>
    %755 = arith.mulf %754, %744 : vector<2x5x105xf32>
    %756 = arith.addf %742, %755 : vector<2x5x105xf32>
    %c8_268 = arith.constant 8 : index
    %c1_269 = arith.constant 1 : index
    %c0_270 = arith.constant 0 : index
    %c2_271 = arith.constant 2 : index
    %c0_272 = arith.constant 0 : index
    %757 = vector.load %arg0[%c8_268, %c1_269, %c0_270, %c2_271, %c0_272] : memref<9x3x2x7x105xf32, #tpu.memory_space<vmem>>, vector<1x1x2x5x105xf32>
    %758 = vector.shape_cast %757 : vector<1x1x2x5x105xf32> to vector<2x5x105xf32>
    %c53 = arith.constant 53 : index
    %759 = memref.load %arg1[%c53] : memref<243xf32, #tpu.memory_space<smem>>
    %c134 = arith.constant 134 : index
    %760 = memref.load %arg1[%c134] : memref<243xf32, #tpu.memory_space<smem>>
    %c215 = arith.constant 215 : index
    %761 = memref.load %arg1[%c215] : memref<243xf32, #tpu.memory_space<smem>>
    %762 = vector.broadcast %760 : f32 to vector<5x105xf32>
    %763 = vector.broadcast %761 : f32 to vector<5x105xf32>
    %764 = arith.select %4, %762, %763 : vector<5x105xi1>, vector<5x105xf32>
    %765 = vector.broadcast %759 : f32 to vector<5x105xf32>
    %766 = arith.select %2, %765, %764 : vector<5x105xi1>, vector<5x105xf32>
    %767 = vector.shape_cast %766 : vector<5x105xf32> to vector<1x5x105xf32>
    %768 = vector.broadcast %767 : vector<1x5x105xf32> to vector<2x5x105xf32>
    %769 = arith.mulf %768, %758 : vector<2x5x105xf32>
    %770 = arith.addf %756, %769 : vector<2x5x105xf32>
    %c0_273 = arith.constant 0 : index
    %c2_274 = arith.constant 2 : index
    %c0_275 = arith.constant 0 : index
    %c0_276 = arith.constant 0 : index
    %c0_277 = arith.constant 0 : index
    %771 = vector.load %arg0[%c0_273, %c2_274, %c0_275, %c0_276, %c0_277] : memref<9x3x2x7x105xf32, #tpu.memory_space<vmem>>, vector<1x1x2x5x105xf32>
    %772 = vector.shape_cast %771 : vector<1x1x2x5x105xf32> to vector<2x5x105xf32>
    %c54 = arith.constant 54 : index
    %773 = memref.load %arg1[%c54] : memref<243xf32, #tpu.memory_space<smem>>
    %c135 = arith.constant 135 : index
    %774 = memref.load %arg1[%c135] : memref<243xf32, #tpu.memory_space<smem>>
    %c216 = arith.constant 216 : index
    %775 = memref.load %arg1[%c216] : memref<243xf32, #tpu.memory_space<smem>>
    %776 = vector.broadcast %774 : f32 to vector<5x105xf32>
    %777 = vector.broadcast %775 : f32 to vector<5x105xf32>
    %778 = arith.select %4, %776, %777 : vector<5x105xi1>, vector<5x105xf32>
    %779 = vector.broadcast %773 : f32 to vector<5x105xf32>
    %780 = arith.select %2, %779, %778 : vector<5x105xi1>, vector<5x105xf32>
    %781 = vector.shape_cast %780 : vector<5x105xf32> to vector<1x5x105xf32>
    %782 = vector.broadcast %781 : vector<1x5x105xf32> to vector<2x5x105xf32>
    %783 = arith.mulf %782, %772 : vector<2x5x105xf32>
    %784 = arith.addf %770, %783 : vector<2x5x105xf32>
    %c1_278 = arith.constant 1 : index
    %c2_279 = arith.constant 2 : index
    %c0_280 = arith.constant 0 : index
    %c0_281 = arith.constant 0 : index
    %c0_282 = arith.constant 0 : index
    %785 = vector.load %arg0[%c1_278, %c2_279, %c0_280, %c0_281, %c0_282] : memref<9x3x2x7x105xf32, #tpu.memory_space<vmem>>, vector<1x1x2x5x105xf32>
    %786 = vector.shape_cast %785 : vector<1x1x2x5x105xf32> to vector<2x5x105xf32>
    %c55 = arith.constant 55 : index
    %787 = memref.load %arg1[%c55] : memref<243xf32, #tpu.memory_space<smem>>
    %c136 = arith.constant 136 : index
    %788 = memref.load %arg1[%c136] : memref<243xf32, #tpu.memory_space<smem>>
    %c217 = arith.constant 217 : index
    %789 = memref.load %arg1[%c217] : memref<243xf32, #tpu.memory_space<smem>>
    %790 = vector.broadcast %788 : f32 to vector<5x105xf32>
    %791 = vector.broadcast %789 : f32 to vector<5x105xf32>
    %792 = arith.select %4, %790, %791 : vector<5x105xi1>, vector<5x105xf32>
    %793 = vector.broadcast %787 : f32 to vector<5x105xf32>
    %794 = arith.select %2, %793, %792 : vector<5x105xi1>, vector<5x105xf32>
    %795 = vector.shape_cast %794 : vector<5x105xf32> to vector<1x5x105xf32>
    %796 = vector.broadcast %795 : vector<1x5x105xf32> to vector<2x5x105xf32>
    %797 = arith.mulf %796, %786 : vector<2x5x105xf32>
    %798 = arith.addf %784, %797 : vector<2x5x105xf32>
    %c2_283 = arith.constant 2 : index
    %c2_284 = arith.constant 2 : index
    %c0_285 = arith.constant 0 : index
    %c0_286 = arith.constant 0 : index
    %c0_287 = arith.constant 0 : index
    %799 = vector.load %arg0[%c2_283, %c2_284, %c0_285, %c0_286, %c0_287] : memref<9x3x2x7x105xf32, #tpu.memory_space<vmem>>, vector<1x1x2x5x105xf32>
    %800 = vector.shape_cast %799 : vector<1x1x2x5x105xf32> to vector<2x5x105xf32>
    %c56 = arith.constant 56 : index
    %801 = memref.load %arg1[%c56] : memref<243xf32, #tpu.memory_space<smem>>
    %c137 = arith.constant 137 : index
    %802 = memref.load %arg1[%c137] : memref<243xf32, #tpu.memory_space<smem>>
    %c218 = arith.constant 218 : index
    %803 = memref.load %arg1[%c218] : memref<243xf32, #tpu.memory_space<smem>>
    %804 = vector.broadcast %802 : f32 to vector<5x105xf32>
    %805 = vector.broadcast %803 : f32 to vector<5x105xf32>
    %806 = arith.select %4, %804, %805 : vector<5x105xi1>, vector<5x105xf32>
    %807 = vector.broadcast %801 : f32 to vector<5x105xf32>
    %808 = arith.select %2, %807, %806 : vector<5x105xi1>, vector<5x105xf32>
    %809 = vector.shape_cast %808 : vector<5x105xf32> to vector<1x5x105xf32>
    %810 = vector.broadcast %809 : vector<1x5x105xf32> to vector<2x5x105xf32>
    %811 = arith.mulf %810, %800 : vector<2x5x105xf32>
    %812 = arith.addf %798, %811 : vector<2x5x105xf32>
    %c3_288 = arith.constant 3 : index
    %c2_289 = arith.constant 2 : index
    %c0_290 = arith.constant 0 : index
    %c0_291 = arith.constant 0 : index
    %c0_292 = arith.constant 0 : index
    %813 = vector.load %arg0[%c3_288, %c2_289, %c0_290, %c0_291, %c0_292] : memref<9x3x2x7x105xf32, #tpu.memory_space<vmem>>, vector<1x1x2x5x105xf32>
    %814 = vector.shape_cast %813 : vector<1x1x2x5x105xf32> to vector<2x5x105xf32>
    %c57 = arith.constant 57 : index
    %815 = memref.load %arg1[%c57] : memref<243xf32, #tpu.memory_space<smem>>
    %c138 = arith.constant 138 : index
    %816 = memref.load %arg1[%c138] : memref<243xf32, #tpu.memory_space<smem>>
    %c219 = arith.constant 219 : index
    %817 = memref.load %arg1[%c219] : memref<243xf32, #tpu.memory_space<smem>>
    %818 = vector.broadcast %816 : f32 to vector<5x105xf32>
    %819 = vector.broadcast %817 : f32 to vector<5x105xf32>
    %820 = arith.select %4, %818, %819 : vector<5x105xi1>, vector<5x105xf32>
    %821 = vector.broadcast %815 : f32 to vector<5x105xf32>
    %822 = arith.select %2, %821, %820 : vector<5x105xi1>, vector<5x105xf32>
    %823 = vector.shape_cast %822 : vector<5x105xf32> to vector<1x5x105xf32>
    %824 = vector.broadcast %823 : vector<1x5x105xf32> to vector<2x5x105xf32>
    %825 = arith.mulf %824, %814 : vector<2x5x105xf32>
    %826 = arith.addf %812, %825 : vector<2x5x105xf32>
    %c4_293 = arith.constant 4 : index
    %c2_294 = arith.constant 2 : index
    %c0_295 = arith.constant 0 : index
    %c0_296 = arith.constant 0 : index
    %c0_297 = arith.constant 0 : index
    %827 = vector.load %arg0[%c4_293, %c2_294, %c0_295, %c0_296, %c0_297] : memref<9x3x2x7x105xf32, #tpu.memory_space<vmem>>, vector<1x1x2x5x105xf32>
    %828 = vector.shape_cast %827 : vector<1x1x2x5x105xf32> to vector<2x5x105xf32>
    %c58 = arith.constant 58 : index
    %829 = memref.load %arg1[%c58] : memref<243xf32, #tpu.memory_space<smem>>
    %c139 = arith.constant 139 : index
    %830 = memref.load %arg1[%c139] : memref<243xf32, #tpu.memory_space<smem>>
    %c220 = arith.constant 220 : index
    %831 = memref.load %arg1[%c220] : memref<243xf32, #tpu.memory_space<smem>>
    %832 = vector.broadcast %830 : f32 to vector<5x105xf32>
    %833 = vector.broadcast %831 : f32 to vector<5x105xf32>
    %834 = arith.select %4, %832, %833 : vector<5x105xi1>, vector<5x105xf32>
    %835 = vector.broadcast %829 : f32 to vector<5x105xf32>
    %836 = arith.select %2, %835, %834 : vector<5x105xi1>, vector<5x105xf32>
    %837 = vector.shape_cast %836 : vector<5x105xf32> to vector<1x5x105xf32>
    %838 = vector.broadcast %837 : vector<1x5x105xf32> to vector<2x5x105xf32>
    %839 = arith.mulf %838, %828 : vector<2x5x105xf32>
    %840 = arith.addf %826, %839 : vector<2x5x105xf32>
    %c5_298 = arith.constant 5 : index
    %c2_299 = arith.constant 2 : index
    %c0_300 = arith.constant 0 : index
    %c0_301 = arith.constant 0 : index
    %c0_302 = arith.constant 0 : index
    %841 = vector.load %arg0[%c5_298, %c2_299, %c0_300, %c0_301, %c0_302] : memref<9x3x2x7x105xf32, #tpu.memory_space<vmem>>, vector<1x1x2x5x105xf32>
    %842 = vector.shape_cast %841 : vector<1x1x2x5x105xf32> to vector<2x5x105xf32>
    %c59 = arith.constant 59 : index
    %843 = memref.load %arg1[%c59] : memref<243xf32, #tpu.memory_space<smem>>
    %c140 = arith.constant 140 : index
    %844 = memref.load %arg1[%c140] : memref<243xf32, #tpu.memory_space<smem>>
    %c221 = arith.constant 221 : index
    %845 = memref.load %arg1[%c221] : memref<243xf32, #tpu.memory_space<smem>>
    %846 = vector.broadcast %844 : f32 to vector<5x105xf32>
    %847 = vector.broadcast %845 : f32 to vector<5x105xf32>
    %848 = arith.select %4, %846, %847 : vector<5x105xi1>, vector<5x105xf32>
    %849 = vector.broadcast %843 : f32 to vector<5x105xf32>
    %850 = arith.select %2, %849, %848 : vector<5x105xi1>, vector<5x105xf32>
    %851 = vector.shape_cast %850 : vector<5x105xf32> to vector<1x5x105xf32>
    %852 = vector.broadcast %851 : vector<1x5x105xf32> to vector<2x5x105xf32>
    %853 = arith.mulf %852, %842 : vector<2x5x105xf32>
    %854 = arith.addf %840, %853 : vector<2x5x105xf32>
    %c6_303 = arith.constant 6 : index
    %c2_304 = arith.constant 2 : index
    %c0_305 = arith.constant 0 : index
    %c0_306 = arith.constant 0 : index
    %c0_307 = arith.constant 0 : index
    %855 = vector.load %arg0[%c6_303, %c2_304, %c0_305, %c0_306, %c0_307] : memref<9x3x2x7x105xf32, #tpu.memory_space<vmem>>, vector<1x1x2x5x105xf32>
    %856 = vector.shape_cast %855 : vector<1x1x2x5x105xf32> to vector<2x5x105xf32>
    %c60 = arith.constant 60 : index
    %857 = memref.load %arg1[%c60] : memref<243xf32, #tpu.memory_space<smem>>
    %c141 = arith.constant 141 : index
    %858 = memref.load %arg1[%c141] : memref<243xf32, #tpu.memory_space<smem>>
    %c222 = arith.constant 222 : index
    %859 = memref.load %arg1[%c222] : memref<243xf32, #tpu.memory_space<smem>>
    %860 = vector.broadcast %858 : f32 to vector<5x105xf32>
    %861 = vector.broadcast %859 : f32 to vector<5x105xf32>
    %862 = arith.select %4, %860, %861 : vector<5x105xi1>, vector<5x105xf32>
    %863 = vector.broadcast %857 : f32 to vector<5x105xf32>
    %864 = arith.select %2, %863, %862 : vector<5x105xi1>, vector<5x105xf32>
    %865 = vector.shape_cast %864 : vector<5x105xf32> to vector<1x5x105xf32>
    %866 = vector.broadcast %865 : vector<1x5x105xf32> to vector<2x5x105xf32>
    %867 = arith.mulf %866, %856 : vector<2x5x105xf32>
    %868 = arith.addf %854, %867 : vector<2x5x105xf32>
    %c7_308 = arith.constant 7 : index
    %c2_309 = arith.constant 2 : index
    %c0_310 = arith.constant 0 : index
    %c0_311 = arith.constant 0 : index
    %c0_312 = arith.constant 0 : index
    %869 = vector.load %arg0[%c7_308, %c2_309, %c0_310, %c0_311, %c0_312] : memref<9x3x2x7x105xf32, #tpu.memory_space<vmem>>, vector<1x1x2x5x105xf32>
    %870 = vector.shape_cast %869 : vector<1x1x2x5x105xf32> to vector<2x5x105xf32>
    %c61 = arith.constant 61 : index
    %871 = memref.load %arg1[%c61] : memref<243xf32, #tpu.memory_space<smem>>
    %c142 = arith.constant 142 : index
    %872 = memref.load %arg1[%c142] : memref<243xf32, #tpu.memory_space<smem>>
    %c223 = arith.constant 223 : index
    %873 = memref.load %arg1[%c223] : memref<243xf32, #tpu.memory_space<smem>>
    %874 = vector.broadcast %872 : f32 to vector<5x105xf32>
    %875 = vector.broadcast %873 : f32 to vector<5x105xf32>
    %876 = arith.select %4, %874, %875 : vector<5x105xi1>, vector<5x105xf32>
    %877 = vector.broadcast %871 : f32 to vector<5x105xf32>
    %878 = arith.select %2, %877, %876 : vector<5x105xi1>, vector<5x105xf32>
    %879 = vector.shape_cast %878 : vector<5x105xf32> to vector<1x5x105xf32>
    %880 = vector.broadcast %879 : vector<1x5x105xf32> to vector<2x5x105xf32>
    %881 = arith.mulf %880, %870 : vector<2x5x105xf32>
    %882 = arith.addf %868, %881 : vector<2x5x105xf32>
    %c8_313 = arith.constant 8 : index
    %c2_314 = arith.constant 2 : index
    %c0_315 = arith.constant 0 : index
    %c0_316 = arith.constant 0 : index
    %c0_317 = arith.constant 0 : index
    %883 = vector.load %arg0[%c8_313, %c2_314, %c0_315, %c0_316, %c0_317] : memref<9x3x2x7x105xf32, #tpu.memory_space<vmem>>, vector<1x1x2x5x105xf32>
    %884 = vector.shape_cast %883 : vector<1x1x2x5x105xf32> to vector<2x5x105xf32>
    %c62 = arith.constant 62 : index
    %885 = memref.load %arg1[%c62] : memref<243xf32, #tpu.memory_space<smem>>
    %c143 = arith.constant 143 : index
    %886 = memref.load %arg1[%c143] : memref<243xf32, #tpu.memory_space<smem>>
    %c224 = arith.constant 224 : index
    %887 = memref.load %arg1[%c224] : memref<243xf32, #tpu.memory_space<smem>>
    %888 = vector.broadcast %886 : f32 to vector<5x105xf32>
    %889 = vector.broadcast %887 : f32 to vector<5x105xf32>
    %890 = arith.select %4, %888, %889 : vector<5x105xi1>, vector<5x105xf32>
    %891 = vector.broadcast %885 : f32 to vector<5x105xf32>
    %892 = arith.select %2, %891, %890 : vector<5x105xi1>, vector<5x105xf32>
    %893 = vector.shape_cast %892 : vector<5x105xf32> to vector<1x5x105xf32>
    %894 = vector.broadcast %893 : vector<1x5x105xf32> to vector<2x5x105xf32>
    %895 = arith.mulf %894, %884 : vector<2x5x105xf32>
    %896 = arith.addf %882, %895 : vector<2x5x105xf32>
    %c0_318 = arith.constant 0 : index
    %c2_319 = arith.constant 2 : index
    %c0_320 = arith.constant 0 : index
    %c1_321 = arith.constant 1 : index
    %c0_322 = arith.constant 0 : index
    %897 = vector.load %arg0[%c0_318, %c2_319, %c0_320, %c1_321, %c0_322] : memref<9x3x2x7x105xf32, #tpu.memory_space<vmem>>, vector<1x1x2x5x105xf32>
    %898 = vector.shape_cast %897 : vector<1x1x2x5x105xf32> to vector<2x5x105xf32>
    %c63 = arith.constant 63 : index
    %899 = memref.load %arg1[%c63] : memref<243xf32, #tpu.memory_space<smem>>
    %c144 = arith.constant 144 : index
    %900 = memref.load %arg1[%c144] : memref<243xf32, #tpu.memory_space<smem>>
    %c225 = arith.constant 225 : index
    %901 = memref.load %arg1[%c225] : memref<243xf32, #tpu.memory_space<smem>>
    %902 = vector.broadcast %900 : f32 to vector<5x105xf32>
    %903 = vector.broadcast %901 : f32 to vector<5x105xf32>
    %904 = arith.select %4, %902, %903 : vector<5x105xi1>, vector<5x105xf32>
    %905 = vector.broadcast %899 : f32 to vector<5x105xf32>
    %906 = arith.select %2, %905, %904 : vector<5x105xi1>, vector<5x105xf32>
    %907 = vector.shape_cast %906 : vector<5x105xf32> to vector<1x5x105xf32>
    %908 = vector.broadcast %907 : vector<1x5x105xf32> to vector<2x5x105xf32>
    %909 = arith.mulf %908, %898 : vector<2x5x105xf32>
    %910 = arith.addf %896, %909 : vector<2x5x105xf32>
    %c1_323 = arith.constant 1 : index
    %c2_324 = arith.constant 2 : index
    %c0_325 = arith.constant 0 : index
    %c1_326 = arith.constant 1 : index
    %c0_327 = arith.constant 0 : index
    %911 = vector.load %arg0[%c1_323, %c2_324, %c0_325, %c1_326, %c0_327] : memref<9x3x2x7x105xf32, #tpu.memory_space<vmem>>, vector<1x1x2x5x105xf32>
    %912 = vector.shape_cast %911 : vector<1x1x2x5x105xf32> to vector<2x5x105xf32>
    %c64 = arith.constant 64 : index
    %913 = memref.load %arg1[%c64] : memref<243xf32, #tpu.memory_space<smem>>
    %c145 = arith.constant 145 : index
    %914 = memref.load %arg1[%c145] : memref<243xf32, #tpu.memory_space<smem>>
    %c226 = arith.constant 226 : index
    %915 = memref.load %arg1[%c226] : memref<243xf32, #tpu.memory_space<smem>>
    %916 = vector.broadcast %914 : f32 to vector<5x105xf32>
    %917 = vector.broadcast %915 : f32 to vector<5x105xf32>
    %918 = arith.select %4, %916, %917 : vector<5x105xi1>, vector<5x105xf32>
    %919 = vector.broadcast %913 : f32 to vector<5x105xf32>
    %920 = arith.select %2, %919, %918 : vector<5x105xi1>, vector<5x105xf32>
    %921 = vector.shape_cast %920 : vector<5x105xf32> to vector<1x5x105xf32>
    %922 = vector.broadcast %921 : vector<1x5x105xf32> to vector<2x5x105xf32>
    %923 = arith.mulf %922, %912 : vector<2x5x105xf32>
    %924 = arith.addf %910, %923 : vector<2x5x105xf32>
    %c2_328 = arith.constant 2 : index
    %c2_329 = arith.constant 2 : index
    %c0_330 = arith.constant 0 : index
    %c1_331 = arith.constant 1 : index
    %c0_332 = arith.constant 0 : index
    %925 = vector.load %arg0[%c2_328, %c2_329, %c0_330, %c1_331, %c0_332] : memref<9x3x2x7x105xf32, #tpu.memory_space<vmem>>, vector<1x1x2x5x105xf32>
    %926 = vector.shape_cast %925 : vector<1x1x2x5x105xf32> to vector<2x5x105xf32>
    %c65 = arith.constant 65 : index
    %927 = memref.load %arg1[%c65] : memref<243xf32, #tpu.memory_space<smem>>
    %c146 = arith.constant 146 : index
    %928 = memref.load %arg1[%c146] : memref<243xf32, #tpu.memory_space<smem>>
    %c227 = arith.constant 227 : index
    %929 = memref.load %arg1[%c227] : memref<243xf32, #tpu.memory_space<smem>>
    %930 = vector.broadcast %928 : f32 to vector<5x105xf32>
    %931 = vector.broadcast %929 : f32 to vector<5x105xf32>
    %932 = arith.select %4, %930, %931 : vector<5x105xi1>, vector<5x105xf32>
    %933 = vector.broadcast %927 : f32 to vector<5x105xf32>
    %934 = arith.select %2, %933, %932 : vector<5x105xi1>, vector<5x105xf32>
    %935 = vector.shape_cast %934 : vector<5x105xf32> to vector<1x5x105xf32>
    %936 = vector.broadcast %935 : vector<1x5x105xf32> to vector<2x5x105xf32>
    %937 = arith.mulf %936, %926 : vector<2x5x105xf32>
    %938 = arith.addf %924, %937 : vector<2x5x105xf32>
    %c3_333 = arith.constant 3 : index
    %c2_334 = arith.constant 2 : index
    %c0_335 = arith.constant 0 : index
    %c1_336 = arith.constant 1 : index
    %c0_337 = arith.constant 0 : index
    %939 = vector.load %arg0[%c3_333, %c2_334, %c0_335, %c1_336, %c0_337] : memref<9x3x2x7x105xf32, #tpu.memory_space<vmem>>, vector<1x1x2x5x105xf32>
    %940 = vector.shape_cast %939 : vector<1x1x2x5x105xf32> to vector<2x5x105xf32>
    %c66 = arith.constant 66 : index
    %941 = memref.load %arg1[%c66] : memref<243xf32, #tpu.memory_space<smem>>
    %c147 = arith.constant 147 : index
    %942 = memref.load %arg1[%c147] : memref<243xf32, #tpu.memory_space<smem>>
    %c228 = arith.constant 228 : index
    %943 = memref.load %arg1[%c228] : memref<243xf32, #tpu.memory_space<smem>>
    %944 = vector.broadcast %942 : f32 to vector<5x105xf32>
    %945 = vector.broadcast %943 : f32 to vector<5x105xf32>
    %946 = arith.select %4, %944, %945 : vector<5x105xi1>, vector<5x105xf32>
    %947 = vector.broadcast %941 : f32 to vector<5x105xf32>
    %948 = arith.select %2, %947, %946 : vector<5x105xi1>, vector<5x105xf32>
    %949 = vector.shape_cast %948 : vector<5x105xf32> to vector<1x5x105xf32>
    %950 = vector.broadcast %949 : vector<1x5x105xf32> to vector<2x5x105xf32>
    %951 = arith.mulf %950, %940 : vector<2x5x105xf32>
    %952 = arith.addf %938, %951 : vector<2x5x105xf32>
    %c4_338 = arith.constant 4 : index
    %c2_339 = arith.constant 2 : index
    %c0_340 = arith.constant 0 : index
    %c1_341 = arith.constant 1 : index
    %c0_342 = arith.constant 0 : index
    %953 = vector.load %arg0[%c4_338, %c2_339, %c0_340, %c1_341, %c0_342] : memref<9x3x2x7x105xf32, #tpu.memory_space<vmem>>, vector<1x1x2x5x105xf32>
    %954 = vector.shape_cast %953 : vector<1x1x2x5x105xf32> to vector<2x5x105xf32>
    %c67 = arith.constant 67 : index
    %955 = memref.load %arg1[%c67] : memref<243xf32, #tpu.memory_space<smem>>
    %c148 = arith.constant 148 : index
    %956 = memref.load %arg1[%c148] : memref<243xf32, #tpu.memory_space<smem>>
    %c229 = arith.constant 229 : index
    %957 = memref.load %arg1[%c229] : memref<243xf32, #tpu.memory_space<smem>>
    %958 = vector.broadcast %956 : f32 to vector<5x105xf32>
    %959 = vector.broadcast %957 : f32 to vector<5x105xf32>
    %960 = arith.select %4, %958, %959 : vector<5x105xi1>, vector<5x105xf32>
    %961 = vector.broadcast %955 : f32 to vector<5x105xf32>
    %962 = arith.select %2, %961, %960 : vector<5x105xi1>, vector<5x105xf32>
    %963 = vector.shape_cast %962 : vector<5x105xf32> to vector<1x5x105xf32>
    %964 = vector.broadcast %963 : vector<1x5x105xf32> to vector<2x5x105xf32>
    %965 = arith.mulf %964, %954 : vector<2x5x105xf32>
    %966 = arith.addf %952, %965 : vector<2x5x105xf32>
    %c5_343 = arith.constant 5 : index
    %c2_344 = arith.constant 2 : index
    %c0_345 = arith.constant 0 : index
    %c1_346 = arith.constant 1 : index
    %c0_347 = arith.constant 0 : index
    %967 = vector.load %arg0[%c5_343, %c2_344, %c0_345, %c1_346, %c0_347] : memref<9x3x2x7x105xf32, #tpu.memory_space<vmem>>, vector<1x1x2x5x105xf32>
    %968 = vector.shape_cast %967 : vector<1x1x2x5x105xf32> to vector<2x5x105xf32>
    %c68 = arith.constant 68 : index
    %969 = memref.load %arg1[%c68] : memref<243xf32, #tpu.memory_space<smem>>
    %c149 = arith.constant 149 : index
    %970 = memref.load %arg1[%c149] : memref<243xf32, #tpu.memory_space<smem>>
    %c230 = arith.constant 230 : index
    %971 = memref.load %arg1[%c230] : memref<243xf32, #tpu.memory_space<smem>>
    %972 = vector.broadcast %970 : f32 to vector<5x105xf32>
    %973 = vector.broadcast %971 : f32 to vector<5x105xf32>
    %974 = arith.select %4, %972, %973 : vector<5x105xi1>, vector<5x105xf32>
    %975 = vector.broadcast %969 : f32 to vector<5x105xf32>
    %976 = arith.select %2, %975, %974 : vector<5x105xi1>, vector<5x105xf32>
    %977 = vector.shape_cast %976 : vector<5x105xf32> to vector<1x5x105xf32>
    %978 = vector.broadcast %977 : vector<1x5x105xf32> to vector<2x5x105xf32>
    %979 = arith.mulf %978, %968 : vector<2x5x105xf32>
    %980 = arith.addf %966, %979 : vector<2x5x105xf32>
    %c6_348 = arith.constant 6 : index
    %c2_349 = arith.constant 2 : index
    %c0_350 = arith.constant 0 : index
    %c1_351 = arith.constant 1 : index
    %c0_352 = arith.constant 0 : index
    %981 = vector.load %arg0[%c6_348, %c2_349, %c0_350, %c1_351, %c0_352] : memref<9x3x2x7x105xf32, #tpu.memory_space<vmem>>, vector<1x1x2x5x105xf32>
    %982 = vector.shape_cast %981 : vector<1x1x2x5x105xf32> to vector<2x5x105xf32>
    %c69 = arith.constant 69 : index
    %983 = memref.load %arg1[%c69] : memref<243xf32, #tpu.memory_space<smem>>
    %c150 = arith.constant 150 : index
    %984 = memref.load %arg1[%c150] : memref<243xf32, #tpu.memory_space<smem>>
    %c231 = arith.constant 231 : index
    %985 = memref.load %arg1[%c231] : memref<243xf32, #tpu.memory_space<smem>>
    %986 = vector.broadcast %984 : f32 to vector<5x105xf32>
    %987 = vector.broadcast %985 : f32 to vector<5x105xf32>
    %988 = arith.select %4, %986, %987 : vector<5x105xi1>, vector<5x105xf32>
    %989 = vector.broadcast %983 : f32 to vector<5x105xf32>
    %990 = arith.select %2, %989, %988 : vector<5x105xi1>, vector<5x105xf32>
    %991 = vector.shape_cast %990 : vector<5x105xf32> to vector<1x5x105xf32>
    %992 = vector.broadcast %991 : vector<1x5x105xf32> to vector<2x5x105xf32>
    %993 = arith.mulf %992, %982 : vector<2x5x105xf32>
    %994 = arith.addf %980, %993 : vector<2x5x105xf32>
    %c7_353 = arith.constant 7 : index
    %c2_354 = arith.constant 2 : index
    %c0_355 = arith.constant 0 : index
    %c1_356 = arith.constant 1 : index
    %c0_357 = arith.constant 0 : index
    %995 = vector.load %arg0[%c7_353, %c2_354, %c0_355, %c1_356, %c0_357] : memref<9x3x2x7x105xf32, #tpu.memory_space<vmem>>, vector<1x1x2x5x105xf32>
    %996 = vector.shape_cast %995 : vector<1x1x2x5x105xf32> to vector<2x5x105xf32>
    %c70 = arith.constant 70 : index
    %997 = memref.load %arg1[%c70] : memref<243xf32, #tpu.memory_space<smem>>
    %c151 = arith.constant 151 : index
    %998 = memref.load %arg1[%c151] : memref<243xf32, #tpu.memory_space<smem>>
    %c232 = arith.constant 232 : index
    %999 = memref.load %arg1[%c232] : memref<243xf32, #tpu.memory_space<smem>>
    %1000 = vector.broadcast %998 : f32 to vector<5x105xf32>
    %1001 = vector.broadcast %999 : f32 to vector<5x105xf32>
    %1002 = arith.select %4, %1000, %1001 : vector<5x105xi1>, vector<5x105xf32>
    %1003 = vector.broadcast %997 : f32 to vector<5x105xf32>
    %1004 = arith.select %2, %1003, %1002 : vector<5x105xi1>, vector<5x105xf32>
    %1005 = vector.shape_cast %1004 : vector<5x105xf32> to vector<1x5x105xf32>
    %1006 = vector.broadcast %1005 : vector<1x5x105xf32> to vector<2x5x105xf32>
    %1007 = arith.mulf %1006, %996 : vector<2x5x105xf32>
    %1008 = arith.addf %994, %1007 : vector<2x5x105xf32>
    %c8_358 = arith.constant 8 : index
    %c2_359 = arith.constant 2 : index
    %c0_360 = arith.constant 0 : index
    %c1_361 = arith.constant 1 : index
    %c0_362 = arith.constant 0 : index
    %1009 = vector.load %arg0[%c8_358, %c2_359, %c0_360, %c1_361, %c0_362] : memref<9x3x2x7x105xf32, #tpu.memory_space<vmem>>, vector<1x1x2x5x105xf32>
    %1010 = vector.shape_cast %1009 : vector<1x1x2x5x105xf32> to vector<2x5x105xf32>
    %c71 = arith.constant 71 : index
    %1011 = memref.load %arg1[%c71] : memref<243xf32, #tpu.memory_space<smem>>
    %c152 = arith.constant 152 : index
    %1012 = memref.load %arg1[%c152] : memref<243xf32, #tpu.memory_space<smem>>
    %c233 = arith.constant 233 : index
    %1013 = memref.load %arg1[%c233] : memref<243xf32, #tpu.memory_space<smem>>
    %1014 = vector.broadcast %1012 : f32 to vector<5x105xf32>
    %1015 = vector.broadcast %1013 : f32 to vector<5x105xf32>
    %1016 = arith.select %4, %1014, %1015 : vector<5x105xi1>, vector<5x105xf32>
    %1017 = vector.broadcast %1011 : f32 to vector<5x105xf32>
    %1018 = arith.select %2, %1017, %1016 : vector<5x105xi1>, vector<5x105xf32>
    %1019 = vector.shape_cast %1018 : vector<5x105xf32> to vector<1x5x105xf32>
    %1020 = vector.broadcast %1019 : vector<1x5x105xf32> to vector<2x5x105xf32>
    %1021 = arith.mulf %1020, %1010 : vector<2x5x105xf32>
    %1022 = arith.addf %1008, %1021 : vector<2x5x105xf32>
    %c0_363 = arith.constant 0 : index
    %c2_364 = arith.constant 2 : index
    %c0_365 = arith.constant 0 : index
    %c2_366 = arith.constant 2 : index
    %c0_367 = arith.constant 0 : index
    %1023 = vector.load %arg0[%c0_363, %c2_364, %c0_365, %c2_366, %c0_367] : memref<9x3x2x7x105xf32, #tpu.memory_space<vmem>>, vector<1x1x2x5x105xf32>
    %1024 = vector.shape_cast %1023 : vector<1x1x2x5x105xf32> to vector<2x5x105xf32>
    %c72 = arith.constant 72 : index
    %1025 = memref.load %arg1[%c72] : memref<243xf32, #tpu.memory_space<smem>>
    %c153 = arith.constant 153 : index
    %1026 = memref.load %arg1[%c153] : memref<243xf32, #tpu.memory_space<smem>>
    %c234 = arith.constant 234 : index
    %1027 = memref.load %arg1[%c234] : memref<243xf32, #tpu.memory_space<smem>>
    %1028 = vector.broadcast %1026 : f32 to vector<5x105xf32>
    %1029 = vector.broadcast %1027 : f32 to vector<5x105xf32>
    %1030 = arith.select %4, %1028, %1029 : vector<5x105xi1>, vector<5x105xf32>
    %1031 = vector.broadcast %1025 : f32 to vector<5x105xf32>
    %1032 = arith.select %2, %1031, %1030 : vector<5x105xi1>, vector<5x105xf32>
    %1033 = vector.shape_cast %1032 : vector<5x105xf32> to vector<1x5x105xf32>
    %1034 = vector.broadcast %1033 : vector<1x5x105xf32> to vector<2x5x105xf32>
    %1035 = arith.mulf %1034, %1024 : vector<2x5x105xf32>
    %1036 = arith.addf %1022, %1035 : vector<2x5x105xf32>
    %c1_368 = arith.constant 1 : index
    %c2_369 = arith.constant 2 : index
    %c0_370 = arith.constant 0 : index
    %c2_371 = arith.constant 2 : index
    %c0_372 = arith.constant 0 : index
    %1037 = vector.load %arg0[%c1_368, %c2_369, %c0_370, %c2_371, %c0_372] : memref<9x3x2x7x105xf32, #tpu.memory_space<vmem>>, vector<1x1x2x5x105xf32>
    %1038 = vector.shape_cast %1037 : vector<1x1x2x5x105xf32> to vector<2x5x105xf32>
    %c73 = arith.constant 73 : index
    %1039 = memref.load %arg1[%c73] : memref<243xf32, #tpu.memory_space<smem>>
    %c154 = arith.constant 154 : index
    %1040 = memref.load %arg1[%c154] : memref<243xf32, #tpu.memory_space<smem>>
    %c235 = arith.constant 235 : index
    %1041 = memref.load %arg1[%c235] : memref<243xf32, #tpu.memory_space<smem>>
    %1042 = vector.broadcast %1040 : f32 to vector<5x105xf32>
    %1043 = vector.broadcast %1041 : f32 to vector<5x105xf32>
    %1044 = arith.select %4, %1042, %1043 : vector<5x105xi1>, vector<5x105xf32>
    %1045 = vector.broadcast %1039 : f32 to vector<5x105xf32>
    %1046 = arith.select %2, %1045, %1044 : vector<5x105xi1>, vector<5x105xf32>
    %1047 = vector.shape_cast %1046 : vector<5x105xf32> to vector<1x5x105xf32>
    %1048 = vector.broadcast %1047 : vector<1x5x105xf32> to vector<2x5x105xf32>
    %1049 = arith.mulf %1048, %1038 : vector<2x5x105xf32>
    %1050 = arith.addf %1036, %1049 : vector<2x5x105xf32>
    %c2_373 = arith.constant 2 : index
    %c2_374 = arith.constant 2 : index
    %c0_375 = arith.constant 0 : index
    %c2_376 = arith.constant 2 : index
    %c0_377 = arith.constant 0 : index
    %1051 = vector.load %arg0[%c2_373, %c2_374, %c0_375, %c2_376, %c0_377] : memref<9x3x2x7x105xf32, #tpu.memory_space<vmem>>, vector<1x1x2x5x105xf32>
    %1052 = vector.shape_cast %1051 : vector<1x1x2x5x105xf32> to vector<2x5x105xf32>
    %c74 = arith.constant 74 : index
    %1053 = memref.load %arg1[%c74] : memref<243xf32, #tpu.memory_space<smem>>
    %c155 = arith.constant 155 : index
    %1054 = memref.load %arg1[%c155] : memref<243xf32, #tpu.memory_space<smem>>
    %c236 = arith.constant 236 : index
    %1055 = memref.load %arg1[%c236] : memref<243xf32, #tpu.memory_space<smem>>
    %1056 = vector.broadcast %1054 : f32 to vector<5x105xf32>
    %1057 = vector.broadcast %1055 : f32 to vector<5x105xf32>
    %1058 = arith.select %4, %1056, %1057 : vector<5x105xi1>, vector<5x105xf32>
    %1059 = vector.broadcast %1053 : f32 to vector<5x105xf32>
    %1060 = arith.select %2, %1059, %1058 : vector<5x105xi1>, vector<5x105xf32>
    %1061 = vector.shape_cast %1060 : vector<5x105xf32> to vector<1x5x105xf32>
    %1062 = vector.broadcast %1061 : vector<1x5x105xf32> to vector<2x5x105xf32>
    %1063 = arith.mulf %1062, %1052 : vector<2x5x105xf32>
    %1064 = arith.addf %1050, %1063 : vector<2x5x105xf32>
    %c3_378 = arith.constant 3 : index
    %c2_379 = arith.constant 2 : index
    %c0_380 = arith.constant 0 : index
    %c2_381 = arith.constant 2 : index
    %c0_382 = arith.constant 0 : index
    %1065 = vector.load %arg0[%c3_378, %c2_379, %c0_380, %c2_381, %c0_382] : memref<9x3x2x7x105xf32, #tpu.memory_space<vmem>>, vector<1x1x2x5x105xf32>
    %1066 = vector.shape_cast %1065 : vector<1x1x2x5x105xf32> to vector<2x5x105xf32>
    %c75 = arith.constant 75 : index
    %1067 = memref.load %arg1[%c75] : memref<243xf32, #tpu.memory_space<smem>>
    %c156 = arith.constant 156 : index
    %1068 = memref.load %arg1[%c156] : memref<243xf32, #tpu.memory_space<smem>>
    %c237 = arith.constant 237 : index
    %1069 = memref.load %arg1[%c237] : memref<243xf32, #tpu.memory_space<smem>>
    %1070 = vector.broadcast %1068 : f32 to vector<5x105xf32>
    %1071 = vector.broadcast %1069 : f32 to vector<5x105xf32>
    %1072 = arith.select %4, %1070, %1071 : vector<5x105xi1>, vector<5x105xf32>
    %1073 = vector.broadcast %1067 : f32 to vector<5x105xf32>
    %1074 = arith.select %2, %1073, %1072 : vector<5x105xi1>, vector<5x105xf32>
    %1075 = vector.shape_cast %1074 : vector<5x105xf32> to vector<1x5x105xf32>
    %1076 = vector.broadcast %1075 : vector<1x5x105xf32> to vector<2x5x105xf32>
    %1077 = arith.mulf %1076, %1066 : vector<2x5x105xf32>
    %1078 = arith.addf %1064, %1077 : vector<2x5x105xf32>
    %c4_383 = arith.constant 4 : index
    %c2_384 = arith.constant 2 : index
    %c0_385 = arith.constant 0 : index
    %c2_386 = arith.constant 2 : index
    %c0_387 = arith.constant 0 : index
    %1079 = vector.load %arg0[%c4_383, %c2_384, %c0_385, %c2_386, %c0_387] : memref<9x3x2x7x105xf32, #tpu.memory_space<vmem>>, vector<1x1x2x5x105xf32>
    %1080 = vector.shape_cast %1079 : vector<1x1x2x5x105xf32> to vector<2x5x105xf32>
    %c76 = arith.constant 76 : index
    %1081 = memref.load %arg1[%c76] : memref<243xf32, #tpu.memory_space<smem>>
    %c157 = arith.constant 157 : index
    %1082 = memref.load %arg1[%c157] : memref<243xf32, #tpu.memory_space<smem>>
    %c238 = arith.constant 238 : index
    %1083 = memref.load %arg1[%c238] : memref<243xf32, #tpu.memory_space<smem>>
    %1084 = vector.broadcast %1082 : f32 to vector<5x105xf32>
    %1085 = vector.broadcast %1083 : f32 to vector<5x105xf32>
    %1086 = arith.select %4, %1084, %1085 : vector<5x105xi1>, vector<5x105xf32>
    %1087 = vector.broadcast %1081 : f32 to vector<5x105xf32>
    %1088 = arith.select %2, %1087, %1086 : vector<5x105xi1>, vector<5x105xf32>
    %1089 = vector.shape_cast %1088 : vector<5x105xf32> to vector<1x5x105xf32>
    %1090 = vector.broadcast %1089 : vector<1x5x105xf32> to vector<2x5x105xf32>
    %1091 = arith.mulf %1090, %1080 : vector<2x5x105xf32>
    %1092 = arith.addf %1078, %1091 : vector<2x5x105xf32>
    %c5_388 = arith.constant 5 : index
    %c2_389 = arith.constant 2 : index
    %c0_390 = arith.constant 0 : index
    %c2_391 = arith.constant 2 : index
    %c0_392 = arith.constant 0 : index
    %1093 = vector.load %arg0[%c5_388, %c2_389, %c0_390, %c2_391, %c0_392] : memref<9x3x2x7x105xf32, #tpu.memory_space<vmem>>, vector<1x1x2x5x105xf32>
    %1094 = vector.shape_cast %1093 : vector<1x1x2x5x105xf32> to vector<2x5x105xf32>
    %c77 = arith.constant 77 : index
    %1095 = memref.load %arg1[%c77] : memref<243xf32, #tpu.memory_space<smem>>
    %c158 = arith.constant 158 : index
    %1096 = memref.load %arg1[%c158] : memref<243xf32, #tpu.memory_space<smem>>
    %c239 = arith.constant 239 : index
    %1097 = memref.load %arg1[%c239] : memref<243xf32, #tpu.memory_space<smem>>
    %1098 = vector.broadcast %1096 : f32 to vector<5x105xf32>
    %1099 = vector.broadcast %1097 : f32 to vector<5x105xf32>
    %1100 = arith.select %4, %1098, %1099 : vector<5x105xi1>, vector<5x105xf32>
    %1101 = vector.broadcast %1095 : f32 to vector<5x105xf32>
    %1102 = arith.select %2, %1101, %1100 : vector<5x105xi1>, vector<5x105xf32>
    %1103 = vector.shape_cast %1102 : vector<5x105xf32> to vector<1x5x105xf32>
    %1104 = vector.broadcast %1103 : vector<1x5x105xf32> to vector<2x5x105xf32>
    %1105 = arith.mulf %1104, %1094 : vector<2x5x105xf32>
    %1106 = arith.addf %1092, %1105 : vector<2x5x105xf32>
    %c6_393 = arith.constant 6 : index
    %c2_394 = arith.constant 2 : index
    %c0_395 = arith.constant 0 : index
    %c2_396 = arith.constant 2 : index
    %c0_397 = arith.constant 0 : index
    %1107 = vector.load %arg0[%c6_393, %c2_394, %c0_395, %c2_396, %c0_397] : memref<9x3x2x7x105xf32, #tpu.memory_space<vmem>>, vector<1x1x2x5x105xf32>
    %1108 = vector.shape_cast %1107 : vector<1x1x2x5x105xf32> to vector<2x5x105xf32>
    %c78 = arith.constant 78 : index
    %1109 = memref.load %arg1[%c78] : memref<243xf32, #tpu.memory_space<smem>>
    %c159 = arith.constant 159 : index
    %1110 = memref.load %arg1[%c159] : memref<243xf32, #tpu.memory_space<smem>>
    %c240 = arith.constant 240 : index
    %1111 = memref.load %arg1[%c240] : memref<243xf32, #tpu.memory_space<smem>>
    %1112 = vector.broadcast %1110 : f32 to vector<5x105xf32>
    %1113 = vector.broadcast %1111 : f32 to vector<5x105xf32>
    %1114 = arith.select %4, %1112, %1113 : vector<5x105xi1>, vector<5x105xf32>
    %1115 = vector.broadcast %1109 : f32 to vector<5x105xf32>
    %1116 = arith.select %2, %1115, %1114 : vector<5x105xi1>, vector<5x105xf32>
    %1117 = vector.shape_cast %1116 : vector<5x105xf32> to vector<1x5x105xf32>
    %1118 = vector.broadcast %1117 : vector<1x5x105xf32> to vector<2x5x105xf32>
    %1119 = arith.mulf %1118, %1108 : vector<2x5x105xf32>
    %1120 = arith.addf %1106, %1119 : vector<2x5x105xf32>
    %c7_398 = arith.constant 7 : index
    %c2_399 = arith.constant 2 : index
    %c0_400 = arith.constant 0 : index
    %c2_401 = arith.constant 2 : index
    %c0_402 = arith.constant 0 : index
    %1121 = vector.load %arg0[%c7_398, %c2_399, %c0_400, %c2_401, %c0_402] : memref<9x3x2x7x105xf32, #tpu.memory_space<vmem>>, vector<1x1x2x5x105xf32>
    %1122 = vector.shape_cast %1121 : vector<1x1x2x5x105xf32> to vector<2x5x105xf32>
    %c79 = arith.constant 79 : index
    %1123 = memref.load %arg1[%c79] : memref<243xf32, #tpu.memory_space<smem>>
    %c160 = arith.constant 160 : index
    %1124 = memref.load %arg1[%c160] : memref<243xf32, #tpu.memory_space<smem>>
    %c241 = arith.constant 241 : index
    %1125 = memref.load %arg1[%c241] : memref<243xf32, #tpu.memory_space<smem>>
    %1126 = vector.broadcast %1124 : f32 to vector<5x105xf32>
    %1127 = vector.broadcast %1125 : f32 to vector<5x105xf32>
    %1128 = arith.select %4, %1126, %1127 : vector<5x105xi1>, vector<5x105xf32>
    %1129 = vector.broadcast %1123 : f32 to vector<5x105xf32>
    %1130 = arith.select %2, %1129, %1128 : vector<5x105xi1>, vector<5x105xf32>
    %1131 = vector.shape_cast %1130 : vector<5x105xf32> to vector<1x5x105xf32>
    %1132 = vector.broadcast %1131 : vector<1x5x105xf32> to vector<2x5x105xf32>
    %1133 = arith.mulf %1132, %1122 : vector<2x5x105xf32>
    %1134 = arith.addf %1120, %1133 : vector<2x5x105xf32>
    %c8_403 = arith.constant 8 : index
    %c2_404 = arith.constant 2 : index
    %c0_405 = arith.constant 0 : index
    %c2_406 = arith.constant 2 : index
    %c0_407 = arith.constant 0 : index
    %1135 = vector.load %arg0[%c8_403, %c2_404, %c0_405, %c2_406, %c0_407] : memref<9x3x2x7x105xf32, #tpu.memory_space<vmem>>, vector<1x1x2x5x105xf32>
    %1136 = vector.shape_cast %1135 : vector<1x1x2x5x105xf32> to vector<2x5x105xf32>
    %c80 = arith.constant 80 : index
    %1137 = memref.load %arg1[%c80] : memref<243xf32, #tpu.memory_space<smem>>
    %c161 = arith.constant 161 : index
    %1138 = memref.load %arg1[%c161] : memref<243xf32, #tpu.memory_space<smem>>
    %c242 = arith.constant 242 : index
    %1139 = memref.load %arg1[%c242] : memref<243xf32, #tpu.memory_space<smem>>
    %1140 = vector.broadcast %1138 : f32 to vector<5x105xf32>
    %1141 = vector.broadcast %1139 : f32 to vector<5x105xf32>
    %1142 = arith.select %4, %1140, %1141 : vector<5x105xi1>, vector<5x105xf32>
    %1143 = vector.broadcast %1137 : f32 to vector<5x105xf32>
    %1144 = arith.select %2, %1143, %1142 : vector<5x105xi1>, vector<5x105xf32>
    %1145 = vector.shape_cast %1144 : vector<5x105xf32> to vector<1x5x105xf32>
    %1146 = vector.broadcast %1145 : vector<1x5x105xf32> to vector<2x5x105xf32>
    %1147 = arith.mulf %1146, %1136 : vector<2x5x105xf32>
    %1148 = arith.addf %1134, %1147 : vector<2x5x105xf32>
    %cst = arith.constant 3.000000e+00 : f32
    %1149 = vector.broadcast %cst : f32 to vector<2x5x105xf32>
    %1150 = arith.addf %1148, %1149 : vector<2x5x105xf32>
    %cst_408 = arith.constant 0.000000e+00 : f32
    %cst_409 = arith.constant 6.000000e+00 : f32
    %1151 = vector.broadcast %cst_408 : f32 to vector<2x5x105xf32>
    %1152 = arith.maximumf %1151, %1150 : vector<2x5x105xf32>
    %1153 = vector.broadcast %cst_409 : f32 to vector<2x5x105xf32>
    %1154 = arith.minimumf %1153, %1152 : vector<2x5x105xf32>
    %1155 = arith.mulf %1148, %1154 : vector<2x5x105xf32>
    %cst_410 = arith.constant 0.166666672 : f32
    %1156 = vector.broadcast %cst_410 : f32 to vector<2x5x105xf32>
    %1157 = arith.mulf %1155, %1156 : vector<2x5x105xf32>
    %1158 = vector.extract_strided_slice %1157 {offsets = [0, 0, 0], sizes = [2, 5, 104], strides = [1, 1, 1]} : vector<2x5x105xf32> to vector<2x5x104xf32>
    %1159 = vector.extract_strided_slice %1157 {offsets = [0, 0, 1], sizes = [2, 5, 104], strides = [1, 1, 1]} : vector<2x5x105xf32> to vector<2x5x104xf32>
    %1160 = arith.maximumf %1158, %1159 : vector<2x5x104xf32>
    %1161 = vector.extract_strided_slice %1160 {offsets = [0, 0, 0], sizes = [2, 5, 97], strides = [1, 1, 1]} : vector<2x5x104xf32> to vector<2x5x97xf32>
    %1162 = vector.extract_strided_slice %1160 {offsets = [0, 0, 7], sizes = [2, 5, 97], strides = [1, 1, 1]} : vector<2x5x104xf32> to vector<2x5x97xf32>
    %1163 = arith.maximumf %1161, %1162 : vector<2x5x97xf32>
    %1164 = vector.extract_strided_slice %1163 {offsets = [0, 0, 0], sizes = [2, 4, 97], strides = [1, 1, 1]} : vector<2x5x97xf32> to vector<2x4x97xf32>
    %1165 = vector.extract_strided_slice %1163 {offsets = [0, 1, 0], sizes = [2, 4, 97], strides = [1, 1, 1]} : vector<2x5x97xf32> to vector<2x4x97xf32>
    %1166 = arith.maximumf %1164, %1165 : vector<2x4x97xf32>
    %c0_411 = arith.constant 0 : index
    %c0_412 = arith.constant 0 : index
    %c0_413 = arith.constant 0 : index
    %1167 = vector.load %arg3[%c0_411, %c0_412, %c0_413] : memref<2x4x97xf32, #tpu.memory_space<vmem>>, vector<2x4x97xf32>
    tpu.vector_store %arg3[%c0_411, %c0_412, %c0_413], %1166 {strides = array<i32>} : memref<2x4x97xf32, #tpu.memory_space<vmem>>, vector<2x4x97xf32>,
    return
  }
}

</mosaic_0001>

<bundles_post_ra>
// kernel: tile.9
= control target key start
LH: loop header
LB: loop body
LE: loop exit
PB: predicated region body
PF: predicated region fallthrough
CT: control target
= control target key end

     0   :  { %vm1892_vm0 = vcmask 1047556   ;;  %s6473_s10 = smov 70   ;;  %vm1894_vm1 = vcmask 285696   ;;  %vm2606_vm2 = vcmask 859696   ;;  %s6474_s4 = smov 35   ;;  %vm3412_vm3 = vcmask 572696   ;;  %s9203_s0 = inlined_call_operand.vmem [shape: f32[9,3,2,7,3,35], index: 0, kind: input, shape index: {}]   ;;  %s9204_s1 = inlined_call_operand.vmem [shape: f32[9,3,2,7,105], index: 1, kind: output, shape index: {}]  }
   0x1   :  { %v6276_v0 = vld [vmem:[%s9203_s0 + $0x1c] sm:$0xf]  ;;  %v6277_v1 = vld [vmem:[%s9203_s0 + $0x18] sm:$0xf]  ;;  %v6278_v2 = vld [vmem:[%s9203_s0 + $0x14] sm:$0xf] }
   0x2   :  { %1858 = vst [vmem:[#allocation1 + $0x38] sm:$0xf] %v6276_v0  ;;  %1863 = vst [vmem:[#allocation1 + $0x30] sm:$0xf] %v6277_v1  ;;  %v6279_v3 = vld [vmem:[%s9203_s0 + $0x10] sm:$0xf] }
   0x3   :  { %1868 = vst [vmem:[#allocation1 + $0x28] sm:$0xf] %v6278_v2  ;;  %v6280_v4 = vld [vmem:[%s9203_s0 + $0xc] sm:$0xf]  ;;  %v6281_v5 = vld [vmem:[%s9203_s0 + $0x8] sm:$0xf] }
   0x4   :  { %1873 = vst [vmem:[#allocation1 + $0x20] sm:$0xf] %v6279_v3  ;;  %1878 = vst [vmem:[#allocation1 + $0x18] sm:$0xf] %v6280_v4  ;;  %v6282_v6 = vld [vmem:[%s9203_s0 + $0x4] sm:$0xf] }
   0x5   :  { %1883 = vst [vmem:[#allocation1 + $0x10] sm:$0xf] %v6281_v5  ;;  %v1888_v7 = vld [vmem:[%s9203_s0] sm:$0xf]  ;;  %1887 = vst [vmem:[#allocation1 + $0x8] sm:$0xf] %v6282_v6 }
   0x6   :  { %1889 = vst [vmem:[#allocation1] sm:$0xf] %v1888_v7  ;;  %v6260_v8 = vld [vmem:[%s9203_s0 + $0x5c] sm:$0xf]  ;;  %v6261_v9 = vld [vmem:[%s9203_s0 + $0x58] sm:$0xf] }
   0x7   :  { %v6262_v10 = vld [vmem:[%s9203_s0 + $0x54] sm:$0xf]  ;;  %1778 = vst [vmem:[#allocation1 + $0xb8] sm:$0xf] %v6260_v8  ;;  %1783 = vst [vmem:[#allocation1 + $0xb0] sm:$0xf] %v6261_v9 }
   0x8   :  { %1788 = vst [vmem:[#allocation1 + $0xa8] sm:$0xf] %v6262_v10  ;;  %v6263_v11 = vld [vmem:[%s9203_s0 + $0x50] sm:$0xf]  ;;  %v6264_v12 = vld [vmem:[%s9203_s0 + $0x4c] sm:$0xf] }
   0x9   :  { %v6265_v13 = vld [vmem:[%s9203_s0 + $0x48] sm:$0xf]  ;;  %1793 = vst [vmem:[#allocation1 + $0xa0] sm:$0xf] %v6263_v11  ;;  %1798 = vst [vmem:[#allocation1 + $0x98] sm:$0xf] %v6264_v12 }
   0xa   :  { %1803 = vst [vmem:[#allocation1 + $0x90] sm:$0xf] %v6265_v13  ;;  %v6266_v14 = vld [vmem:[%s9203_s0 + $0x44] sm:$0xf]  ;;  %v6267_v15 = vld [vmem:[%s9203_s0 + $0x40] sm:$0xf] }
   0xb   :  { %v6268_v16 = vld [vmem:[%s9203_s0 + $0x3c] sm:$0xf]  ;;  %1808 = vst [vmem:[#allocation1 + $0x88] sm:$0xf] %v6266_v14  ;;  %1813 = vst [vmem:[#allocation1 + $0x80] sm:$0xf] %v6267_v15 }
   0xc   :  { %1818 = vst [vmem:[#allocation1 + $0x78] sm:$0xf] %v6268_v16  ;;  %v6269_v17 = vld [vmem:[%s9203_s0 + $0x38] sm:$0xf]  ;;  %v6270_v18 = vld [vmem:[%s9203_s0 + $0x34] sm:$0xf] }
   0xd   :  { %v6271_v19 = vld [vmem:[%s9203_s0 + $0x30] sm:$0xf]  ;;  %1823 = vst [vmem:[#allocation1 + $0x70] sm:$0xf] %v6269_v17  ;;  %1828 = vst [vmem:[#allocation1 + $0x68] sm:$0xf] %v6270_v18 }
   0xe   :  { %1833 = vst [vmem:[#allocation1 + $0x60] sm:$0xf] %v6271_v19  ;;  %v6272_v20 = vld [vmem:[%s9203_s0 + $0x2c] sm:$0xf]  ;;  %v6273_v21 = vld [vmem:[%s9203_s0 + $0x28] sm:$0xf] }
   0xf   :  { %v6274_v22 = vld [vmem:[%s9203_s0 + $0x24] sm:$0xf]  ;;  %1838 = vst [vmem:[#allocation1 + $0x58] sm:$0xf] %v6272_v20  ;;  %1843 = vst [vmem:[#allocation1 + $0x50] sm:$0xf] %v6273_v21 }
  0x10   :  { %1848 = vst [vmem:[#allocation1 + $0x48] sm:$0xf] %v6274_v22  ;;  %v6275_v23 = vld [vmem:[%s9203_s0 + $0x20] sm:$0xf]  ;;  %v6252_v24 = vld [vmem:[%s9203_s0 + $0x7c] sm:$0xf] }
  0x11   :  { %v6253_v25 = vld [vmem:[%s9203_s0 + $0x78] sm:$0xf]  ;;  %1853 = vst [vmem:[#allocation1 + $0x40] sm:$0xf] %v6275_v23  ;;  %1738 = vst [vmem:[#allocation1 + $0xf8] sm:$0xf] %v6252_v24 }
  0x12   :  { %v2601_v26 = vld [vmem:[#allocation1 + $0x2] ss:$8 sm:$0xf0]   ;;  %1743 = vst [vmem:[#allocation1 + $0xf0] sm:$0xf] %v6253_v25  ;;  %s4203_s5 = smov 3 }
  0x13   :  { %v6254_v27 = vld [vmem:[%s9203_s0 + $0x74] sm:$0xf]  ;;  %v2599_v28 = vld [vmem:[#allocation1 + $0x2] ss:$8 sm:$0xf]  }
  0x14   :  { %1748 = vst [vmem:[#allocation1 + $0xe8] sm:$0xf] %v6254_v27  ;;  %v6255_v29 = vld [vmem:[%s9203_s0 + $0x70] sm:$0xf]  ;;  %v2603_v30 = vsel %vm1892_vm0, %v2601_v26, %v2599_v28  ;;  %v6256_v31 = vld [vmem:[%s9203_s0 + $0x6c] sm:$0xf] }
  0x15   :  { %1753 = vst [vmem:[#allocation1 + $0xe0] sm:$0xf] %v6255_v29  ;;  %v6257_v32 = vld [vmem:[%s9203_s0 + $0x68] sm:$0xf]  ;;  %v6258_v33 = vld [vmem:[%s9203_s0 + $0x64] sm:$0xf]  ;;  %2604 = vrot.lane.b32.xlu0 %v2603_v30, %s6473_s10 }
  0x16   :  { %v2634_v34 = vld [vmem:[#allocation1 + $0x82] ss:$8 sm:$0xf0]   ;;  %1758 = vst [vmem:[#allocation1 + $0xd8] sm:$0xf] %v6256_v31 }
  0x17   :  { %1763 = vst [vmem:[#allocation1 + $0xd0] sm:$0xf] %v6257_v32  ;;  %1768 = vst [vmem:[#allocation1 + $0xc8] sm:$0xf] %v6258_v33  ;;  %v6259_v35 = vld [vmem:[%s9203_s0 + $0x60] sm:$0xf] }
  0x18   :  { %v2632_v36 = vld [vmem:[#allocation1 + $0x82] ss:$8 sm:$0xf]   ;;  %1773 = vst [vmem:[#allocation1 + $0xc0] sm:$0xf] %v6259_v35 }
  0x19   :  { %v6244_v37 = vld [vmem:[%s9203_s0 + $0x9c] sm:$0xf]  ;;  %v2636_v38 = vsel %vm1892_vm0, %v2634_v34, %v2632_v36  ;;  %v2617_v39 = vld [vmem:[#allocation1 + $0x42] ss:$8 sm:$0xf0]  }
  0x1a   :  { %1698 = vst [vmem:[#allocation1 + $0x138] sm:$0xf] %v6244_v37  ;;  %v6245_v40 = vld [vmem:[%s9203_s0 + $0x98] sm:$0xf]  ;;  %2637 = vrot.lane.b32.xlu1 %v2636_v38, %s6473_s10  ;;  %v6246_v41 = vld [vmem:[%s9203_s0 + $0x94] sm:$0xf] }
  0x1b   :  { %1703 = vst [vmem:[#allocation1 + $0x130] sm:$0xf] %v6245_v40  ;;  %v6247_v42 = vld [vmem:[%s9203_s0 + $0x90] sm:$0xf]  ;;  %v6248_v43 = vld [vmem:[%s9203_s0 + $0x8c] sm:$0xf] }
  0x1c   :  { %v2615_v44 = vld [vmem:[#allocation1 + $0x42] ss:$8 sm:$0xf]   ;;  %1708 = vst [vmem:[#allocation1 + $0x128] sm:$0xf] %v6246_v41 }
  0x1d   :  { %1713 = vst [vmem:[#allocation1 + $0x120] sm:$0xf] %v6247_v42  ;;  %1718 = vst [vmem:[#allocation1 + $0x118] sm:$0xf] %v6248_v43  ;;  %v6249_v45 = vld [vmem:[%s9203_s0 + $0x88] sm:$0xf]  ;;  %v2619_v46 = vsel %vm1892_vm0, %v2617_v39, %v2615_v44 }
  0x1e   :  { %1723 = vst [vmem:[#allocation1 + $0x110] sm:$0xf] %v6249_v45  ;;  %v6250_v47 = vld [vmem:[%s9203_s0 + $0x84] sm:$0xf]  ;;  %v6251_v48 = vld [vmem:[%s9203_s0 + $0x80] sm:$0xf]  ;;  %2620 = vrot.lane.b32.xlu0 %v2619_v46, %s6473_s10 }
  0x1f   :  { %v6236_v49 = vld [vmem:[%s9203_s0 + $0xbc] sm:$0xf]  ;;  %v2651_v50 = vld [vmem:[#allocation1 + $0xc2] ss:$8 sm:$0xf0]  }
  0x20   :  { %1728 = vst [vmem:[#allocation1 + $0x108] sm:$0xf] %v6250_v47  ;;  %1733 = vst [vmem:[#allocation1 + $0x100] sm:$0xf] %v6251_v48  ;;  %v6237_v51 = vld [vmem:[%s9203_s0 + $0xb8] sm:$0xf] }
  0x21   :  { %1658 = vst [vmem:[#allocation1 + $0x178] sm:$0xf] %v6236_v49  ;;  %1663 = vst [vmem:[#allocation1 + $0x170] sm:$0xf] %v6237_v51  ;;  %v6238_v52 = vld [vmem:[%s9203_s0 + $0xb4] sm:$0xf] }
  0x22   :  { %v6239_v53 = vld [vmem:[%s9203_s0 + $0xb0] sm:$0xf]  ;;  %v6240_v54 = vld [vmem:[%s9203_s0 + $0xac] sm:$0xf]  ;;  %1668 = vst [vmem:[#allocation1 + $0x168] sm:$0xf] %v6238_v52 }
  0x23   :  { %v2649_v55 = vld [vmem:[#allocation1 + $0xc2] ss:$8 sm:$0xf]   ;;  %1673 = vst [vmem:[#allocation1 + $0x160] sm:$0xf] %v6239_v53 }
  0x24   :  { %1678 = vst [vmem:[#allocation1 + $0x158] sm:$0xf] %v6240_v54  ;;  %v6241_v56 = vld [vmem:[%s9203_s0 + $0xa8] sm:$0xf]  ;;  %v2653_v57 = vsel %vm1892_vm0, %v2651_v50, %v2649_v55  ;;  %v6242_v58 = vld [vmem:[%s9203_s0 + $0xa4] sm:$0xf] }
  0x25   :  { %1683 = vst [vmem:[#allocation1 + $0x150] sm:$0xf] %v6241_v56  ;;  %v6243_v59 = vld [vmem:[%s9203_s0 + $0xa0] sm:$0xf]  ;;  %v6228_v60 = vld [vmem:[%s9203_s0 + $0xdc] sm:$0xf]  ;;  %2654 = vrot.lane.b32.xlu1 %v2653_v57, %s6473_s10 }
  0x26   :  { %1688 = vst [vmem:[#allocation1 + $0x148] sm:$0xf] %v6242_v58  ;;  %1693 = vst [vmem:[#allocation1 + $0x140] sm:$0xf] %v6243_v59  ;;  %v6229_v61 = vld [vmem:[%s9203_s0 + $0xd8] sm:$0xf] }
  0x27   :  { %1618 = vst [vmem:[#allocation1 + $0x1b8] sm:$0xf] %v6228_v60  ;;  %v6230_v62 = vld [vmem:[%s9203_s0 + $0xd4] sm:$0xf]  ;;  %v6231_v63 = vld [vmem:[%s9203_s0 + $0xd0] sm:$0xf] }
  0x28   :  { %v2668_v0 = vld [vmem:[#allocation1 + $0x102] ss:$8 sm:$0xf0]   ;;  %1623 = vst [vmem:[#allocation1 + $0x1b0] sm:$0xf] %v6229_v61 }
  0x29   :  { %1628 = vst [vmem:[#allocation1 + $0x1a8] sm:$0xf] %v6230_v62  ;;  %1633 = vst [vmem:[#allocation1 + $0x1a0] sm:$0xf] %v6231_v63  ;;  %v6232_v1 = vld [vmem:[%s9203_s0 + $0xcc] sm:$0xf] }
  0x2a   :  { %1638 = vst [vmem:[#allocation1 + $0x198] sm:$0xf] %v6232_v1  ;;  %v6233_v2 = vld [vmem:[%s9203_s0 + $0xc8] sm:$0xf]  ;;  %v6234_v3 = vld [vmem:[%s9203_s0 + $0xc4] sm:$0xf] }
  0x2b   :  { %v6235_v4 = vld [vmem:[%s9203_s0 + $0xc0] sm:$0xf]  ;;  %1643 = vst [vmem:[#allocation1 + $0x190] sm:$0xf] %v6233_v2  ;;  %1648 = vst [vmem:[#allocation1 + $0x188] sm:$0xf] %v6234_v3 }
  0x2c   :  { %v2666_v5 = vld [vmem:[#allocation1 + $0x102] ss:$8 sm:$0xf]   ;;  %1653 = vst [vmem:[#allocation1 + $0x180] sm:$0xf] %v6235_v4 }
  0x2d   :  { %v6220_v6 = vld [vmem:[%s9203_s0 + $0xfc] sm:$0xf]  ;;  %v2670_v7 = vsel %vm1892_vm0, %v2668_v0, %v2666_v5  ;;  %v6221_v8 = vld [vmem:[%s9203_s0 + $0xf8] sm:$0xf]  ;;  %v6222_v9 = vld [vmem:[%s9203_s0 + $0xf4] sm:$0xf] }
  0x2e   :  { %1578 = vst [vmem:[#allocation1 + $0x1f8] sm:$0xf] %v6220_v6  ;;  %v6223_v10 = vld [vmem:[%s9203_s0 + $0xf0] sm:$0xf]  ;;  %2671 = vrot.lane.b32.xlu0 %v2670_v7, %s6473_s10  ;;  %1583 = vst [vmem:[#allocation1 + $0x1f0] sm:$0xf] %v6221_v8 }
  0x2f   :  { %v2685_v11 = vld [vmem:[#allocation1 + $0x142] ss:$8 sm:$0xf0]   ;;  %1588 = vst [vmem:[#allocation1 + $0x1e8] sm:$0xf] %v6222_v9 }
  0x30   :  { %1593 = vst [vmem:[#allocation1 + $0x1e0] sm:$0xf] %v6223_v10  ;;  %v6224_v12 = vld [vmem:[%s9203_s0 + $0xec] sm:$0xf]  ;;  %v6225_v13 = vld [vmem:[%s9203_s0 + $0xe8] sm:$0xf] }
  0x31   :  { %1598 = vst [vmem:[#allocation1 + $0x1d8] sm:$0xf] %v6224_v12  ;;  %v6226_v14 = vld [vmem:[%s9203_s0 + $0xe4] sm:$0xf]  ;;  %v6227_v15 = vld [vmem:[%s9203_s0 + $0xe0] sm:$0xf] }
  0x32   :  { %v2683_v16 = vld [vmem:[#allocation1 + $0x142] ss:$8 sm:$0xf]   ;;  %1603 = vst [vmem:[#allocation1 + $0x1d0] sm:$0xf] %v6225_v13 }
  0x33   :  { %1608 = vst [vmem:[#allocation1 + $0x1c8] sm:$0xf] %v6226_v14  ;;  %1613 = vst [vmem:[#allocation1 + $0x1c0] sm:$0xf] %v6227_v15  ;;  %v6212_v17 = vld [vmem:[%s9203_s0 + $0x11c] sm:$0xf]  ;;  %v2687_v18 = vsel %vm1892_vm0, %v2685_v11, %v2683_v16 }
  0x34   :  { %v2702_v19 = vld [vmem:[#allocation1 + $0x182] ss:$8 sm:$0xf0]   ;;  %1538 = vst [vmem:[#allocation1 + $0x238] sm:$0xf] %v6212_v17  ;;  %2688 = vrot.lane.b32.xlu1 %v2687_v18, %s6473_s10 }
  0x35   :  { %v6213_v20 = vld [vmem:[%s9203_s0 + $0x118] sm:$0xf]  ;;  %v6214_v21 = vld [vmem:[%s9203_s0 + $0x114] sm:$0xf]  ;;  %v6215_v22 = vld [vmem:[%s9203_s0 + $0x110] sm:$0xf] }
  0x36   :  { %1543 = vst [vmem:[#allocation1 + $0x230] sm:$0xf] %v6213_v20  ;;  %v6216_v23 = vld [vmem:[%s9203_s0 + $0x10c] sm:$0xf]  ;;  %1548 = vst [vmem:[#allocation1 + $0x228] sm:$0xf] %v6214_v21 }
  0x37   :  { %v2700_v24 = vld [vmem:[#allocation1 + $0x182] ss:$8 sm:$0xf]   ;;  %1553 = vst [vmem:[#allocation1 + $0x220] sm:$0xf] %v6215_v22 }
  0x38   :  { %1558 = vst [vmem:[#allocation1 + $0x218] sm:$0xf] %v6216_v23  ;;  %v6217_v25 = vld [vmem:[%s9203_s0 + $0x108] sm:$0xf]  ;;  %v2704_v26 = vsel %vm1892_vm0, %v2702_v19, %v2700_v24  ;;  %v6218_v27 = vld [vmem:[%s9203_s0 + $0x104] sm:$0xf] }
  0x39   :  { %1563 = vst [vmem:[#allocation1 + $0x210] sm:$0xf] %v6217_v25  ;;  %v6219_v28 = vld [vmem:[%s9203_s0 + $0x100] sm:$0xf]  ;;  %v6204_v29 = vld [vmem:[%s9203_s0 + $0x13c] sm:$0xf]  ;;  %2705 = vrot.lane.b32.xlu0 %v2704_v26, %s6473_s10 }
  0x3a   :  { %v2719_v30 = vld [vmem:[#allocation1 + $0x1c2] ss:$8 sm:$0xf0]   ;;  %1568 = vst [vmem:[#allocation1 + $0x208] sm:$0xf] %v6218_v27 }
  0x3b   :  { %1573 = vst [vmem:[#allocation1 + $0x200] sm:$0xf] %v6219_v28  ;;  %1498 = vst [vmem:[#allocation1 + $0x278] sm:$0xf] %v6204_v29  ;;  %v6205_v31 = vld [vmem:[%s9203_s0 + $0x138] sm:$0xf] }
  0x3c   :  { %1503 = vst [vmem:[#allocation1 + $0x270] sm:$0xf] %v6205_v31  ;;  %v6206_v32 = vld [vmem:[%s9203_s0 + $0x134] sm:$0xf]  ;;  %v6207_v33 = vld [vmem:[%s9203_s0 + $0x130] sm:$0xf] }
  0x3d   :  { %v6208_v34 = vld [vmem:[%s9203_s0 + $0x12c] sm:$0xf]  ;;  %v2717_v35 = vld [vmem:[#allocation1 + $0x1c2] ss:$8 sm:$0xf]  }
  0x3e   :  { %1508 = vst [vmem:[#allocation1 + $0x268] sm:$0xf] %v6206_v32  ;;  %1513 = vst [vmem:[#allocation1 + $0x260] sm:$0xf] %v6207_v33  ;;  %v6209_v36 = vld [vmem:[%s9203_s0 + $0x128] sm:$0xf]  ;;  %v2721_v37 = vsel %vm1892_vm0, %v2719_v30, %v2717_v35 }
  0x3f   :  { %1518 = vst [vmem:[#allocation1 + $0x258] sm:$0xf] %v6208_v34  ;;  %1523 = vst [vmem:[#allocation1 + $0x250] sm:$0xf] %v6209_v36  ;;  %v6210_v38 = vld [vmem:[%s9203_s0 + $0x124] sm:$0xf]  ;;  %2722 = vrot.lane.b32.xlu1 %v2721_v37, %s6473_s10 }
  0x40   :  { %v6211_v39 = vld [vmem:[%s9203_s0 + $0x120] sm:$0xf]  ;;  %v6196_v40 = vld [vmem:[%s9203_s0 + $0x15c] sm:$0xf]  ;;  %1528 = vst [vmem:[#allocation1 + $0x248] sm:$0xf] %v6210_v38 }
  0x41   :  { %1533 = vst [vmem:[#allocation1 + $0x240] sm:$0xf] %v6211_v39  ;;  %1458 = vst [vmem:[#allocation1 + $0x2b8] sm:$0xf] %v6196_v40  ;;  %v6197_v41 = vld [vmem:[%s9203_s0 + $0x158] sm:$0xf] }
  0x42   :  { %v6198_v42 = vld [vmem:[%s9203_s0 + $0x154] sm:$0xf]  ;;  %v6199_v43 = vld [vmem:[%s9203_s0 + $0x150] sm:$0xf]  ;;  %1463 = vst [vmem:[#allocation1 + $0x2b0] sm:$0xf] %v6197_v41 }
  0x43   :  { %v2736_v44 = vld [vmem:[#allocation1 + $0x202] ss:$8 sm:$0xf0]   ;;  %1468 = vst [vmem:[#allocation1 + $0x2a8] sm:$0xf] %v6198_v42 }
  0x44   :  { %1473 = vst [vmem:[#allocation1 + $0x2a0] sm:$0xf] %v6199_v43  ;;  %v6200_v45 = vld [vmem:[%s9203_s0 + $0x14c] sm:$0xf]  ;;  %v6201_v46 = vld [vmem:[%s9203_s0 + $0x148] sm:$0xf] }
  0x45   :  { %1478 = vst [vmem:[#allocation1 + $0x298] sm:$0xf] %v6200_v45  ;;  %v6202_v47 = vld [vmem:[%s9203_s0 + $0x144] sm:$0xf]  ;;  %v6203_v48 = vld [vmem:[%s9203_s0 + $0x140] sm:$0xf] }
  0x46   :  { %v2734_v49 = vld [vmem:[#allocation1 + $0x202] ss:$8 sm:$0xf]   ;;  %1483 = vst [vmem:[#allocation1 + $0x290] sm:$0xf] %v6201_v46 }
  0x47   :  { %1488 = vst [vmem:[#allocation1 + $0x288] sm:$0xf] %v6202_v47  ;;  %1493 = vst [vmem:[#allocation1 + $0x280] sm:$0xf] %v6203_v48  ;;  %v6188_v50 = vld [vmem:[%s9203_s0 + $0x17c] sm:$0xf]  ;;  %v2738_v51 = vsel %vm1892_vm0, %v2736_v44, %v2734_v49 }
  0x48   :  { %1418 = vst [vmem:[#allocation1 + $0x2f8] sm:$0xf] %v6188_v50  ;;  %v6189_v52 = vld [vmem:[%s9203_s0 + $0x178] sm:$0xf]  ;;  %v6190_v53 = vld [vmem:[%s9203_s0 + $0x174] sm:$0xf]  ;;  %2739 = vrot.lane.b32.xlu0 %v2738_v51, %s6473_s10 }
  0x49   :  { %v6191_v54 = vld [vmem:[%s9203_s0 + $0x170] sm:$0xf]  ;;  %1423 = vst [vmem:[#allocation1 + $0x2f0] sm:$0xf] %v6189_v52  ;;  %1428 = vst [vmem:[#allocation1 + $0x2e8] sm:$0xf] %v6190_v53 }
  0x4a   :  { %v2753_v55 = vld [vmem:[#allocation1 + $0x242] ss:$8 sm:$0xf0]   ;;  %1433 = vst [vmem:[#allocation1 + $0x2e0] sm:$0xf] %v6191_v54 }
  0x4b   :  { %v6192_v56 = vld [vmem:[%s9203_s0 + $0x16c] sm:$0xf]  ;;  %v6193_v57 = vld [vmem:[%s9203_s0 + $0x168] sm:$0xf]  ;;  %v6194_v58 = vld [vmem:[%s9203_s0 + $0x164] sm:$0xf] }
  0x4c   :  { %1438 = vst [vmem:[#allocation1 + $0x2d8] sm:$0xf] %v6192_v56  ;;  %v6195_v59 = vld [vmem:[%s9203_s0 + $0x160] sm:$0xf]  ;;  %1443 = vst [vmem:[#allocation1 + $0x2d0] sm:$0xf] %v6193_v57 }
  0x4d   :  { %v2751_v60 = vld [vmem:[#allocation1 + $0x242] ss:$8 sm:$0xf]   ;;  %1448 = vst [vmem:[#allocation1 + $0x2c8] sm:$0xf] %v6194_v58 }
  0x4e   :  { %1453 = vst [vmem:[#allocation1 + $0x2c0] sm:$0xf] %v6195_v59  ;;  %v6180_v61 = vld [vmem:[%s9203_s0 + $0x19c] sm:$0xf]  ;;  %v2755_v62 = vsel %vm1892_vm0, %v2753_v55, %v2751_v60  ;;  %v6181_v0 = vld [vmem:[%s9203_s0 + $0x198] sm:$0xf] }
  0x4f   :  { %v2770_v63 = vld [vmem:[#allocation1 + $0x282] ss:$8 sm:$0xf0]   ;;  %1378 = vst [vmem:[#allocation1 + $0x338] sm:$0xf] %v6180_v61  ;;  %2756 = vrot.lane.b32.xlu1 %v2755_v62, %s6473_s10 }
  0x50   :  { %1383 = vst [vmem:[#allocation1 + $0x330] sm:$0xf] %v6181_v0  ;;  %v6182_v1 = vld [vmem:[%s9203_s0 + $0x194] sm:$0xf]  ;;  %v6183_v2 = vld [vmem:[%s9203_s0 + $0x190] sm:$0xf] }
  0x51   :  { %v6184_v3 = vld [vmem:[%s9203_s0 + $0x18c] sm:$0xf]  ;;  %v2768_v4 = vld [vmem:[#allocation1 + $0x282] ss:$8 sm:$0xf]  }
  0x52   :  { %1388 = vst [vmem:[#allocation1 + $0x328] sm:$0xf] %v6182_v1  ;;  %1393 = vst [vmem:[#allocation1 + $0x320] sm:$0xf] %v6183_v2  ;;  %v6185_v5 = vld [vmem:[%s9203_s0 + $0x188] sm:$0xf]  ;;  %v2772_v6 = vsel %vm1892_vm0, %v2770_v63, %v2768_v4 }
  0x53   :  { %1398 = vst [vmem:[#allocation1 + $0x318] sm:$0xf] %v6184_v3  ;;  %1403 = vst [vmem:[#allocation1 + $0x310] sm:$0xf] %v6185_v5  ;;  %v6186_v7 = vld [vmem:[%s9203_s0 + $0x184] sm:$0xf]  ;;  %2773 = vrot.lane.b32.xlu0 %v2772_v6, %s6473_s10 }
  0x54   :  { %v6187_v8 = vld [vmem:[%s9203_s0 + $0x180] sm:$0xf]  ;;  %v6172_v9 = vld [vmem:[%s9203_s0 + $0x1bc] sm:$0xf]  ;;  %1408 = vst [vmem:[#allocation1 + $0x308] sm:$0xf] %v6186_v7 }
  0x55   :  { %v2787_v10 = vld [vmem:[#allocation1 + $0x2c2] ss:$8 sm:$0xf0]   ;;  %1413 = vst [vmem:[#allocation1 + $0x300] sm:$0xf] %v6187_v8 }
  0x56   :  { %1338 = vst [vmem:[#allocation1 + $0x378] sm:$0xf] %v6172_v9  ;;  %v6173_v11 = vld [vmem:[%s9203_s0 + $0x1b8] sm:$0xf]  ;;  %v6174_v12 = vld [vmem:[%s9203_s0 + $0x1b4] sm:$0xf] }
  0x57   :  { %1343 = vst [vmem:[#allocation1 + $0x370] sm:$0xf] %v6173_v11  ;;  %v6175_v13 = vld [vmem:[%s9203_s0 + $0x1b0] sm:$0xf]  ;;  %v6176_v14 = vld [vmem:[%s9203_s0 + $0x1ac] sm:$0xf] }
  0x58   :  { %v2785_v15 = vld [vmem:[#allocation1 + $0x2c2] ss:$8 sm:$0xf]   ;;  %1348 = vst [vmem:[#allocation1 + $0x368] sm:$0xf] %v6174_v12 }
  0x59   :  { %1353 = vst [vmem:[#allocation1 + $0x360] sm:$0xf] %v6175_v13  ;;  %1358 = vst [vmem:[#allocation1 + $0x358] sm:$0xf] %v6176_v14  ;;  %v6177_v16 = vld [vmem:[%s9203_s0 + $0x1a8] sm:$0xf]  ;;  %v2789_v17 = vsel %vm1892_vm0, %v2787_v10, %v2785_v15 }
  0x5a   :  { %1363 = vst [vmem:[#allocation1 + $0x350] sm:$0xf] %v6177_v16  ;;  %v6178_v18 = vld [vmem:[%s9203_s0 + $0x1a4] sm:$0xf]  ;;  %v6179_v19 = vld [vmem:[%s9203_s0 + $0x1a0] sm:$0xf]  ;;  %2790 = vrot.lane.b32.xlu1 %v2789_v17, %s6473_s10 }
  0x5b   :  { %v6164_v20 = vld [vmem:[%s9203_s0 + $0x1dc] sm:$0xf]  ;;  %1368 = vst [vmem:[#allocation1 + $0x348] sm:$0xf] %v6178_v18  ;;  %1373 = vst [vmem:[#allocation1 + $0x340] sm:$0xf] %v6179_v19 }
  0x5c   :  { %1298 = vst [vmem:[#allocation1 + $0x3b8] sm:$0xf] %v6164_v20  ;;  %v6165_v21 = vld [vmem:[%s9203_s0 + $0x1d8] sm:$0xf]  ;;  %v6166_v22 = vld [vmem:[%s9203_s0 + $0x1d4] sm:$0xf] }
  0x5d   :  { %v6167_v23 = vld [vmem:[%s9203_s0 + $0x1d0] sm:$0xf]  ;;  %1303 = vst [vmem:[#allocation1 + $0x3b0] sm:$0xf] %v6165_v21  ;;  %1308 = vst [vmem:[#allocation1 + $0x3a8] sm:$0xf] %v6166_v22 }
  0x5e   :  { %v2804_v24 = vld [vmem:[#allocation1 + $0x302] ss:$8 sm:$0xf0]   ;;  %1313 = vst [vmem:[#allocation1 + $0x3a0] sm:$0xf] %v6167_v23 }
  0x5f   :  { %v6168_v25 = vld [vmem:[%s9203_s0 + $0x1cc] sm:$0xf]  ;;  %v6169_v26 = vld [vmem:[%s9203_s0 + $0x1c8] sm:$0xf]  ;;  %v6170_v27 = vld [vmem:[%s9203_s0 + $0x1c4] sm:$0xf] }
  0x60   :  { %1318 = vst [vmem:[#allocation1 + $0x398] sm:$0xf] %v6168_v25  ;;  %v6171_v28 = vld [vmem:[%s9203_s0 + $0x1c0] sm:$0xf]  ;;  %1323 = vst [vmem:[#allocation1 + $0x390] sm:$0xf] %v6169_v26 }
  0x61   :  { %v2802_v29 = vld [vmem:[#allocation1 + $0x302] ss:$8 sm:$0xf]   ;;  %1328 = vst [vmem:[#allocation1 + $0x388] sm:$0xf] %v6170_v27 }
  0x62   :  { %1333 = vst [vmem:[#allocation1 + $0x380] sm:$0xf] %v6171_v28  ;;  %v6156_v30 = vld [vmem:[%s9203_s0 + $0x1fc] sm:$0xf]  ;;  %v2806_v31 = vsel %vm1892_vm0, %v2804_v24, %v2802_v29  ;;  %v6157_v32 = vld [vmem:[%s9203_s0 + $0x1f8] sm:$0xf] }
  0x63   :  { %1258 = vst [vmem:[#allocation1 + $0x3f8] sm:$0xf] %v6156_v30  ;;  %v6158_v33 = vld [vmem:[%s9203_s0 + $0x1f4] sm:$0xf]  ;;  %v6159_v34 = vld [vmem:[%s9203_s0 + $0x1f0] sm:$0xf]  ;;  %2807 = vrot.lane.b32.xlu0 %v2806_v31, %s6473_s10 }
  0x64   :  { %v2821_v35 = vld [vmem:[#allocation1 + $0x342] ss:$8 sm:$0xf0]   ;;  %1263 = vst [vmem:[#allocation1 + $0x3f0] sm:$0xf] %v6157_v32 }
  0x65   :  { %1268 = vst [vmem:[#allocation1 + $0x3e8] sm:$0xf] %v6158_v33  ;;  %1273 = vst [vmem:[#allocation1 + $0x3e0] sm:$0xf] %v6159_v34  ;;  %v6160_v36 = vld [vmem:[%s9203_s0 + $0x1ec] sm:$0xf] }
  0x66   :  { %1278 = vst [vmem:[#allocation1 + $0x3d8] sm:$0xf] %v6160_v36  ;;  %v6161_v37 = vld [vmem:[%s9203_s0 + $0x1e8] sm:$0xf]  ;;  %v6162_v38 = vld [vmem:[%s9203_s0 + $0x1e4] sm:$0xf] }
  0x67   :  { %v6163_v39 = vld [vmem:[%s9203_s0 + $0x1e0] sm:$0xf]  ;;  %1283 = vst [vmem:[#allocation1 + $0x3d0] sm:$0xf] %v6161_v37  ;;  %1288 = vst [vmem:[#allocation1 + $0x3c8] sm:$0xf] %v6162_v38 }
  0x68   :  { %v2819_v40 = vld [vmem:[#allocation1 + $0x342] ss:$8 sm:$0xf]   ;;  %1293 = vst [vmem:[#allocation1 + $0x3c0] sm:$0xf] %v6163_v39 }
  0x69   :  { %v6148_v41 = vld [vmem:[%s9203_s0 + $0x21c] sm:$0xf]  ;;  %v2823_v42 = vsel %vm1892_vm0, %v2821_v35, %v2819_v40  ;;  %v2838_v43 = vld [vmem:[#allocation1 + $0x382] ss:$8 sm:$0xf0]  }
  0x6a   :  { %1218 = vst [vmem:[#allocation1 + $0x438] sm:$0xf] %v6148_v41  ;;  %v6149_v44 = vld [vmem:[%s9203_s0 + $0x218] sm:$0xf]  ;;  %2824 = vrot.lane.b32.xlu1 %v2823_v42, %s6473_s10  ;;  %v6150_v45 = vld [vmem:[%s9203_s0 + $0x214] sm:$0xf] }
  0x6b   :  { %1223 = vst [vmem:[#allocation1 + $0x430] sm:$0xf] %v6149_v44  ;;  %v6151_v46 = vld [vmem:[%s9203_s0 + $0x210] sm:$0xf]  ;;  %v6152_v47 = vld [vmem:[%s9203_s0 + $0x20c] sm:$0xf] }
  0x6c   :  { %v2836_v48 = vld [vmem:[#allocation1 + $0x382] ss:$8 sm:$0xf]   ;;  %1228 = vst [vmem:[#allocation1 + $0x428] sm:$0xf] %v6150_v45 }
  0x6d   :  { %1233 = vst [vmem:[#allocation1 + $0x420] sm:$0xf] %v6151_v46  ;;  %1238 = vst [vmem:[#allocation1 + $0x418] sm:$0xf] %v6152_v47  ;;  %v6153_v49 = vld [vmem:[%s9203_s0 + $0x208] sm:$0xf]  ;;  %v2840_v50 = vsel %vm1892_vm0, %v2838_v43, %v2836_v48 }
  0x6e   :  { %1243 = vst [vmem:[#allocation1 + $0x410] sm:$0xf] %v6153_v49  ;;  %v6154_v51 = vld [vmem:[%s9203_s0 + $0x204] sm:$0xf]  ;;  %v6155_v52 = vld [vmem:[%s9203_s0 + $0x200] sm:$0xf]  ;;  %2841 = vrot.lane.b32.xlu0 %v2840_v50, %s6473_s10 }
  0x6f   :  { %v6140_v53 = vld [vmem:[%s9203_s0 + $0x23c] sm:$0xf]  ;;  %v2855_v54 = vld [vmem:[#allocation1 + $0x3c2] ss:$8 sm:$0xf0]  }
  0x70   :  { %1248 = vst [vmem:[#allocation1 + $0x408] sm:$0xf] %v6154_v51  ;;  %1253 = vst [vmem:[#allocation1 + $0x400] sm:$0xf] %v6155_v52  ;;  %v6141_v55 = vld [vmem:[%s9203_s0 + $0x238] sm:$0xf] }
  0x71   :  { %1178 = vst [vmem:[#allocation1 + $0x478] sm:$0xf] %v6140_v53  ;;  %1183 = vst [vmem:[#allocation1 + $0x470] sm:$0xf] %v6141_v55  ;;  %v6142_v56 = vld [vmem:[%s9203_s0 + $0x234] sm:$0xf] }
  0x72   :  { %v6143_v57 = vld [vmem:[%s9203_s0 + $0x230] sm:$0xf]  ;;  %v6144_v58 = vld [vmem:[%s9203_s0 + $0x22c] sm:$0xf]  ;;  %1188 = vst [vmem:[#allocation1 + $0x468] sm:$0xf] %v6142_v56 }
  0x73   :  { %v2853_v59 = vld [vmem:[#allocation1 + $0x3c2] ss:$8 sm:$0xf]   ;;  %1193 = vst [vmem:[#allocation1 + $0x460] sm:$0xf] %v6143_v57 }
  0x74   :  { %1198 = vst [vmem:[#allocation1 + $0x458] sm:$0xf] %v6144_v58  ;;  %v6145_v60 = vld [vmem:[%s9203_s0 + $0x228] sm:$0xf]  ;;  %v2857_v61 = vsel %vm1892_vm0, %v2855_v54, %v2853_v59  ;;  %v6146_v62 = vld [vmem:[%s9203_s0 + $0x224] sm:$0xf] }
  0x75   :  { %1203 = vst [vmem:[#allocation1 + $0x450] sm:$0xf] %v6145_v60  ;;  %v6147_v63 = vld [vmem:[%s9203_s0 + $0x220] sm:$0xf]  ;;  %v6132_v0 = vld [vmem:[%s9203_s0 + $0x25c] sm:$0xf]  ;;  %2858 = vrot.lane.b32.xlu1 %v2857_v61, %s6473_s10 }
  0x76   :  { %1208 = vst [vmem:[#allocation1 + $0x448] sm:$0xf] %v6146_v62  ;;  %1213 = vst [vmem:[#allocation1 + $0x440] sm:$0xf] %v6147_v63  ;;  %v6133_v1 = vld [vmem:[%s9203_s0 + $0x258] sm:$0xf] }
  0x77   :  { %1138 = vst [vmem:[#allocation1 + $0x4b8] sm:$0xf] %v6132_v0  ;;  %v6134_v2 = vld [vmem:[%s9203_s0 + $0x254] sm:$0xf]  ;;  %v6135_v3 = vld [vmem:[%s9203_s0 + $0x250] sm:$0xf] }
  0x78   :  { %v2872_v4 = vld [vmem:[#allocation1 + $0x402] ss:$8 sm:$0xf0]   ;;  %1143 = vst [vmem:[#allocation1 + $0x4b0] sm:$0xf] %v6133_v1 }
  0x79   :  { %1148 = vst [vmem:[#allocation1 + $0x4a8] sm:$0xf] %v6134_v2  ;;  %1153 = vst [vmem:[#allocation1 + $0x4a0] sm:$0xf] %v6135_v3  ;;  %v6136_v5 = vld [vmem:[%s9203_s0 + $0x24c] sm:$0xf] }
  0x7a   :  { %1158 = vst [vmem:[#allocation1 + $0x498] sm:$0xf] %v6136_v5  ;;  %v6137_v6 = vld [vmem:[%s9203_s0 + $0x248] sm:$0xf]  ;;  %v6138_v7 = vld [vmem:[%s9203_s0 + $0x244] sm:$0xf] }
  0x7b   :  { %v6139_v8 = vld [vmem:[%s9203_s0 + $0x240] sm:$0xf]  ;;  %1163 = vst [vmem:[#allocation1 + $0x490] sm:$0xf] %v6137_v6  ;;  %1168 = vst [vmem:[#allocation1 + $0x488] sm:$0xf] %v6138_v7 }
  0x7c   :  { %v2870_v9 = vld [vmem:[#allocation1 + $0x402] ss:$8 sm:$0xf]   ;;  %1173 = vst [vmem:[#allocation1 + $0x480] sm:$0xf] %v6139_v8 }
  0x7d   :  { %v6124_v10 = vld [vmem:[%s9203_s0 + $0x27c] sm:$0xf]  ;;  %v2874_v11 = vsel %vm1892_vm0, %v2872_v4, %v2870_v9  ;;  %v6125_v12 = vld [vmem:[%s9203_s0 + $0x278] sm:$0xf]  ;;  %v6126_v13 = vld [vmem:[%s9203_s0 + $0x274] sm:$0xf] }
  0x7e   :  { %1098 = vst [vmem:[#allocation1 + $0x4f8] sm:$0xf] %v6124_v10  ;;  %v6127_v14 = vld [vmem:[%s9203_s0 + $0x270] sm:$0xf]  ;;  %2875 = vrot.lane.b32.xlu0 %v2874_v11, %s6473_s10  ;;  %1103 = vst [vmem:[#allocation1 + $0x4f0] sm:$0xf] %v6125_v12 }
  0x7f   :  { %v2889_v15 = vld [vmem:[#allocation1 + $0x442] ss:$8 sm:$0xf0]   ;;  %1108 = vst [vmem:[#allocation1 + $0x4e8] sm:$0xf] %v6126_v13 }
  0x80   :  { %1113 = vst [vmem:[#allocation1 + $0x4e0] sm:$0xf] %v6127_v14  ;;  %v6128_v16 = vld [vmem:[%s9203_s0 + $0x26c] sm:$0xf]  ;;  %v6129_v17 = vld [vmem:[%s9203_s0 + $0x268] sm:$0xf] }
  0x81   :  { %1118 = vst [vmem:[#allocation1 + $0x4d8] sm:$0xf] %v6128_v16  ;;  %v6130_v18 = vld [vmem:[%s9203_s0 + $0x264] sm:$0xf]  ;;  %v6131_v19 = vld [vmem:[%s9203_s0 + $0x260] sm:$0xf] }
  0x82   :  { %v2887_v20 = vld [vmem:[#allocation1 + $0x442] ss:$8 sm:$0xf]   ;;  %1123 = vst [vmem:[#allocation1 + $0x4d0] sm:$0xf] %v6129_v17 }
  0x83   :  { %1128 = vst [vmem:[#allocation1 + $0x4c8] sm:$0xf] %v6130_v18  ;;  %1133 = vst [vmem:[#allocation1 + $0x4c0] sm:$0xf] %v6131_v19  ;;  %v6116_v21 = vld [vmem:[%s9203_s0 + $0x29c] sm:$0xf]  ;;  %v2891_v22 = vsel %vm1892_vm0, %v2889_v15, %v2887_v20 }
  0x84   :  { %v2906_v23 = vld [vmem:[#allocation1 + $0x482] ss:$8 sm:$0xf0]   ;;  %1058 = vst [vmem:[#allocation1 + $0x538] sm:$0xf] %v6116_v21  ;;  %2892 = vrot.lane.b32.xlu1 %v2891_v22, %s6473_s10 }
  0x85   :  { %v6117_v24 = vld [vmem:[%s9203_s0 + $0x298] sm:$0xf]  ;;  %v6118_v25 = vld [vmem:[%s9203_s0 + $0x294] sm:$0xf]  ;;  %v6119_v26 = vld [vmem:[%s9203_s0 + $0x290] sm:$0xf] }
  0x86   :  { %1063 = vst [vmem:[#allocation1 + $0x530] sm:$0xf] %v6117_v24  ;;  %v6120_v27 = vld [vmem:[%s9203_s0 + $0x28c] sm:$0xf]  ;;  %1068 = vst [vmem:[#allocation1 + $0x528] sm:$0xf] %v6118_v25 }
  0x87   :  { %v2904_v28 = vld [vmem:[#allocation1 + $0x482] ss:$8 sm:$0xf]   ;;  %1073 = vst [vmem:[#allocation1 + $0x520] sm:$0xf] %v6119_v26 }
  0x88   :  { %1078 = vst [vmem:[#allocation1 + $0x518] sm:$0xf] %v6120_v27  ;;  %v6121_v29 = vld [vmem:[%s9203_s0 + $0x288] sm:$0xf]  ;;  %v2908_v30 = vsel %vm1892_vm0, %v2906_v23, %v2904_v28  ;;  %v6122_v31 = vld [vmem:[%s9203_s0 + $0x284] sm:$0xf] }
  0x89   :  { %1083 = vst [vmem:[#allocation1 + $0x510] sm:$0xf] %v6121_v29  ;;  %v6123_v32 = vld [vmem:[%s9203_s0 + $0x280] sm:$0xf]  ;;  %v6108_v33 = vld [vmem:[%s9203_s0 + $0x2bc] sm:$0xf]  ;;  %2909 = vrot.lane.b32.xlu0 %v2908_v30, %s6473_s10 }
  0x8a   :  { %v2923_v34 = vld [vmem:[#allocation1 + $0x4c2] ss:$8 sm:$0xf0]   ;;  %1088 = vst [vmem:[#allocation1 + $0x508] sm:$0xf] %v6122_v31 }
  0x8b   :  { %1093 = vst [vmem:[#allocation1 + $0x500] sm:$0xf] %v6123_v32  ;;  %1018 = vst [vmem:[#allocation1 + $0x578] sm:$0xf] %v6108_v33  ;;  %v6109_v35 = vld [vmem:[%s9203_s0 + $0x2b8] sm:$0xf] }
  0x8c   :  { %1023 = vst [vmem:[#allocation1 + $0x570] sm:$0xf] %v6109_v35  ;;  %v6110_v36 = vld [vmem:[%s9203_s0 + $0x2b4] sm:$0xf]  ;;  %v6111_v37 = vld [vmem:[%s9203_s0 + $0x2b0] sm:$0xf] }
  0x8d   :  { %v6112_v38 = vld [vmem:[%s9203_s0 + $0x2ac] sm:$0xf]  ;;  %v2921_v39 = vld [vmem:[#allocation1 + $0x4c2] ss:$8 sm:$0xf]  }
  0x8e   :  { %1028 = vst [vmem:[#allocation1 + $0x568] sm:$0xf] %v6110_v36  ;;  %1033 = vst [vmem:[#allocation1 + $0x560] sm:$0xf] %v6111_v37  ;;  %v6113_v40 = vld [vmem:[%s9203_s0 + $0x2a8] sm:$0xf]  ;;  %v2925_v41 = vsel %vm1892_vm0, %v2923_v34, %v2921_v39 }
  0x8f   :  { %1038 = vst [vmem:[#allocation1 + $0x558] sm:$0xf] %v6112_v38  ;;  %1043 = vst [vmem:[#allocation1 + $0x550] sm:$0xf] %v6113_v40  ;;  %v6114_v42 = vld [vmem:[%s9203_s0 + $0x2a4] sm:$0xf]  ;;  %2926 = vrot.lane.b32.xlu1 %v2925_v41, %s6473_s10 }
  0x90   :  { %v6115_v43 = vld [vmem:[%s9203_s0 + $0x2a0] sm:$0xf]  ;;  %v6100_v44 = vld [vmem:[%s9203_s0 + $0x2dc] sm:$0xf]  ;;  %1048 = vst [vmem:[#allocation1 + $0x548] sm:$0xf] %v6114_v42 }
  0x91   :  { %1053 = vst [vmem:[#allocation1 + $0x540] sm:$0xf] %v6115_v43  ;;  %978 = vst [vmem:[#allocation1 + $0x5b8] sm:$0xf] %v6100_v44  ;;  %v6101_v45 = vld [vmem:[%s9203_s0 + $0x2d8] sm:$0xf] }
  0x92   :  { %v6102_v46 = vld [vmem:[%s9203_s0 + $0x2d4] sm:$0xf]  ;;  %v6103_v47 = vld [vmem:[%s9203_s0 + $0x2d0] sm:$0xf]  ;;  %983 = vst [vmem:[#allocation1 + $0x5b0] sm:$0xf] %v6101_v45 }
  0x93   :  { %v2940_v48 = vld [vmem:[#allocation1 + $0x502] ss:$8 sm:$0xf0]   ;;  %988 = vst [vmem:[#allocation1 + $0x5a8] sm:$0xf] %v6102_v46 }
  0x94   :  { %993 = vst [vmem:[#allocation1 + $0x5a0] sm:$0xf] %v6103_v47  ;;  %v6104_v49 = vld [vmem:[%s9203_s0 + $0x2cc] sm:$0xf]  ;;  %v6105_v50 = vld [vmem:[%s9203_s0 + $0x2c8] sm:$0xf] }
  0x95   :  { %998 = vst [vmem:[#allocation1 + $0x598] sm:$0xf] %v6104_v49  ;;  %v6106_v51 = vld [vmem:[%s9203_s0 + $0x2c4] sm:$0xf]  ;;  %v6107_v52 = vld [vmem:[%s9203_s0 + $0x2c0] sm:$0xf] }
  0x96   :  { %v2938_v53 = vld [vmem:[#allocation1 + $0x502] ss:$8 sm:$0xf]   ;;  %1003 = vst [vmem:[#allocation1 + $0x590] sm:$0xf] %v6105_v50 }
  0x97   :  { %1008 = vst [vmem:[#allocation1 + $0x588] sm:$0xf] %v6106_v51  ;;  %1013 = vst [vmem:[#allocation1 + $0x580] sm:$0xf] %v6107_v52  ;;  %v6092_v54 = vld [vmem:[%s9203_s0 + $0x2fc] sm:$0xf]  ;;  %v2942_v55 = vsel %vm1892_vm0, %v2940_v48, %v2938_v53 }
  0x98   :  { %938 = vst [vmem:[#allocation1 + $0x5f8] sm:$0xf] %v6092_v54  ;;  %v6093_v56 = vld [vmem:[%s9203_s0 + $0x2f8] sm:$0xf]  ;;  %v6094_v57 = vld [vmem:[%s9203_s0 + $0x2f4] sm:$0xf]  ;;  %2943 = vrot.lane.b32.xlu0 %v2942_v55, %s6473_s10 }
  0x99   :  { %v6095_v58 = vld [vmem:[%s9203_s0 + $0x2f0] sm:$0xf]  ;;  %943 = vst [vmem:[#allocation1 + $0x5f0] sm:$0xf] %v6093_v56  ;;  %948 = vst [vmem:[#allocation1 + $0x5e8] sm:$0xf] %v6094_v57 }
  0x9a   :  { %v2957_v59 = vld [vmem:[#allocation1 + $0x542] ss:$8 sm:$0xf0]   ;;  %953 = vst [vmem:[#allocation1 + $0x5e0] sm:$0xf] %v6095_v58 }
  0x9b   :  { %v6096_v60 = vld [vmem:[%s9203_s0 + $0x2ec] sm:$0xf]  ;;  %v6097_v61 = vld [vmem:[%s9203_s0 + $0x2e8] sm:$0xf]  ;;  %v6098_v62 = vld [vmem:[%s9203_s0 + $0x2e4] sm:$0xf] }
  0x9c   :  { %958 = vst [vmem:[#allocation1 + $0x5d8] sm:$0xf] %v6096_v60  ;;  %v6099_v63 = vld [vmem:[%s9203_s0 + $0x2e0] sm:$0xf]  ;;  %963 = vst [vmem:[#allocation1 + $0x5d0] sm:$0xf] %v6097_v61 }
  0x9d   :  { %v2955_v0 = vld [vmem:[#allocation1 + $0x542] ss:$8 sm:$0xf]   ;;  %968 = vst [vmem:[#allocation1 + $0x5c8] sm:$0xf] %v6098_v62 }
  0x9e   :  { %973 = vst [vmem:[#allocation1 + $0x5c0] sm:$0xf] %v6099_v63  ;;  %v6084_v1 = vld [vmem:[%s9203_s0 + $0x31c] sm:$0xf]  ;;  %v2959_v2 = vsel %vm1892_vm0, %v2957_v59, %v2955_v0  ;;  %v6085_v4 = vld [vmem:[%s9203_s0 + $0x318] sm:$0xf] }
  0x9f   :  { %v2974_v3 = vld [vmem:[#allocation1 + $0x582] ss:$8 sm:$0xf0]   ;;  %898 = vst [vmem:[#allocation1 + $0x638] sm:$0xf] %v6084_v1  ;;  %2960 = vrot.lane.b32.xlu1 %v2959_v2, %s6473_s10 }
  0xa0   :  { %903 = vst [vmem:[#allocation1 + $0x630] sm:$0xf] %v6085_v4  ;;  %v6086_v5 = vld [vmem:[%s9203_s0 + $0x314] sm:$0xf]  ;;  %v6087_v6 = vld [vmem:[%s9203_s0 + $0x310] sm:$0xf] }
  0xa1   :  { %v6088_v7 = vld [vmem:[%s9203_s0 + $0x30c] sm:$0xf]  ;;  %v2972_v8 = vld [vmem:[#allocation1 + $0x582] ss:$8 sm:$0xf]  }
  0xa2   :  { %908 = vst [vmem:[#allocation1 + $0x628] sm:$0xf] %v6086_v5  ;;  %913 = vst [vmem:[#allocation1 + $0x620] sm:$0xf] %v6087_v6  ;;  %v6089_v9 = vld [vmem:[%s9203_s0 + $0x308] sm:$0xf]  ;;  %v2976_v10 = vsel %vm1892_vm0, %v2974_v3, %v2972_v8 }
  0xa3   :  { %918 = vst [vmem:[#allocation1 + $0x618] sm:$0xf] %v6088_v7  ;;  %923 = vst [vmem:[#allocation1 + $0x610] sm:$0xf] %v6089_v9  ;;  %v6090_v11 = vld [vmem:[%s9203_s0 + $0x304] sm:$0xf]  ;;  %2977 = vrot.lane.b32.xlu0 %v2976_v10, %s6473_s10 }
  0xa4   :  { %v6091_v12 = vld [vmem:[%s9203_s0 + $0x300] sm:$0xf]  ;;  %v6076_v13 = vld [vmem:[%s9203_s0 + $0x33c] sm:$0xf]  ;;  %928 = vst [vmem:[#allocation1 + $0x608] sm:$0xf] %v6090_v11 }
  0xa5   :  { %v2991_v14 = vld [vmem:[#allocation1 + $0x5c2] ss:$8 sm:$0xf0]   ;;  %933 = vst [vmem:[#allocation1 + $0x600] sm:$0xf] %v6091_v12 }
  0xa6   :  { %858 = vst [vmem:[#allocation1 + $0x678] sm:$0xf] %v6076_v13  ;;  %v6077_v15 = vld [vmem:[%s9203_s0 + $0x338] sm:$0xf]  ;;  %v6078_v16 = vld [vmem:[%s9203_s0 + $0x334] sm:$0xf] }
  0xa7   :  { %863 = vst [vmem:[#allocation1 + $0x670] sm:$0xf] %v6077_v15  ;;  %v6079_v17 = vld [vmem:[%s9203_s0 + $0x330] sm:$0xf]  ;;  %v6080_v18 = vld [vmem:[%s9203_s0 + $0x32c] sm:$0xf] }
  0xa8   :  { %v2989_v19 = vld [vmem:[#allocation1 + $0x5c2] ss:$8 sm:$0xf]   ;;  %868 = vst [vmem:[#allocation1 + $0x668] sm:$0xf] %v6078_v16 }
  0xa9   :  { %873 = vst [vmem:[#allocation1 + $0x660] sm:$0xf] %v6079_v17  ;;  %878 = vst [vmem:[#allocation1 + $0x658] sm:$0xf] %v6080_v18  ;;  %v6081_v20 = vld [vmem:[%s9203_s0 + $0x328] sm:$0xf]  ;;  %v2993_v21 = vsel %vm1892_vm0, %v2991_v14, %v2989_v19 }
  0xaa   :  { %883 = vst [vmem:[#allocation1 + $0x650] sm:$0xf] %v6081_v20  ;;  %v6082_v22 = vld [vmem:[%s9203_s0 + $0x324] sm:$0xf]  ;;  %v6083_v23 = vld [vmem:[%s9203_s0 + $0x320] sm:$0xf]  ;;  %2994 = vrot.lane.b32.xlu1 %v2993_v21, %s6473_s10 }
  0xab   :  { %v6068_v24 = vld [vmem:[%s9203_s0 + $0x35c] sm:$0xf]  ;;  %888 = vst [vmem:[#allocation1 + $0x648] sm:$0xf] %v6082_v22  ;;  %893 = vst [vmem:[#allocation1 + $0x640] sm:$0xf] %v6083_v23 }
  0xac   :  { %818 = vst [vmem:[#allocation1 + $0x6b8] sm:$0xf] %v6068_v24  ;;  %v6069_v25 = vld [vmem:[%s9203_s0 + $0x358] sm:$0xf]  ;;  %v6070_v26 = vld [vmem:[%s9203_s0 + $0x354] sm:$0xf] }
  0xad   :  { %v6071_v27 = vld [vmem:[%s9203_s0 + $0x350] sm:$0xf]  ;;  %823 = vst [vmem:[#allocation1 + $0x6b0] sm:$0xf] %v6069_v25  ;;  %828 = vst [vmem:[#allocation1 + $0x6a8] sm:$0xf] %v6070_v26 }
  0xae   :  { %v3008_v28 = vld [vmem:[#allocation1 + $0x602] ss:$8 sm:$0xf0]   ;;  %833 = vst [vmem:[#allocation1 + $0x6a0] sm:$0xf] %v6071_v27 }
  0xaf   :  { %v6072_v29 = vld [vmem:[%s9203_s0 + $0x34c] sm:$0xf]  ;;  %v6073_v30 = vld [vmem:[%s9203_s0 + $0x348] sm:$0xf]  ;;  %v6074_v31 = vld [vmem:[%s9203_s0 + $0x344] sm:$0xf] }
  0xb0   :  { %838 = vst [vmem:[#allocation1 + $0x698] sm:$0xf] %v6072_v29  ;;  %v6075_v32 = vld [vmem:[%s9203_s0 + $0x340] sm:$0xf]  ;;  %843 = vst [vmem:[#allocation1 + $0x690] sm:$0xf] %v6073_v30  ;;  %v7318_v29 = vpop.permute.xlu0 %2604  }
  0xb1   :  { %v3006_v33 = vld [vmem:[#allocation1 + $0x602] ss:$8 sm:$0xf]   ;;  %848 = vst [vmem:[#allocation1 + $0x688] sm:$0xf] %v6074_v31 }
  0xb2   :  { %853 = vst [vmem:[#allocation1 + $0x680] sm:$0xf] %v6075_v32  ;;  %v6060_v34 = vld [vmem:[%s9203_s0 + $0x37c] sm:$0xf]  ;;  %v3010_v35 = vsel %vm1892_vm0, %v3008_v28, %v3006_v33  ;;  %v6061_v36 = vld [vmem:[%s9203_s0 + $0x378] sm:$0xf] }
  0xb3   :  { %778 = vst [vmem:[#allocation1 + $0x6f8] sm:$0xf] %v6060_v34  ;;  %v6062_v37 = vld [vmem:[%s9203_s0 + $0x374] sm:$0xf]  ;;  %v6063_v38 = vld [vmem:[%s9203_s0 + $0x370] sm:$0xf]  ;;  %3011 = vrot.lane.b32.xlu0 %v3010_v35, %s6473_s10 }
  0xb4   :  { %v3025_v39 = vld [vmem:[#allocation1 + $0x642] ss:$8 sm:$0xf0]   ;;  %783 = vst [vmem:[#allocation1 + $0x6f0] sm:$0xf] %v6061_v36 }
  0xb5   :  { %788 = vst [vmem:[#allocation1 + $0x6e8] sm:$0xf] %v6062_v37  ;;  %793 = vst [vmem:[#allocation1 + $0x6e0] sm:$0xf] %v6063_v38  ;;  %v6064_v40 = vld [vmem:[%s9203_s0 + $0x36c] sm:$0xf] }
  0xb6   :  { %798 = vst [vmem:[#allocation1 + $0x6d8] sm:$0xf] %v6064_v40  ;;  %v6065_v41 = vld [vmem:[%s9203_s0 + $0x368] sm:$0xf]  ;;  %v6066_v42 = vld [vmem:[%s9203_s0 + $0x364] sm:$0xf] }
  0xb7   :  { %v6067_v43 = vld [vmem:[%s9203_s0 + $0x360] sm:$0xf]  ;;  %803 = vst [vmem:[#allocation1 + $0x6d0] sm:$0xf] %v6065_v41  ;;  %808 = vst [vmem:[#allocation1 + $0x6c8] sm:$0xf] %v6066_v42 }
  0xb8   :  { %v3023_v44 = vld [vmem:[#allocation1 + $0x642] ss:$8 sm:$0xf]   ;;  %813 = vst [vmem:[#allocation1 + $0x6c0] sm:$0xf] %v6067_v43 }
  0xb9   :  { %v6052_v45 = vld [vmem:[%s9203_s0 + $0x39c] sm:$0xf]  ;;  %v3027_v46 = vsel %vm1892_vm0, %v3025_v39, %v3023_v44  ;;  %v3042_v47 = vld [vmem:[#allocation1 + $0x682] ss:$8 sm:$0xf0]   ;;  %v7343_v39 = vpop.permute.xlu1 %2637  }
  0xba   :  { %738 = vst [vmem:[#allocation1 + $0x738] sm:$0xf] %v6052_v45  ;;  %v6053_v48 = vld [vmem:[%s9203_s0 + $0x398] sm:$0xf]  ;;  %3028 = vrot.lane.b32.xlu1 %v3027_v46, %s6473_s10  ;;  %v6054_v49 = vld [vmem:[%s9203_s0 + $0x394] sm:$0xf] }
  0xbb   :  { %743 = vst [vmem:[#allocation1 + $0x730] sm:$0xf] %v6053_v48  ;;  %v6055_v50 = vld [vmem:[%s9203_s0 + $0x390] sm:$0xf]  ;;  %v6056_v51 = vld [vmem:[%s9203_s0 + $0x38c] sm:$0xf] }
  0xbc   :  { %v3040_v52 = vld [vmem:[#allocation1 + $0x682] ss:$8 sm:$0xf]   ;;  %748 = vst [vmem:[#allocation1 + $0x728] sm:$0xf] %v6054_v49 }
  0xbd   :  { %753 = vst [vmem:[#allocation1 + $0x720] sm:$0xf] %v6055_v50  ;;  %758 = vst [vmem:[#allocation1 + $0x718] sm:$0xf] %v6056_v51  ;;  %v6057_v53 = vld [vmem:[%s9203_s0 + $0x388] sm:$0xf]  ;;  %v3044_v54 = vsel %vm1892_vm0, %v3042_v47, %v3040_v52  ;;  %v7361_v47 = vpop.permute.xlu0 %2620  }
  0xbe   :  { %763 = vst [vmem:[#allocation1 + $0x710] sm:$0xf] %v6057_v53  ;;  %v6058_v55 = vld [vmem:[%s9203_s0 + $0x384] sm:$0xf]  ;;  %v6059_v56 = vld [vmem:[%s9203_s0 + $0x380] sm:$0xf]  ;;  %3045 = vrot.lane.b32.xlu0 %v3044_v54, %s6473_s10 }
  0xbf   :  { %v6044_v57 = vld [vmem:[%s9203_s0 + $0x3bc] sm:$0xf]  ;;  %v3059_v58 = vld [vmem:[#allocation1 + $0x6c2] ss:$8 sm:$0xf0]  }
  0xc0   :  { %768 = vst [vmem:[#allocation1 + $0x708] sm:$0xf] %v6058_v55  ;;  %773 = vst [vmem:[#allocation1 + $0x700] sm:$0xf] %v6059_v56  ;;  %v6045_v59 = vld [vmem:[%s9203_s0 + $0x3b8] sm:$0xf] }
  0xc1   :  { %698 = vst [vmem:[#allocation1 + $0x778] sm:$0xf] %v6044_v57  ;;  %703 = vst [vmem:[#allocation1 + $0x770] sm:$0xf] %v6045_v59  ;;  %v6046_v60 = vld [vmem:[%s9203_s0 + $0x3b4] sm:$0xf] }
  0xc2   :  { %v6047_v61 = vld [vmem:[%s9203_s0 + $0x3b0] sm:$0xf]  ;;  %v6048_v62 = vld [vmem:[%s9203_s0 + $0x3ac] sm:$0xf]  ;;  %708 = vst [vmem:[#allocation1 + $0x768] sm:$0xf] %v6046_v60  ;;  %v7395_v60 = vpop.permute.xlu1 %2654  }
  0xc3   :  { %v3057_v63 = vld [vmem:[#allocation1 + $0x6c2] ss:$8 sm:$0xf]   ;;  %713 = vst [vmem:[#allocation1 + $0x760] sm:$0xf] %v6047_v61 }
  0xc4   :  { %718 = vst [vmem:[#allocation1 + $0x758] sm:$0xf] %v6048_v62  ;;  %v6049_v0 = vld [vmem:[%s9203_s0 + $0x3a8] sm:$0xf]  ;;  %v3061_v1 = vsel %vm1892_vm0, %v3059_v58, %v3057_v63  ;;  %v6050_v2 = vld [vmem:[%s9203_s0 + $0x3a4] sm:$0xf] }
  0xc5   :  { %723 = vst [vmem:[#allocation1 + $0x750] sm:$0xf] %v6049_v0  ;;  %v6051_v3 = vld [vmem:[%s9203_s0 + $0x3a0] sm:$0xf]  ;;  %v6036_v4 = vld [vmem:[%s9203_s0 + $0x3dc] sm:$0xf]  ;;  %3062 = vrot.lane.b32.xlu1 %v3061_v1, %s6473_s10 }
  0xc6   :  { %728 = vst [vmem:[#allocation1 + $0x748] sm:$0xf] %v6050_v2  ;;  %733 = vst [vmem:[#allocation1 + $0x740] sm:$0xf] %v6051_v3  ;;  %v6037_v5 = vld [vmem:[%s9203_s0 + $0x3d8] sm:$0xf] }
  0xc7   :  { %658 = vst [vmem:[#allocation1 + $0x7b8] sm:$0xf] %v6036_v4  ;;  %v6038_v6 = vld [vmem:[%s9203_s0 + $0x3d4] sm:$0xf]  ;;  %v6039_v7 = vld [vmem:[%s9203_s0 + $0x3d0] sm:$0xf] }
  0xc8   :  { %v3076_v8 = vld [vmem:[#allocation1 + $0x702] ss:$8 sm:$0xf0]   ;;  %663 = vst [vmem:[#allocation1 + $0x7b0] sm:$0xf] %v6037_v5 }
  0xc9   :  { %668 = vst [vmem:[#allocation1 + $0x7a8] sm:$0xf] %v6038_v6  ;;  %673 = vst [vmem:[#allocation1 + $0x7a0] sm:$0xf] %v6039_v7  ;;  %v6040_v9 = vld [vmem:[%s9203_s0 + $0x3cc] sm:$0xf] }
  0xca   :  { %678 = vst [vmem:[#allocation1 + $0x798] sm:$0xf] %v6040_v9  ;;  %v6041_v10 = vld [vmem:[%s9203_s0 + $0x3c8] sm:$0xf]  ;;  %v6042_v11 = vld [vmem:[%s9203_s0 + $0x3c4] sm:$0xf] }
  0xcb   :  { %v6043_v12 = vld [vmem:[%s9203_s0 + $0x3c0] sm:$0xf]  ;;  %683 = vst [vmem:[#allocation1 + $0x790] sm:$0xf] %v6041_v10  ;;  %688 = vst [vmem:[#allocation1 + $0x788] sm:$0xf] %v6042_v11  ;;  %v7426_v10 = vpop.permute.xlu0 %2671  }
  0xcc   :  { %v3074_v13 = vld [vmem:[#allocation1 + $0x702] ss:$8 sm:$0xf]   ;;  %693 = vst [vmem:[#allocation1 + $0x780] sm:$0xf] %v6043_v12 }
  0xcd   :  { %v6028_v14 = vld [vmem:[%s9203_s0 + $0x3fc] sm:$0xf]  ;;  %v3078_v15 = vsel %vm1892_vm0, %v3076_v8, %v3074_v13  ;;  %v6029_v16 = vld [vmem:[%s9203_s0 + $0x3f8] sm:$0xf]  ;;  %v6030_v17 = vld [vmem:[%s9203_s0 + $0x3f4] sm:$0xf] }
  0xce   :  { %618 = vst [vmem:[#allocation1 + $0x7f8] sm:$0xf] %v6028_v14  ;;  %v6031_v18 = vld [vmem:[%s9203_s0 + $0x3f0] sm:$0xf]  ;;  %3079 = vrot.lane.b32.xlu0 %v3078_v15, %s6473_s10  ;;  %623 = vst [vmem:[#allocation1 + $0x7f0] sm:$0xf] %v6029_v16 }
  0xcf   :  { %v3093_v19 = vld [vmem:[#allocation1 + $0x742] ss:$8 sm:$0xf0]   ;;  %628 = vst [vmem:[#allocation1 + $0x7e8] sm:$0xf] %v6030_v17 }
  0xd0   :  { %633 = vst [vmem:[#allocation1 + $0x7e0] sm:$0xf] %v6031_v18  ;;  %v6032_v20 = vld [vmem:[%s9203_s0 + $0x3ec] sm:$0xf]  ;;  %v6033_v21 = vld [vmem:[%s9203_s0 + $0x3e8] sm:$0xf] }
  0xd1   :  { %638 = vst [vmem:[#allocation1 + $0x7d8] sm:$0xf] %v6032_v20  ;;  %v6034_v22 = vld [vmem:[%s9203_s0 + $0x3e4] sm:$0xf]  ;;  %v6035_v23 = vld [vmem:[%s9203_s0 + $0x3e0] sm:$0xf] }
  0xd2   :  { %v3091_v24 = vld [vmem:[#allocation1 + $0x742] ss:$8 sm:$0xf]   ;;  %643 = vst [vmem:[#allocation1 + $0x7d0] sm:$0xf] %v6033_v21 }
  0xd3   :  { %648 = vst [vmem:[#allocation1 + $0x7c8] sm:$0xf] %v6034_v22  ;;  %653 = vst [vmem:[#allocation1 + $0x7c0] sm:$0xf] %v6035_v23  ;;  %v6020_v25 = vld [vmem:[%s9203_s0 + $0x41c] sm:$0xf]  ;;  %v3095_v26 = vsel %vm1892_vm0, %v3093_v19, %v3091_v24  ;;  %v7455_v23 = vpop.permute.xlu1 %2688  }
  0xd4   :  { %v3110_v27 = vld [vmem:[#allocation1 + $0x782] ss:$8 sm:$0xf0]   ;;  %578 = vst [vmem:[#allocation1 + $0x838] sm:$0xf] %v6020_v25  ;;  %3096 = vrot.lane.b32.xlu1 %v3095_v26, %s6473_s10 }
  0xd5   :  { %v6021_v28 = vld [vmem:[%s9203_s0 + $0x418] sm:$0xf]  ;;  %v6022_v30 = vld [vmem:[%s9203_s0 + $0x414] sm:$0xf]  ;;  %v6023_v31 = vld [vmem:[%s9203_s0 + $0x410] sm:$0xf] }
  0xd6   :  { %583 = vst [vmem:[#allocation1 + $0x830] sm:$0xf] %v6021_v28  ;;  %v6024_v32 = vld [vmem:[%s9203_s0 + $0x40c] sm:$0xf]  ;;  %588 = vst [vmem:[#allocation1 + $0x828] sm:$0xf] %v6022_v30 }
  0xd7   :  { %v3108_v33 = vld [vmem:[#allocation1 + $0x782] ss:$8 sm:$0xf]   ;;  %593 = vst [vmem:[#allocation1 + $0x820] sm:$0xf] %v6023_v31 }
  0xd8   :  { %598 = vst [vmem:[#allocation1 + $0x818] sm:$0xf] %v6024_v32  ;;  %v6025_v34 = vld [vmem:[%s9203_s0 + $0x408] sm:$0xf]  ;;  %v3112_v35 = vsel %vm1892_vm0, %v3110_v27, %v3108_v33  ;;  %v6026_v36 = vld [vmem:[%s9203_s0 + $0x404] sm:$0xf]  ;;  %v7473_v32 = vpop.permute.xlu0 %2705  }
  0xd9   :  { %603 = vst [vmem:[#allocation1 + $0x810] sm:$0xf] %v6025_v34  ;;  %v6027_v37 = vld [vmem:[%s9203_s0 + $0x400] sm:$0xf]  ;;  %v6012_v38 = vld [vmem:[%s9203_s0 + $0x43c] sm:$0xf]  ;;  %3113 = vrot.lane.b32.xlu0 %v3112_v35, %s6473_s10 }
  0xda   :  { %v3127_v40 = vld [vmem:[#allocation1 + $0x7c2] ss:$8 sm:$0xf0]   ;;  %608 = vst [vmem:[#allocation1 + $0x808] sm:$0xf] %v6026_v36 }
  0xdb   :  { %613 = vst [vmem:[#allocation1 + $0x800] sm:$0xf] %v6027_v37  ;;  %538 = vst [vmem:[#allocation1 + $0x878] sm:$0xf] %v6012_v38  ;;  %v6013_v41 = vld [vmem:[%s9203_s0 + $0x438] sm:$0xf] }
  0xdc   :  { %543 = vst [vmem:[#allocation1 + $0x870] sm:$0xf] %v6013_v41  ;;  %v6014_v42 = vld [vmem:[%s9203_s0 + $0x434] sm:$0xf]  ;;  %v6015_v43 = vld [vmem:[%s9203_s0 + $0x430] sm:$0xf] }
  0xdd   :  { %v6016_v44 = vld [vmem:[%s9203_s0 + $0x42c] sm:$0xf]  ;;  %v3125_v45 = vld [vmem:[#allocation1 + $0x7c2] ss:$8 sm:$0xf]  }
  0xde   :  { %548 = vst [vmem:[#allocation1 + $0x868] sm:$0xf] %v6014_v42  ;;  %553 = vst [vmem:[#allocation1 + $0x860] sm:$0xf] %v6015_v43  ;;  %v6017_v46 = vld [vmem:[%s9203_s0 + $0x428] sm:$0xf]  ;;  %v3129_v48 = vsel %vm1892_vm0, %v3127_v40, %v3125_v45 }
  0xdf   :  { %558 = vst [vmem:[#allocation1 + $0x858] sm:$0xf] %v6016_v44  ;;  %563 = vst [vmem:[#allocation1 + $0x850] sm:$0xf] %v6017_v46  ;;  %v6018_v49 = vld [vmem:[%s9203_s0 + $0x424] sm:$0xf]  ;;  %3130 = vrot.lane.b32.xlu1 %v3129_v48, %s6473_s10  ;;  %v7507_v46 = vpop.permute.xlu1 %2722  }
  0xe0   :  { %v6019_v50 = vld [vmem:[%s9203_s0 + $0x420] sm:$0xf]  ;;  %v6004_v51 = vld [vmem:[%s9203_s0 + $0x45c] sm:$0xf]  ;;  %568 = vst [vmem:[#allocation1 + $0x848] sm:$0xf] %v6018_v49 }
  0xe1   :  { %573 = vst [vmem:[#allocation1 + $0x840] sm:$0xf] %v6019_v50  ;;  %498 = vst [vmem:[#allocation1 + $0x8b8] sm:$0xf] %v6004_v51  ;;  %v6005_v52 = vld [vmem:[%s9203_s0 + $0x458] sm:$0xf] }
  0xe2   :  { %v6006_v53 = vld [vmem:[%s9203_s0 + $0x454] sm:$0xf]  ;;  %v6007_v54 = vld [vmem:[%s9203_s0 + $0x450] sm:$0xf]  ;;  %503 = vst [vmem:[#allocation1 + $0x8b0] sm:$0xf] %v6005_v52 }
  0xe3   :  { %v3144_v55 = vld [vmem:[#allocation1 + $0x802] ss:$8 sm:$0xf0]   ;;  %508 = vst [vmem:[#allocation1 + $0x8a8] sm:$0xf] %v6006_v53 }
  0xe4   :  { %513 = vst [vmem:[#allocation1 + $0x8a0] sm:$0xf] %v6007_v54  ;;  %v6008_v56 = vld [vmem:[%s9203_s0 + $0x44c] sm:$0xf]  ;;  %v6009_v57 = vld [vmem:[%s9203_s0 + $0x448] sm:$0xf] }
  0xe5   :  { %518 = vst [vmem:[#allocation1 + $0x898] sm:$0xf] %v6008_v56  ;;  %v6010_v58 = vld [vmem:[%s9203_s0 + $0x444] sm:$0xf]  ;;  %v6011_v59 = vld [vmem:[%s9203_s0 + $0x440] sm:$0xf] }
  0xe6   :  { %v3142_v61 = vld [vmem:[#allocation1 + $0x802] ss:$8 sm:$0xf]   ;;  %523 = vst [vmem:[#allocation1 + $0x890] sm:$0xf] %v6009_v57 }
  0xe7   :  { %528 = vst [vmem:[#allocation1 + $0x888] sm:$0xf] %v6010_v58  ;;  %533 = vst [vmem:[#allocation1 + $0x880] sm:$0xf] %v6011_v59  ;;  %v5996_v62 = vld [vmem:[%s9203_s0 + $0x47c] sm:$0xf]  ;;  %v3146_v63 = vsel %vm1892_vm0, %v3144_v55, %v3142_v61 }
  0xe8   :  { %458 = vst [vmem:[#allocation1 + $0x8f8] sm:$0xf] %v5996_v62  ;;  %v5997_v0 = vld [vmem:[%s9203_s0 + $0x478] sm:$0xf]  ;;  %v5998_v1 = vld [vmem:[%s9203_s0 + $0x474] sm:$0xf]  ;;  %3147 = vrot.lane.b32.xlu0 %v3146_v63, %s6473_s10  ;;  %v7538_v62 = vpop.permute.xlu0 %2739  }
  0xe9   :  { %v5999_v2 = vld [vmem:[%s9203_s0 + $0x470] sm:$0xf]  ;;  %463 = vst [vmem:[#allocation1 + $0x8f0] sm:$0xf] %v5997_v0  ;;  %468 = vst [vmem:[#allocation1 + $0x8e8] sm:$0xf] %v5998_v1 }
  0xea   :  { %v3161_v3 = vld [vmem:[#allocation1 + $0x842] ss:$8 sm:$0xf0]   ;;  %473 = vst [vmem:[#allocation1 + $0x8e0] sm:$0xf] %v5999_v2 }
  0xeb   :  { %v6000_v4 = vld [vmem:[%s9203_s0 + $0x46c] sm:$0xf]  ;;  %v6001_v5 = vld [vmem:[%s9203_s0 + $0x468] sm:$0xf]  ;;  %v6002_v6 = vld [vmem:[%s9203_s0 + $0x464] sm:$0xf] }
  0xec   :  { %478 = vst [vmem:[#allocation1 + $0x8d8] sm:$0xf] %v6000_v4  ;;  %v6003_v7 = vld [vmem:[%s9203_s0 + $0x460] sm:$0xf]  ;;  %483 = vst [vmem:[#allocation1 + $0x8d0] sm:$0xf] %v6001_v5 }
  0xed   :  { %v3159_v8 = vld [vmem:[#allocation1 + $0x842] ss:$8 sm:$0xf]   ;;  %488 = vst [vmem:[#allocation1 + $0x8c8] sm:$0xf] %v6002_v6 }
  0xee   :  { %493 = vst [vmem:[#allocation1 + $0x8c0] sm:$0xf] %v6003_v7  ;;  %v5988_v9 = vld [vmem:[%s9203_s0 + $0x49c] sm:$0xf]  ;;  %v3163_v11 = vsel %vm1892_vm0, %v3161_v3, %v3159_v8  ;;  %v5989_v13 = vld [vmem:[%s9203_s0 + $0x498] sm:$0xf] }
  0xef   :  { %v3178_v12 = vld [vmem:[#allocation1 + $0x882] ss:$8 sm:$0xf0]   ;;  %418 = vst [vmem:[#allocation1 + $0x938] sm:$0xf] %v5988_v9  ;;  %3164 = vrot.lane.b32.xlu1 %v3163_v11, %s6473_s10 }
  0xf0   :  { %423 = vst [vmem:[#allocation1 + $0x930] sm:$0xf] %v5989_v13  ;;  %v5990_v14 = vld [vmem:[%s9203_s0 + $0x494] sm:$0xf]  ;;  %v5991_v15 = vld [vmem:[%s9203_s0 + $0x490] sm:$0xf] }
  0xf1   :  { %v5992_v16 = vld [vmem:[%s9203_s0 + $0x48c] sm:$0xf]  ;;  %v3176_v17 = vld [vmem:[#allocation1 + $0x882] ss:$8 sm:$0xf]  }
  0xf2   :  { %428 = vst [vmem:[#allocation1 + $0x928] sm:$0xf] %v5990_v14  ;;  %433 = vst [vmem:[#allocation1 + $0x920] sm:$0xf] %v5991_v15  ;;  %v5993_v18 = vld [vmem:[%s9203_s0 + $0x488] sm:$0xf]  ;;  %v3180_v19 = vsel %vm1892_vm0, %v3178_v12, %v3176_v17  ;;  %v7567_v12 = vpop.permute.xlu1 %2756  }
  0xf3   :  { %438 = vst [vmem:[#allocation1 + $0x918] sm:$0xf] %v5992_v16  ;;  %443 = vst [vmem:[#allocation1 + $0x910] sm:$0xf] %v5993_v18  ;;  %v5994_v20 = vld [vmem:[%s9203_s0 + $0x484] sm:$0xf]  ;;  %3181 = vrot.lane.b32.xlu0 %v3180_v19, %s6473_s10 }
  0xf4   :  { %v5995_v21 = vld [vmem:[%s9203_s0 + $0x480] sm:$0xf]  ;;  %v5980_v22 = vld [vmem:[%s9203_s0 + $0x4bc] sm:$0xf]  ;;  %448 = vst [vmem:[#allocation1 + $0x908] sm:$0xf] %v5994_v20  ;;  %v7585_v20 = vpop.permute.xlu0 %2773  }
  0xf5   :  { %v3195_v24 = vld [vmem:[#allocation1 + $0x8c2] ss:$8 sm:$0xf0]   ;;  %453 = vst [vmem:[#allocation1 + $0x900] sm:$0xf] %v5995_v21 }
  0xf6   :  { %378 = vst [vmem:[#allocation1 + $0x978] sm:$0xf] %v5980_v22  ;;  %v5981_v25 = vld [vmem:[%s9203_s0 + $0x4b8] sm:$0xf]  ;;  %v5982_v26 = vld [vmem:[%s9203_s0 + $0x4b4] sm:$0xf] }
  0xf7   :  { %383 = vst [vmem:[#allocation1 + $0x970] sm:$0xf] %v5981_v25  ;;  %v5983_v27 = vld [vmem:[%s9203_s0 + $0x4b0] sm:$0xf]  ;;  %v5984_v28 = vld [vmem:[%s9203_s0 + $0x4ac] sm:$0xf] }
  0xf8   :  { %v3193_v30 = vld [vmem:[#allocation1 + $0x8c2] ss:$8 sm:$0xf]   ;;  %388 = vst [vmem:[#allocation1 + $0x968] sm:$0xf] %v5982_v26 }
  0xf9   :  { %393 = vst [vmem:[#allocation1 + $0x960] sm:$0xf] %v5983_v27  ;;  %398 = vst [vmem:[#allocation1 + $0x958] sm:$0xf] %v5984_v28  ;;  %v5985_v31 = vld [vmem:[%s9203_s0 + $0x4a8] sm:$0xf]  ;;  %v3197_v33 = vsel %vm1892_vm0, %v3195_v24, %v3193_v30 }
  0xfa   :  { %403 = vst [vmem:[#allocation1 + $0x950] sm:$0xf] %v5985_v31  ;;  %v5986_v34 = vld [vmem:[%s9203_s0 + $0x4a4] sm:$0xf]  ;;  %v5987_v35 = vld [vmem:[%s9203_s0 + $0x4a0] sm:$0xf]  ;;  %3198 = vrot.lane.b32.xlu1 %v3197_v33, %s6473_s10 }
  0xfb   :  { %v5972_v36 = vld [vmem:[%s9203_s0 + $0x4dc] sm:$0xf]  ;;  %408 = vst [vmem:[#allocation1 + $0x948] sm:$0xf] %v5986_v34  ;;  %413 = vst [vmem:[#allocation1 + $0x940] sm:$0xf] %v5987_v35 }
  0xfc   :  { %338 = vst [vmem:[#allocation1 + $0x9b8] sm:$0xf] %v5972_v36  ;;  %v5973_v37 = vld [vmem:[%s9203_s0 + $0x4d8] sm:$0xf]  ;;  %v5974_v38 = vld [vmem:[%s9203_s0 + $0x4d4] sm:$0xf]  ;;  %v7619_v36 = vpop.permute.xlu1 %2790  }
  0xfd   :  { %v5975_v40 = vld [vmem:[%s9203_s0 + $0x4d0] sm:$0xf]  ;;  %343 = vst [vmem:[#allocation1 + $0x9b0] sm:$0xf] %v5973_v37  ;;  %348 = vst [vmem:[#allocation1 + $0x9a8] sm:$0xf] %v5974_v38 }
  0xfe   :  { %v3212_v41 = vld [vmem:[#allocation1 + $0x902] ss:$8 sm:$0xf0]   ;;  %353 = vst [vmem:[#allocation1 + $0x9a0] sm:$0xf] %v5975_v40 }
  0xff   :  { %v5976_v42 = vld [vmem:[%s9203_s0 + $0x4cc] sm:$0xf]  ;;  %v5977_v43 = vld [vmem:[%s9203_s0 + $0x4c8] sm:$0xf]  ;;  %v5978_v44 = vld [vmem:[%s9203_s0 + $0x4c4] sm:$0xf] }
 0x100   :  { %358 = vst [vmem:[#allocation1 + $0x998] sm:$0xf] %v5976_v42  ;;  %v5979_v45 = vld [vmem:[%s9203_s0 + $0x4c0] sm:$0xf]  ;;  %363 = vst [vmem:[#allocation1 + $0x990] sm:$0xf] %v5977_v43 }
 0x101   :  { %v3210_v48 = vld [vmem:[#allocation1 + $0x902] ss:$8 sm:$0xf]   ;;  %368 = vst [vmem:[#allocation1 + $0x988] sm:$0xf] %v5978_v44 }
 0x102   :  { %373 = vst [vmem:[#allocation1 + $0x980] sm:$0xf] %v5979_v45  ;;  %v5964_v49 = vld [vmem:[%s9203_s0 + $0x4fc] sm:$0xf]  ;;  %v3214_v50 = vsel %vm1892_vm0, %v3212_v41, %v3210_v48  ;;  %v5965_v51 = vld [vmem:[%s9203_s0 + $0x4f8] sm:$0xf] }
 0x103   :  { %298 = vst [vmem:[#allocation1 + $0x9f8] sm:$0xf] %v5964_v49  ;;  %v5966_v52 = vld [vmem:[%s9203_s0 + $0x4f4] sm:$0xf]  ;;  %v5967_v53 = vld [vmem:[%s9203_s0 + $0x4f0] sm:$0xf]  ;;  %3215 = vrot.lane.b32.xlu0 %v3214_v50, %s6473_s10 }
 0x104   :  { %v3229_v54 = vld [vmem:[#allocation1 + $0x942] ss:$8 sm:$0xf0]   ;;  %303 = vst [vmem:[#allocation1 + $0x9f0] sm:$0xf] %v5965_v51 }
 0x105   :  { %308 = vst [vmem:[#allocation1 + $0x9e8] sm:$0xf] %v5966_v52  ;;  %313 = vst [vmem:[#allocation1 + $0x9e0] sm:$0xf] %v5967_v53  ;;  %v5968_v55 = vld [vmem:[%s9203_s0 + $0x4ec] sm:$0xf]  ;;  %v7650_v53 = vpop.permute.xlu0 %2807  }
 0x106   :  { %318 = vst [vmem:[#allocation1 + $0x9d8] sm:$0xf] %v5968_v55  ;;  %v5969_v56 = vld [vmem:[%s9203_s0 + $0x4e8] sm:$0xf]  ;;  %v5970_v57 = vld [vmem:[%s9203_s0 + $0x4e4] sm:$0xf] }
 0x107   :  { %v5971_v58 = vld [vmem:[%s9203_s0 + $0x4e0] sm:$0xf]  ;;  %323 = vst [vmem:[#allocation1 + $0x9d0] sm:$0xf] %v5969_v56  ;;  %328 = vst [vmem:[#allocation1 + $0x9c8] sm:$0xf] %v5970_v57 }
 0x108   :  { %v3227_v59 = vld [vmem:[#allocation1 + $0x942] ss:$8 sm:$0xf]   ;;  %333 = vst [vmem:[#allocation1 + $0x9c0] sm:$0xf] %v5971_v58 }
 0x109   :  { %v5956_v61 = vld [vmem:[%s9203_s0 + $0x51c] sm:$0xf]  ;;  %v3231_v63 = vsel %vm1892_vm0, %v3229_v54, %v3227_v59  ;;  %v3246_v0 = vld [vmem:[#allocation1 + $0x982] ss:$8 sm:$0xf0]  }
 0x10a   :  { %258 = vst [vmem:[#allocation1 + $0xa38] sm:$0xf] %v5956_v61  ;;  %v5957_v1 = vld [vmem:[%s9203_s0 + $0x518] sm:$0xf]  ;;  %3232 = vrot.lane.b32.xlu1 %v3231_v63, %s6473_s10  ;;  %v5958_v2 = vld [vmem:[%s9203_s0 + $0x514] sm:$0xf] }
 0x10b   :  { %263 = vst [vmem:[#allocation1 + $0xa30] sm:$0xf] %v5957_v1  ;;  %v5959_v3 = vld [vmem:[%s9203_s0 + $0x510] sm:$0xf]  ;;  %v5960_v4 = vld [vmem:[%s9203_s0 + $0x50c] sm:$0xf] }
 0x10c   :  { %v3244_v5 = vld [vmem:[#allocation1 + $0x982] ss:$8 sm:$0xf]   ;;  %268 = vst [vmem:[#allocation1 + $0xa28] sm:$0xf] %v5958_v2 }
 0x10d   :  { %273 = vst [vmem:[#allocation1 + $0xa20] sm:$0xf] %v5959_v3  ;;  %278 = vst [vmem:[#allocation1 + $0xa18] sm:$0xf] %v5960_v4  ;;  %v5961_v6 = vld [vmem:[%s9203_s0 + $0x508] sm:$0xf]  ;;  %v3248_v7 = vsel %vm1892_vm0, %v3246_v0, %v3244_v5  ;;  %v7679_v4 = vpop.permute.xlu1 %2824  }
 0x10e   :  { %283 = vst [vmem:[#allocation1 + $0xa10] sm:$0xf] %v5961_v6  ;;  %v5962_v8 = vld [vmem:[%s9203_s0 + $0x504] sm:$0xf]  ;;  %v5963_v9 = vld [vmem:[%s9203_s0 + $0x500] sm:$0xf]  ;;  %3249 = vrot.lane.b32.xlu0 %v3248_v7, %s6473_s10 }
 0x10f   :  { %v5948_v11 = vld [vmem:[%s9203_s0 + $0x53c] sm:$0xf]  ;;  %v3263_v13 = vld [vmem:[#allocation1 + $0x9c2] ss:$8 sm:$0xf0]  }
 0x110   :  { %288 = vst [vmem:[#allocation1 + $0xa08] sm:$0xf] %v5962_v8  ;;  %293 = vst [vmem:[#allocation1 + $0xa00] sm:$0xf] %v5963_v9  ;;  %v5949_v14 = vld [vmem:[%s9203_s0 + $0x538] sm:$0xf] }
 0x111   :  { %218 = vst [vmem:[#allocation1 + $0xa78] sm:$0xf] %v5948_v11  ;;  %223 = vst [vmem:[#allocation1 + $0xa70] sm:$0xf] %v5949_v14  ;;  %v5950_v15 = vld [vmem:[%s9203_s0 + $0x534] sm:$0xf]  ;;  %v7697_v14 = vpop.permute.xlu0 %2841  }
 0x112   :  { %v5951_v16 = vld [vmem:[%s9203_s0 + $0x530] sm:$0xf]  ;;  %v5952_v17 = vld [vmem:[%s9203_s0 + $0x52c] sm:$0xf]  ;;  %228 = vst [vmem:[#allocation1 + $0xa68] sm:$0xf] %v5950_v15 }
 0x113   :  { %v3261_v18 = vld [vmem:[#allocation1 + $0x9c2] ss:$8 sm:$0xf]   ;;  %233 = vst [vmem:[#allocation1 + $0xa60] sm:$0xf] %v5951_v16 }
 0x114   :  { %238 = vst [vmem:[#allocation1 + $0xa58] sm:$0xf] %v5952_v17  ;;  %v5953_v19 = vld [vmem:[%s9203_s0 + $0x528] sm:$0xf]  ;;  %v3265_v21 = vsel %vm1892_vm0, %v3263_v13, %v3261_v18  ;;  %v5954_v22 = vld [vmem:[%s9203_s0 + $0x524] sm:$0xf] }
 0x115   :  { %243 = vst [vmem:[#allocation1 + $0xa50] sm:$0xf] %v5953_v19  ;;  %v5955_v24 = vld [vmem:[%s9203_s0 + $0x520] sm:$0xf]  ;;  %v5940_v25 = vld [vmem:[%s9203_s0 + $0x55c] sm:$0xf]  ;;  %3266 = vrot.lane.b32.xlu1 %v3265_v21, %s6473_s10 }
 0x116   :  { %248 = vst [vmem:[#allocation1 + $0xa48] sm:$0xf] %v5954_v22  ;;  %253 = vst [vmem:[#allocation1 + $0xa40] sm:$0xf] %v5955_v24  ;;  %v5941_v26 = vld [vmem:[%s9203_s0 + $0x558] sm:$0xf] }
 0x117   :  { %178 = vst [vmem:[#allocation1 + $0xab8] sm:$0xf] %v5940_v25  ;;  %v5942_v27 = vld [vmem:[%s9203_s0 + $0x554] sm:$0xf]  ;;  %v5943_v28 = vld [vmem:[%s9203_s0 + $0x550] sm:$0xf] }
 0x118   :  { %v3280_v30 = vld [vmem:[#allocation1 + $0xa02] ss:$8 sm:$0xf0]   ;;  %183 = vst [vmem:[#allocation1 + $0xab0] sm:$0xf] %v5941_v26 }
 0x119   :  { %188 = vst [vmem:[#allocation1 + $0xaa8] sm:$0xf] %v5942_v27  ;;  %193 = vst [vmem:[#allocation1 + $0xaa0] sm:$0xf] %v5943_v28  ;;  %v5944_v31 = vld [vmem:[%s9203_s0 + $0x54c] sm:$0xf] }
 0x11a   :  { %198 = vst [vmem:[#allocation1 + $0xa98] sm:$0xf] %v5944_v31  ;;  %v5945_v33 = vld [vmem:[%s9203_s0 + $0x548] sm:$0xf]  ;;  %v5946_v34 = vld [vmem:[%s9203_s0 + $0x544] sm:$0xf] }
 0x11b   :  { %v5947_v35 = vld [vmem:[%s9203_s0 + $0x540] sm:$0xf]  ;;  %203 = vst [vmem:[#allocation1 + $0xa90] sm:$0xf] %v5945_v33  ;;  %208 = vst [vmem:[#allocation1 + $0xa88] sm:$0xf] %v5946_v34 }
 0x11c   :  { %v3278_v37 = vld [vmem:[#allocation1 + $0xa02] ss:$8 sm:$0xf]   ;;  %213 = vst [vmem:[#allocation1 + $0xa80] sm:$0xf] %v5947_v35 }
 0x11d   :  { %v5932_v38 = vld [vmem:[%s9203_s0 + $0x57c] sm:$0xf]  ;;  %v3282_v40 = vsel %vm1892_vm0, %v3280_v30, %v3278_v37  ;;  %v5933_v41 = vld [vmem:[%s9203_s0 + $0x578] sm:$0xf]  ;;  %v5934_v42 = vld [vmem:[%s9203_s0 + $0x574] sm:$0xf]  ;;  %v7731_v30 = vpop.permute.xlu1 %2858  }
 0x11e   :  { %138 = vst [vmem:[#allocation1 + $0xaf8] sm:$0xf] %v5932_v38  ;;  %v5935_v43 = vld [vmem:[%s9203_s0 + $0x570] sm:$0xf]  ;;  %3283 = vrot.lane.b32.xlu0 %v3282_v40, %s6473_s10  ;;  %143 = vst [vmem:[#allocation1 + $0xaf0] sm:$0xf] %v5933_v41  ;;  %v7741_v40 = vpop.permute.xlu0 %2875  }
 0x11f   :  { %v3297_v44 = vld [vmem:[#allocation1 + $0xa42] ss:$8 sm:$0xf0]   ;;  %148 = vst [vmem:[#allocation1 + $0xae8] sm:$0xf] %v5934_v42 }
 0x120   :  { %153 = vst [vmem:[#allocation1 + $0xae0] sm:$0xf] %v5935_v43  ;;  %v5936_v45 = vld [vmem:[%s9203_s0 + $0x56c] sm:$0xf]  ;;  %v5937_v48 = vld [vmem:[%s9203_s0 + $0x568] sm:$0xf] }
 0x121   :  { %158 = vst [vmem:[#allocation1 + $0xad8] sm:$0xf] %v5936_v45  ;;  %v5938_v49 = vld [vmem:[%s9203_s0 + $0x564] sm:$0xf]  ;;  %v5939_v50 = vld [vmem:[%s9203_s0 + $0x560] sm:$0xf] }
 0x122   :  { %v3295_v51 = vld [vmem:[#allocation1 + $0xa42] ss:$8 sm:$0xf]   ;;  %163 = vst [vmem:[#allocation1 + $0xad0] sm:$0xf] %v5937_v48 }
 0x123   :  { %168 = vst [vmem:[#allocation1 + $0xac8] sm:$0xf] %v5938_v49  ;;  %173 = vst [vmem:[#allocation1 + $0xac0] sm:$0xf] %v5939_v50  ;;  %v5924_v52 = vld [vmem:[%s9203_s0 + $0x59c] sm:$0xf]  ;;  %v3299_v54 = vsel %vm1892_vm0, %v3297_v44, %v3295_v51  ;;  %v7746_v51 = vpop.permute.xlu1 %2892  }
 0x124   :  { %v3314_v55 = vld [vmem:[#allocation1 + $0xa82] ss:$8 sm:$0xf0]   ;;  %98 = vst [vmem:[#allocation1 + $0xb38] sm:$0xf] %v5924_v52  ;;  %3300 = vrot.lane.b32.xlu1 %v3299_v54, %s6473_s10 }
 0x125   :  { %v5925_v56 = vld [vmem:[%s9203_s0 + $0x598] sm:$0xf]  ;;  %v5926_v57 = vld [vmem:[%s9203_s0 + $0x594] sm:$0xf]  ;;  %v5927_v58 = vld [vmem:[%s9203_s0 + $0x590] sm:$0xf] }
 0x126   :  { %103 = vst [vmem:[#allocation1 + $0xb30] sm:$0xf] %v5925_v56  ;;  %v5928_v59 = vld [vmem:[%s9203_s0 + $0x58c] sm:$0xf]  ;;  %108 = vst [vmem:[#allocation1 + $0xb28] sm:$0xf] %v5926_v57 }
 0x127   :  { %v3312_v61 = vld [vmem:[#allocation1 + $0xa82] ss:$8 sm:$0xf]   ;;  %113 = vst [vmem:[#allocation1 + $0xb20] sm:$0xf] %v5927_v58  ;;  %v7754_v58 = vpop.permute.xlu0 %2909  }
 0x128   :  { %118 = vst [vmem:[#allocation1 + $0xb18] sm:$0xf] %v5928_v59  ;;  %v5929_v63 = vld [vmem:[%s9203_s0 + $0x588] sm:$0xf]  ;;  %v3316_v0 = vsel %vm1892_vm0, %v3314_v55, %v3312_v61  ;;  %v5930_v1 = vld [vmem:[%s9203_s0 + $0x584] sm:$0xf] }
 0x129   :  { %123 = vst [vmem:[#allocation1 + $0xb10] sm:$0xf] %v5929_v63  ;;  %v5931_v2 = vld [vmem:[%s9203_s0 + $0x580] sm:$0xf]  ;;  %v5916_v3 = vld [vmem:[%s9203_s0 + $0x5bc] sm:$0xf]  ;;  %3317 = vrot.lane.b32.xlu0 %v3316_v0, %s6473_s10 }
 0x12a   :  { %v3331_v5 = vld [vmem:[#allocation1 + $0xac2] ss:$8 sm:$0xf0]   ;;  %128 = vst [vmem:[#allocation1 + $0xb08] sm:$0xf] %v5930_v1 }
 0x12b   :  { %133 = vst [vmem:[#allocation1 + $0xb00] sm:$0xf] %v5931_v2  ;;  %58 = vst [vmem:[#allocation1 + $0xb78] sm:$0xf] %v5916_v3  ;;  %v5917_v6 = vld [vmem:[%s9203_s0 + $0x5b8] sm:$0xf] }
 0x12c   :  { %63 = vst [vmem:[#allocation1 + $0xb70] sm:$0xf] %v5917_v6  ;;  %v5918_v7 = vld [vmem:[%s9203_s0 + $0x5b4] sm:$0xf]  ;;  %v5919_v8 = vld [vmem:[%s9203_s0 + $0x5b0] sm:$0xf] }
 0x12d   :  { %v5920_v9 = vld [vmem:[%s9203_s0 + $0x5ac] sm:$0xf]  ;;  %v3329_v11 = vld [vmem:[#allocation1 + $0xac2] ss:$8 sm:$0xf]  }
 0x12e   :  { %68 = vst [vmem:[#allocation1 + $0xb68] sm:$0xf] %v5918_v7  ;;  %73 = vst [vmem:[#allocation1 + $0xb60] sm:$0xf] %v5919_v8  ;;  %v5921_v13 = vld [vmem:[%s9203_s0 + $0x5a8] sm:$0xf]  ;;  %v3333_v15 = vsel %vm1892_vm0, %v3331_v5, %v3329_v11 }
 0x12f   :  { %78 = vst [vmem:[#allocation1 + $0xb58] sm:$0xf] %v5920_v9  ;;  %83 = vst [vmem:[#allocation1 + $0xb50] sm:$0xf] %v5921_v13  ;;  %v5922_v16 = vld [vmem:[%s9203_s0 + $0x5a4] sm:$0xf]  ;;  %3334 = vrot.lane.b32.xlu1 %v3333_v15, %s6473_s10  ;;  %v7761_v9 = vpop.permute.xlu1 %2926  }
 0x130   :  { %v5923_v17 = vld [vmem:[%s9203_s0 + $0x5a0] sm:$0xf]  ;;  %v5908_v18 = vld [vmem:[%s9203_s0 + $0x5dc] sm:$0xf]  ;;  %88 = vst [vmem:[#allocation1 + $0xb48] sm:$0xf] %v5922_v16 }
 0x131   :  { %93 = vst [vmem:[#allocation1 + $0xb40] sm:$0xf] %v5923_v17  ;;  %18 = vst [vmem:[#allocation1 + $0xbb8] sm:$0xf] %v5908_v18  ;;  %v5909_v19 = vld [vmem:[%s9203_s0 + $0x5d8] sm:$0xf] }
 0x132   :  { %v5910_v21 = vld [vmem:[%s9203_s0 + $0x5d4] sm:$0xf]  ;;  %v5911_v22 = vld [vmem:[%s9203_s0 + $0x5d0] sm:$0xf]  ;;  %23 = vst [vmem:[#allocation1 + $0xbb0] sm:$0xf] %v5909_v19 }
 0x133   :  { %v3348_v24 = vld [vmem:[#allocation1 + $0xb02] ss:$8 sm:$0xf0]   ;;  %28 = vst [vmem:[#allocation1 + $0xba8] sm:$0xf] %v5910_v21 }
 0x134   :  { %33 = vst [vmem:[#allocation1 + $0xba0] sm:$0xf] %v5911_v22  ;;  %v5912_v25 = vld [vmem:[%s9203_s0 + $0x5cc] sm:$0xf]  ;;  %v5913_v26 = vld [vmem:[%s9203_s0 + $0x5c8] sm:$0xf] }
 0x135   :  { %38 = vst [vmem:[#allocation1 + $0xb98] sm:$0xf] %v5912_v25  ;;  %v5914_v27 = vld [vmem:[%s9203_s0 + $0x5c4] sm:$0xf]  ;;  %v5915_v28 = vld [vmem:[%s9203_s0 + $0x5c0] sm:$0xf] }
 0x136   :  { %v3346_v31 = vld [vmem:[#allocation1 + $0xb02] ss:$8 sm:$0xf]   ;;  %43 = vst [vmem:[#allocation1 + $0xb90] sm:$0xf] %v5913_v26 }
 0x137   :  { %48 = vst [vmem:[#allocation1 + $0xb88] sm:$0xf] %v5914_v27  ;;  %53 = vst [vmem:[#allocation1 + $0xb80] sm:$0xf] %v5915_v28  ;;  %v5906_v33 = vld [vmem:[%s9203_s0 + $0x5e4] sm:$0xf]  ;;  %v3350_v34 = vsel %vm1892_vm0, %v3348_v24, %v3346_v31  ;;  %v7798_v28 = vpop.permute.xlu0 %2943  }
 0x138   :  { %8 = vst [vmem:[#allocation1 + $0xbc8] sm:$0xf] %v5906_v33  ;;  %v5907_v35 = vld [vmem:[%s9203_s0 + $0x5e0] sm:$0xf]  ;;  %3351 = vrot.lane.b32.xlu0 %v3350_v34, %s6473_s10  ;;  %s3397_s0 = smov 3 }
 0x139   :  { %v3365_v37 = vld [vmem:[#allocation1 + $0xb42] ss:$8 sm:$0xf0]   ;;  %13 = vst [vmem:[#allocation1 + $0xbc0] sm:$0xf] %v5907_v35 }
 0x13a   :  { %v3363_v38 = vld [vmem:[#allocation1 + $0xb42] ss:$8 sm:$0xf]   ;;  %v3405_v43 = vld [vmem:[#allocation1 + $0x1] ss:$8 sm:$0xf]  }
 0x13b   :  { %v3367_v41 = vsel %vm1892_vm0, %v3365_v37, %v3363_v38  ;;  %v3382_v42 = vld [vmem:[#allocation1 + $0xb82] ss:$8 sm:$0xf0]   ;;  %v3407_v45 = vld [vmem:[#allocation1 + $0x1] ss:$8 sm:$0xf0]  }
 0x13c   :  { %3368 = vrot.lane.b32.xlu1 %v3367_v41, %s6473_s10  ;;  %v3421_v49 = vld [vmem:[#allocation1 + $0x41] ss:$8 sm:$0xf]   ;;  %v3409_v54 = vsel %vm1892_vm0, %v3407_v45, %v3405_v43  ;;  %v1890_v2 = vld [vmem:[#allocation1] ss:$8 sm:$0xf]   ;;  %v7830_v45 = vpop.permute.xlu1 %2960  }
 0x13d   :  { %v3423_v50 = vld [vmem:[#allocation1 + $0x41] ss:$8 sm:$0xf0]   ;;  %v1891_v3 = vld [vmem:[#allocation1] ss:$8 sm:$0xf0]  }
 0x13e   :  { %v3380_v44 = vld [vmem:[#allocation1 + $0xb82] ss:$8 sm:$0xf]   ;;  %v3425_v55 = vsel %vm1892_vm0, %v3423_v50, %v3421_v49  ;;  %v3438_v56 = vld [vmem:[#allocation1 + $0x81] ss:$8 sm:$0xf]   ;;  %v1893_v6 = vsel %vm1892_vm0, %v1891_v3, %v1890_v2 }
 0x13f   :  { %v3384_v48 = vsel %vm1892_vm0, %v3382_v42, %v3380_v44  ;;  %v3440_v57 = vld [vmem:[#allocation1 + $0x81] ss:$8 sm:$0xf0]   ;;  %v1918_v7 = vld [vmem:[#allocation1 + $0x80] ss:$8 sm:$0xf]  }
 0x140   :  { %3385 = vrot.lane.b32.xlu0 %v3384_v48, %s6473_s10  ;;  %v3398_v52 = vld [vmem:[#allocation1 + $0xbc2] ss:$8 sm:%s3397_s0]   ;;  %v3455_v59 = vld [vmem:[#allocation1 + $0xc1] ss:$8 sm:$0xf]   ;;  %v3442_v1 = vsel %vm1892_vm0, %v3440_v57, %v3438_v56  ;;  %v7857_v57 = vpop.permute.xlu0 %2977  }
 0x141   :  { %3399 = vrot.lane.b32.xlu1 %v3398_v52, %s6473_s10  ;;  %s7751_s10 = smov 3  ;;  %v3457_v61 = vld [vmem:[#allocation1 + $0xc1] ss:$8 sm:$0xf0]   ;;  %1895 = vst.msk [vmem:[#allocation0] sm:$0x3] %vm1894_vm1, %v1893_v6  }
 0x142   :  { %v3472_v63 = vld [vmem:[#allocation1 + $0x101] ss:$8 sm:$0xf]   ;;  %v3459_v5 = vsel %vm1892_vm0, %v3457_v61, %v3455_v59  ;;  %v1920_v8 = vld [vmem:[#allocation1 + $0x80] ss:$8 sm:$0xf0]  }
 0x143   :  { %v3474_v0 = vld [vmem:[#allocation1 + $0x101] ss:$8 sm:$0xf0]   ;;  %1897 = vst.msk [vmem:[#allocation0 + $0x6] sm:$0xc] %vm1894_vm1, %v1893_v6   ;;  %v1922_v15 = vsel %vm1892_vm0, %v1920_v8, %v1918_v7  ;;  %v7889_v8 = vpop.permute.xlu1 %2994  }
 0x144   :  { %3410 = vrot.lane.b32.xlu0 %v3409_v54, %s6474_s4  ;;  %v3489_v11 = vld [vmem:[#allocation1 + $0x141] ss:$8 sm:$0xf]   ;;  %1899 = vst.msk [vmem:[#allocation0 + $0xc] sm:$0x30] %vm1894_vm1, %v1893_v6  }
 0x145   :  { %3426 = vrot.lane.b32.xlu1 %v3425_v55, %s6474_s4  ;;  %v3491_v13 = vld [vmem:[#allocation1 + $0x141] ss:$8 sm:$0xf0]   ;;  %1901 = vst.msk [vmem:[#allocation0 + $0x12] sm:$0xc0] %vm1894_vm1, %v1893_v6  }
 0x146   :  { %v3506_v16 = vld [vmem:[#allocation1 + $0x181] ss:$8 sm:$0xf]   ;;  %2607 = vst.msk [vmem:[#allocation0] sm:$0x3] %vm2606_vm2, %v7318_v29   ;;  %v3493_v19 = vsel %vm1892_vm0, %v3491_v13, %v3489_v11 }
 0x147   :  { %v3508_v17 = vld [vmem:[#allocation1 + $0x181] ss:$8 sm:$0xf0]   ;;  %2609 = vst.msk [vmem:[#allocation0 + $0x6] sm:$0xc] %vm2606_vm2, %v7318_v29  }
 0x148   :  { %3443 = vrot.lane.b32.xlu0 %v3442_v1, %s6474_s4  ;;  %2611 = vst.msk [vmem:[#allocation0 + $0xc] sm:$0x30] %vm2606_vm2, %v7318_v29   ;;  %2613 = vst.msk [vmem:[#allocation0 + $0x12] sm:$0xc0] %vm2606_vm2, %v7318_v29   ;;  %v3476_v29 = vsel %vm1892_vm0, %v3474_v0, %v3472_v63 }
 0x149   :  { %1925 = vst.msk [vmem:[#allocation0 + $0x40] sm:$0x3] %vm1894_vm1, %v1922_v15   ;;  %1927 = vst.msk [vmem:[#allocation0 + $0x46] sm:$0xc] %vm1894_vm1, %v1922_v15   ;;  %3460 = vrot.lane.b32.xlu1 %v3459_v5, %s6474_s4 }
 0x14a   :  { %1929 = vst.msk [vmem:[#allocation0 + $0x4c] sm:$0x30] %vm1894_vm1, %v1922_v15   ;;  %1931 = vst.msk [vmem:[#allocation0 + $0x52] sm:$0xc0] %vm1894_vm1, %v1922_v15  }
 0x14b   :  { %2641 = vst.msk [vmem:[#allocation0 + $0x40] sm:$0x3] %vm2606_vm2, %v7343_v39   ;;  %2643 = vst.msk [vmem:[#allocation0 + $0x46] sm:$0xc] %vm2606_vm2, %v7343_v39  }
 0x14c   :  { %2645 = vst.msk [vmem:[#allocation0 + $0x4c] sm:$0x30] %vm2606_vm2, %v7343_v39   ;;  %2647 = vst.msk [vmem:[#allocation0 + $0x52] sm:$0xc0] %vm2606_vm2, %v7343_v39   ;;  %3477 = vrot.lane.b32.xlu0 %v3476_v29, %s6474_s4 }
 0x14d   :  { %v1903_v39 = vld [vmem:[#allocation1 + $0x40] ss:$8 sm:$0xf]   ;;  %v3523_v25 = vld [vmem:[#allocation1 + $0x1c1] ss:$8 sm:$0xf]   ;;  %3494 = vrot.lane.b32.xlu1 %v3493_v19, %s6474_s4 }
 0x14e   :  { %v1905_v18 = vld [vmem:[#allocation1 + $0x40] ss:$8 sm:$0xf0]   ;;  %v3525_v26 = vld [vmem:[#allocation1 + $0x1c1] ss:$8 sm:$0xf0]  }
 0x14f   :  { %v1907_v21 = vsel %vm1892_vm0, %v1905_v18, %v1903_v39  ;;  %v1933_v22 = vld [vmem:[#allocation1 + $0xc0] ss:$8 sm:$0xf]   ;;  %v3540_v31 = vld [vmem:[#allocation1 + $0x201] ss:$8 sm:$0xf]   ;;  %v3527_v35 = vsel %vm1892_vm0, %v3525_v26, %v3523_v25  ;;  %v7926_v26 = vpop.permute.xlu0 %3011  }
 0x150   :  { %v1935_v24 = vld [vmem:[#allocation1 + $0xc0] ss:$8 sm:$0xf0]   ;;  %1910 = vst.msk [vmem:[#allocation0 + $0x20] sm:$0x3] %vm1894_vm1, %v1907_v21  }
 0x151   :  { %1912 = vst.msk [vmem:[#allocation0 + $0x26] sm:$0xc] %vm1894_vm1, %v1907_v21   ;;  %1914 = vst.msk [vmem:[#allocation0 + $0x2c] sm:$0x30] %vm1894_vm1, %v1907_v21   ;;  %v1937_v27 = vsel %vm1892_vm0, %v1935_v24, %v1933_v22  ;;  %3528 = vrot.lane.b32.xlu1 %v3527_v35, %s6474_s4 }
 0x152   :  { %1916 = vst.msk [vmem:[#allocation0 + $0x32] sm:$0xc0] %vm1894_vm1, %v1907_v21   ;;  %v3542_v33 = vld [vmem:[#allocation1 + $0x201] ss:$8 sm:$0xf0]  }
 0x153   :  { %2624 = vst.msk [vmem:[#allocation0 + $0x20] sm:$0x3] %vm2606_vm2, %v7361_v47   ;;  %2626 = vst.msk [vmem:[#allocation0 + $0x26] sm:$0xc] %vm2606_vm2, %v7361_v47  }
 0x154   :  { %2628 = vst.msk [vmem:[#allocation0 + $0x2c] sm:$0x30] %vm2606_vm2, %v7361_v47   ;;  %2630 = vst.msk [vmem:[#allocation0 + $0x32] sm:$0xc0] %vm2606_vm2, %v7361_v47   ;;  %v3510_v47 = vsel %vm1892_vm0, %v3508_v17, %v3506_v16 }
 0x155   :  { %1940 = vst.msk [vmem:[#allocation0 + $0x60] sm:$0x3] %vm1894_vm1, %v1937_v27   ;;  %1942 = vst.msk [vmem:[#allocation0 + $0x66] sm:$0xc] %vm1894_vm1, %v1937_v27   ;;  %3511 = vrot.lane.b32.xlu0 %v3510_v47, %s6474_s4 }
 0x156   :  { %1944 = vst.msk [vmem:[#allocation0 + $0x6c] sm:$0x30] %vm1894_vm1, %v1937_v27   ;;  %1946 = vst.msk [vmem:[#allocation0 + $0x72] sm:$0xc0] %vm1894_vm1, %v1937_v27  }
 0x157   :  { %2658 = vst.msk [vmem:[#allocation0 + $0x60] sm:$0x3] %vm2606_vm2, %v7395_v60   ;;  %2660 = vst.msk [vmem:[#allocation0 + $0x66] sm:$0xc] %vm2606_vm2, %v7395_v60  }
 0x158   :  { %2662 = vst.msk [vmem:[#allocation0 + $0x6c] sm:$0x30] %vm2606_vm2, %v7395_v60   ;;  %2664 = vst.msk [vmem:[#allocation0 + $0x72] sm:$0xc0] %vm2606_vm2, %v7395_v60  }
 0x159   :  { %v1948_v60 = vld [vmem:[#allocation1 + $0x100] ss:$8 sm:$0xf]   ;;  %v3557_v42 = vld [vmem:[#allocation1 + $0x241] ss:$8 sm:$0xf]  }
 0x15a   :  { %v1950_v34 = vld [vmem:[#allocation1 + $0x100] ss:$8 sm:$0xf0]   ;;  %v3559_v43 = vld [vmem:[#allocation1 + $0x241] ss:$8 sm:$0xf0]  }
 0x15b   :  { %v1952_v37 = vsel %vm1892_vm0, %v1950_v34, %v1948_v60  ;;  %v1963_v38 = vld [vmem:[#allocation1 + $0x140] ss:$8 sm:$0xf]   ;;  %v3574_v48 = vld [vmem:[#allocation1 + $0x281] ss:$8 sm:$0xf]   ;;  %v3561_v52 = vsel %vm1892_vm0, %v3559_v43, %v3557_v42  ;;  %v7958_v42 = vpop.permute.xlu1 %3028  }
 0x15c   :  { %v1965_v41 = vld [vmem:[#allocation1 + $0x140] ss:$8 sm:$0xf0]   ;;  %1955 = vst.msk [vmem:[#allocation0 + $0x80] sm:$0x3] %vm1894_vm1, %v1952_v37   ;;  %3562 = vrot.lane.b32.xlu1 %v3561_v52, %s6474_s4  ;;  %v7985_v52 = vpop.permute.xlu0 %3045  }
 0x15d   :  { %1957 = vst.msk [vmem:[#allocation0 + $0x86] sm:$0xc] %vm1894_vm1, %v1952_v37   ;;  %1959 = vst.msk [vmem:[#allocation0 + $0x8c] sm:$0x30] %vm1894_vm1, %v1952_v37   ;;  %v1967_v44 = vsel %vm1892_vm0, %v1965_v41, %v1963_v38 }
 0x15e   :  { %1961 = vst.msk [vmem:[#allocation0 + $0x92] sm:$0xc0] %vm1894_vm1, %v1952_v37   ;;  %v3576_v49 = vld [vmem:[#allocation1 + $0x281] ss:$8 sm:$0xf0]  }
 0x15f   :  { %2675 = vst.msk [vmem:[#allocation0 + $0x80] sm:$0x3] %vm2606_vm2, %v7426_v10   ;;  %2677 = vst.msk [vmem:[#allocation0 + $0x86] sm:$0xc] %vm2606_vm2, %v7426_v10  }
 0x160   :  { %2679 = vst.msk [vmem:[#allocation0 + $0x8c] sm:$0x30] %vm2606_vm2, %v7426_v10   ;;  %2681 = vst.msk [vmem:[#allocation0 + $0x92] sm:$0xc0] %vm2606_vm2, %v7426_v10   ;;  %v3544_v10 = vsel %vm1892_vm0, %v3542_v33, %v3540_v31 }
 0x161   :  { %1970 = vst.msk [vmem:[#allocation0 + $0xa0] sm:$0x3] %vm1894_vm1, %v1967_v44   ;;  %1972 = vst.msk [vmem:[#allocation0 + $0xa6] sm:$0xc] %vm1894_vm1, %v1967_v44   ;;  %3545 = vrot.lane.b32.xlu0 %v3544_v10, %s6474_s4 }
 0x162   :  { %1974 = vst.msk [vmem:[#allocation0 + $0xac] sm:$0x30] %vm1894_vm1, %v1967_v44   ;;  %1976 = vst.msk [vmem:[#allocation0 + $0xb2] sm:$0xc0] %vm1894_vm1, %v1967_v44  }
 0x163   :  { %2692 = vst.msk [vmem:[#allocation0 + $0xa0] sm:$0x3] %vm2606_vm2, %v7455_v23   ;;  %2694 = vst.msk [vmem:[#allocation0 + $0xa6] sm:$0xc] %vm2606_vm2, %v7455_v23  }
 0x164   :  { %2696 = vst.msk [vmem:[#allocation0 + $0xac] sm:$0x30] %vm2606_vm2, %v7455_v23   ;;  %2698 = vst.msk [vmem:[#allocation0 + $0xb2] sm:$0xc0] %vm2606_vm2, %v7455_v23  }
 0x165   :  { %v1978_v23 = vld [vmem:[#allocation1 + $0x180] ss:$8 sm:$0xf]   ;;  %v3591_v59 = vld [vmem:[#allocation1 + $0x2c1] ss:$8 sm:$0xf]  }
 0x166   :  { %v1980_v50 = vld [vmem:[#allocation1 + $0x180] ss:$8 sm:$0xf0]   ;;  %v3593_v61 = vld [vmem:[#allocation1 + $0x2c1] ss:$8 sm:$0xf0]  }
 0x167   :  { %v1982_v54 = vsel %vm1892_vm0, %v1980_v50, %v1978_v23  ;;  %v1993_v55 = vld [vmem:[#allocation1 + $0x1c0] ss:$8 sm:$0xf]   ;;  %v3608_v0 = vld [vmem:[#allocation1 + $0x301] ss:$8 sm:$0xf]   ;;  %v3595_v3 = vsel %vm1892_vm0, %v3593_v61, %v3591_v59 }
 0x168   :  { %v1995_v56 = vld [vmem:[#allocation1 + $0x1c0] ss:$8 sm:$0xf0]   ;;  %1985 = vst.msk [vmem:[#allocation0 + $0xc0] sm:$0x3] %vm1894_vm1, %v1982_v54   ;;  %3596 = vrot.lane.b32.xlu1 %v3595_v3, %s6474_s4 }
 0x169   :  { %1987 = vst.msk [vmem:[#allocation0 + $0xc6] sm:$0xc] %vm1894_vm1, %v1982_v54   ;;  %1989 = vst.msk [vmem:[#allocation0 + $0xcc] sm:$0x30] %vm1894_vm1, %v1982_v54   ;;  %v1997_v63 = vsel %vm1892_vm0, %v1995_v56, %v1993_v55 }
 0x16a   :  { %1991 = vst.msk [vmem:[#allocation0 + $0xd2] sm:$0xc0] %vm1894_vm1, %v1982_v54   ;;  %v3610_v1 = vld [vmem:[#allocation1 + $0x301] ss:$8 sm:$0xf0]  }
 0x16b   :  { %2709 = vst.msk [vmem:[#allocation0 + $0xc0] sm:$0x3] %vm2606_vm2, %v7473_v32   ;;  %2711 = vst.msk [vmem:[#allocation0 + $0xc6] sm:$0xc] %vm2606_vm2, %v7473_v32  }
 0x16c   :  { %2713 = vst.msk [vmem:[#allocation0 + $0xcc] sm:$0x30] %vm2606_vm2, %v7473_v32   ;;  %2715 = vst.msk [vmem:[#allocation0 + $0xd2] sm:$0xc0] %vm2606_vm2, %v7473_v32   ;;  %v3578_v32 = vsel %vm1892_vm0, %v3576_v49, %v3574_v48 }
 0x16d   :  { %2000 = vst.msk [vmem:[#allocation0 + $0xe0] sm:$0x3] %vm1894_vm1, %v1997_v63   ;;  %2002 = vst.msk [vmem:[#allocation0 + $0xe6] sm:$0xc] %vm1894_vm1, %v1997_v63   ;;  %3579 = vrot.lane.b32.xlu0 %v3578_v32, %s6474_s4 }
 0x16e   :  { %2004 = vst.msk [vmem:[#allocation0 + $0xec] sm:$0x30] %vm1894_vm1, %v1997_v63   ;;  %2006 = vst.msk [vmem:[#allocation0 + $0xf2] sm:$0xc0] %vm1894_vm1, %v1997_v63  }
 0x16f   :  { %2726 = vst.msk [vmem:[#allocation0 + $0xe0] sm:$0x3] %vm2606_vm2, %v7507_v46   ;;  %2728 = vst.msk [vmem:[#allocation0 + $0xe6] sm:$0xc] %vm2606_vm2, %v7507_v46  }
 0x170   :  { %2730 = vst.msk [vmem:[#allocation0 + $0xec] sm:$0x30] %vm2606_vm2, %v7507_v46   ;;  %2732 = vst.msk [vmem:[#allocation0 + $0xf2] sm:$0xc0] %vm2606_vm2, %v7507_v46  }
 0x171   :  { %v2008_v46 = vld [vmem:[#allocation1 + $0x200] ss:$8 sm:$0xf]   ;;  %v3625_v11 = vld [vmem:[#allocation1 + $0x341] ss:$8 sm:$0xf]  }
 0x172   :  { %v2010_v2 = vld [vmem:[#allocation1 + $0x200] ss:$8 sm:$0xf0]   ;;  %v3627_v13 = vld [vmem:[#allocation1 + $0x341] ss:$8 sm:$0xf0]  }
 0x173   :  { %v2012_v5 = vsel %vm1892_vm0, %v2010_v2, %v2008_v46  ;;  %v2023_v6 = vld [vmem:[#allocation1 + $0x240] ss:$8 sm:$0xf]   ;;  %v3642_v16 = vld [vmem:[#allocation1 + $0x381] ss:$8 sm:$0xf]   ;;  %v3629_v39 = vsel %vm1892_vm0, %v3627_v13, %v3625_v11  ;;  %v8017_v2 = vpop.permute.xlu1 %3062  }
 0x174   :  { %v2025_v7 = vld [vmem:[#allocation1 + $0x240] ss:$8 sm:$0xf0]   ;;  %2015 = vst.msk [vmem:[#allocation0 + $0x100] sm:$0x3] %vm1894_vm1, %v2012_v5   ;;  %3630 = vrot.lane.b32.xlu1 %v3629_v39, %s6474_s4 }
 0x175   :  { %2017 = vst.msk [vmem:[#allocation0 + $0x106] sm:$0xc] %vm1894_vm1, %v2012_v5   ;;  %2019 = vst.msk [vmem:[#allocation0 + $0x10c] sm:$0x30] %vm1894_vm1, %v2012_v5   ;;  %v2027_v15 = vsel %vm1892_vm0, %v2025_v7, %v2023_v6 }
 0x176   :  { %2021 = vst.msk [vmem:[#allocation0 + $0x112] sm:$0xc0] %vm1894_vm1, %v2012_v5   ;;  %v3644_v17 = vld [vmem:[#allocation1 + $0x381] ss:$8 sm:$0xf0]  }
 0x177   :  { %2743 = vst.msk [vmem:[#allocation0 + $0x100] sm:$0x3] %vm2606_vm2, %v7538_v62   ;;  %2745 = vst.msk [vmem:[#allocation0 + $0x106] sm:$0xc] %vm2606_vm2, %v7538_v62  }
 0x178   :  { %2747 = vst.msk [vmem:[#allocation0 + $0x10c] sm:$0x30] %vm2606_vm2, %v7538_v62   ;;  %2749 = vst.msk [vmem:[#allocation0 + $0x112] sm:$0xc0] %vm2606_vm2, %v7538_v62   ;;  %v3612_v62 = vsel %vm1892_vm0, %v3610_v1, %v3608_v0 }
 0x179   :  { %2030 = vst.msk [vmem:[#allocation0 + $0x120] sm:$0x3] %vm1894_vm1, %v2027_v15   ;;  %2032 = vst.msk [vmem:[#allocation0 + $0x126] sm:$0xc] %vm1894_vm1, %v2027_v15   ;;  %3613 = vrot.lane.b32.xlu0 %v3612_v62, %s6474_s4 }
 0x17a   :  { %2034 = vst.msk [vmem:[#allocation0 + $0x12c] sm:$0x30] %vm1894_vm1, %v2027_v15   ;;  %2036 = vst.msk [vmem:[#allocation0 + $0x132] sm:$0xc0] %vm1894_vm1, %v2027_v15  }
 0x17b   :  { %2760 = vst.msk [vmem:[#allocation0 + $0x120] sm:$0x3] %vm2606_vm2, %v7567_v12   ;;  %2762 = vst.msk [vmem:[#allocation0 + $0x126] sm:$0xc] %vm2606_vm2, %v7567_v12  }
 0x17c   :  { %2764 = vst.msk [vmem:[#allocation0 + $0x12c] sm:$0x30] %vm2606_vm2, %v7567_v12   ;;  %2766 = vst.msk [vmem:[#allocation0 + $0x132] sm:$0xc0] %vm2606_vm2, %v7567_v12  }
 0x17d   :  { %v2038_v12 = vld [vmem:[#allocation1 + $0x280] ss:$8 sm:$0xf]   ;;  %v3659_v22 = vld [vmem:[#allocation1 + $0x3c1] ss:$8 sm:$0xf]  }
 0x17e   :  { %v2040_v29 = vld [vmem:[#allocation1 + $0x280] ss:$8 sm:$0xf0]   ;;  %v3661_v24 = vld [vmem:[#allocation1 + $0x3c1] ss:$8 sm:$0xf0]  }
 0x17f   :  { %v2042_v18 = vsel %vm1892_vm0, %v2040_v29, %v2038_v12  ;;  %v2053_v19 = vld [vmem:[#allocation1 + $0x2c0] ss:$8 sm:$0xf]   ;;  %v3676_v27 = vld [vmem:[#allocation1 + $0x401] ss:$8 sm:$0xf]   ;;  %v3663_v47 = vsel %vm1892_vm0, %v3661_v24, %v3659_v22 }
 0x180   :  { %v2055_v21 = vld [vmem:[#allocation1 + $0x2c0] ss:$8 sm:$0xf0]   ;;  %2045 = vst.msk [vmem:[#allocation0 + $0x140] sm:$0x3] %vm1894_vm1, %v2042_v18   ;;  %3664 = vrot.lane.b32.xlu1 %v3663_v47, %s6474_s4  ;;  %v8086_v47 = vpop.permute.xlu1 %3096  }
 0x181   :  { %2047 = vst.msk [vmem:[#allocation0 + $0x146] sm:$0xc] %vm1894_vm1, %v2042_v18   ;;  %2049 = vst.msk [vmem:[#allocation0 + $0x14c] sm:$0x30] %vm1894_vm1, %v2042_v18   ;;  %v2057_v25 = vsel %vm1892_vm0, %v2055_v21, %v2053_v19 }
 0x182   :  { %2051 = vst.msk [vmem:[#allocation0 + $0x152] sm:$0xc0] %vm1894_vm1, %v2042_v18   ;;  %v3678_v31 = vld [vmem:[#allocation1 + $0x401] ss:$8 sm:$0xf0]   ;;  %v8054_v18 = vpop.permute.xlu0 %3079  }
 0x183   :  { %2777 = vst.msk [vmem:[#allocation0 + $0x140] sm:$0x3] %vm2606_vm2, %v7585_v20   ;;  %2779 = vst.msk [vmem:[#allocation0 + $0x146] sm:$0xc] %vm2606_vm2, %v7585_v20  }
 0x184   :  { %2781 = vst.msk [vmem:[#allocation0 + $0x14c] sm:$0x30] %vm2606_vm2, %v7585_v20   ;;  %2783 = vst.msk [vmem:[#allocation0 + $0x152] sm:$0xc0] %vm2606_vm2, %v7585_v20   ;;  %v3646_v20 = vsel %vm1892_vm0, %v3644_v17, %v3642_v16 }
 0x185   :  { %2060 = vst.msk [vmem:[#allocation0 + $0x160] sm:$0x3] %vm1894_vm1, %v2057_v25   ;;  %2062 = vst.msk [vmem:[#allocation0 + $0x166] sm:$0xc] %vm1894_vm1, %v2057_v25   ;;  %3647 = vrot.lane.b32.xlu0 %v3646_v20, %s6474_s4 }
 0x186   :  { %2064 = vst.msk [vmem:[#allocation0 + $0x16c] sm:$0x30] %vm1894_vm1, %v2057_v25   ;;  %2066 = vst.msk [vmem:[#allocation0 + $0x172] sm:$0xc0] %vm1894_vm1, %v2057_v25  }
 0x187   :  { %2794 = vst.msk [vmem:[#allocation0 + $0x160] sm:$0x3] %vm2606_vm2, %v7619_v36   ;;  %2796 = vst.msk [vmem:[#allocation0 + $0x166] sm:$0xc] %vm2606_vm2, %v7619_v36  }
 0x188   :  { %2798 = vst.msk [vmem:[#allocation0 + $0x16c] sm:$0x30] %vm2606_vm2, %v7619_v36   ;;  %2800 = vst.msk [vmem:[#allocation0 + $0x172] sm:$0xc0] %vm2606_vm2, %v7619_v36  }
 0x189   :  { %v2068_v36 = vld [vmem:[#allocation1 + $0x300] ss:$8 sm:$0xf]   ;;  %v3693_v37 = vld [vmem:[#allocation1 + $0x441] ss:$8 sm:$0xf]  }
 0x18a   :  { %v2070_v33 = vld [vmem:[#allocation1 + $0x300] ss:$8 sm:$0xf0]   ;;  %v3695_v38 = vld [vmem:[#allocation1 + $0x441] ss:$8 sm:$0xf0]  }
 0x18b   :  { %v2072_v60 = vsel %vm1892_vm0, %v2070_v33, %v2068_v36  ;;  %v2083_v34 = vld [vmem:[#allocation1 + $0x340] ss:$8 sm:$0xf]   ;;  %v3710_v43 = vld [vmem:[#allocation1 + $0x481] ss:$8 sm:$0xf]   ;;  %v3697_v49 = vsel %vm1892_vm0, %v3695_v38, %v3693_v37 }
 0x18c   :  { %v2085_v35 = vld [vmem:[#allocation1 + $0x340] ss:$8 sm:$0xf0]   ;;  %2075 = vst.msk [vmem:[#allocation0 + $0x180] sm:$0x3] %vm1894_vm1, %v2072_v60   ;;  %3698 = vrot.lane.b32.xlu1 %v3697_v49, %s6474_s4 }
 0x18d   :  { %2077 = vst.msk [vmem:[#allocation0 + $0x186] sm:$0xc] %vm1894_vm1, %v2072_v60   ;;  %2079 = vst.msk [vmem:[#allocation0 + $0x18c] sm:$0x30] %vm1894_vm1, %v2072_v60   ;;  %v2087_v41 = vsel %vm1892_vm0, %v2085_v35, %v2083_v34 }
 0x18e   :  { %2081 = vst.msk [vmem:[#allocation0 + $0x192] sm:$0xc0] %vm1894_vm1, %v2072_v60   ;;  %v3712_v44 = vld [vmem:[#allocation1 + $0x481] ss:$8 sm:$0xf0]  }
 0x18f   :  { %2811 = vst.msk [vmem:[#allocation0 + $0x180] sm:$0x3] %vm2606_vm2, %v7650_v53   ;;  %2813 = vst.msk [vmem:[#allocation0 + $0x186] sm:$0xc] %vm2606_vm2, %v7650_v53  }
 0x190   :  { %2815 = vst.msk [vmem:[#allocation0 + $0x18c] sm:$0x30] %vm2606_vm2, %v7650_v53   ;;  %2817 = vst.msk [vmem:[#allocation0 + $0x192] sm:$0xc0] %vm2606_vm2, %v7650_v53   ;;  %v3680_v53 = vsel %vm1892_vm0, %v3678_v31, %v3676_v27 }
 0x191   :  { %2090 = vst.msk [vmem:[#allocation0 + $0x1a0] sm:$0x3] %vm1894_vm1, %v2087_v41   ;;  %2092 = vst.msk [vmem:[#allocation0 + $0x1a6] sm:$0xc] %vm1894_vm1, %v2087_v41   ;;  %3681 = vrot.lane.b32.xlu0 %v3680_v53, %s6474_s4 }
 0x192   :  { %2094 = vst.msk [vmem:[#allocation0 + $0x1ac] sm:$0x30] %vm1894_vm1, %v2087_v41   ;;  %2096 = vst.msk [vmem:[#allocation0 + $0x1b2] sm:$0xc0] %vm1894_vm1, %v2087_v41  }
 0x193   :  { %2828 = vst.msk [vmem:[#allocation0 + $0x1a0] sm:$0x3] %vm2606_vm2, %v7679_v4   ;;  %2830 = vst.msk [vmem:[#allocation0 + $0x1a6] sm:$0xc] %vm2606_vm2, %v7679_v4  }
 0x194   :  { %2832 = vst.msk [vmem:[#allocation0 + $0x1ac] sm:$0x30] %vm2606_vm2, %v7679_v4   ;;  %2834 = vst.msk [vmem:[#allocation0 + $0x1b2] sm:$0xc0] %vm2606_vm2, %v7679_v4  }
 0x195   :  { %v2098_v4 = vld [vmem:[#allocation1 + $0x380] ss:$8 sm:$0xf]   ;;  %v3727_v54 = vld [vmem:[#allocation1 + $0x4c1] ss:$8 sm:$0xf]  }
 0x196   :  { %v2100_v48 = vld [vmem:[#allocation1 + $0x380] ss:$8 sm:$0xf0]   ;;  %v3729_v55 = vld [vmem:[#allocation1 + $0x4c1] ss:$8 sm:$0xf0]  }
 0x197   :  { %v2102_v10 = vsel %vm1892_vm0, %v2100_v48, %v2098_v4  ;;  %v2113_v23 = vld [vmem:[#allocation1 + $0x3c0] ss:$8 sm:$0xf]   ;;  %v3744_v59 = vld [vmem:[#allocation1 + $0x501] ss:$8 sm:$0xf]   ;;  %v3731_v0 = vsel %vm1892_vm0, %v3729_v55, %v3727_v54 }
 0x198   :  { %v2115_v50 = vld [vmem:[#allocation1 + $0x3c0] ss:$8 sm:$0xf0]   ;;  %2105 = vst.msk [vmem:[#allocation0 + $0x1c0] sm:$0x3] %vm1894_vm1, %v2102_v10   ;;  %3732 = vrot.lane.b32.xlu1 %v3731_v0, %s6474_s4 }
 0x199   :  { %2107 = vst.msk [vmem:[#allocation0 + $0x1c6] sm:$0xc] %vm1894_vm1, %v2102_v10   ;;  %2109 = vst.msk [vmem:[#allocation0 + $0x1cc] sm:$0x30] %vm1894_vm1, %v2102_v10   ;;  %v2117_v56 = vsel %vm1892_vm0, %v2115_v50, %v2113_v23 }
 0x19a   :  { %2111 = vst.msk [vmem:[#allocation0 + $0x1d2] sm:$0xc0] %vm1894_vm1, %v2102_v10   ;;  %v3746_v61 = vld [vmem:[#allocation1 + $0x501] ss:$8 sm:$0xf0]  }
 0x19b   :  { %2845 = vst.msk [vmem:[#allocation0 + $0x1c0] sm:$0x3] %vm2606_vm2, %v7697_v14   ;;  %2847 = vst.msk [vmem:[#allocation0 + $0x1c6] sm:$0xc] %vm2606_vm2, %v7697_v14  }
 0x19c   :  { %2849 = vst.msk [vmem:[#allocation0 + $0x1cc] sm:$0x30] %vm2606_vm2, %v7697_v14   ;;  %2851 = vst.msk [vmem:[#allocation0 + $0x1d2] sm:$0xc0] %vm2606_vm2, %v7697_v14   ;;  %v3714_v14 = vsel %vm1892_vm0, %v3712_v44, %v3710_v43  ;;  %v8113_v44 = vpop.permute.xlu0 %3113  }
 0x19d   :  { %2120 = vst.msk [vmem:[#allocation0 + $0x1e0] sm:$0x3] %vm1894_vm1, %v2117_v56   ;;  %2122 = vst.msk [vmem:[#allocation0 + $0x1e6] sm:$0xc] %vm1894_vm1, %v2117_v56   ;;  %3715 = vrot.lane.b32.xlu0 %v3714_v14, %s6474_s4 }
 0x19e   :  { %2124 = vst.msk [vmem:[#allocation0 + $0x1ec] sm:$0x30] %vm1894_vm1, %v2117_v56   ;;  %2126 = vst.msk [vmem:[#allocation0 + $0x1f2] sm:$0xc0] %vm1894_vm1, %v2117_v56  }
 0x19f   :  { %2862 = vst.msk [vmem:[#allocation0 + $0x1e0] sm:$0x3] %vm2606_vm2, %v7731_v30   ;;  %2864 = vst.msk [vmem:[#allocation0 + $0x1e6] sm:$0xc] %vm2606_vm2, %v7731_v30  }
 0x1a0   :  { %2866 = vst.msk [vmem:[#allocation0 + $0x1ec] sm:$0x30] %vm2606_vm2, %v7731_v30   ;;  %2868 = vst.msk [vmem:[#allocation0 + $0x1f2] sm:$0xc0] %vm2606_vm2, %v7731_v30  }
 0x1a1   :  { %v2128_v30 = vld [vmem:[#allocation1 + $0x400] ss:$8 sm:$0xf]   ;;  %v3761_v3 = vld [vmem:[#allocation1 + $0x541] ss:$8 sm:$0xf]  }
 0x1a2   :  { %v2130_v63 = vld [vmem:[#allocation1 + $0x400] ss:$8 sm:$0xf0]   ;;  %v3763_v5 = vld [vmem:[#allocation1 + $0x541] ss:$8 sm:$0xf0]  }
 0x1a3   :  { %v2132_v1 = vsel %vm1892_vm0, %v2130_v63, %v2128_v30  ;;  %v2143_v32 = vld [vmem:[#allocation1 + $0x440] ss:$8 sm:$0xf]   ;;  %v3778_v7 = vld [vmem:[#allocation1 + $0x581] ss:$8 sm:$0xf]   ;;  %v3765_v15 = vsel %vm1892_vm0, %v3763_v5, %v3761_v3 }
 0x1a4   :  { %v2145_v46 = vld [vmem:[#allocation1 + $0x440] ss:$8 sm:$0xf0]   ;;  %2135 = vst.msk [vmem:[#allocation0 + $0x200] sm:$0x3] %vm1894_vm1, %v2132_v1   ;;  %3766 = vrot.lane.b32.xlu1 %v3765_v15, %s6474_s4 }
 0x1a5   :  { %2137 = vst.msk [vmem:[#allocation0 + $0x206] sm:$0xc] %vm1894_vm1, %v2132_v1   ;;  %2139 = vst.msk [vmem:[#allocation0 + $0x20c] sm:$0x30] %vm1894_vm1, %v2132_v1   ;;  %v2147_v6 = vsel %vm1892_vm0, %v2145_v46, %v2143_v32 }
 0x1a6   :  { %2141 = vst.msk [vmem:[#allocation0 + $0x212] sm:$0xc0] %vm1894_vm1, %v2132_v1   ;;  %v3780_v11 = vld [vmem:[#allocation1 + $0x581] ss:$8 sm:$0xf0]  }
 0x1a7   :  { %2879 = vst.msk [vmem:[#allocation0 + $0x200] sm:$0x3] %vm2606_vm2, %v7741_v40   ;;  %2881 = vst.msk [vmem:[#allocation0 + $0x206] sm:$0xc] %vm2606_vm2, %v7741_v40  }
 0x1a8   :  { %2883 = vst.msk [vmem:[#allocation0 + $0x20c] sm:$0x30] %vm2606_vm2, %v7741_v40   ;;  %2885 = vst.msk [vmem:[#allocation0 + $0x212] sm:$0xc0] %vm2606_vm2, %v7741_v40   ;;  %v3748_v40 = vsel %vm1892_vm0, %v3746_v61, %v3744_v59  ;;  %v8145_v59 = vpop.permute.xlu1 %3130  }
 0x1a9   :  { %2150 = vst.msk [vmem:[#allocation0 + $0x220] sm:$0x3] %vm1894_vm1, %v2147_v6   ;;  %2152 = vst.msk [vmem:[#allocation0 + $0x226] sm:$0xc] %vm1894_vm1, %v2147_v6   ;;  %3749 = vrot.lane.b32.xlu0 %v3748_v40, %s6474_s4  ;;  %v8182_v40 = vpop.permute.xlu0 %3147  }
 0x1aa   :  { %2154 = vst.msk [vmem:[#allocation0 + $0x22c] sm:$0x30] %vm1894_vm1, %v2147_v6   ;;  %2156 = vst.msk [vmem:[#allocation0 + $0x232] sm:$0xc0] %vm1894_vm1, %v2147_v6  }
 0x1ab   :  { %2896 = vst.msk [vmem:[#allocation0 + $0x220] sm:$0x3] %vm2606_vm2, %v7746_v51   ;;  %2898 = vst.msk [vmem:[#allocation0 + $0x226] sm:$0xc] %vm2606_vm2, %v7746_v51  }
 0x1ac   :  { %2900 = vst.msk [vmem:[#allocation0 + $0x22c] sm:$0x30] %vm2606_vm2, %v7746_v51   ;;  %2902 = vst.msk [vmem:[#allocation0 + $0x232] sm:$0xc0] %vm2606_vm2, %v7746_v51  }
 0x1ad   :  { %v2158_v51 = vld [vmem:[#allocation1 + $0x480] ss:$8 sm:$0xf]   ;;  %v3795_v12 = vld [vmem:[#allocation1 + $0x5c1] ss:$8 sm:$0xf]  }
 0x1ae   :  { %v2160_v13 = vld [vmem:[#allocation1 + $0x480] ss:$8 sm:$0xf0]   ;;  %v3797_v29 = vld [vmem:[#allocation1 + $0x5c1] ss:$8 sm:$0xf0]  }
 0x1af   :  { %v2162_v16 = vsel %vm1892_vm0, %v2160_v13, %v2158_v51  ;;  %v2173_v17 = vld [vmem:[#allocation1 + $0x4c0] ss:$8 sm:$0xf]   ;;  %v3812_v19 = vld [vmem:[#allocation1 + $0x601] ss:$8 sm:$0xf]   ;;  %v3799_v24 = vsel %vm1892_vm0, %v3797_v29, %v3795_v12 }
 0x1b0   :  { %v2175_v62 = vld [vmem:[#allocation1 + $0x4c0] ss:$8 sm:$0xf0]   ;;  %2165 = vst.msk [vmem:[#allocation0 + $0x240] sm:$0x3] %vm1894_vm1, %v2162_v16   ;;  %3800 = vrot.lane.b32.xlu1 %v3799_v24, %s6474_s4 }
 0x1b1   :  { %2167 = vst.msk [vmem:[#allocation0 + $0x246] sm:$0xc] %vm1894_vm1, %v2162_v16   ;;  %2169 = vst.msk [vmem:[#allocation0 + $0x24c] sm:$0x30] %vm1894_vm1, %v2162_v16   ;;  %v2177_v39 = vsel %vm1892_vm0, %v2175_v62, %v2173_v17 }
 0x1b2   :  { %2171 = vst.msk [vmem:[#allocation0 + $0x252] sm:$0xc0] %vm1894_vm1, %v2162_v16   ;;  %v3814_v21 = vld [vmem:[#allocation1 + $0x601] ss:$8 sm:$0xf0]  }
 0x1b3   :  { %2913 = vst.msk [vmem:[#allocation0 + $0x240] sm:$0x3] %vm2606_vm2, %v7754_v58   ;;  %2915 = vst.msk [vmem:[#allocation0 + $0x246] sm:$0xc] %vm2606_vm2, %v7754_v58  }
 0x1b4   :  { %2917 = vst.msk [vmem:[#allocation0 + $0x24c] sm:$0x30] %vm2606_vm2, %v7754_v58   ;;  %2919 = vst.msk [vmem:[#allocation0 + $0x252] sm:$0xc0] %vm2606_vm2, %v7754_v58   ;;  %v3782_v58 = vsel %vm1892_vm0, %v3780_v11, %v3778_v7 }
 0x1b5   :  { %2180 = vst.msk [vmem:[#allocation0 + $0x260] sm:$0x3] %vm1894_vm1, %v2177_v39   ;;  %2182 = vst.msk [vmem:[#allocation0 + $0x266] sm:$0xc] %vm1894_vm1, %v2177_v39   ;;  %3783 = vrot.lane.b32.xlu0 %v3782_v58, %s6474_s4 }
 0x1b6   :  { %2184 = vst.msk [vmem:[#allocation0 + $0x26c] sm:$0x30] %vm1894_vm1, %v2177_v39   ;;  %2186 = vst.msk [vmem:[#allocation0 + $0x272] sm:$0xc0] %vm1894_vm1, %v2177_v39  }
 0x1b7   :  { %2930 = vst.msk [vmem:[#allocation0 + $0x260] sm:$0x3] %vm2606_vm2, %v7761_v9   ;;  %2932 = vst.msk [vmem:[#allocation0 + $0x266] sm:$0xc] %vm2606_vm2, %v7761_v9  }
 0x1b8   :  { %2934 = vst.msk [vmem:[#allocation0 + $0x26c] sm:$0x30] %vm2606_vm2, %v7761_v9   ;;  %2936 = vst.msk [vmem:[#allocation0 + $0x272] sm:$0xc0] %vm2606_vm2, %v7761_v9  }
 0x1b9   :  { %v2188_v9 = vld [vmem:[#allocation1 + $0x500] ss:$8 sm:$0xf]   ;;  %v3829_v20 = vld [vmem:[#allocation1 + $0x641] ss:$8 sm:$0xf]  }
 0x1ba   :  { %v2190_v22 = vld [vmem:[#allocation1 + $0x500] ss:$8 sm:$0xf0]   ;;  %v3831_v36 = vld [vmem:[#allocation1 + $0x641] ss:$8 sm:$0xf0]  }
 0x1bb   :  { %v2192_v25 = vsel %vm1892_vm0, %v2190_v22, %v2188_v9  ;;  %v2203_v27 = vld [vmem:[#allocation1 + $0x540] ss:$8 sm:$0xf]   ;;  %v3846_v60 = vld [vmem:[#allocation1 + $0x681] ss:$8 sm:$0xf]   ;;  %v3833_v37 = vsel %vm1892_vm0, %v3831_v36, %v3829_v20  ;;  %v8241_v36 = vpop.permute.xlu0 %3181  }
 0x1bc   :  { %v2205_v31 = vld [vmem:[#allocation1 + $0x540] ss:$8 sm:$0xf0]   ;;  %2195 = vst.msk [vmem:[#allocation0 + $0x280] sm:$0x3] %vm1894_vm1, %v2192_v25   ;;  %3834 = vrot.lane.b32.xlu1 %v3833_v37, %s6474_s4 }
 0x1bd   :  { %2197 = vst.msk [vmem:[#allocation0 + $0x286] sm:$0xc] %vm1894_vm1, %v2192_v25   ;;  %2199 = vst.msk [vmem:[#allocation0 + $0x28c] sm:$0x30] %vm1894_vm1, %v2192_v25   ;;  %v2207_v33 = vsel %vm1892_vm0, %v2205_v31, %v2203_v27 }
 0x1be   :  { %2201 = vst.msk [vmem:[#allocation0 + $0x292] sm:$0xc0] %vm1894_vm1, %v2192_v25   ;;  %v3848_v34 = vld [vmem:[#allocation1 + $0x681] ss:$8 sm:$0xf0]  }
 0x1bf   :  { %2947 = vst.msk [vmem:[#allocation0 + $0x280] sm:$0x3] %vm2606_vm2, %v7798_v28   ;;  %2949 = vst.msk [vmem:[#allocation0 + $0x286] sm:$0xc] %vm2606_vm2, %v7798_v28  }
 0x1c0   :  { %2951 = vst.msk [vmem:[#allocation0 + $0x28c] sm:$0x30] %vm2606_vm2, %v7798_v28   ;;  %2953 = vst.msk [vmem:[#allocation0 + $0x292] sm:$0xc0] %vm2606_vm2, %v7798_v28   ;;  %v3816_v28 = vsel %vm1892_vm0, %v3814_v21, %v3812_v19  ;;  %v8214_v21 = vpop.permute.xlu1 %3164  }
 0x1c1   :  { %2210 = vst.msk [vmem:[#allocation0 + $0x2a0] sm:$0x3] %vm1894_vm1, %v2207_v33   ;;  %2212 = vst.msk [vmem:[#allocation0 + $0x2a6] sm:$0xc] %vm1894_vm1, %v2207_v33   ;;  %3817 = vrot.lane.b32.xlu0 %v3816_v28, %s6474_s4 }
 0x1c2   :  { %2214 = vst.msk [vmem:[#allocation0 + $0x2ac] sm:$0x30] %vm1894_vm1, %v2207_v33   ;;  %2216 = vst.msk [vmem:[#allocation0 + $0x2b2] sm:$0xc0] %vm1894_vm1, %v2207_v33  }
 0x1c3   :  { %2964 = vst.msk [vmem:[#allocation0 + $0x2a0] sm:$0x3] %vm2606_vm2, %v7830_v45   ;;  %2966 = vst.msk [vmem:[#allocation0 + $0x2a6] sm:$0xc] %vm2606_vm2, %v7830_v45  }
 0x1c4   :  { %2968 = vst.msk [vmem:[#allocation0 + $0x2ac] sm:$0x30] %vm2606_vm2, %v7830_v45   ;;  %2970 = vst.msk [vmem:[#allocation0 + $0x2b2] sm:$0xc0] %vm2606_vm2, %v7830_v45  }
 0x1c5   :  { %v2218_v45 = vld [vmem:[#allocation1 + $0x580] ss:$8 sm:$0xf]   ;;  %v3863_v53 = vld [vmem:[#allocation1 + $0x6c1] ss:$8 sm:$0xf]  }
 0x1c6   :  { %v2220_v35 = vld [vmem:[#allocation1 + $0x580] ss:$8 sm:$0xf0]   ;;  %v3865_v4 = vld [vmem:[#allocation1 + $0x6c1] ss:$8 sm:$0xf0]  }
 0x1c7   :  { %v2222_v38 = vsel %vm1892_vm0, %v2220_v35, %v2218_v45  ;;  %v2233_v41 = vld [vmem:[#allocation1 + $0x5c0] ss:$8 sm:$0xf]   ;;  %v3880_v49 = vld [vmem:[#allocation1 + $0x701] ss:$8 sm:$0xf]   ;;  %v3867_v50 = vsel %vm1892_vm0, %v3865_v4, %v3863_v53  ;;  %v3199_v53 = vpop.permute.xlu1 %3198  }
 0x1c8   :  { %v2235_v43 = vld [vmem:[#allocation1 + $0x5c0] ss:$8 sm:$0xf0]   ;;  %2225 = vst.msk [vmem:[#allocation0 + $0x2c0] sm:$0x3] %vm1894_vm1, %v2222_v38   ;;  %3868 = vrot.lane.b32.xlu1 %v3867_v50, %s6474_s4 }
 0x1c9   :  { %2227 = vst.msk [vmem:[#allocation0 + $0x2c6] sm:$0xc] %vm1894_vm1, %v2222_v38   ;;  %2229 = vst.msk [vmem:[#allocation0 + $0x2cc] sm:$0x30] %vm1894_vm1, %v2222_v38   ;;  %v2237_v48 = vsel %vm1892_vm0, %v2235_v43, %v2233_v41 }
 0x1ca   :  { %2231 = vst.msk [vmem:[#allocation0 + $0x2d2] sm:$0xc0] %vm1894_vm1, %v2222_v38   ;;  %v3882_v10 = vld [vmem:[#allocation1 + $0x701] ss:$8 sm:$0xf0]  }
 0x1cb   :  { %2981 = vst.msk [vmem:[#allocation0 + $0x2c0] sm:$0x3] %vm2606_vm2, %v7857_v57   ;;  %2983 = vst.msk [vmem:[#allocation0 + $0x2c6] sm:$0xc] %vm2606_vm2, %v7857_v57  }
 0x1cc   :  { %2985 = vst.msk [vmem:[#allocation0 + $0x2cc] sm:$0x30] %vm2606_vm2, %v7857_v57   ;;  %2987 = vst.msk [vmem:[#allocation0 + $0x2d2] sm:$0xc0] %vm2606_vm2, %v7857_v57   ;;  %v3850_v57 = vsel %vm1892_vm0, %v3848_v34, %v3846_v60 }
 0x1cd   :  { %2240 = vst.msk [vmem:[#allocation0 + $0x2e0] sm:$0x3] %vm1894_vm1, %v2237_v48   ;;  %2242 = vst.msk [vmem:[#allocation0 + $0x2e6] sm:$0xc] %vm1894_vm1, %v2237_v48   ;;  %3851 = vrot.lane.b32.xlu0 %v3850_v57, %s6474_s4 }
 0x1ce   :  { %2244 = vst.msk [vmem:[#allocation0 + $0x2ec] sm:$0x30] %vm1894_vm1, %v2237_v48   ;;  %2246 = vst.msk [vmem:[#allocation0 + $0x2f2] sm:$0xc0] %vm1894_vm1, %v2237_v48  }
 0x1cf   :  { %2998 = vst.msk [vmem:[#allocation0 + $0x2e0] sm:$0x3] %vm2606_vm2, %v7889_v8   ;;  %3000 = vst.msk [vmem:[#allocation0 + $0x2e6] sm:$0xc] %vm2606_vm2, %v7889_v8  }
 0x1d0   :  { %3002 = vst.msk [vmem:[#allocation0 + $0x2ec] sm:$0x30] %vm2606_vm2, %v7889_v8   ;;  %3004 = vst.msk [vmem:[#allocation0 + $0x2f2] sm:$0xc0] %vm2606_vm2, %v7889_v8  }
 0x1d1   :  { %v2248_v8 = vld [vmem:[#allocation1 + $0x600] ss:$8 sm:$0xf]   ;;  %v3897_v61 = vld [vmem:[#allocation1 + $0x741] ss:$8 sm:$0xf]  }
 0x1d2   :  { %v2250_v23 = vld [vmem:[#allocation1 + $0x600] ss:$8 sm:$0xf0]   ;;  %v3899_v14 = vld [vmem:[#allocation1 + $0x741] ss:$8 sm:$0xf0]  }
 0x1d3   :  { %v2252_v54 = vsel %vm1892_vm0, %v2250_v23, %v2248_v8  ;;  %v2263_v55 = vld [vmem:[#allocation1 + $0x640] ss:$8 sm:$0xf]   ;;  %v3914_v63 = vld [vmem:[#allocation1 + $0x781] ss:$8 sm:$0xf]   ;;  %v3901_v32 = vsel %vm1892_vm0, %v3899_v14, %v3897_v61 }
 0x1d4   :  { %v2265_v56 = vld [vmem:[#allocation1 + $0x640] ss:$8 sm:$0xf0]   ;;  %2255 = vst.msk [vmem:[#allocation0 + $0x300] sm:$0x3] %vm1894_vm1, %v2252_v54   ;;  %3902 = vrot.lane.b32.xlu1 %v3901_v32, %s6474_s4 }
 0x1d5   :  { %2257 = vst.msk [vmem:[#allocation0 + $0x306] sm:$0xc] %vm1894_vm1, %v2252_v54   ;;  %2259 = vst.msk [vmem:[#allocation0 + $0x30c] sm:$0x30] %vm1894_vm1, %v2252_v54   ;;  %v2267_v30 = vsel %vm1892_vm0, %v2265_v56, %v2263_v55 }
 0x1d6   :  { %2261 = vst.msk [vmem:[#allocation0 + $0x312] sm:$0xc0] %vm1894_vm1, %v2252_v54   ;;  %v3916_v0 = vld [vmem:[#allocation1 + $0x781] ss:$8 sm:$0xf0]  }
 0x1d7   :  { %3015 = vst.msk [vmem:[#allocation0 + $0x300] sm:$0x3] %vm2606_vm2, %v7926_v26   ;;  %3017 = vst.msk [vmem:[#allocation0 + $0x306] sm:$0xc] %vm2606_vm2, %v7926_v26  }
 0x1d8   :  { %3019 = vst.msk [vmem:[#allocation0 + $0x30c] sm:$0x30] %vm2606_vm2, %v7926_v26   ;;  %3021 = vst.msk [vmem:[#allocation0 + $0x312] sm:$0xc0] %vm2606_vm2, %v7926_v26   ;;  %v3884_v26 = vsel %vm1892_vm0, %v3882_v10, %v3880_v49 }
 0x1d9   :  { %2270 = vst.msk [vmem:[#allocation0 + $0x320] sm:$0x3] %vm1894_vm1, %v2267_v30   ;;  %2272 = vst.msk [vmem:[#allocation0 + $0x326] sm:$0xc] %vm1894_vm1, %v2267_v30   ;;  %3885 = vrot.lane.b32.xlu0 %v3884_v26, %s6474_s4 }
 0x1da   :  { %2274 = vst.msk [vmem:[#allocation0 + $0x32c] sm:$0x30] %vm1894_vm1, %v2267_v30   ;;  %2276 = vst.msk [vmem:[#allocation0 + $0x332] sm:$0xc0] %vm1894_vm1, %v2267_v30  }
 0x1db   :  { %3032 = vst.msk [vmem:[#allocation0 + $0x320] sm:$0x3] %vm2606_vm2, %v7958_v42   ;;  %3034 = vst.msk [vmem:[#allocation0 + $0x326] sm:$0xc] %vm2606_vm2, %v7958_v42  }
 0x1dc   :  { %3036 = vst.msk [vmem:[#allocation0 + $0x32c] sm:$0x30] %vm2606_vm2, %v7958_v42   ;;  %3038 = vst.msk [vmem:[#allocation0 + $0x332] sm:$0xc0] %vm2606_vm2, %v7958_v42  }
 0x1dd   :  { %v2278_v42 = vld [vmem:[#allocation1 + $0x680] ss:$8 sm:$0xf]   ;;  %v3931_v6 = vld [vmem:[#allocation1 + $0x7c1] ss:$8 sm:$0xf]  }
 0x1de   :  { %v2280_v1 = vld [vmem:[#allocation1 + $0x680] ss:$8 sm:$0xf0]   ;;  %v3933_v7 = vld [vmem:[#allocation1 + $0x7c1] ss:$8 sm:$0xf0]  }
 0x1df   :  { %v2282_v46 = vsel %vm1892_vm0, %v2280_v1, %v2278_v42  ;;  %v2293_v3 = vld [vmem:[#allocation1 + $0x6c0] ss:$8 sm:$0xf]   ;;  %v3948_v51 = vld [vmem:[#allocation1 + $0x801] ss:$8 sm:$0xf]   ;;  %v3935_v16 = vsel %vm1892_vm0, %v3933_v7, %v3931_v6 }
 0x1e0   :  { %v2295_v5 = vld [vmem:[#allocation1 + $0x6c0] ss:$8 sm:$0xf0]   ;;  %2285 = vst.msk [vmem:[#allocation0 + $0x340] sm:$0x3] %vm1894_vm1, %v2282_v46   ;;  %3936 = vrot.lane.b32.xlu1 %v3935_v16, %s6474_s4 }
 0x1e1   :  { %2287 = vst.msk [vmem:[#allocation0 + $0x346] sm:$0xc] %vm1894_vm1, %v2282_v46   ;;  %2289 = vst.msk [vmem:[#allocation0 + $0x34c] sm:$0x30] %vm1894_vm1, %v2282_v46   ;;  %v2297_v11 = vsel %vm1892_vm0, %v2295_v5, %v2293_v3 }
 0x1e2   :  { %2291 = vst.msk [vmem:[#allocation0 + $0x352] sm:$0xc0] %vm1894_vm1, %v2282_v46   ;;  %v3950_v13 = vld [vmem:[#allocation1 + $0x801] ss:$8 sm:$0xf0]  }
 0x1e3   :  { %3049 = vst.msk [vmem:[#allocation0 + $0x340] sm:$0x3] %vm2606_vm2, %v7985_v52   ;;  %3051 = vst.msk [vmem:[#allocation0 + $0x346] sm:$0xc] %vm2606_vm2, %v7985_v52  }
 0x1e4   :  { %3053 = vst.msk [vmem:[#allocation0 + $0x34c] sm:$0x30] %vm2606_vm2, %v7985_v52   ;;  %3055 = vst.msk [vmem:[#allocation0 + $0x352] sm:$0xc0] %vm2606_vm2, %v7985_v52   ;;  %v3918_v52 = vsel %vm1892_vm0, %v3916_v0, %v3914_v63  ;;  %v3216_v63 = vpop.permute.xlu0 %3215  }
 0x1e5   :  { %2300 = vst.msk [vmem:[#allocation0 + $0x360] sm:$0x3] %vm1894_vm1, %v2297_v11   ;;  %2302 = vst.msk [vmem:[#allocation0 + $0x366] sm:$0xc] %vm1894_vm1, %v2297_v11   ;;  %3919 = vrot.lane.b32.xlu0 %v3918_v52, %s6474_s4 }
 0x1e6   :  { %2304 = vst.msk [vmem:[#allocation0 + $0x36c] sm:$0x30] %vm1894_vm1, %v2297_v11   ;;  %2306 = vst.msk [vmem:[#allocation0 + $0x372] sm:$0xc0] %vm1894_vm1, %v2297_v11  }
 0x1e7   :  { %3066 = vst.msk [vmem:[#allocation0 + $0x360] sm:$0x3] %vm2606_vm2, %v8017_v2   ;;  %3068 = vst.msk [vmem:[#allocation0 + $0x366] sm:$0xc] %vm2606_vm2, %v8017_v2  }
 0x1e8   :  { %3070 = vst.msk [vmem:[#allocation0 + $0x36c] sm:$0x30] %vm2606_vm2, %v8017_v2   ;;  %3072 = vst.msk [vmem:[#allocation0 + $0x372] sm:$0xc0] %vm2606_vm2, %v8017_v2  }
 0x1e9   :  { %v2308_v2 = vld [vmem:[#allocation1 + $0x700] ss:$8 sm:$0xf]   ;;  %v3965_v29 = vld [vmem:[#allocation1 + $0x841] ss:$8 sm:$0xf]  }
 0x1ea   :  { %v2310_v15 = vld [vmem:[#allocation1 + $0x700] ss:$8 sm:$0xf0]   ;;  %v3967_v39 = vld [vmem:[#allocation1 + $0x841] ss:$8 sm:$0xf0]  }
 0x1eb   :  { %v2312_v17 = vsel %vm1892_vm0, %v2310_v15, %v2308_v2  ;;  %v2323_v62 = vld [vmem:[#allocation1 + $0x740] ss:$8 sm:$0xf]   ;;  %v3982_v58 = vld [vmem:[#allocation1 + $0x881] ss:$8 sm:$0xf]   ;;  %v3969_v25 = vsel %vm1892_vm0, %v3967_v39, %v3965_v29  ;;  %v3250_v39 = vpop.permute.xlu0 %3249  }
 0x1ec   :  { %v2325_v12 = vld [vmem:[#allocation1 + $0x740] ss:$8 sm:$0xf0]   ;;  %2315 = vst.msk [vmem:[#allocation0 + $0x380] sm:$0x3] %vm1894_vm1, %v2312_v17   ;;  %3970 = vrot.lane.b32.xlu1 %v3969_v25, %s6474_s4 }
 0x1ed   :  { %2317 = vst.msk [vmem:[#allocation0 + $0x386] sm:$0xc] %vm1894_vm1, %v2312_v17   ;;  %2319 = vst.msk [vmem:[#allocation0 + $0x38c] sm:$0x30] %vm1894_vm1, %v2312_v17   ;;  %v2327_v19 = vsel %vm1892_vm0, %v2325_v12, %v2323_v62 }
 0x1ee   :  { %2321 = vst.msk [vmem:[#allocation0 + $0x392] sm:$0xc0] %vm1894_vm1, %v2312_v17   ;;  %v3984_v9 = vld [vmem:[#allocation1 + $0x881] ss:$8 sm:$0xf0]  }
 0x1ef   :  { %3083 = vst.msk [vmem:[#allocation0 + $0x380] sm:$0x3] %vm2606_vm2, %v8054_v18   ;;  %3085 = vst.msk [vmem:[#allocation0 + $0x386] sm:$0xc] %vm2606_vm2, %v8054_v18   ;;  %v3986_v45 = vsel %vm1892_vm0, %v3984_v9, %v3982_v58 }
 0x1f0   :  { %3087 = vst.msk [vmem:[#allocation0 + $0x38c] sm:$0x30] %vm2606_vm2, %v8054_v18   ;;  %3089 = vst.msk [vmem:[#allocation0 + $0x392] sm:$0xc0] %vm2606_vm2, %v8054_v18   ;;  %v3952_v18 = vsel %vm1892_vm0, %v3950_v13, %v3948_v51 }
 0x1f1   :  { %2330 = vst.msk [vmem:[#allocation0 + $0x3a0] sm:$0x3] %vm1894_vm1, %v2327_v19   ;;  %2332 = vst.msk [vmem:[#allocation0 + $0x3a6] sm:$0xc] %vm1894_vm1, %v2327_v19   ;;  %3953 = vrot.lane.b32.xlu0 %v3952_v18, %s6474_s4 }
 0x1f2   :  { %2334 = vst.msk [vmem:[#allocation0 + $0x3ac] sm:$0x30] %vm1894_vm1, %v2327_v19   ;;  %2336 = vst.msk [vmem:[#allocation0 + $0x3b2] sm:$0xc0] %vm1894_vm1, %v2327_v19  }
 0x1f3   :  { %3100 = vst.msk [vmem:[#allocation0 + $0x3a0] sm:$0x3] %vm2606_vm2, %v8086_v47   ;;  %3102 = vst.msk [vmem:[#allocation0 + $0x3a6] sm:$0xc] %vm2606_vm2, %v8086_v47  }
 0x1f4   :  { %3104 = vst.msk [vmem:[#allocation0 + $0x3ac] sm:$0x30] %vm2606_vm2, %v8086_v47   ;;  %3106 = vst.msk [vmem:[#allocation0 + $0x3b2] sm:$0xc0] %vm2606_vm2, %v8086_v47  }
 0x1f5   :  { %v2338_v22 = vld [vmem:[#allocation1 + $0x780] ss:$8 sm:$0xf]   ;;  %v3999_v33 = vld [vmem:[#allocation1 + $0x8c1] ss:$8 sm:$0xf]   ;;  %3987 = vrot.lane.b32.xlu0 %v3986_v45, %s6474_s4 }
 0x1f6   :  { %v2340_v24 = vld [vmem:[#allocation1 + $0x780] ss:$8 sm:$0xf0]   ;;  %v4001_v47 = vld [vmem:[#allocation1 + $0x8c1] ss:$8 sm:$0xf0]  }
 0x1f7   :  { %v2342_v27 = vsel %vm1892_vm0, %v2340_v24, %v2338_v22  ;;  %v2353_v31 = vld [vmem:[#allocation1 + $0x7c0] ss:$8 sm:$0xf]   ;;  %v4016_v34 = vld [vmem:[#allocation1 + $0x901] ss:$8 sm:$0xf]   ;;  %v4003_v38 = vsel %vm1892_vm0, %v4001_v47, %v3999_v33 }
 0x1f8   :  { %v2355_v20 = vld [vmem:[#allocation1 + $0x7c0] ss:$8 sm:$0xf0]   ;;  %2345 = vst.msk [vmem:[#allocation0 + $0x3c0] sm:$0x3] %vm1894_vm1, %v2342_v27   ;;  %4004 = vrot.lane.b32.xlu1 %v4003_v38, %s6474_s4 }
 0x1f9   :  { %2347 = vst.msk [vmem:[#allocation0 + $0x3c6] sm:$0xc] %vm1894_vm1, %v2342_v27   ;;  %2349 = vst.msk [vmem:[#allocation0 + $0x3cc] sm:$0x30] %vm1894_vm1, %v2342_v27   ;;  %v2357_v60 = vsel %vm1892_vm0, %v2355_v20, %v2353_v31 }
 0x1fa   :  { %2351 = vst.msk [vmem:[#allocation0 + $0x3d2] sm:$0xc0] %vm1894_vm1, %v2342_v27   ;;  %v4018_v28 = vld [vmem:[#allocation1 + $0x901] ss:$8 sm:$0xf0]  }
 0x1fb   :  { %3117 = vst.msk [vmem:[#allocation0 + $0x3c0] sm:$0x3] %vm2606_vm2, %v8113_v44   ;;  %3119 = vst.msk [vmem:[#allocation0 + $0x3c6] sm:$0xc] %vm2606_vm2, %v8113_v44   ;;  %v4020_v8 = vsel %vm1892_vm0, %v4018_v28, %v4016_v34 }
 0x1fc   :  { %3121 = vst.msk [vmem:[#allocation0 + $0x3cc] sm:$0x30] %vm2606_vm2, %v8113_v44   ;;  %3123 = vst.msk [vmem:[#allocation0 + $0x3d2] sm:$0xc0] %vm2606_vm2, %v8113_v44   ;;  %4021 = vrot.lane.b32.xlu0 %v4020_v8, %s6474_s4 }
 0x1fd   :  { %2360 = vst.msk [vmem:[#allocation0 + $0x3e0] sm:$0x3] %vm1894_vm1, %v2357_v60   ;;  %2362 = vst.msk [vmem:[#allocation0 + $0x3e6] sm:$0xc] %vm1894_vm1, %v2357_v60  }
 0x1fe   :  { %2364 = vst.msk [vmem:[#allocation0 + $0x3ec] sm:$0x30] %vm1894_vm1, %v2357_v60   ;;  %2366 = vst.msk [vmem:[#allocation0 + $0x3f2] sm:$0xc0] %vm1894_vm1, %v2357_v60  }
 0x1ff   :  { %3134 = vst.msk [vmem:[#allocation0 + $0x3e0] sm:$0x3] %vm2606_vm2, %v8145_v59   ;;  %3136 = vst.msk [vmem:[#allocation0 + $0x3e6] sm:$0xc] %vm2606_vm2, %v8145_v59  }
 0x200   :  { %3138 = vst.msk [vmem:[#allocation0 + $0x3ec] sm:$0x30] %vm2606_vm2, %v8145_v59   ;;  %3140 = vst.msk [vmem:[#allocation0 + $0x3f2] sm:$0xc0] %vm2606_vm2, %v8145_v59  }
 0x201   :  { %v2368_v35 = vld [vmem:[#allocation1 + $0x800] ss:$8 sm:$0xf]   ;;  %v4033_v4 = vld [vmem:[#allocation1 + $0x941] ss:$8 sm:$0xf]  }
 0x202   :  { %v2370_v37 = vld [vmem:[#allocation1 + $0x800] ss:$8 sm:$0xf0]   ;;  %v4035_v48 = vld [vmem:[#allocation1 + $0x941] ss:$8 sm:$0xf0]  }
 0x203   :  { %v2372_v41 = vsel %vm1892_vm0, %v2370_v37, %v2368_v35  ;;  %v2383_v43 = vld [vmem:[#allocation1 + $0x840] ss:$8 sm:$0xf]   ;;  %v4050_v10 = vld [vmem:[#allocation1 + $0x981] ss:$8 sm:$0xf]   ;;  %v4037_v54 = vsel %vm1892_vm0, %v4035_v48, %v4033_v4 }
 0x204   :  { %v2385_v44 = vld [vmem:[#allocation1 + $0x840] ss:$8 sm:$0xf0]   ;;  %2375 = vst.msk [vmem:[#allocation0 + $0x400] sm:$0x3] %vm1894_vm1, %v2372_v41   ;;  %4038 = vrot.lane.b32.xlu1 %v4037_v54, %s6474_s4 }
 0x205   :  { %2377 = vst.msk [vmem:[#allocation0 + $0x406] sm:$0xc] %vm1894_vm1, %v2372_v41   ;;  %2379 = vst.msk [vmem:[#allocation0 + $0x40c] sm:$0x30] %vm1894_vm1, %v2372_v41   ;;  %v2387_v49 = vsel %vm1892_vm0, %v2385_v44, %v2383_v43 }
 0x206   :  { %2381 = vst.msk [vmem:[#allocation0 + $0x412] sm:$0xc0] %vm1894_vm1, %v2372_v41   ;;  %v4052_v57 = vld [vmem:[#allocation1 + $0x981] ss:$8 sm:$0xf0]  }
 0x207   :  { %3151 = vst.msk [vmem:[#allocation0 + $0x400] sm:$0x3] %vm2606_vm2, %v8182_v40   ;;  %3153 = vst.msk [vmem:[#allocation0 + $0x406] sm:$0xc] %vm2606_vm2, %v8182_v40   ;;  %v4054_v42 = vsel %vm1892_vm0, %v4052_v57, %v4050_v10 }
 0x208   :  { %3155 = vst.msk [vmem:[#allocation0 + $0x40c] sm:$0x30] %vm2606_vm2, %v8182_v40   ;;  %3157 = vst.msk [vmem:[#allocation0 + $0x412] sm:$0xc0] %vm2606_vm2, %v8182_v40   ;;  %v3233_v40 = vpop.permute.xlu1 %3232   ;;  %4055 = vrot.lane.b32.xlu0 %v4054_v42, %s6474_s4 }
 0x209   :  { %2390 = vst.msk [vmem:[#allocation0 + $0x420] sm:$0x3] %vm1894_vm1, %v2387_v49   ;;  %2392 = vst.msk [vmem:[#allocation0 + $0x426] sm:$0xc] %vm1894_vm1, %v2387_v49  }
 0x20a   :  { %2394 = vst.msk [vmem:[#allocation0 + $0x42c] sm:$0x30] %vm1894_vm1, %v2387_v49   ;;  %2396 = vst.msk [vmem:[#allocation0 + $0x432] sm:$0xc0] %vm1894_vm1, %v2387_v49  }
 0x20b   :  { %3168 = vst.msk [vmem:[#allocation0 + $0x420] sm:$0x3] %vm2606_vm2, %v8214_v21   ;;  %3170 = vst.msk [vmem:[#allocation0 + $0x426] sm:$0xc] %vm2606_vm2, %v8214_v21  }
 0x20c   :  { %3172 = vst.msk [vmem:[#allocation0 + $0x42c] sm:$0x30] %vm2606_vm2, %v8214_v21   ;;  %3174 = vst.msk [vmem:[#allocation0 + $0x432] sm:$0xc0] %vm2606_vm2, %v8214_v21   ;;  %v3267_v35 = vpop.permute.xlu1 %3266  }
 0x20d   :  { %v2398_v23 = vld [vmem:[#allocation1 + $0x880] ss:$8 sm:$0xf]   ;;  %v4067_v61 = vld [vmem:[#allocation1 + $0x9c1] ss:$8 sm:$0xf]  }
 0x20e   :  { %v2400_v50 = vld [vmem:[#allocation1 + $0x880] ss:$8 sm:$0xf0]   ;;  %v4069_v14 = vld [vmem:[#allocation1 + $0x9c1] ss:$8 sm:$0xf0]  }
 0x20f   :  { %v2402_v55 = vsel %vm1892_vm0, %v2400_v50, %v2398_v23  ;;  %v2413_v56 = vld [vmem:[#allocation1 + $0x8c0] ss:$8 sm:$0xf]   ;;  %v4084_v0 = vld [vmem:[#allocation1 + $0xa01] ss:$8 sm:$0xf]   ;;  %v4071_v46 = vsel %vm1892_vm0, %v4069_v14, %v4067_v61 }
 0x210   :  { %v2415_v59 = vld [vmem:[#allocation1 + $0x8c0] ss:$8 sm:$0xf0]   ;;  %2405 = vst.msk [vmem:[#allocation0 + $0x440] sm:$0x3] %vm1894_vm1, %v2402_v55   ;;  %4072 = vrot.lane.b32.xlu1 %v4071_v46, %s6474_s4 }
 0x211   :  { %2407 = vst.msk [vmem:[#allocation0 + $0x446] sm:$0xc] %vm1894_vm1, %v2402_v55   ;;  %2409 = vst.msk [vmem:[#allocation0 + $0x44c] sm:$0x30] %vm1894_vm1, %v2402_v55   ;;  %v2417_v30 = vsel %vm1892_vm0, %v2415_v59, %v2413_v56  ;;  %v2594_v23 = vld [vmem:[#allocation1 + $0xbc0] ss:$8 sm:%s7751_s10]   ;;  %v3284_v59 = vpop.permute.xlu0 %3283  }
 0x212   :  { %2411 = vst.msk [vmem:[#allocation0 + $0x452] sm:$0xc0] %vm1894_vm1, %v2402_v55   ;;  %v4086_v26 = vld [vmem:[#allocation1 + $0xa01] ss:$8 sm:$0xf0]  }
 0x213   :  { %3185 = vst.msk [vmem:[#allocation0 + $0x440] sm:$0x3] %vm2606_vm2, %v8241_v36   ;;  %3187 = vst.msk [vmem:[#allocation0 + $0x446] sm:$0xc] %vm2606_vm2, %v8241_v36   ;;  %v4088_v15 = vsel %vm1892_vm0, %v4086_v26, %v4084_v0  ;;  %v4204_v14 = vld [vmem:[#allocation1 + $0xbc1] ss:$8 sm:%s4203_s5]  }
 0x214   :  { %3189 = vst.msk [vmem:[#allocation0 + $0x44c] sm:$0x30] %vm2606_vm2, %v8241_v36   ;;  %3191 = vst.msk [vmem:[#allocation0 + $0x452] sm:$0xc0] %vm2606_vm2, %v8241_v36   ;;  %4089 = vrot.lane.b32.xlu0 %v4088_v15, %s6474_s4 }
 0x215   :  { %2420 = vst.msk [vmem:[#allocation0 + $0x460] sm:$0x3] %vm1894_vm1, %v2417_v30   ;;  %2422 = vst.msk [vmem:[#allocation0 + $0x466] sm:$0xc] %vm1894_vm1, %v2417_v30  }
 0x216   :  { %2424 = vst.msk [vmem:[#allocation0 + $0x46c] sm:$0x30] %vm1894_vm1, %v2417_v30   ;;  %2426 = vst.msk [vmem:[#allocation0 + $0x472] sm:$0xc0] %vm1894_vm1, %v2417_v30   ;;  %v3301_v30 = vpop.permute.xlu1 %3300  }
 0x217   :  { %3202 = vst.msk [vmem:[#allocation0 + $0x460] sm:$0x3] %vm2606_vm2, %v3199_v53   ;;  %3204 = vst.msk [vmem:[#allocation0 + $0x466] sm:$0xc] %vm2606_vm2, %v3199_v53  }
 0x218   :  { %3206 = vst.msk [vmem:[#allocation0 + $0x46c] sm:$0x30] %vm2606_vm2, %v3199_v53   ;;  %3208 = vst.msk [vmem:[#allocation0 + $0x472] sm:$0xc0] %vm2606_vm2, %v3199_v53  }
 0x219   :  { %v2428_v1 = vld [vmem:[#allocation1 + $0x900] ss:$8 sm:$0xf]   ;;  %v4101_v7 = vld [vmem:[#allocation1 + $0xa41] ss:$8 sm:$0xf]  }
 0x21a   :  { %v2430_v32 = vld [vmem:[#allocation1 + $0x900] ss:$8 sm:$0xf0]   ;;  %v4103_v11 = vld [vmem:[#allocation1 + $0xa41] ss:$8 sm:$0xf0]   ;;  %v3335_v0 = vpop.permute.xlu1 %3334  }
 0x21b   :  { %v2432_v3 = vsel %vm1892_vm0, %v2430_v32, %v2428_v1  ;;  %v2443_v5 = vld [vmem:[#allocation1 + $0x940] ss:$8 sm:$0xf]   ;;  %v4118_v13 = vld [vmem:[#allocation1 + $0xa81] ss:$8 sm:$0xf]   ;;  %v4105_v29 = vsel %vm1892_vm0, %v4103_v11, %v4101_v7 }
 0x21c   :  { %v2445_v6 = vld [vmem:[#allocation1 + $0x940] ss:$8 sm:$0xf0]   ;;  %2435 = vst.msk [vmem:[#allocation0 + $0x480] sm:$0x3] %vm1894_vm1, %v2432_v3   ;;  %4106 = vrot.lane.b32.xlu1 %v4105_v29, %s6474_s4 }
 0x21d   :  { %2437 = vst.msk [vmem:[#allocation0 + $0x486] sm:$0xc] %vm1894_vm1, %v2432_v3   ;;  %2439 = vst.msk [vmem:[#allocation0 + $0x48c] sm:$0x30] %vm1894_vm1, %v2432_v3   ;;  %v2447_v51 = vsel %vm1892_vm0, %v2445_v6, %v2443_v5 }
 0x21e   :  { %2441 = vst.msk [vmem:[#allocation0 + $0x492] sm:$0xc0] %vm1894_vm1, %v2432_v3   ;;  %v4120_v52 = vld [vmem:[#allocation1 + $0xa81] ss:$8 sm:$0xf0]   ;;  %v3369_v42 = vpop.permute.xlu1 %3368  }
 0x21f   :  { %3219 = vst.msk [vmem:[#allocation0 + $0x480] sm:$0x3] %vm2606_vm2, %v3216_v63   ;;  %3221 = vst.msk [vmem:[#allocation0 + $0x486] sm:$0xc] %vm2606_vm2, %v3216_v63   ;;  %v4122_v36 = vsel %vm1892_vm0, %v4120_v52, %v4118_v13 }
 0x220   :  { %3223 = vst.msk [vmem:[#allocation0 + $0x48c] sm:$0x30] %vm2606_vm2, %v3216_v63   ;;  %3225 = vst.msk [vmem:[#allocation0 + $0x492] sm:$0xc0] %vm2606_vm2, %v3216_v63   ;;  %4123 = vrot.lane.b32.xlu0 %v4122_v36, %s6474_s4  ;;  %v3318_v63 = vpop.permute.xlu0 %3317  }
 0x221   :  { %2450 = vst.msk [vmem:[#allocation0 + $0x4a0] sm:$0x3] %vm1894_vm1, %v2447_v51   ;;  %2452 = vst.msk [vmem:[#allocation0 + $0x4a6] sm:$0xc] %vm1894_vm1, %v2447_v51  }
 0x222   :  { %2454 = vst.msk [vmem:[#allocation0 + $0x4ac] sm:$0x30] %vm1894_vm1, %v2447_v51   ;;  %2456 = vst.msk [vmem:[#allocation0 + $0x4b2] sm:$0xc0] %vm1894_vm1, %v2447_v51   ;;  %v3400_v32 = vpop.permute.xlu1 %3399  }
 0x223   :  { %v2458_v2 = vld [vmem:[#allocation1 + $0x980] ss:$8 sm:$0xf]   ;;  %v4135_v16 = vld [vmem:[#allocation1 + $0xac1] ss:$8 sm:$0xf]  }
 0x224   :  { %v4137_v17 = vld [vmem:[#allocation1 + $0xac1] ss:$8 sm:$0xf0]   ;;  %3236 = vst.msk [vmem:[#allocation0 + $0x4a0] sm:$0x3] %vm2606_vm2, %v3233_v40   ;;  %v3352_v26 = vpop.permute.xlu0 %3351  }
 0x225   :  { %3238 = vst.msk [vmem:[#allocation0 + $0x4a6] sm:$0xc] %vm2606_vm2, %v3233_v40   ;;  %3240 = vst.msk [vmem:[#allocation0 + $0x4ac] sm:$0x30] %vm2606_vm2, %v3233_v40   ;;  %v4139_v45 = vsel %vm1892_vm0, %v4137_v17, %v4135_v16 }
 0x226   :  { %3242 = vst.msk [vmem:[#allocation0 + $0x4b2] sm:$0xc0] %vm2606_vm2, %v3233_v40   ;;  %v2460_v62 = vld [vmem:[#allocation1 + $0x980] ss:$8 sm:$0xf0]   ;;  %4140 = vrot.lane.b32.xlu1 %v4139_v45, %s6474_s4  ;;  %v3427_v3 = vpop.permute.xlu1 %3426  }
 0x227   :  { %v2473_v12 = vld [vmem:[#allocation1 + $0x9c0] ss:$8 sm:$0xf]   ;;  %v2462_v19 = vsel %vm1892_vm0, %v2460_v62, %v2458_v2  ;;  %v4152_v24 = vld [vmem:[#allocation1 + $0xb01] ss:$8 sm:$0xf]  }
 0x228   :  { %v2475_v21 = vld [vmem:[#allocation1 + $0x9c0] ss:$8 sm:$0xf0]   ;;  %2465 = vst.msk [vmem:[#allocation0 + $0x4c0] sm:$0x3] %vm1894_vm1, %v2462_v19   ;;  %v3386_v1 = vpop.permute.xlu0 %3385  }
 0x229   :  { %v2488_v58 = vld [vmem:[#allocation1 + $0xa00] ss:$8 sm:$0xf]   ;;  %2467 = vst.msk [vmem:[#allocation0 + $0x4c6] sm:$0xc] %vm1894_vm1, %v2462_v19   ;;  %v2477_v9 = vsel %vm1892_vm0, %v2475_v21, %v2473_v12 }
 0x22a   :  { %2469 = vst.msk [vmem:[#allocation0 + $0x4cc] sm:$0x30] %vm1894_vm1, %v2462_v19   ;;  %2471 = vst.msk [vmem:[#allocation0 + $0x4d2] sm:$0xc0] %vm1894_vm1, %v2462_v19   ;;  %v3461_v6 = vpop.permute.xlu1 %3460  }
 0x22b   :  { %v2490_v18 = vld [vmem:[#allocation1 + $0xa00] ss:$8 sm:$0xf0]   ;;  %v4154_v25 = vld [vmem:[#allocation1 + $0xb01] ss:$8 sm:$0xf0]  }
 0x22c   :  { %v2503_v22 = vld [vmem:[#allocation1 + $0xa40] ss:$8 sm:$0xf]   ;;  %3253 = vst.msk [vmem:[#allocation0 + $0x4c0] sm:$0x3] %vm2606_vm2, %v3250_v39   ;;  %v2492_v27 = vsel %vm1892_vm0, %v2490_v18, %v2488_v58  ;;  %v4156_v10 = vsel %vm1892_vm0, %v4154_v25, %v4152_v24  ;;  %v3411_v46 = vpop.permute.xlu0 %3410  }
 0x22d   :  { %3255 = vst.msk [vmem:[#allocation0 + $0x4c6] sm:$0xc] %vm2606_vm2, %v3250_v39   ;;  %3257 = vst.msk [vmem:[#allocation0 + $0x4cc] sm:$0x30] %vm2606_vm2, %v3250_v39   ;;  %4157 = vrot.lane.b32.xlu0 %v4156_v10, %s6474_s4 }
 0x22e   :  { %3259 = vst.msk [vmem:[#allocation0 + $0x4d2] sm:$0xc0] %vm2606_vm2, %v3250_v39   ;;  %v2505_v31 = vld [vmem:[#allocation1 + $0xa40] ss:$8 sm:$0xf0]   ;;  %v3495_v15 = vpop.permute.xlu1 %3494  }
 0x22f   :  { %2480 = vst.msk [vmem:[#allocation0 + $0x4e0] sm:$0x3] %vm1894_vm1, %v2477_v9   ;;  %2482 = vst.msk [vmem:[#allocation0 + $0x4e6] sm:$0xc] %vm1894_vm1, %v2477_v9   ;;  %v2507_v60 = vsel %vm1892_vm0, %v2505_v31, %v2503_v22 }
 0x230   :  { %2484 = vst.msk [vmem:[#allocation0 + $0x4ec] sm:$0x30] %vm1894_vm1, %v2477_v9   ;;  %2486 = vst.msk [vmem:[#allocation0 + $0x4f2] sm:$0xc0] %vm1894_vm1, %v2477_v9   ;;  %v3444_v5 = vpop.permute.xlu0 %3443  }
 0x231   :  { %v2518_v20 = vld [vmem:[#allocation1 + $0xa80] ss:$8 sm:$0xf]   ;;  %v4169_v33 = vld [vmem:[#allocation1 + $0xb41] ss:$8 sm:$0xf]  }
 0x232   :  { %v4171_v47 = vld [vmem:[#allocation1 + $0xb41] ss:$8 sm:$0xf0]   ;;  %2495 = vst.msk [vmem:[#allocation0 + $0x500] sm:$0x3] %vm1894_vm1, %v2492_v27   ;;  %v3529_v9 = vpop.permute.xlu1 %3528  }
 0x233   :  { %2497 = vst.msk [vmem:[#allocation0 + $0x506] sm:$0xc] %vm1894_vm1, %v2492_v27   ;;  %2499 = vst.msk [vmem:[#allocation0 + $0x50c] sm:$0x30] %vm1894_vm1, %v2492_v27   ;;  %v4173_v50 = vsel %vm1892_vm0, %v4171_v47, %v4169_v33 }
 0x234   :  { %2501 = vst.msk [vmem:[#allocation0 + $0x512] sm:$0xc0] %vm1894_vm1, %v2492_v27   ;;  %v2520_v34 = vld [vmem:[#allocation1 + $0xa80] ss:$8 sm:$0xf0]   ;;  %4174 = vrot.lane.b32.xlu1 %v4173_v50, %s6474_s4  ;;  %v3478_v51 = vpop.permute.xlu0 %3477  }
 0x235   :  { %v2533_v28 = vld [vmem:[#allocation1 + $0xac0] ss:$8 sm:$0xf]   ;;  %2510 = vst.msk [vmem:[#allocation0 + $0x520] sm:$0x3] %vm1894_vm1, %v2507_v60   ;;  %v2522_v37 = vsel %vm1892_vm0, %v2520_v34, %v2518_v20 }
 0x236   :  { %2512 = vst.msk [vmem:[#allocation0 + $0x526] sm:$0xc] %vm1894_vm1, %v2507_v60   ;;  %2514 = vst.msk [vmem:[#allocation0 + $0x52c] sm:$0x30] %vm1894_vm1, %v2507_v60   ;;  %v3563_v47 = vpop.permute.xlu1 %3562  }
 0x237   :  { %2516 = vst.msk [vmem:[#allocation0 + $0x532] sm:$0xc0] %vm1894_vm1, %v2507_v60   ;;  %v2535_v38 = vld [vmem:[#allocation1 + $0xac0] ss:$8 sm:$0xf0]  }
 0x238   :  { %v2548_v41 = vld [vmem:[#allocation1 + $0xb00] ss:$8 sm:$0xf]   ;;  %3270 = vst.msk [vmem:[#allocation0 + $0x4e0] sm:$0x3] %vm2606_vm2, %v3267_v35   ;;  %v2537_v43 = vsel %vm1892_vm0, %v2535_v38, %v2533_v28  ;;  %4205 = vrot.lane.b32.xlu1 %v4204_v14, %s6474_s4  ;;  %v3512_v39 = vpop.permute.xlu0 %3511  }
 0x239   :  { %3272 = vst.msk [vmem:[#allocation0 + $0x4e6] sm:$0xc] %vm2606_vm2, %v3267_v35   ;;  %3274 = vst.msk [vmem:[#allocation0 + $0x4ec] sm:$0x30] %vm2606_vm2, %v3267_v35  }
 0x23a   :  { %3276 = vst.msk [vmem:[#allocation0 + $0x4f2] sm:$0xc0] %vm2606_vm2, %v3267_v35   ;;  %v2550_v44 = vld [vmem:[#allocation1 + $0xb00] ss:$8 sm:$0xf0]  }
 0x23b   :  { %2525 = vst.msk [vmem:[#allocation0 + $0x540] sm:$0x3] %vm1894_vm1, %v2522_v37   ;;  %2527 = vst.msk [vmem:[#allocation0 + $0x546] sm:$0xc] %vm1894_vm1, %v2522_v37   ;;  %v2552_v4 = vsel %vm1892_vm0, %v2550_v44, %v2548_v41  ;;  %v3597_v44 = vpop.permute.xlu1 %3596  }
 0x23c   :  { %2529 = vst.msk [vmem:[#allocation0 + $0x54c] sm:$0x30] %vm1894_vm1, %v2522_v37   ;;  %2531 = vst.msk [vmem:[#allocation0 + $0x552] sm:$0xc0] %vm1894_vm1, %v2522_v37   ;;  %v3546_v31 = vpop.permute.xlu0 %3545  }
 0x23d   :  { %v2563_v53 = vld [vmem:[#allocation1 + $0xb40] ss:$8 sm:$0xf]   ;;  %2540 = vst.msk [vmem:[#allocation0 + $0x560] sm:$0x3] %vm1894_vm1, %v2537_v43  }
 0x23e   :  { %2542 = vst.msk [vmem:[#allocation0 + $0x566] sm:$0xc] %vm1894_vm1, %v2537_v43   ;;  %2544 = vst.msk [vmem:[#allocation0 + $0x56c] sm:$0x30] %vm1894_vm1, %v2537_v43  }
 0x23f   :  { %2546 = vst.msk [vmem:[#allocation0 + $0x572] sm:$0xc0] %vm1894_vm1, %v2537_v43   ;;  %v2565_v48 = vld [vmem:[#allocation1 + $0xb40] ss:$8 sm:$0xf0]  }
 0x240   :  { %v2578_v49 = vld [vmem:[#allocation1 + $0xb80] ss:$8 sm:$0xf]   ;;  %2555 = vst.msk [vmem:[#allocation0 + $0x580] sm:$0x3] %vm1894_vm1, %v2552_v4   ;;  %v2567_v57 = vsel %vm1892_vm0, %v2565_v48, %v2563_v53  ;;  %v3580_v37 = vpop.permute.xlu0 %3579  }
 0x241   :  { %2557 = vst.msk [vmem:[#allocation0 + $0x586] sm:$0xc] %vm1894_vm1, %v2552_v4   ;;  %2559 = vst.msk [vmem:[#allocation0 + $0x58c] sm:$0x30] %vm1894_vm1, %v2552_v4  }
 0x242   :  { %2561 = vst.msk [vmem:[#allocation0 + $0x592] sm:$0xc0] %vm1894_vm1, %v2552_v4   ;;  %v2580_v8 = vld [vmem:[#allocation1 + $0xb80] ss:$8 sm:$0xf0]  }
 0x243   :  { %v4186_v54 = vld [vmem:[#allocation1 + $0xb81] ss:$8 sm:$0xf]   ;;  %2570 = vst.msk [vmem:[#allocation0 + $0x5a0] sm:$0x3] %vm1894_vm1, %v2567_v57   ;;  %v2582_v56 = vsel %vm1892_vm0, %v2580_v8, %v2578_v49 }
 0x244   :  { %v4188_v55 = vld [vmem:[#allocation1 + $0xb81] ss:$8 sm:$0xf0]   ;;  %2572 = vst.msk [vmem:[#allocation0 + $0x5a6] sm:$0xc] %vm1894_vm1, %v2567_v57  }
 0x245   :  { %2574 = vst.msk [vmem:[#allocation0 + $0x5ac] sm:$0x30] %vm1894_vm1, %v2567_v57   ;;  %2576 = vst.msk [vmem:[#allocation0 + $0x5b2] sm:$0xc0] %vm1894_vm1, %v2567_v57   ;;  %v4190_v61 = vsel %vm1892_vm0, %v4188_v55, %v4186_v54  ;;  %v3614_v57 = vpop.permute.xlu0 %3613   ;;  %v3631_v54 = vpop.permute.xlu1 %3630  }
 0x246   :  { %2597 = vst.msk [vmem:[#allocation0 + $0x5e0] sm:$0x3] %vm1894_vm1, %v2594_v23   ;;  %2585 = vst.msk [vmem:[#allocation0 + $0x5c0] sm:$0x3] %vm1894_vm1, %v2582_v56   ;;  %4191 = vrot.lane.b32.xlu0 %v4190_v61, %s6474_s4 }
 0x247   :  { %2587 = vst.msk [vmem:[#allocation0 + $0x5c6] sm:$0xc] %vm1894_vm1, %v2582_v56   ;;  %2589 = vst.msk [vmem:[#allocation0 + $0x5cc] sm:$0x30] %vm1894_vm1, %v2582_v56  }
 0x248   :  { %2591 = vst.msk [vmem:[#allocation0 + $0x5d2] sm:$0xc0] %vm1894_vm1, %v2582_v56  }
 0x249   :  { %3287 = vst.msk [vmem:[#allocation0 + $0x500] sm:$0x3] %vm2606_vm2, %v3284_v59   ;;  %3289 = vst.msk [vmem:[#allocation0 + $0x506] sm:$0xc] %vm2606_vm2, %v3284_v59  }
 0x24a   :  { %3291 = vst.msk [vmem:[#allocation0 + $0x50c] sm:$0x30] %vm2606_vm2, %v3284_v59   ;;  %3293 = vst.msk [vmem:[#allocation0 + $0x512] sm:$0xc0] %vm2606_vm2, %v3284_v59  }
 0x24b   :  { %3304 = vst.msk [vmem:[#allocation0 + $0x520] sm:$0x3] %vm2606_vm2, %v3301_v30   ;;  %3306 = vst.msk [vmem:[#allocation0 + $0x526] sm:$0xc] %vm2606_vm2, %v3301_v30  }
 0x24c   :  { %3308 = vst.msk [vmem:[#allocation0 + $0x52c] sm:$0x30] %vm2606_vm2, %v3301_v30   ;;  %3310 = vst.msk [vmem:[#allocation0 + $0x532] sm:$0xc0] %vm2606_vm2, %v3301_v30   ;;  %v3648_v30 = vpop.permute.xlu0 %3647  }
 0x24d   :  { %3321 = vst.msk [vmem:[#allocation0 + $0x540] sm:$0x3] %vm2606_vm2, %v3318_v63   ;;  %3323 = vst.msk [vmem:[#allocation0 + $0x546] sm:$0xc] %vm2606_vm2, %v3318_v63  }
 0x24e   :  { %3325 = vst.msk [vmem:[#allocation0 + $0x54c] sm:$0x30] %vm2606_vm2, %v3318_v63   ;;  %3327 = vst.msk [vmem:[#allocation0 + $0x552] sm:$0xc0] %vm2606_vm2, %v3318_v63  }
 0x24f   :  { %3338 = vst.msk [vmem:[#allocation0 + $0x560] sm:$0x3] %vm2606_vm2, %v3335_v0   ;;  %3340 = vst.msk [vmem:[#allocation0 + $0x566] sm:$0xc] %vm2606_vm2, %v3335_v0  }
 0x250   :  { %3342 = vst.msk [vmem:[#allocation0 + $0x56c] sm:$0x30] %vm2606_vm2, %v3335_v0   ;;  %3344 = vst.msk [vmem:[#allocation0 + $0x572] sm:$0xc0] %vm2606_vm2, %v3335_v0  }
 0x251   :  { %3355 = vst.msk [vmem:[#allocation0 + $0x580] sm:$0x3] %vm2606_vm2, %v3352_v26   ;;  %3357 = vst.msk [vmem:[#allocation0 + $0x586] sm:$0xc] %vm2606_vm2, %v3352_v26  }
 0x252   :  { %3359 = vst.msk [vmem:[#allocation0 + $0x58c] sm:$0x30] %vm2606_vm2, %v3352_v26   ;;  %3361 = vst.msk [vmem:[#allocation0 + $0x592] sm:$0xc0] %vm2606_vm2, %v3352_v26  }
 0x253   :  { %3372 = vst.msk [vmem:[#allocation0 + $0x5a0] sm:$0x3] %vm2606_vm2, %v3369_v42   ;;  %3374 = vst.msk [vmem:[#allocation0 + $0x5a6] sm:$0xc] %vm2606_vm2, %v3369_v42  }
 0x254   :  { %3376 = vst.msk [vmem:[#allocation0 + $0x5ac] sm:$0x30] %vm2606_vm2, %v3369_v42   ;;  %3378 = vst.msk [vmem:[#allocation0 + $0x5b2] sm:$0xc0] %vm2606_vm2, %v3369_v42   ;;  %v3665_v42 = vpop.permute.xlu1 %3664  }
 0x255   :  { %3389 = vst.msk [vmem:[#allocation0 + $0x5c0] sm:$0x3] %vm2606_vm2, %v3386_v1   ;;  %3391 = vst.msk [vmem:[#allocation0 + $0x5c6] sm:$0xc] %vm2606_vm2, %v3386_v1  }
 0x256   :  { %3393 = vst.msk [vmem:[#allocation0 + $0x5cc] sm:$0x30] %vm2606_vm2, %v3386_v1   ;;  %3395 = vst.msk [vmem:[#allocation0 + $0x5d2] sm:$0xc0] %vm2606_vm2, %v3386_v1  }
 0x257   :  { %3403 = vst.msk [vmem:[#allocation0 + $0x5e0] sm:$0x3] %vm2606_vm2, %v3400_v32  }
 0x258   :  { %3413 = vst.msk [vmem:[#allocation0] sm:$0x3] %vm3412_vm3, %v3411_v46   ;;  %3415 = vst.msk [vmem:[#allocation0 + $0x6] sm:$0xc] %vm3412_vm3, %v3411_v46  }
 0x259   :  { %3417 = vst.msk [vmem:[#allocation0 + $0xc] sm:$0x30] %vm3412_vm3, %v3411_v46   ;;  %3419 = vst.msk [vmem:[#allocation0 + $0x12] sm:$0xc0] %vm3412_vm3, %v3411_v46  }
 0x25a   :  { %3430 = vst.msk [vmem:[#allocation0 + $0x20] sm:$0x3] %vm3412_vm3, %v3427_v3   ;;  %3432 = vst.msk [vmem:[#allocation0 + $0x26] sm:$0xc] %vm3412_vm3, %v3427_v3  }
 0x25b   :  { %3434 = vst.msk [vmem:[#allocation0 + $0x2c] sm:$0x30] %vm3412_vm3, %v3427_v3   ;;  %3436 = vst.msk [vmem:[#allocation0 + $0x32] sm:$0xc0] %vm3412_vm3, %v3427_v3  }
 0x25c   :  { %3447 = vst.msk [vmem:[#allocation0 + $0x40] sm:$0x3] %vm3412_vm3, %v3444_v5   ;;  %3449 = vst.msk [vmem:[#allocation0 + $0x46] sm:$0xc] %vm3412_vm3, %v3444_v5  }
 0x25d   :  { %3451 = vst.msk [vmem:[#allocation0 + $0x4c] sm:$0x30] %vm3412_vm3, %v3444_v5   ;;  %3453 = vst.msk [vmem:[#allocation0 + $0x52] sm:$0xc0] %vm3412_vm3, %v3444_v5  }
 0x25e   :  { %3464 = vst.msk [vmem:[#allocation0 + $0x60] sm:$0x3] %vm3412_vm3, %v3461_v6   ;;  %3466 = vst.msk [vmem:[#allocation0 + $0x66] sm:$0xc] %vm3412_vm3, %v3461_v6  }
 0x25f   :  { %3468 = vst.msk [vmem:[#allocation0 + $0x6c] sm:$0x30] %vm3412_vm3, %v3461_v6   ;;  %3470 = vst.msk [vmem:[#allocation0 + $0x72] sm:$0xc0] %vm3412_vm3, %v3461_v6   ;;  %v4213_v7 = vld [vmem:[#allocation0] sm:$0x3]  ;;  %v3682_v6 = vpop.permute.xlu0 %3681  }
 0x260   :  { %v4217_v11 = vld [vmem:[#allocation0 + $0x8] sm:$0x3]  ;;  %v4222_v40 = vld [vmem:[#allocation0 + $0x10] sm:$0x3]  ;;  %4215 = vst [vmem:[%s9204_s1] sm:$0x3] %v4213_v7 }
 0x261   :  { %6283 = vst [vmem:[%s9204_s1 + $0x2] sm:$0x3] %v4217_v11  ;;  %6284 = vst [vmem:[%s9204_s1 + $0x4] sm:$0x3] %v4222_v40  ;;  %v4228_v13 = vld [vmem:[#allocation0 + $0x18] sm:$0x3] }
 0x262   :  { %v4234_v52 = vld [vmem:[#allocation0 + $0x20] sm:$0x3]  ;;  %v4240_v2 = vld [vmem:[#allocation0 + $0x28] sm:$0x3]  ;;  %3481 = vst.msk [vmem:[#allocation0 + $0x80] sm:$0x3] %vm3412_vm3, %v3478_v51  }
 0x263   :  { %3483 = vst.msk [vmem:[#allocation0 + $0x86] sm:$0xc] %vm3412_vm3, %v3478_v51   ;;  %3485 = vst.msk [vmem:[#allocation0 + $0x8c] sm:$0x30] %vm3412_vm3, %v3478_v51   ;;  %v4246_v16 = vld [vmem:[#allocation0 + $0x30] sm:$0x3] }
 0x264   :  { %3487 = vst.msk [vmem:[#allocation0 + $0x92] sm:$0xc0] %vm3412_vm3, %v3478_v51   ;;  %6285 = vst [vmem:[%s9204_s1 + $0x6] sm:$0x3] %v4228_v13  ;;  %v4252_v17 = vld [vmem:[#allocation0 + $0x38] sm:$0x3]  ;;  %v3699_v51 = vpop.permute.xlu1 %3698  }
 0x265   :  { %6286 = vst [vmem:[%s9204_s1 + $0x8] sm:$0x3] %v4234_v52  ;;  %6287 = vst [vmem:[%s9204_s1 + $0xa] sm:$0x3] %v4240_v2  ;;  %v4258_v62 = vld [vmem:[#allocation0 + $0x40] sm:$0x3] }
 0x266   :  { %3498 = vst.msk [vmem:[#allocation0 + $0xa0] sm:$0x3] %vm3412_vm3, %v3495_v15   ;;  %3500 = vst.msk [vmem:[#allocation0 + $0xa6] sm:$0xc] %vm3412_vm3, %v3495_v15   ;;  %v4264_v12 = vld [vmem:[#allocation0 + $0x48] sm:$0x3] }
 0x267   :  { %3502 = vst.msk [vmem:[#allocation0 + $0xac] sm:$0x30] %vm3412_vm3, %v3495_v15   ;;  %3504 = vst.msk [vmem:[#allocation0 + $0xb2] sm:$0xc0] %vm3412_vm3, %v3495_v15   ;;  %v4270_v29 = vld [vmem:[#allocation0 + $0x50] sm:$0x3] }
 0x268   :  { %6288 = vst [vmem:[%s9204_s1 + $0xc] sm:$0x3] %v4246_v16  ;;  %6289 = vst [vmem:[%s9204_s1 + $0xe] sm:$0x3] %v4252_v17  ;;  %v4276_v19 = vld [vmem:[#allocation0 + $0x58] sm:$0x3]  ;;  %v3716_v17 = vpop.permute.xlu0 %3715  }
 0x269   :  { %6290 = vst [vmem:[%s9204_s1 + $0x10] sm:$0x3] %v4258_v62  ;;  %6291 = vst [vmem:[%s9204_s1 + $0x12] sm:$0x3] %v4264_v12  ;;  %v4282_v21 = vld [vmem:[#allocation0 + $0x60] sm:$0x3] }
 0x26a   :  { %6292 = vst [vmem:[%s9204_s1 + $0x14] sm:$0x3] %v4270_v29  ;;  %v4288_v58 = vld [vmem:[#allocation0 + $0x68] sm:$0x3]  ;;  %3515 = vst.msk [vmem:[#allocation0 + $0xc0] sm:$0x3] %vm3412_vm3, %v3512_v39  }
 0x26b   :  { %3517 = vst.msk [vmem:[#allocation0 + $0xc6] sm:$0xc] %vm3412_vm3, %v3512_v39   ;;  %3519 = vst.msk [vmem:[#allocation0 + $0xcc] sm:$0x30] %vm3412_vm3, %v3512_v39   ;;  %v4294_v18 = vld [vmem:[#allocation0 + $0x70] sm:$0x3] }
 0x26c   :  { %3521 = vst.msk [vmem:[#allocation0 + $0xd2] sm:$0xc0] %vm3412_vm3, %v3512_v39   ;;  %6293 = vst [vmem:[%s9204_s1 + $0x16] sm:$0x3] %v4276_v19  ;;  %v4300_v22 = vld [vmem:[#allocation0 + $0x78] sm:$0x3]  ;;  %v3733_v39 = vpop.permute.xlu1 %3732  }
 0x26d   :  { %6294 = vst [vmem:[%s9204_s1 + $0x18] sm:$0x3] %v4282_v21  ;;  %6295 = vst [vmem:[%s9204_s1 + $0x1a] sm:$0x3] %v4288_v58  ;;  %v4306_v24 = vld [vmem:[#allocation0 + $0x80] sm:$0x3] }
 0x26e   :  { %3532 = vst.msk [vmem:[#allocation0 + $0xe0] sm:$0x3] %vm3412_vm3, %v3529_v9   ;;  %3534 = vst.msk [vmem:[#allocation0 + $0xe6] sm:$0xc] %vm3412_vm3, %v3529_v9   ;;  %v4312_v25 = vld [vmem:[#allocation0 + $0x88] sm:$0x3] }
 0x26f   :  { %3536 = vst.msk [vmem:[#allocation0 + $0xec] sm:$0x30] %vm3412_vm3, %v3529_v9   ;;  %3538 = vst.msk [vmem:[#allocation0 + $0xf2] sm:$0xc0] %vm3412_vm3, %v3529_v9   ;;  %v4318_v27 = vld [vmem:[#allocation0 + $0x90] sm:$0x3] }
 0x270   :  { %6296 = vst [vmem:[%s9204_s1 + $0x1c] sm:$0x3] %v4294_v18  ;;  %6297 = vst [vmem:[%s9204_s1 + $0x1e] sm:$0x3] %v4300_v22  ;;  %v4324_v20 = vld [vmem:[#allocation0 + $0x98] sm:$0x3]  ;;  %v3750_v22 = vpop.permute.xlu0 %3749  }
 0x271   :  { %6298 = vst [vmem:[%s9204_s1 + $0x20] sm:$0x3] %v4306_v24  ;;  %6299 = vst [vmem:[%s9204_s1 + $0x22] sm:$0x3] %v4312_v25  ;;  %v4330_v36 = vld [vmem:[#allocation0 + $0xa0] sm:$0x3] }
 0x272   :  { %6300 = vst [vmem:[%s9204_s1 + $0x24] sm:$0x3] %v4318_v27  ;;  %v4336_v33 = vld [vmem:[#allocation0 + $0xa8] sm:$0x3]  ;;  %3549 = vst.msk [vmem:[#allocation0 + $0x100] sm:$0x3] %vm3412_vm3, %v3546_v31  }
 0x273   :  { %3551 = vst.msk [vmem:[#allocation0 + $0x106] sm:$0xc] %vm3412_vm3, %v3546_v31   ;;  %3553 = vst.msk [vmem:[#allocation0 + $0x10c] sm:$0x30] %vm3412_vm3, %v3546_v31   ;;  %v4342_v60 = vld [vmem:[#allocation0 + $0xb0] sm:$0x3] }
 0x274   :  { %3555 = vst.msk [vmem:[#allocation0 + $0x112] sm:$0xc0] %vm3412_vm3, %v3546_v31   ;;  %6301 = vst [vmem:[%s9204_s1 + $0x26] sm:$0x3] %v4324_v20  ;;  %v4348_v34 = vld [vmem:[#allocation0 + $0xb8] sm:$0x3]  ;;  %v3767_v31 = vpop.permute.xlu1 %3766  }
 0x275   :  { %6302 = vst [vmem:[%s9204_s1 + $0x28] sm:$0x3] %v4330_v36  ;;  %6303 = vst [vmem:[%s9204_s1 + $0x2a] sm:$0x3] %v4336_v33  ;;  %v4354_v28 = vld [vmem:[#allocation0 + $0xc0] sm:$0x3] }
 0x276   :  { %3566 = vst.msk [vmem:[#allocation0 + $0x120] sm:$0x3] %vm3412_vm3, %v3563_v47   ;;  %3568 = vst.msk [vmem:[#allocation0 + $0x126] sm:$0xc] %vm3412_vm3, %v3563_v47   ;;  %v4360_v45 = vld [vmem:[#allocation0 + $0xc8] sm:$0x3] }
 0x277   :  { %3570 = vst.msk [vmem:[#allocation0 + $0x12c] sm:$0x30] %vm3412_vm3, %v3563_v47   ;;  %3572 = vst.msk [vmem:[#allocation0 + $0x132] sm:$0xc0] %vm3412_vm3, %v3563_v47   ;;  %v4366_v35 = vld [vmem:[#allocation0 + $0xd0] sm:$0x3] }
 0x278   :  { %6304 = vst [vmem:[%s9204_s1 + $0x2c] sm:$0x3] %v4342_v60  ;;  %6305 = vst [vmem:[%s9204_s1 + $0x2e] sm:$0x3] %v4348_v34  ;;  %v4372_v38 = vld [vmem:[#allocation0 + $0xd8] sm:$0x3]  ;;  %v3784_v34 = vpop.permute.xlu0 %3783  }
 0x279   :  { %6306 = vst [vmem:[%s9204_s1 + $0x30] sm:$0x3] %v4354_v28  ;;  %6307 = vst [vmem:[%s9204_s1 + $0x32] sm:$0x3] %v4360_v45  ;;  %v4378_v41 = vld [vmem:[#allocation0 + $0xe0] sm:$0x3] }
 0x27a   :  { %6308 = vst [vmem:[%s9204_s1 + $0x34] sm:$0x3] %v4366_v35  ;;  %v4384_v43 = vld [vmem:[#allocation0 + $0xe8] sm:$0x3]  ;;  %3583 = vst.msk [vmem:[#allocation0 + $0x140] sm:$0x3] %vm3412_vm3, %v3580_v37  }
 0x27b   :  { %3585 = vst.msk [vmem:[#allocation0 + $0x146] sm:$0xc] %vm3412_vm3, %v3580_v37   ;;  %3587 = vst.msk [vmem:[#allocation0 + $0x14c] sm:$0x30] %vm3412_vm3, %v3580_v37   ;;  %v4390_v53 = vld [vmem:[#allocation0 + $0xf0] sm:$0x3] }
 0x27c   :  { %3589 = vst.msk [vmem:[#allocation0 + $0x152] sm:$0xc0] %vm3412_vm3, %v3580_v37   ;;  %6309 = vst [vmem:[%s9204_s1 + $0x36] sm:$0x3] %v4372_v38  ;;  %v4396_v4 = vld [vmem:[#allocation0 + $0xf8] sm:$0x3]  ;;  %v3801_v37 = vpop.permute.xlu1 %3800  }
 0x27d   :  { %6310 = vst [vmem:[%s9204_s1 + $0x38] sm:$0x3] %v4378_v41  ;;  %6311 = vst [vmem:[%s9204_s1 + $0x3a] sm:$0x3] %v4384_v43  ;;  %v4402_v48 = vld [vmem:[#allocation0 + $0x100] sm:$0x3] }
 0x27e   :  { %3600 = vst.msk [vmem:[#allocation0 + $0x160] sm:$0x3] %vm3412_vm3, %v3597_v44   ;;  %3602 = vst.msk [vmem:[#allocation0 + $0x166] sm:$0xc] %vm3412_vm3, %v3597_v44   ;;  %v4408_v49 = vld [vmem:[#allocation0 + $0x108] sm:$0x3] }
 0x27f   :  { %3604 = vst.msk [vmem:[#allocation0 + $0x16c] sm:$0x30] %vm3412_vm3, %v3597_v44   ;;  %3606 = vst.msk [vmem:[#allocation0 + $0x172] sm:$0xc0] %vm3412_vm3, %v3597_v44   ;;  %v4414_v10 = vld [vmem:[#allocation0 + $0x110] sm:$0x3] }
 0x280   :  { %6312 = vst [vmem:[%s9204_s1 + $0x3c] sm:$0x3] %v4390_v53  ;;  %6313 = vst [vmem:[%s9204_s1 + $0x3e] sm:$0x3] %v4396_v4  ;;  %v4420_v8 = vld [vmem:[#allocation0 + $0x118] sm:$0x3]  ;;  %v3818_v4 = vpop.permute.xlu0 %3817  }
 0x281   :  { %6314 = vst [vmem:[%s9204_s1 + $0x40] sm:$0x3] %v4402_v48  ;;  %6315 = vst [vmem:[%s9204_s1 + $0x42] sm:$0x3] %v4408_v49  ;;  %v4426_v23 = vld [vmem:[#allocation0 + $0x120] sm:$0x3] }
 0x282   :  { %6316 = vst [vmem:[%s9204_s1 + $0x44] sm:$0x3] %v4414_v10  ;;  %v4432_v50 = vld [vmem:[#allocation0 + $0x128] sm:$0x3]  ;;  %3617 = vst.msk [vmem:[#allocation0 + $0x180] sm:$0x3] %vm3412_vm3, %v3614_v57  }
 0x283   :  { %3619 = vst.msk [vmem:[#allocation0 + $0x186] sm:$0xc] %vm3412_vm3, %v3614_v57   ;;  %3621 = vst.msk [vmem:[#allocation0 + $0x18c] sm:$0x30] %vm3412_vm3, %v3614_v57   ;;  %v4438_v55 = vld [vmem:[#allocation0 + $0x130] sm:$0x3] }
 0x284   :  { %3623 = vst.msk [vmem:[#allocation0 + $0x192] sm:$0xc0] %vm3412_vm3, %v3614_v57   ;;  %6317 = vst [vmem:[%s9204_s1 + $0x46] sm:$0x3] %v4420_v8  ;;  %v4444_v56 = vld [vmem:[#allocation0 + $0x138] sm:$0x3]  ;;  %v3835_v57 = vpop.permute.xlu1 %3834  }
 0x285   :  { %6318 = vst [vmem:[%s9204_s1 + $0x48] sm:$0x3] %v4426_v23  ;;  %6319 = vst [vmem:[%s9204_s1 + $0x4a] sm:$0x3] %v4432_v50  ;;  %v4450_v59 = vld [vmem:[#allocation0 + $0x140] sm:$0x3] }
 0x286   :  { %3634 = vst.msk [vmem:[#allocation0 + $0x1a0] sm:$0x3] %vm3412_vm3, %v3631_v54   ;;  %3636 = vst.msk [vmem:[#allocation0 + $0x1a6] sm:$0xc] %vm3412_vm3, %v3631_v54   ;;  %v4456_v61 = vld [vmem:[#allocation0 + $0x148] sm:$0x3] }
 0x287   :  { %3638 = vst.msk [vmem:[#allocation0 + $0x1ac] sm:$0x30] %vm3412_vm3, %v3631_v54   ;;  %3640 = vst.msk [vmem:[#allocation0 + $0x1b2] sm:$0xc0] %vm3412_vm3, %v3631_v54   ;;  %v4462_v14 = vld [vmem:[#allocation0 + $0x150] sm:$0x3] }
 0x288   :  { %6320 = vst [vmem:[%s9204_s1 + $0x4c] sm:$0x3] %v4438_v55  ;;  %6321 = vst [vmem:[%s9204_s1 + $0x4e] sm:$0x3] %v4444_v56  ;;  %v4468_v63 = vld [vmem:[#allocation0 + $0x158] sm:$0x3]  ;;  %v3852_v56 = vpop.permute.xlu0 %3851  }
 0x289   :  { %6322 = vst [vmem:[%s9204_s1 + $0x50] sm:$0x3] %v4450_v59  ;;  %6323 = vst [vmem:[%s9204_s1 + $0x52] sm:$0x3] %v4456_v61  ;;  %v4474_v0 = vld [vmem:[#allocation0 + $0x160] sm:$0x3] }
 0x28a   :  { %6324 = vst [vmem:[%s9204_s1 + $0x54] sm:$0x3] %v4462_v14  ;;  %v4480_v26 = vld [vmem:[#allocation0 + $0x168] sm:$0x3]  ;;  %3651 = vst.msk [vmem:[#allocation0 + $0x1c0] sm:$0x3] %vm3412_vm3, %v3648_v30  }
 0x28b   :  { %3653 = vst.msk [vmem:[#allocation0 + $0x1c6] sm:$0xc] %vm3412_vm3, %v3648_v30   ;;  %3655 = vst.msk [vmem:[#allocation0 + $0x1cc] sm:$0x30] %vm3412_vm3, %v3648_v30   ;;  %v4486_v1 = vld [vmem:[#allocation0 + $0x170] sm:$0x3] }
 0x28c   :  { %3657 = vst.msk [vmem:[#allocation0 + $0x1d2] sm:$0xc0] %vm3412_vm3, %v3648_v30   ;;  %6325 = vst [vmem:[%s9204_s1 + $0x56] sm:$0x3] %v4468_v63  ;;  %v4492_v32 = vld [vmem:[#allocation0 + $0x178] sm:$0x3]  ;;  %v3869_v30 = vpop.permute.xlu1 %3868  }
 0x28d   :  { %6326 = vst [vmem:[%s9204_s1 + $0x58] sm:$0x3] %v4474_v0  ;;  %6327 = vst [vmem:[%s9204_s1 + $0x5a] sm:$0x3] %v4480_v26  ;;  %v4498_v46 = vld [vmem:[#allocation0 + $0x180] sm:$0x3] }
 0x28e   :  { %3668 = vst.msk [vmem:[#allocation0 + $0x1e0] sm:$0x3] %vm3412_vm3, %v3665_v42   ;;  %3670 = vst.msk [vmem:[#allocation0 + $0x1e6] sm:$0xc] %vm3412_vm3, %v3665_v42   ;;  %v4504_v3 = vld [vmem:[#allocation0 + $0x188] sm:$0x3] }
 0x28f   :  { %3672 = vst.msk [vmem:[#allocation0 + $0x1ec] sm:$0x30] %vm3412_vm3, %v3665_v42   ;;  %3674 = vst.msk [vmem:[#allocation0 + $0x1f2] sm:$0xc0] %vm3412_vm3, %v3665_v42   ;;  %v4510_v5 = vld [vmem:[#allocation0 + $0x190] sm:$0x3] }
 0x290   :  { %6328 = vst [vmem:[%s9204_s1 + $0x5c] sm:$0x3] %v4486_v1  ;;  %6329 = vst [vmem:[%s9204_s1 + $0x5e] sm:$0x3] %v4492_v32  ;;  %v4516_v7 = vld [vmem:[#allocation0 + $0x198] sm:$0x3]  ;;  %v3886_v32 = vpop.permute.xlu0 %3885  }
 0x291   :  { %6330 = vst [vmem:[%s9204_s1 + $0x60] sm:$0x3] %v4498_v46  ;;  %6331 = vst [vmem:[%s9204_s1 + $0x62] sm:$0x3] %v4504_v3  ;;  %v4522_v11 = vld [vmem:[#allocation0 + $0x1a0] sm:$0x3] }
 0x292   :  { %6332 = vst [vmem:[%s9204_s1 + $0x64] sm:$0x3] %v4510_v5  ;;  %v4528_v40 = vld [vmem:[#allocation0 + $0x1a8] sm:$0x3]  ;;  %3685 = vst.msk [vmem:[#allocation0 + $0x200] sm:$0x3] %vm3412_vm3, %v3682_v6  }
 0x293   :  { %3687 = vst.msk [vmem:[#allocation0 + $0x206] sm:$0xc] %vm3412_vm3, %v3682_v6   ;;  %3689 = vst.msk [vmem:[#allocation0 + $0x20c] sm:$0x30] %vm3412_vm3, %v3682_v6   ;;  %v4534_v13 = vld [vmem:[#allocation0 + $0x1b0] sm:$0x3] }
 0x294   :  { %3691 = vst.msk [vmem:[#allocation0 + $0x212] sm:$0xc0] %vm3412_vm3, %v3682_v6   ;;  %6333 = vst [vmem:[%s9204_s1 + $0x66] sm:$0x3] %v4516_v7  ;;  %v4540_v52 = vld [vmem:[#allocation0 + $0x1b8] sm:$0x3]  ;;  %v3903_v6 = vpop.permute.xlu1 %3902  }
 0x295   :  { %6334 = vst [vmem:[%s9204_s1 + $0x68] sm:$0x3] %v4522_v11  ;;  %6335 = vst [vmem:[%s9204_s1 + $0x6a] sm:$0x3] %v4528_v40  ;;  %v4546_v2 = vld [vmem:[#allocation0 + $0x1c0] sm:$0x3] }
 0x296   :  { %3702 = vst.msk [vmem:[#allocation0 + $0x220] sm:$0x3] %vm3412_vm3, %v3699_v51   ;;  %3704 = vst.msk [vmem:[#allocation0 + $0x226] sm:$0xc] %vm3412_vm3, %v3699_v51   ;;  %v4552_v15 = vld [vmem:[#allocation0 + $0x1c8] sm:$0x3] }
 0x297   :  { %3706 = vst.msk [vmem:[#allocation0 + $0x22c] sm:$0x30] %vm3412_vm3, %v3699_v51   ;;  %3708 = vst.msk [vmem:[#allocation0 + $0x232] sm:$0xc0] %vm3412_vm3, %v3699_v51   ;;  %v4558_v16 = vld [vmem:[#allocation0 + $0x1d0] sm:$0x3] }
 0x298   :  { %6336 = vst [vmem:[%s9204_s1 + $0x6c] sm:$0x3] %v4534_v13  ;;  %6337 = vst [vmem:[%s9204_s1 + $0x6e] sm:$0x3] %v4540_v52  ;;  %v4564_v62 = vld [vmem:[#allocation0 + $0x1d8] sm:$0x3]  ;;  %v3920_v52 = vpop.permute.xlu0 %3919  }
 0x299   :  { %6338 = vst [vmem:[%s9204_s1 + $0x70] sm:$0x3] %v4546_v2  ;;  %6339 = vst [vmem:[%s9204_s1 + $0x72] sm:$0x3] %v4552_v15  ;;  %v4570_v12 = vld [vmem:[#allocation0 + $0x1e0] sm:$0x3] }
 0x29a   :  { %6340 = vst [vmem:[%s9204_s1 + $0x74] sm:$0x3] %v4558_v16  ;;  %v4576_v29 = vld [vmem:[#allocation0 + $0x1e8] sm:$0x3]  ;;  %3719 = vst.msk [vmem:[#allocation0 + $0x240] sm:$0x3] %vm3412_vm3, %v3716_v17  }
 0x29b   :  { %3721 = vst.msk [vmem:[#allocation0 + $0x246] sm:$0xc] %vm3412_vm3, %v3716_v17   ;;  %3723 = vst.msk [vmem:[#allocation0 + $0x24c] sm:$0x30] %vm3412_vm3, %v3716_v17   ;;  %v4582_v19 = vld [vmem:[#allocation0 + $0x1f0] sm:$0x3] }
 0x29c   :  { %3725 = vst.msk [vmem:[#allocation0 + $0x252] sm:$0xc0] %vm3412_vm3, %v3716_v17   ;;  %6341 = vst [vmem:[%s9204_s1 + $0x76] sm:$0x3] %v4564_v62  ;;  %v4588_v21 = vld [vmem:[#allocation0 + $0x1f8] sm:$0x3]  ;;  %v3937_v17 = vpop.permute.xlu1 %3936  }
 0x29d   :  { %6342 = vst [vmem:[%s9204_s1 + $0x78] sm:$0x3] %v4570_v12  ;;  %6343 = vst [vmem:[%s9204_s1 + $0x7a] sm:$0x3] %v4576_v29  ;;  %v4594_v58 = vld [vmem:[#allocation0 + $0x200] sm:$0x3] }
 0x29e   :  { %3736 = vst.msk [vmem:[#allocation0 + $0x260] sm:$0x3] %vm3412_vm3, %v3733_v39   ;;  %3738 = vst.msk [vmem:[#allocation0 + $0x266] sm:$0xc] %vm3412_vm3, %v3733_v39   ;;  %v4600_v9 = vld [vmem:[#allocation0 + $0x208] sm:$0x3] }
 0x29f   :  { %3740 = vst.msk [vmem:[#allocation0 + $0x26c] sm:$0x30] %vm3412_vm3, %v3733_v39   ;;  %3742 = vst.msk [vmem:[#allocation0 + $0x272] sm:$0xc0] %vm3412_vm3, %v3733_v39   ;;  %v4606_v18 = vld [vmem:[#allocation0 + $0x210] sm:$0x3] }
 0x2a0   :  { %6344 = vst [vmem:[%s9204_s1 + $0x7c] sm:$0x3] %v4582_v19  ;;  %6345 = vst [vmem:[%s9204_s1 + $0x7e] sm:$0x3] %v4588_v21  ;;  %v4612_v24 = vld [vmem:[#allocation0 + $0x218] sm:$0x3]  ;;  %v3954_v21 = vpop.permute.xlu0 %3953  }
 0x2a1   :  { %6346 = vst [vmem:[%s9204_s1 + $0x80] sm:$0x3] %v4594_v58  ;;  %6347 = vst [vmem:[%s9204_s1 + $0x82] sm:$0x3] %v4600_v9  ;;  %v4618_v25 = vld [vmem:[#allocation0 + $0x220] sm:$0x3] }
 0x2a2   :  { %6348 = vst [vmem:[%s9204_s1 + $0x84] sm:$0x3] %v4606_v18  ;;  %v4624_v27 = vld [vmem:[#allocation0 + $0x228] sm:$0x3]  ;;  %3753 = vst.msk [vmem:[#allocation0 + $0x280] sm:$0x3] %vm3412_vm3, %v3750_v22  }
 0x2a3   :  { %3755 = vst.msk [vmem:[#allocation0 + $0x286] sm:$0xc] %vm3412_vm3, %v3750_v22   ;;  %3757 = vst.msk [vmem:[#allocation0 + $0x28c] sm:$0x30] %vm3412_vm3, %v3750_v22   ;;  %v4630_v20 = vld [vmem:[#allocation0 + $0x230] sm:$0x3] }
 0x2a4   :  { %3759 = vst.msk [vmem:[#allocation0 + $0x292] sm:$0xc0] %vm3412_vm3, %v3750_v22   ;;  %6349 = vst [vmem:[%s9204_s1 + $0x86] sm:$0x3] %v4612_v24  ;;  %v4636_v36 = vld [vmem:[#allocation0 + $0x238] sm:$0x3]  ;;  %v3971_v22 = vpop.permute.xlu1 %3970  }
 0x2a5   :  { %6350 = vst [vmem:[%s9204_s1 + $0x88] sm:$0x3] %v4618_v25  ;;  %6351 = vst [vmem:[%s9204_s1 + $0x8a] sm:$0x3] %v4624_v27  ;;  %v4642_v33 = vld [vmem:[#allocation0 + $0x240] sm:$0x3] }
 0x2a6   :  { %3770 = vst.msk [vmem:[#allocation0 + $0x2a0] sm:$0x3] %vm3412_vm3, %v3767_v31   ;;  %3772 = vst.msk [vmem:[#allocation0 + $0x2a6] sm:$0xc] %vm3412_vm3, %v3767_v31   ;;  %v4648_v47 = vld [vmem:[#allocation0 + $0x248] sm:$0x3] }
 0x2a7   :  { %3774 = vst.msk [vmem:[#allocation0 + $0x2ac] sm:$0x30] %vm3412_vm3, %v3767_v31   ;;  %3776 = vst.msk [vmem:[#allocation0 + $0x2b2] sm:$0xc0] %vm3412_vm3, %v3767_v31   ;;  %v4654_v60 = vld [vmem:[#allocation0 + $0x250] sm:$0x3] }
 0x2a8   :  { %6352 = vst [vmem:[%s9204_s1 + $0x8c] sm:$0x3] %v4630_v20  ;;  %6353 = vst [vmem:[%s9204_s1 + $0x8e] sm:$0x3] %v4636_v36  ;;  %v4660_v28 = vld [vmem:[#allocation0 + $0x258] sm:$0x3]  ;;  %v3988_v36 = vpop.permute.xlu0 %3987  }
 0x2a9   :  { %6354 = vst [vmem:[%s9204_s1 + $0x90] sm:$0x3] %v4642_v33  ;;  %6355 = vst [vmem:[%s9204_s1 + $0x92] sm:$0x3] %v4648_v47  ;;  %v4666_v45 = vld [vmem:[#allocation0 + $0x260] sm:$0x3] }
 0x2aa   :  { %6356 = vst [vmem:[%s9204_s1 + $0x94] sm:$0x3] %v4654_v60  ;;  %v4672_v35 = vld [vmem:[#allocation0 + $0x268] sm:$0x3]  ;;  %3787 = vst.msk [vmem:[#allocation0 + $0x2c0] sm:$0x3] %vm3412_vm3, %v3784_v34  }
 0x2ab   :  { %3789 = vst.msk [vmem:[#allocation0 + $0x2c6] sm:$0xc] %vm3412_vm3, %v3784_v34   ;;  %3791 = vst.msk [vmem:[#allocation0 + $0x2cc] sm:$0x30] %vm3412_vm3, %v3784_v34   ;;  %v4678_v38 = vld [vmem:[#allocation0 + $0x270] sm:$0x3] }
 0x2ac   :  { %3793 = vst.msk [vmem:[#allocation0 + $0x2d2] sm:$0xc0] %vm3412_vm3, %v3784_v34   ;;  %6357 = vst [vmem:[%s9204_s1 + $0x96] sm:$0x3] %v4660_v28  ;;  %v4684_v41 = vld [vmem:[#allocation0 + $0x278] sm:$0x3]  ;;  %v4005_v34 = vpop.permute.xlu1 %4004  }
 0x2ad   :  { %6358 = vst [vmem:[%s9204_s1 + $0x98] sm:$0x3] %v4666_v45  ;;  %6359 = vst [vmem:[%s9204_s1 + $0x9a] sm:$0x3] %v4672_v35  ;;  %v4690_v43 = vld [vmem:[#allocation0 + $0x280] sm:$0x3] }
 0x2ae   :  { %3804 = vst.msk [vmem:[#allocation0 + $0x2e0] sm:$0x3] %vm3412_vm3, %v3801_v37   ;;  %3806 = vst.msk [vmem:[#allocation0 + $0x2e6] sm:$0xc] %vm3412_vm3, %v3801_v37   ;;  %v4696_v44 = vld [vmem:[#allocation0 + $0x288] sm:$0x3] }
 0x2af   :  { %3808 = vst.msk [vmem:[#allocation0 + $0x2ec] sm:$0x30] %vm3412_vm3, %v3801_v37   ;;  %3810 = vst.msk [vmem:[#allocation0 + $0x2f2] sm:$0xc0] %vm3412_vm3, %v3801_v37   ;;  %v4702_v53 = vld [vmem:[#allocation0 + $0x290] sm:$0x3] }
 0x2b0   :  { %6360 = vst [vmem:[%s9204_s1 + $0x9c] sm:$0x3] %v4678_v38  ;;  %6361 = vst [vmem:[%s9204_s1 + $0x9e] sm:$0x3] %v4684_v41  ;;  %v4708_v48 = vld [vmem:[#allocation0 + $0x298] sm:$0x3]  ;;  %v4022_v41 = vpop.permute.xlu0 %4021  }
 0x2b1   :  { %6362 = vst [vmem:[%s9204_s1 + $0xa0] sm:$0x3] %v4690_v43  ;;  %6363 = vst [vmem:[%s9204_s1 + $0xa2] sm:$0x3] %v4696_v44  ;;  %v4714_v49 = vld [vmem:[#allocation0 + $0x2a0] sm:$0x3] }
 0x2b2   :  { %6364 = vst [vmem:[%s9204_s1 + $0xa4] sm:$0x3] %v4702_v53  ;;  %v4720_v10 = vld [vmem:[#allocation0 + $0x2a8] sm:$0x3]  ;;  %3821 = vst.msk [vmem:[#allocation0 + $0x300] sm:$0x3] %vm3412_vm3, %v3818_v4  }
 0x2b3   :  { %3823 = vst.msk [vmem:[#allocation0 + $0x306] sm:$0xc] %vm3412_vm3, %v3818_v4   ;;  %3825 = vst.msk [vmem:[#allocation0 + $0x30c] sm:$0x30] %vm3412_vm3, %v3818_v4   ;;  %v4726_v8 = vld [vmem:[#allocation0 + $0x2b0] sm:$0x3] }
 0x2b4   :  { %3827 = vst.msk [vmem:[#allocation0 + $0x312] sm:$0xc0] %vm3412_vm3, %v3818_v4   ;;  %6365 = vst [vmem:[%s9204_s1 + $0xa6] sm:$0x3] %v4708_v48  ;;  %v4732_v23 = vld [vmem:[#allocation0 + $0x2b8] sm:$0x3]  ;;  %v4039_v4 = vpop.permute.xlu1 %4038  }
 0x2b5   :  { %6366 = vst [vmem:[%s9204_s1 + $0xa8] sm:$0x3] %v4714_v49  ;;  %6367 = vst [vmem:[%s9204_s1 + $0xaa] sm:$0x3] %v4720_v10  ;;  %v4738_v50 = vld [vmem:[#allocation0 + $0x2c0] sm:$0x3] }
 0x2b6   :  { %3838 = vst.msk [vmem:[#allocation0 + $0x320] sm:$0x3] %vm3412_vm3, %v3835_v57   ;;  %3840 = vst.msk [vmem:[#allocation0 + $0x326] sm:$0xc] %vm3412_vm3, %v3835_v57   ;;  %v4744_v54 = vld [vmem:[#allocation0 + $0x2c8] sm:$0x3] }
 0x2b7   :  { %3842 = vst.msk [vmem:[#allocation0 + $0x32c] sm:$0x30] %vm3412_vm3, %v3835_v57   ;;  %3844 = vst.msk [vmem:[#allocation0 + $0x332] sm:$0xc0] %vm3412_vm3, %v3835_v57   ;;  %v4750_v55 = vld [vmem:[#allocation0 + $0x2d0] sm:$0x3] }
 0x2b8   :  { %6368 = vst [vmem:[%s9204_s1 + $0xac] sm:$0x3] %v4726_v8  ;;  %6369 = vst [vmem:[%s9204_s1 + $0xae] sm:$0x3] %v4732_v23  ;;  %v4756_v59 = vld [vmem:[#allocation0 + $0x2d8] sm:$0x3]  ;;  %v4056_v23 = vpop.permute.xlu0 %4055  }
 0x2b9   :  { %6370 = vst [vmem:[%s9204_s1 + $0xb0] sm:$0x3] %v4738_v50  ;;  %6371 = vst [vmem:[%s9204_s1 + $0xb2] sm:$0x3] %v4744_v54  ;;  %v4762_v61 = vld [vmem:[#allocation0 + $0x2e0] sm:$0x3] }
 0x2ba   :  { %6372 = vst [vmem:[%s9204_s1 + $0xb4] sm:$0x3] %v4750_v55  ;;  %v4768_v14 = vld [vmem:[#allocation0 + $0x2e8] sm:$0x3]  ;;  %3855 = vst.msk [vmem:[#allocation0 + $0x340] sm:$0x3] %vm3412_vm3, %v3852_v56  }
 0x2bb   :  { %3857 = vst.msk [vmem:[#allocation0 + $0x346] sm:$0xc] %vm3412_vm3, %v3852_v56   ;;  %3859 = vst.msk [vmem:[#allocation0 + $0x34c] sm:$0x30] %vm3412_vm3, %v3852_v56   ;;  %v4774_v63 = vld [vmem:[#allocation0 + $0x2f0] sm:$0x3] }
 0x2bc   :  { %3861 = vst.msk [vmem:[#allocation0 + $0x352] sm:$0xc0] %vm3412_vm3, %v3852_v56   ;;  %6373 = vst [vmem:[%s9204_s1 + $0xb6] sm:$0x3] %v4756_v59  ;;  %v4780_v0 = vld [vmem:[#allocation0 + $0x2f8] sm:$0x3]  ;;  %v4073_v56 = vpop.permute.xlu1 %4072  }
 0x2bd   :  { %6374 = vst [vmem:[%s9204_s1 + $0xb8] sm:$0x3] %v4762_v61  ;;  %6375 = vst [vmem:[%s9204_s1 + $0xba] sm:$0x3] %v4768_v14  ;;  %v4786_v26 = vld [vmem:[#allocation0 + $0x300] sm:$0x3] }
 0x2be   :  { %3872 = vst.msk [vmem:[#allocation0 + $0x360] sm:$0x3] %vm3412_vm3, %v3869_v30   ;;  %3874 = vst.msk [vmem:[#allocation0 + $0x366] sm:$0xc] %vm3412_vm3, %v3869_v30   ;;  %v4792_v42 = vld [vmem:[#allocation0 + $0x308] sm:$0x3] }
 0x2bf   :  { %3876 = vst.msk [vmem:[#allocation0 + $0x36c] sm:$0x30] %vm3412_vm3, %v3869_v30   ;;  %3878 = vst.msk [vmem:[#allocation0 + $0x372] sm:$0xc0] %vm3412_vm3, %v3869_v30   ;;  %v4798_v1 = vld [vmem:[#allocation0 + $0x310] sm:$0x3] }
 0x2c0   :  { %6376 = vst [vmem:[%s9204_s1 + $0xbc] sm:$0x3] %v4774_v63  ;;  %6377 = vst [vmem:[%s9204_s1 + $0xbe] sm:$0x3] %v4780_v0  ;;  %v4804_v46 = vld [vmem:[#allocation0 + $0x318] sm:$0x3]  ;;  %v4090_v0 = vpop.permute.xlu0 %4089  }
 0x2c1   :  { %6378 = vst [vmem:[%s9204_s1 + $0xc0] sm:$0x3] %v4786_v26  ;;  %6379 = vst [vmem:[%s9204_s1 + $0xc2] sm:$0x3] %v4792_v42  ;;  %v4810_v3 = vld [vmem:[#allocation0 + $0x320] sm:$0x3] }
 0x2c2   :  { %6380 = vst [vmem:[%s9204_s1 + $0xc4] sm:$0x3] %v4798_v1  ;;  %v4816_v5 = vld [vmem:[#allocation0 + $0x328] sm:$0x3]  ;;  %3889 = vst.msk [vmem:[#allocation0 + $0x380] sm:$0x3] %vm3412_vm3, %v3886_v32  }
 0x2c3   :  { %3891 = vst.msk [vmem:[#allocation0 + $0x386] sm:$0xc] %vm3412_vm3, %v3886_v32   ;;  %3893 = vst.msk [vmem:[#allocation0 + $0x38c] sm:$0x30] %vm3412_vm3, %v3886_v32   ;;  %v4822_v7 = vld [vmem:[#allocation0 + $0x330] sm:$0x3] }
 0x2c4   :  { %3895 = vst.msk [vmem:[#allocation0 + $0x392] sm:$0xc0] %vm3412_vm3, %v3886_v32   ;;  %6381 = vst [vmem:[%s9204_s1 + $0xc6] sm:$0x3] %v4804_v46  ;;  %v4828_v11 = vld [vmem:[#allocation0 + $0x338] sm:$0x3]  ;;  %v4107_v32 = vpop.permute.xlu1 %4106  }
 0x2c5   :  { %6382 = vst [vmem:[%s9204_s1 + $0xc8] sm:$0x3] %v4810_v3  ;;  %6383 = vst [vmem:[%s9204_s1 + $0xca] sm:$0x3] %v4816_v5  ;;  %v4834_v40 = vld [vmem:[#allocation0 + $0x340] sm:$0x3] }
 0x2c6   :  { %3906 = vst.msk [vmem:[#allocation0 + $0x3a0] sm:$0x3] %vm3412_vm3, %v3903_v6   ;;  %3908 = vst.msk [vmem:[#allocation0 + $0x3a6] sm:$0xc] %vm3412_vm3, %v3903_v6   ;;  %v4840_v51 = vld [vmem:[#allocation0 + $0x348] sm:$0x3] }
 0x2c7   :  { %3910 = vst.msk [vmem:[#allocation0 + $0x3ac] sm:$0x30] %vm3412_vm3, %v3903_v6   ;;  %3912 = vst.msk [vmem:[#allocation0 + $0x3b2] sm:$0xc0] %vm3412_vm3, %v3903_v6   ;;  %v4846_v13 = vld [vmem:[#allocation0 + $0x350] sm:$0x3] }
 0x2c8   :  { %6384 = vst [vmem:[%s9204_s1 + $0xcc] sm:$0x3] %v4822_v7  ;;  %6385 = vst [vmem:[%s9204_s1 + $0xce] sm:$0x3] %v4828_v11  ;;  %v4852_v2 = vld [vmem:[#allocation0 + $0x358] sm:$0x3]  ;;  %v4124_v11 = vpop.permute.xlu0 %4123  }
 0x2c9   :  { %6386 = vst [vmem:[%s9204_s1 + $0xd0] sm:$0x3] %v4834_v40  ;;  %6387 = vst [vmem:[%s9204_s1 + $0xd2] sm:$0x3] %v4840_v51  ;;  %v4858_v15 = vld [vmem:[#allocation0 + $0x360] sm:$0x3] }
 0x2ca   :  { %6388 = vst [vmem:[%s9204_s1 + $0xd4] sm:$0x3] %v4846_v13  ;;  %v4864_v16 = vld [vmem:[#allocation0 + $0x368] sm:$0x3]  ;;  %3923 = vst.msk [vmem:[#allocation0 + $0x3c0] sm:$0x3] %vm3412_vm3, %v3920_v52  }
 0x2cb   :  { %3925 = vst.msk [vmem:[#allocation0 + $0x3c6] sm:$0xc] %vm3412_vm3, %v3920_v52   ;;  %3927 = vst.msk [vmem:[#allocation0 + $0x3cc] sm:$0x30] %vm3412_vm3, %v3920_v52   ;;  %v4870_v62 = vld [vmem:[#allocation0 + $0x370] sm:$0x3] }
 0x2cc   :  { %3929 = vst.msk [vmem:[#allocation0 + $0x3d2] sm:$0xc0] %vm3412_vm3, %v3920_v52   ;;  %6389 = vst [vmem:[%s9204_s1 + $0xd6] sm:$0x3] %v4852_v2  ;;  %v4876_v12 = vld [vmem:[#allocation0 + $0x378] sm:$0x3]  ;;  %v4141_v52 = vpop.permute.xlu1 %4140  }
 0x2cd   :  { %6390 = vst [vmem:[%s9204_s1 + $0xd8] sm:$0x3] %v4858_v15  ;;  %6391 = vst [vmem:[%s9204_s1 + $0xda] sm:$0x3] %v4864_v16  ;;  %v4882_v29 = vld [vmem:[#allocation0 + $0x380] sm:$0x3] }
 0x2ce   :  { %3940 = vst.msk [vmem:[#allocation0 + $0x3e0] sm:$0x3] %vm3412_vm3, %v3937_v17   ;;  %3942 = vst.msk [vmem:[#allocation0 + $0x3e6] sm:$0xc] %vm3412_vm3, %v3937_v17   ;;  %v4888_v39 = vld [vmem:[#allocation0 + $0x388] sm:$0x3] }
 0x2cf   :  { %3944 = vst.msk [vmem:[#allocation0 + $0x3ec] sm:$0x30] %vm3412_vm3, %v3937_v17   ;;  %3946 = vst.msk [vmem:[#allocation0 + $0x3f2] sm:$0xc0] %vm3412_vm3, %v3937_v17   ;;  %v4894_v19 = vld [vmem:[#allocation0 + $0x390] sm:$0x3] }
 0x2d0   :  { %6392 = vst [vmem:[%s9204_s1 + $0xdc] sm:$0x3] %v4870_v62  ;;  %6393 = vst [vmem:[%s9204_s1 + $0xde] sm:$0x3] %v4876_v12  ;;  %v4900_v58 = vld [vmem:[#allocation0 + $0x398] sm:$0x3]  ;;  %v4158_v12 = vpop.permute.xlu0 %4157  }
 0x2d1   :  { %6394 = vst [vmem:[%s9204_s1 + $0xe0] sm:$0x3] %v4882_v29  ;;  %6395 = vst [vmem:[%s9204_s1 + $0xe2] sm:$0x3] %v4888_v39  ;;  %v4906_v9 = vld [vmem:[#allocation0 + $0x3a0] sm:$0x3] }
 0x2d2   :  { %6396 = vst [vmem:[%s9204_s1 + $0xe4] sm:$0x3] %v4894_v19  ;;  %v4912_v18 = vld [vmem:[#allocation0 + $0x3a8] sm:$0x3]  ;;  %3957 = vst.msk [vmem:[#allocation0 + $0x400] sm:$0x3] %vm3412_vm3, %v3954_v21  }
 0x2d3   :  { %3959 = vst.msk [vmem:[#allocation0 + $0x406] sm:$0xc] %vm3412_vm3, %v3954_v21   ;;  %3961 = vst.msk [vmem:[#allocation0 + $0x40c] sm:$0x30] %vm3412_vm3, %v3954_v21   ;;  %v4918_v24 = vld [vmem:[#allocation0 + $0x3b0] sm:$0x3] }
 0x2d4   :  { %3963 = vst.msk [vmem:[#allocation0 + $0x412] sm:$0xc0] %vm3412_vm3, %v3954_v21   ;;  %6397 = vst [vmem:[%s9204_s1 + $0xe6] sm:$0x3] %v4900_v58  ;;  %v4924_v25 = vld [vmem:[#allocation0 + $0x3b8] sm:$0x3]  ;;  %v4175_v21 = vpop.permute.xlu1 %4174  }
 0x2d5   :  { %6398 = vst [vmem:[%s9204_s1 + $0xe8] sm:$0x3] %v4906_v9  ;;  %6399 = vst [vmem:[%s9204_s1 + $0xea] sm:$0x3] %v4912_v18  ;;  %v4930_v27 = vld [vmem:[#allocation0 + $0x3c0] sm:$0x3] }
 0x2d6   :  { %3974 = vst.msk [vmem:[#allocation0 + $0x420] sm:$0x3] %vm3412_vm3, %v3971_v22   ;;  %3976 = vst.msk [vmem:[#allocation0 + $0x426] sm:$0xc] %vm3412_vm3, %v3971_v22   ;;  %v4936_v31 = vld [vmem:[#allocation0 + $0x3c8] sm:$0x3] }
 0x2d7   :  { %3978 = vst.msk [vmem:[#allocation0 + $0x42c] sm:$0x30] %vm3412_vm3, %v3971_v22   ;;  %3980 = vst.msk [vmem:[#allocation0 + $0x432] sm:$0xc0] %vm3412_vm3, %v3971_v22   ;;  %v4942_v20 = vld [vmem:[#allocation0 + $0x3d0] sm:$0x3] }
 0x2d8   :  { %6400 = vst [vmem:[%s9204_s1 + $0xec] sm:$0x3] %v4918_v24  ;;  %6401 = vst [vmem:[%s9204_s1 + $0xee] sm:$0x3] %v4924_v25  ;;  %v4948_v33 = vld [vmem:[#allocation0 + $0x3d8] sm:$0x3]  ;;  %v4192_v25 = vpop.permute.xlu0 %4191  }
 0x2d9   :  { %6402 = vst [vmem:[%s9204_s1 + $0xf0] sm:$0x3] %v4930_v27  ;;  %6403 = vst [vmem:[%s9204_s1 + $0xf2] sm:$0x3] %v4936_v31  ;;  %v4954_v47 = vld [vmem:[#allocation0 + $0x3e0] sm:$0x3] }
 0x2da   :  { %6404 = vst [vmem:[%s9204_s1 + $0xf4] sm:$0x3] %v4942_v20  ;;  %v4960_v60 = vld [vmem:[#allocation0 + $0x3e8] sm:$0x3]  ;;  %3991 = vst.msk [vmem:[#allocation0 + $0x440] sm:$0x3] %vm3412_vm3, %v3988_v36  }
 0x2db   :  { %3993 = vst.msk [vmem:[#allocation0 + $0x446] sm:$0xc] %vm3412_vm3, %v3988_v36   ;;  %3995 = vst.msk [vmem:[#allocation0 + $0x44c] sm:$0x30] %vm3412_vm3, %v3988_v36   ;;  %v4966_v28 = vld [vmem:[#allocation0 + $0x3f0] sm:$0x3] }
 0x2dc   :  { %3997 = vst.msk [vmem:[#allocation0 + $0x452] sm:$0xc0] %vm3412_vm3, %v3988_v36   ;;  %6405 = vst [vmem:[%s9204_s1 + $0xf6] sm:$0x3] %v4948_v33  ;;  %v4972_v45 = vld [vmem:[#allocation0 + $0x3f8] sm:$0x3]  ;;  %v4206_v36 = vpop.permute.xlu1 %4205  }
 0x2dd   :  { %6406 = vst [vmem:[%s9204_s1 + $0xf8] sm:$0x3] %v4954_v47  ;;  %6407 = vst [vmem:[%s9204_s1 + $0xfa] sm:$0x3] %v4960_v60  ;;  %v4978_v35 = vld [vmem:[#allocation0 + $0x400] sm:$0x3] }
 0x2de   :  { %4008 = vst.msk [vmem:[#allocation0 + $0x460] sm:$0x3] %vm3412_vm3, %v4005_v34   ;;  %4010 = vst.msk [vmem:[#allocation0 + $0x466] sm:$0xc] %vm3412_vm3, %v4005_v34   ;;  %v4984_v37 = vld [vmem:[#allocation0 + $0x408] sm:$0x3] }
 0x2df   :  { %4012 = vst.msk [vmem:[#allocation0 + $0x46c] sm:$0x30] %vm3412_vm3, %v4005_v34   ;;  %4014 = vst.msk [vmem:[#allocation0 + $0x472] sm:$0xc0] %vm3412_vm3, %v4005_v34   ;;  %v4990_v38 = vld [vmem:[#allocation0 + $0x410] sm:$0x3] }
 0x2e0   :  { %6408 = vst [vmem:[%s9204_s1 + $0xfc] sm:$0x3] %v4966_v28  ;;  %6409 = vst [vmem:[%s9204_s1 + $0xfe] sm:$0x3] %v4972_v45  ;;  %v4996_v43 = vld [vmem:[#allocation0 + $0x418] sm:$0x3] }
 0x2e1   :  { %6410 = vst [vmem:[%s9204_s1 + $0x100] sm:$0x3] %v4978_v35  ;;  %6411 = vst [vmem:[%s9204_s1 + $0x102] sm:$0x3] %v4984_v37  ;;  %v5002_v44 = vld [vmem:[#allocation0 + $0x420] sm:$0x3] }
 0x2e2   :  { %6412 = vst [vmem:[%s9204_s1 + $0x104] sm:$0x3] %v4990_v38  ;;  %v5008_v53 = vld [vmem:[#allocation0 + $0x428] sm:$0x3]  ;;  %4025 = vst.msk [vmem:[#allocation0 + $0x480] sm:$0x3] %vm3412_vm3, %v4022_v41  }
 0x2e3   :  { %4027 = vst.msk [vmem:[#allocation0 + $0x486] sm:$0xc] %vm3412_vm3, %v4022_v41   ;;  %4029 = vst.msk [vmem:[#allocation0 + $0x48c] sm:$0x30] %vm3412_vm3, %v4022_v41   ;;  %v5014_v48 = vld [vmem:[#allocation0 + $0x430] sm:$0x3] }
 0x2e4   :  { %4031 = vst.msk [vmem:[#allocation0 + $0x492] sm:$0xc0] %vm3412_vm3, %v4022_v41   ;;  %6413 = vst [vmem:[%s9204_s1 + $0x106] sm:$0x3] %v4996_v43  ;;  %v5020_v49 = vld [vmem:[#allocation0 + $0x438] sm:$0x3] }
 0x2e5   :  { %6414 = vst [vmem:[%s9204_s1 + $0x108] sm:$0x3] %v5002_v44  ;;  %6415 = vst [vmem:[%s9204_s1 + $0x10a] sm:$0x3] %v5008_v53  ;;  %v5026_v10 = vld [vmem:[#allocation0 + $0x440] sm:$0x3] }
 0x2e6   :  { %4042 = vst.msk [vmem:[#allocation0 + $0x4a0] sm:$0x3] %vm3412_vm3, %v4039_v4   ;;  %4044 = vst.msk [vmem:[#allocation0 + $0x4a6] sm:$0xc] %vm3412_vm3, %v4039_v4   ;;  %v5032_v57 = vld [vmem:[#allocation0 + $0x448] sm:$0x3] }
 0x2e7   :  { %4046 = vst.msk [vmem:[#allocation0 + $0x4ac] sm:$0x30] %vm3412_vm3, %v4039_v4   ;;  %4048 = vst.msk [vmem:[#allocation0 + $0x4b2] sm:$0xc0] %vm3412_vm3, %v4039_v4   ;;  %v5038_v8 = vld [vmem:[#allocation0 + $0x450] sm:$0x3] }
 0x2e8   :  { %6416 = vst [vmem:[%s9204_s1 + $0x10c] sm:$0x3] %v5014_v48  ;;  %6417 = vst [vmem:[%s9204_s1 + $0x10e] sm:$0x3] %v5020_v49  ;;  %v5044_v50 = vld [vmem:[#allocation0 + $0x458] sm:$0x3] }
 0x2e9   :  { %6418 = vst [vmem:[%s9204_s1 + $0x110] sm:$0x3] %v5026_v10  ;;  %6419 = vst [vmem:[%s9204_s1 + $0x112] sm:$0x3] %v5032_v57  ;;  %v5050_v54 = vld [vmem:[#allocation0 + $0x460] sm:$0x3] }
 0x2ea   :  { %6420 = vst [vmem:[%s9204_s1 + $0x114] sm:$0x3] %v5038_v8  ;;  %v5056_v55 = vld [vmem:[#allocation0 + $0x468] sm:$0x3]  ;;  %4059 = vst.msk [vmem:[#allocation0 + $0x4c0] sm:$0x3] %vm3412_vm3, %v4056_v23  }
 0x2eb   :  { %4061 = vst.msk [vmem:[#allocation0 + $0x4c6] sm:$0xc] %vm3412_vm3, %v4056_v23   ;;  %4063 = vst.msk [vmem:[#allocation0 + $0x4cc] sm:$0x30] %vm3412_vm3, %v4056_v23   ;;  %v5062_v59 = vld [vmem:[#allocation0 + $0x470] sm:$0x3] }
 0x2ec   :  { %4065 = vst.msk [vmem:[#allocation0 + $0x4d2] sm:$0xc0] %vm3412_vm3, %v4056_v23   ;;  %6421 = vst [vmem:[%s9204_s1 + $0x116] sm:$0x3] %v5044_v50  ;;  %v5068_v61 = vld [vmem:[#allocation0 + $0x478] sm:$0x3] }
 0x2ed   :  { %6422 = vst [vmem:[%s9204_s1 + $0x118] sm:$0x3] %v5050_v54  ;;  %6423 = vst [vmem:[%s9204_s1 + $0x11a] sm:$0x3] %v5056_v55  ;;  %v5074_v14 = vld [vmem:[#allocation0 + $0x480] sm:$0x3] }
 0x2ee   :  { %4076 = vst.msk [vmem:[#allocation0 + $0x4e0] sm:$0x3] %vm3412_vm3, %v4073_v56   ;;  %4078 = vst.msk [vmem:[#allocation0 + $0x4e6] sm:$0xc] %vm3412_vm3, %v4073_v56   ;;  %v5080_v30 = vld [vmem:[#allocation0 + $0x488] sm:$0x3] }
 0x2ef   :  { %4080 = vst.msk [vmem:[#allocation0 + $0x4ec] sm:$0x30] %vm3412_vm3, %v4073_v56   ;;  %4082 = vst.msk [vmem:[#allocation0 + $0x4f2] sm:$0xc0] %vm3412_vm3, %v4073_v56   ;;  %v5086_v63 = vld [vmem:[#allocation0 + $0x490] sm:$0x3] }
 0x2f0   :  { %6424 = vst [vmem:[%s9204_s1 + $0x11c] sm:$0x3] %v5062_v59  ;;  %6425 = vst [vmem:[%s9204_s1 + $0x11e] sm:$0x3] %v5068_v61  ;;  %v5092_v26 = vld [vmem:[#allocation0 + $0x498] sm:$0x3] }
 0x2f1   :  { %6426 = vst [vmem:[%s9204_s1 + $0x120] sm:$0x3] %v5074_v14  ;;  %6427 = vst [vmem:[%s9204_s1 + $0x122] sm:$0x3] %v5080_v30  ;;  %v5098_v42 = vld [vmem:[#allocation0 + $0x4a0] sm:$0x3] }
 0x2f2   :  { %6428 = vst [vmem:[%s9204_s1 + $0x124] sm:$0x3] %v5086_v63  ;;  %v5104_v1 = vld [vmem:[#allocation0 + $0x4a8] sm:$0x3]  ;;  %4093 = vst.msk [vmem:[#allocation0 + $0x500] sm:$0x3] %vm3412_vm3, %v4090_v0  }
 0x2f3   :  { %4095 = vst.msk [vmem:[#allocation0 + $0x506] sm:$0xc] %vm3412_vm3, %v4090_v0   ;;  %4097 = vst.msk [vmem:[#allocation0 + $0x50c] sm:$0x30] %vm3412_vm3, %v4090_v0   ;;  %v5110_v46 = vld [vmem:[#allocation0 + $0x4b0] sm:$0x3] }
 0x2f4   :  { %4099 = vst.msk [vmem:[#allocation0 + $0x512] sm:$0xc0] %vm3412_vm3, %v4090_v0   ;;  %6429 = vst [vmem:[%s9204_s1 + $0x126] sm:$0x3] %v5092_v26  ;;  %v5116_v3 = vld [vmem:[#allocation0 + $0x4b8] sm:$0x3] }
 0x2f5   :  { %6430 = vst [vmem:[%s9204_s1 + $0x128] sm:$0x3] %v5098_v42  ;;  %6431 = vst [vmem:[%s9204_s1 + $0x12a] sm:$0x3] %v5104_v1  ;;  %v5122_v5 = vld [vmem:[#allocation0 + $0x4c0] sm:$0x3] }
 0x2f6   :  { %4110 = vst.msk [vmem:[#allocation0 + $0x520] sm:$0x3] %vm3412_vm3, %v4107_v32   ;;  %4112 = vst.msk [vmem:[#allocation0 + $0x526] sm:$0xc] %vm3412_vm3, %v4107_v32   ;;  %v5128_v6 = vld [vmem:[#allocation0 + $0x4c8] sm:$0x3] }
 0x2f7   :  { %4114 = vst.msk [vmem:[#allocation0 + $0x52c] sm:$0x30] %vm3412_vm3, %v4107_v32   ;;  %4116 = vst.msk [vmem:[#allocation0 + $0x532] sm:$0xc0] %vm3412_vm3, %v4107_v32   ;;  %v5134_v7 = vld [vmem:[#allocation0 + $0x4d0] sm:$0x3] }
 0x2f8   :  { %6432 = vst [vmem:[%s9204_s1 + $0x12c] sm:$0x3] %v5110_v46  ;;  %6433 = vst [vmem:[%s9204_s1 + $0x12e] sm:$0x3] %v5116_v3  ;;  %v5140_v40 = vld [vmem:[#allocation0 + $0x4d8] sm:$0x3] }
 0x2f9   :  { %6434 = vst [vmem:[%s9204_s1 + $0x130] sm:$0x3] %v5122_v5  ;;  %6435 = vst [vmem:[%s9204_s1 + $0x132] sm:$0x3] %v5128_v6  ;;  %v5146_v51 = vld [vmem:[#allocation0 + $0x4e0] sm:$0x3] }
 0x2fa   :  { %6436 = vst [vmem:[%s9204_s1 + $0x134] sm:$0x3] %v5134_v7  ;;  %v5152_v13 = vld [vmem:[#allocation0 + $0x4e8] sm:$0x3]  ;;  %4127 = vst.msk [vmem:[#allocation0 + $0x540] sm:$0x3] %vm3412_vm3, %v4124_v11  }
 0x2fb   :  { %4129 = vst.msk [vmem:[#allocation0 + $0x546] sm:$0xc] %vm3412_vm3, %v4124_v11   ;;  %4131 = vst.msk [vmem:[#allocation0 + $0x54c] sm:$0x30] %vm3412_vm3, %v4124_v11   ;;  %v5158_v2 = vld [vmem:[#allocation0 + $0x4f0] sm:$0x3] }
 0x2fc   :  { %4133 = vst.msk [vmem:[#allocation0 + $0x552] sm:$0xc0] %vm3412_vm3, %v4124_v11   ;;  %6437 = vst [vmem:[%s9204_s1 + $0x136] sm:$0x3] %v5140_v40  ;;  %v5164_v15 = vld [vmem:[#allocation0 + $0x4f8] sm:$0x3] }
 0x2fd   :  { %6438 = vst [vmem:[%s9204_s1 + $0x138] sm:$0x3] %v5146_v51  ;;  %6439 = vst [vmem:[%s9204_s1 + $0x13a] sm:$0x3] %v5152_v13  ;;  %v5170_v16 = vld [vmem:[#allocation0 + $0x500] sm:$0x3] }
 0x2fe   :  { %4144 = vst.msk [vmem:[#allocation0 + $0x560] sm:$0x3] %vm3412_vm3, %v4141_v52   ;;  %4146 = vst.msk [vmem:[#allocation0 + $0x566] sm:$0xc] %vm3412_vm3, %v4141_v52   ;;  %v5176_v17 = vld [vmem:[#allocation0 + $0x508] sm:$0x3] }
 0x2ff   :  { %4148 = vst.msk [vmem:[#allocation0 + $0x56c] sm:$0x30] %vm3412_vm3, %v4141_v52   ;;  %4150 = vst.msk [vmem:[#allocation0 + $0x572] sm:$0xc0] %vm3412_vm3, %v4141_v52   ;;  %v5182_v62 = vld [vmem:[#allocation0 + $0x510] sm:$0x3] }
 0x300   :  { %6440 = vst [vmem:[%s9204_s1 + $0x13c] sm:$0x3] %v5158_v2  ;;  %6441 = vst [vmem:[%s9204_s1 + $0x13e] sm:$0x3] %v5164_v15  ;;  %v5188_v29 = vld [vmem:[#allocation0 + $0x518] sm:$0x3] }
 0x301   :  { %6442 = vst [vmem:[%s9204_s1 + $0x140] sm:$0x3] %v5170_v16  ;;  %6443 = vst [vmem:[%s9204_s1 + $0x142] sm:$0x3] %v5176_v17  ;;  %v5194_v39 = vld [vmem:[#allocation0 + $0x520] sm:$0x3] }
 0x302   :  { %6444 = vst [vmem:[%s9204_s1 + $0x144] sm:$0x3] %v5182_v62  ;;  %v5200_v19 = vld [vmem:[#allocation0 + $0x528] sm:$0x3]  ;;  %4161 = vst.msk [vmem:[#allocation0 + $0x580] sm:$0x3] %vm3412_vm3, %v4158_v12  }
 0x303   :  { %4163 = vst.msk [vmem:[#allocation0 + $0x586] sm:$0xc] %vm3412_vm3, %v4158_v12   ;;  %4165 = vst.msk [vmem:[#allocation0 + $0x58c] sm:$0x30] %vm3412_vm3, %v4158_v12   ;;  %v5206_v58 = vld [vmem:[#allocation0 + $0x530] sm:$0x3] }
 0x304   :  { %4167 = vst.msk [vmem:[#allocation0 + $0x592] sm:$0xc0] %vm3412_vm3, %v4158_v12   ;;  %6445 = vst [vmem:[%s9204_s1 + $0x146] sm:$0x3] %v5188_v29  ;;  %v5212_v9 = vld [vmem:[#allocation0 + $0x538] sm:$0x3] }
 0x305   :  { %6446 = vst [vmem:[%s9204_s1 + $0x148] sm:$0x3] %v5194_v39  ;;  %6447 = vst [vmem:[%s9204_s1 + $0x14a] sm:$0x3] %v5200_v19  ;;  %v5218_v18 = vld [vmem:[#allocation0 + $0x540] sm:$0x3] }
 0x306   :  { %4178 = vst.msk [vmem:[#allocation0 + $0x5a0] sm:$0x3] %vm3412_vm3, %v4175_v21   ;;  %4180 = vst.msk [vmem:[#allocation0 + $0x5a6] sm:$0xc] %vm3412_vm3, %v4175_v21   ;;  %v5224_v22 = vld [vmem:[#allocation0 + $0x548] sm:$0x3] }
 0x307   :  { %4182 = vst.msk [vmem:[#allocation0 + $0x5ac] sm:$0x30] %vm3412_vm3, %v4175_v21   ;;  %4184 = vst.msk [vmem:[#allocation0 + $0x5b2] sm:$0xc0] %vm3412_vm3, %v4175_v21   ;;  %v5230_v24 = vld [vmem:[#allocation0 + $0x550] sm:$0x3] }
 0x308   :  { %6448 = vst [vmem:[%s9204_s1 + $0x14c] sm:$0x3] %v5206_v58  ;;  %6449 = vst [vmem:[%s9204_s1 + $0x14e] sm:$0x3] %v5212_v9  ;;  %v5236_v27 = vld [vmem:[#allocation0 + $0x558] sm:$0x3] }
 0x309   :  { %6450 = vst [vmem:[%s9204_s1 + $0x150] sm:$0x3] %v5218_v18  ;;  %6451 = vst [vmem:[%s9204_s1 + $0x152] sm:$0x3] %v5224_v22  ;;  %v5242_v31 = vld [vmem:[#allocation0 + $0x560] sm:$0x3] }
 0x30a   :  { %6452 = vst [vmem:[%s9204_s1 + $0x154] sm:$0x3] %v5230_v24  ;;  %v5248_v20 = vld [vmem:[#allocation0 + $0x568] sm:$0x3]  ;;  %4195 = vst.msk [vmem:[#allocation0 + $0x5c0] sm:$0x3] %vm3412_vm3, %v4192_v25  }
 0x30b   :  { %4197 = vst.msk [vmem:[#allocation0 + $0x5c6] sm:$0xc] %vm3412_vm3, %v4192_v25   ;;  %4199 = vst.msk [vmem:[#allocation0 + $0x5cc] sm:$0x30] %vm3412_vm3, %v4192_v25   ;;  %v5254_v33 = vld [vmem:[#allocation0 + $0x570] sm:$0x3] }
 0x30c   :  { %4201 = vst.msk [vmem:[#allocation0 + $0x5d2] sm:$0xc0] %vm3412_vm3, %v4192_v25   ;;  %6453 = vst [vmem:[%s9204_s1 + $0x156] sm:$0x3] %v5236_v27  ;;  %v5260_v47 = vld [vmem:[#allocation0 + $0x578] sm:$0x3] }
 0x30d   :  { %6454 = vst [vmem:[%s9204_s1 + $0x158] sm:$0x3] %v5242_v31  ;;  %6455 = vst [vmem:[%s9204_s1 + $0x15a] sm:$0x3] %v5248_v20  ;;  %v5266_v60 = vld [vmem:[#allocation0 + $0x580] sm:$0x3] }
 0x30e   :  { %4209 = vst.msk [vmem:[#allocation0 + $0x5e0] sm:$0x3] %vm3412_vm3, %v4206_v36   ;;  %6456 = vst [vmem:[%s9204_s1 + $0x15c] sm:$0x3] %v5254_v33  ;;  %v5272_v34 = vld [vmem:[#allocation0 + $0x588] sm:$0x3] }
 0x30f   :  { %6457 = vst [vmem:[%s9204_s1 + $0x15e] sm:$0x3] %v5260_v47  ;;  %v5278_v28 = vld [vmem:[#allocation0 + $0x590] sm:$0x3]  ;;  %6458 = vst [vmem:[%s9204_s1 + $0x160] sm:$0x3] %v5266_v60 }
 0x310   :  { %6459 = vst [vmem:[%s9204_s1 + $0x162] sm:$0x3] %v5272_v34  ;;  %6460 = vst [vmem:[%s9204_s1 + $0x164] sm:$0x3] %v5278_v28  ;;  %v5284_v45 = vld [vmem:[#allocation0 + $0x598] sm:$0x3] }
 0x311   :  { %v5290_v35 = vld [vmem:[#allocation0 + $0x5a0] sm:$0x3]  ;;  %v5296_v37 = vld [vmem:[#allocation0 + $0x5a8] sm:$0x3]  ;;  %6461 = vst [vmem:[%s9204_s1 + $0x166] sm:$0x3] %v5284_v45 }
 0x312   :  { %6462 = vst [vmem:[%s9204_s1 + $0x168] sm:$0x3] %v5290_v35  ;;  %6463 = vst [vmem:[%s9204_s1 + $0x16a] sm:$0x3] %v5296_v37  ;;  %v5302_v38 = vld [vmem:[#allocation0 + $0x5b0] sm:$0x3] }
 0x313   :  { %v5308_v41 = vld [vmem:[#allocation0 + $0x5b8] sm:$0x3]  ;;  %6464 = vst [vmem:[%s9204_s1 + $0x16c] sm:$0x3] %v5302_v38  ;;  %v5314_v43 = vld [vmem:[#allocation0 + $0x5c0] sm:$0x3] }
 0x314   :  { %6465 = vst [vmem:[%s9204_s1 + $0x16e] sm:$0x3] %v5308_v41  ;;  %v5320_v44 = vld [vmem:[#allocation0 + $0x5c8] sm:$0x3]  ;;  %v5326_v53 = vld [vmem:[#allocation0 + $0x5d0] sm:$0x3] }
 0x315   :  { %6466 = vst [vmem:[%s9204_s1 + $0x170] sm:$0x3] %v5314_v43  ;;  %6467 = vst [vmem:[%s9204_s1 + $0x172] sm:$0x3] %v5320_v44  ;;  %v5332_v4 = vld [vmem:[#allocation0 + $0x5d8] sm:$0x3] }
 0x316   :  { %6468 = vst [vmem:[%s9204_s1 + $0x174] sm:$0x3] %v5326_v53  ;;  %v5338_v48 = vld [vmem:[#allocation0 + $0x5e0] sm:$0x3]  ;;  %6469 = vst [vmem:[%s9204_s1 + $0x176] sm:$0x3] %v5332_v4 }
 0x317   :  { %6470 = vst [vmem:[%s9204_s1 + $0x178] sm:$0x3] %v5338_v48 }

// kernel: model_forward.1
= control target key start
LH: loop header
LB: loop body
LE: loop exit
PB: predicated region body
PF: predicated region fallthrough
CT: control target
= control target key end

     0   :  { %8 = vsyncpa [#allocation3], 0  ;;  %s3604_s0 = inlined_call_operand.vmem [shape: f32[9,3,2,7,105], index: 0, kind: input, shape index: {}]   ;;  %s3605_s1 = inlined_call_operand.vmem [shape: f32[243], index: 1, kind: input, shape index: {}]   ;;  %s3606_s2 = inlined_call_operand.vmem [shape: f32[3], index: 2, kind: input, shape index: {}]   ;;  %s3607_s3 = inlined_call_operand.vmem [shape: f32[2,4,97], index: 3, kind: output, shape index: {}]  }
   0x1   :  { %s18_s14 = sshll.u32 %s3605_s1, 4  ;;  %s19_s14 = int_to_ptr.vmem [resolvable:$true] %s18_s14 }
   0x2   :  { %9 = vsyncpa [#allocation5], 0  ;;  %s28_s17 = sshll.u32 %s3606_s2, 4  ;;  %s1662_s18 = scalar_lea.vmem %s19_s14, 32  ;;  %s29_s17 = int_to_ptr.vmem [resolvable:$true] %s28_s17 }
   0x3   :  { %p1663_p0 = scmp.ne.s32.totalorder %s19_s14, %s1662_s18  ;;  %p1667_p1 = scmp.lt.s32.totalorder %s19_s14, %s19_s14 }
   0x4   :  { %p1668_p2 = scmp.lt.s32.totalorder %s1662_s18, %s1662_s18 }
   0x6   :  { %p1669_p3 = por %p1668_p2, %p1667_p1 }
   0x8   :  { %p1670_p4 = pnand %p1669_p3, %p1663_p0 }
   0xa   :  { %1673 = shalt.err (!%p1670_p4)
}
   0xb   :  { %s1690_s19 = smov [#allocation2]   ;;  %s1674_s20 = scalar_lea.vmem %s29_s17, 16 }
   0xc   :  { %21 = dma.vmem_to_smem %s19_s14, 32, %s1690_s19, [#allocation3]  }
   0xd   :  { %p1675_p5 = scmp.ne.s32.totalorder %s29_s17, %s1674_s20  ;;  %p1679_p6 = scmp.lt.s32.totalorder %s29_s17, %s29_s17 }
   0xe   :  { %p1680_p7 = scmp.lt.s32.totalorder %s1674_s20, %s1674_s20 }
  0x10   :  { %p1681_p8 = por %p1680_p7, %p1679_p6 }
  0x12   :  { %p1682_p9 = pnand %p1681_p8, %p1675_p5 }
  0x14   :  { %1685 = shalt.err (!%p1682_p9)
}
  0x15   :  { %s1691_s1 = smov [#allocation4]  }
  0x16   :  { %31 = dma.vmem_to_smem %s29_s17, 16, %s1691_s1, [#allocation5]  }
  0x17   :  { %1686 = dma.done.wait [#allocation3], 32  }
  0x18   :  { %1687 = vsyncadd [#allocation3], 4294967264 }
  0x19   :  { %1688 = dma.done.wait [#allocation5], 16  }
  0x1a   :  { %1689 = vsyncadd [#allocation5], 4294967280 }
  0x1b   :  { %38 = sfence }
  0x1c   :  { %v39_v0 = vlaneseq  ;;  %s1720_s2 = sld [smem:[#allocation4]]  ;;  %s1258_s21 = sld [smem:[#allocation4 + $0x1]]  ;;  %v51_v7 = vld [vmem:[%s3604_s0] sm:$0x1f]  ;;  %v1262_v15 = vld [vmem:[%s3604_s0 + $0x30] sm:$0x1f] }
  0x1d   :  { %s1259_s22 = sld [smem:[#allocation4 + $0x2]]  ;;  %s1722_s23 = sld [smem:[#allocation2]]  ;;  %v1267_v20 = vld [vmem:[%s3604_s0 + $0x60] sm:$0x1f]  ;;  %v1272_v30 = vld [vmem:[%s3604_s0 + $0x90] sm:$0x1f] }
  0x1e   :  { %v1724_v1 = vand.u32 127, %v39_v0  ;;  %s1260_s24 = sld [smem:[#allocation2 + $0x51]]  ;;  %s1261_s25 = sld [smem:[#allocation2 + $0xa2]]  ;;  %v1277_v34 = vld [vmem:[%s3604_s0 + $0xc0] sm:$0x1f]  ;;  %vm1249_vm2 = vcmask 789504  }
  0x1f   :  { %s1726_s26 = sld [smem:[#allocation2 + $0x1]]  ;;  %s1728_s27 = sld [smem:[#allocation2 + $0x52]]  ;;  %v1282_v43 = vld [vmem:[%s3604_s0 + $0xf0] sm:$0x1f]  ;;  %v1287_v51 = vld [vmem:[%s3604_s0 + $0x120] sm:$0x1f] }
  0x20   :  { %s1730_s28 = sld [smem:[#allocation2 + $0xa3]]  ;;  %s1732_s29 = sld [smem:[#allocation2 + $0x2]]  ;;  %vm42_vm0 = vcmp.lt.s32.totalorder %v1724_v1, 70  ;;  %vm41_vm1 = vcmp.lt.s32.totalorder %v1724_v1, 35  ;;  %v1292_v60 = vld [vmem:[%s3604_s0 + $0x150] sm:$0x1f] }
  0x21   :  { %s1734_s30 = sld [smem:[#allocation2 + $0x53]]  ;;  %s1736_s4 = sld [smem:[#allocation2 + $0xa4]]  ;;  %v1326_v1 = vld [vmem:[%s3604_s0 + $0xf9] sm:$0x1f] }
  0x22   :  { %v46_v2 = vstv %s1258_s21  ;;  %s1739_s5 = sld [smem:[#allocation2 + $0x3]]  ;;  %s1741_s6 = sld [smem:[#allocation2 + $0x54]]  ;;  %v49_v4 = vstv %s1720_s2 }
  0x23   :  { %v47_v3 = vstv %s1259_s22  ;;  %v59_v5 = vstv %s1722_s23  ;;  %s1746_s7 = sld [smem:[#allocation2 + $0xa5]]  ;;  %s1748_s8 = sld [smem:[#allocation2 + $0x4]] }
  0x24   :  { %v48_v6 = vsel %vm42_vm0, %v46_v2, %v47_v3  ;;  %v56_v8 = vstv %s1260_s24  ;;  %v57_v9 = vstv %s1261_s25  ;;  %s1755_s11 = sld [smem:[#allocation2 + $0x55]]  ;;  %s1757_s12 = sld [smem:[#allocation2 + $0xa6]] }
  0x25   :  { %v58_v10 = vsel %vm42_vm0, %v56_v8, %v57_v9  ;;  %v71_v11 = vstv %s1728_s27  ;;  %v74_v12 = vstv %s1726_s26  ;;  %s1763_s13 = sld [smem:[#allocation2 + $0x5]]  ;;  %s1765_s14 = sld [smem:[#allocation2 + $0x56]]  ;;  %v1769_v13 = vsel %vm41_vm1, %v49_v4, %v48_v6  ;;  %v1297_v4 = vld [vmem:[%s3604_s0 + $0x180] sm:$0x1f] }
  0x26   :  { %v1773_v14 = vsel %vm41_vm1, %v59_v5, %v58_v10  ;;  %v72_v16 = vstv %s1730_s28  ;;  %v89_v17 = vstv %s1732_s29  ;;  %s1780_s17 = sld [smem:[#allocation2 + $0xa7]]  ;;  %s1782_s18 = sld [smem:[#allocation2 + $0x6]] }
  0x27   :  { %v61_v18 = vmul.f32 %v1773_v14, %v51_v7  ;;  %v73_v19 = vsel %vm42_vm0, %v71_v11, %v72_v16  ;;  %v86_v21 = vstv %s1734_s30  ;;  %v87_v22 = vstv %s1736_s4  ;;  %s1792_s1 = sld [smem:[#allocation2 + $0x57]]  ;;  %s1794_s2 = sld [smem:[#allocation2 + $0xa8]] }
  0x28   :  { %v1798_v23 = vsel %vm41_vm1, %v74_v12, %v73_v19  ;;  %v88_v24 = vsel %vm42_vm0, %v86_v21, %v87_v22  ;;  %v101_v25 = vstv %s1741_s6  ;;  %v104_v26 = vstv %s1739_s5  ;;  %s1804_s21 = sld [smem:[#allocation2 + $0x7]]  ;;  %s1806_s22 = sld [smem:[#allocation2 + $0x58]] }
  0x29   :  { %v63_v27 = vadd.f32 %v61_v18, %v1769_v13  ;;  %v76_v28 = vmul.f32 %v1262_v15, %v1798_v23  ;;  %v1812_v29 = vsel %vm41_vm1, %v89_v17, %v88_v24  ;;  %v102_v31 = vstv %s1746_s7  ;;  %s1818_s25 = sld [smem:[#allocation2 + $0xa9]]  ;;  %s1820_s26 = sld [smem:[#allocation2 + $0x8]]  ;;  %v185_v15 = vld [vmem:[%s3604_s0 + $0x1] sm:$0x1f] }
  0x2a   :  { %v91_v32 = vmul.f32 %v1267_v20, %v1812_v29  ;;  %v103_v33 = vsel %vm42_vm0, %v101_v25, %v102_v31  ;;  %v116_v35 = vstv %s1755_s11  ;;  %v117_v36 = vstv %s1757_s12  ;;  %s1830_s29 = sld [smem:[#allocation2 + $0x59]]  ;;  %s1832_s30 = sld [smem:[#allocation2 + $0xaa]] }
  0x2b   :  { %v78_v37 = vadd.f32 %v76_v28, %v63_v27  ;;  %v1836_v38 = vsel %vm41_vm1, %v104_v26, %v103_v33  ;;  %v118_v39 = vsel %vm42_vm0, %v116_v35, %v117_v36  ;;  %v119_v40 = vstv %s1748_s8  ;;  %s1841_s4 = sld [smem:[#allocation2 + $0x9]]  ;;  %s1843_s5 = sld [smem:[#allocation2 + $0x5a]]  ;;  %v1305_v27 = vld [vmem:[%s3604_s0 + $0x31] sm:$0x1f]  ;;  %v1310_v36 = vld [vmem:[%s3604_s0 + $0x61] sm:$0x1f] }
  0x2c   :  { %v106_v41 = vmul.f32 %v1272_v30, %v1836_v38  ;;  %v1848_v42 = vsel %vm41_vm1, %v119_v40, %v118_v39  ;;  %v131_v44 = vstv %s1765_s14  ;;  %v132_v45 = vstv %s1780_s17  ;;  %s1855_s8 = sld [smem:[#allocation2 + $0xab]]  ;;  %s1857_s9 = sld [smem:[#allocation2 + $0xa]] }
  0x2d   :  { %v93_v46 = vadd.f32 %v91_v32, %v78_v37  ;;  %v121_v47 = vmul.f32 %v1277_v34, %v1848_v42  ;;  %v133_v48 = vsel %vm42_vm0, %v131_v44, %v132_v45  ;;  %v134_v49 = vstv %s1763_s13  ;;  %s1863_s10 = sld [smem:[#allocation2 + $0x5b]]  ;;  %s1865_s11 = sld [smem:[#allocation2 + $0xac]] }
  0x2e   :  { %v1869_v50 = vsel %vm41_vm1, %v134_v49, %v133_v48  ;;  %v146_v52 = vstv %s1792_s1  ;;  %v147_v53 = vstv %s1794_s2  ;;  %v149_v54 = vstv %s1782_s18  ;;  %s1877_s15 = sld [smem:[#allocation2 + $0x5c]]  ;;  %s1883_s13 = sld [smem:[#allocation2 + $0xb]] }
  0x2f   :  { %v108_v55 = vadd.f32 %v106_v41, %v93_v46  ;;  %v136_v56 = vmul.f32 %v1282_v43, %v1869_v50  ;;  %v148_v57 = vsel %vm42_vm0, %v146_v52, %v147_v53  ;;  %v161_v58 = vstv %s1806_s22  ;;  %s1885_s16 = sld [smem:[#allocation2 + $0xad]]  ;;  %s1899_s20 = sld [smem:[#allocation2 + $0xae]]  ;;  %v1315_v46 = vld [vmem:[%s3604_s0 + $0x91] sm:$0x1f] }
  0x30   :  { %v1889_v59 = vsel %vm41_vm1, %v149_v54, %v148_v57  ;;  %v162_v61 = vstv %s1818_s25  ;;  %v164_v62 = vstv %s1804_s21  ;;  %v176_v63 = vstv %s1830_s29  ;;  %s1897_s19 = sld [smem:[#allocation2 + $0x5d]]  ;;  %s1908_s22 = sld [smem:[#allocation2 + $0xc]] }
  0x31   :  { %v123_v0 = vadd.f32 %v121_v47, %v108_v55  ;;  %v151_v2 = vmul.f32 %v1287_v51, %v1889_v59  ;;  %v163_v3 = vsel %vm42_vm0, %v161_v58, %v162_v61  ;;  %v177_v5 = vstv %s1832_s30  ;;  %s1910_s21 = sld [smem:[#allocation2 + $0xd]]  ;;  %s1920_s23 = sld [smem:[#allocation2 + $0x5e]] }
  0x32   :  { %v1914_v6 = vsel %vm41_vm1, %v164_v62, %v163_v3  ;;  %v178_v7 = vsel %vm42_vm0, %v176_v63, %v177_v5  ;;  %v179_v8 = vstv %s1820_s26  ;;  %v190_v9 = vstv %s1843_s5  ;;  %s1922_s24 = sld [smem:[#allocation2 + $0xaf]]  ;;  %s1933_s26 = sld [smem:[#allocation2 + $0xe]]  ;;  %v1330_v5 = vld [vmem:[%s3604_s0 + $0x121] sm:$0x1f] }
  0x33   :  { %v138_v10 = vadd.f32 %v136_v56, %v123_v0  ;;  %v166_v11 = vmul.f32 %v1292_v60, %v1914_v6  ;;  %v1927_v12 = vsel %vm41_vm1, %v179_v8, %v178_v7  ;;  %v191_v16 = vstv %s1855_s8  ;;  %s1935_s28 = sld [smem:[#allocation2 + $0x5f]]  ;;  %s1942_s29 = sld [smem:[#allocation2 + $0xb0]]  ;;  %v1320_v56 = vld [vmem:[%s3604_s0 + $0xc1] sm:$0x1f]  ;;  %v1325_v0 = vld [vmem:[%s3604_s0 + $0xf1] sm:$0x1f] }
  0x34   :  { %v181_v17 = vmul.f32 %v1297_v4, %v1927_v12  ;;  %v192_v18 = vsel %vm42_vm0, %v190_v9, %v191_v16  ;;  %v193_v19 = vstv %s1841_s4  ;;  %v204_v20 = vstv %s1863_s10  ;;  %s1944_s30 = sld [smem:[#allocation2 + $0x60]]  ;;  %s1952_s5 = sld [smem:[#allocation2 + $0xb1]] }
  0x35   :  { %v153_v21 = vadd.f32 %v151_v2, %v138_v10  ;;  %v1948_v22 = vsel %vm41_vm1, %v193_v19, %v192_v18  ;;  %v205_v24 = vstv %s1865_s11  ;;  %v207_v25 = vstv %s1857_s9  ;;  %s1962_s7 = sld [smem:[#allocation2 + $0xf]]  ;;  %s1964_s8 = sld [smem:[#allocation2 + $0x61]] }
  0x36   :  { %v195_v26 = vmul.f32 %v1948_v22, %v185_v15  ;;  %v206_v28 = vsel %vm42_vm0, %v204_v20, %v205_v24  ;;  %v218_v30 = vstv %s1877_s15  ;;  %v219_v31 = vstv %s1885_s16  ;;  %s1973_s9 = sld [smem:[#allocation2 + $0xb2]]  ;;  %s1984_s12 = sld [smem:[#allocation2 + $0x10]] }
  0x37   :  { %v168_v32 = vadd.f32 %v166_v11, %v153_v21  ;;  %v1968_v33 = vsel %vm41_vm1, %v207_v25, %v206_v28  ;;  %v220_v34 = vsel %vm42_vm0, %v218_v30, %v219_v31  ;;  %v221_v35 = vstv %s1883_s13  ;;  %s1986_s14 = sld [smem:[#allocation2 + $0x62]]  ;;  %s1992_s15 = sld [smem:[#allocation2 + $0x11]] }
  0x38   :  { %v1980_v37 = vsel %vm41_vm1, %v221_v35, %v220_v34  ;;  %v232_v39 = vstv %s1897_s19  ;;  %v233_v40 = vstv %s1899_s20  ;;  %v209_v43 = vmul.f32 %v1305_v27, %v1968_v33  ;;  %s1994_s13 = sld [smem:[#allocation2 + $0xb3]]  ;;  %s2008_s19 = sld [smem:[#allocation2 + $0xb4]]  ;;  %v1335_v27 = vld [vmem:[%s3604_s0 + $0x151] sm:$0x1f]  ;;  %v1340_v35 = vld [vmem:[%s3604_s0 + $0x181] sm:$0x1f] }
  0x39   :  { %v183_v41 = vadd.f32 %v181_v17, %v168_v32  ;;  %v234_v44 = vsel %vm42_vm0, %v232_v39, %v233_v40  ;;  %v235_v45 = vstv %s1908_s22  ;;  %v246_v48 = vstv %s1920_s23  ;;  %s2006_s18 = sld [smem:[#allocation2 + $0x63]]  ;;  %s2014_s20 = sld [smem:[#allocation2 + $0x12]] }
  0x3a   :  { %v2001_v47 = vsel %vm41_vm1, %v235_v45, %v234_v44  ;;  %v247_v49 = vstv %s1922_s24  ;;  %v249_v51 = vstv %s1910_s21  ;;  %v223_v53 = vmul.f32 %v1310_v36, %v1980_v37  ;;  %s2026_s22 = sld [smem:[#allocation2 + $0x64]]  ;;  %s2028_s21 = sld [smem:[#allocation2 + $0xb5]] }
  0x3b   :  { %v197_v52 = vadd.f32 %v195_v26, %v183_v41  ;;  %v248_v54 = vsel %vm42_vm0, %v246_v48, %v247_v49  ;;  %v260_v55 = vstv %s1935_s28  ;;  %v261_v58 = vstv %s1942_s29  ;;  %s2037_s25 = sld [smem:[#allocation2 + $0x13]]  ;;  %s2039_s27 = sld [smem:[#allocation2 + $0x14]]  ;;  %v311_v41 = vld [vmem:[%s3604_s0 + $0x2] sm:$0x1f] }
  0x3c   :  { %v2021_v57 = vsel %vm41_vm1, %v249_v51, %v248_v54  ;;  %v263_v60 = vstv %s1933_s26  ;;  %v274_v61 = vstv %s1944_s30  ;;  %v237_v63 = vmul.f32 %v1315_v46, %v2001_v47  ;;  %s2052_s29 = sld [smem:[#allocation2 + $0x65]]  ;;  %s2054_s30 = sld [smem:[#allocation2 + $0xb6]] }
  0x3d   :  { %v211_v62 = vadd.f32 %v209_v43, %v197_v52  ;;  %v262_v2 = vsel %vm42_vm0, %v260_v55, %v261_v58  ;;  %v275_v3 = vstv %s1952_s5  ;;  %v277_v8 = vstv %s1962_s7  ;;  %s2062_s5 = sld [smem:[#allocation2 + $0x66]]  ;;  %s2069_s4 = sld [smem:[#allocation2 + $0xb7]] }
  0x3e   :  { %v2043_v4 = vsel %vm41_vm1, %v263_v60, %v262_v2  ;;  %v276_v7 = vsel %vm42_vm0, %v274_v61, %v275_v3  ;;  %v288_v9 = vstv %s1964_s8  ;;  %v251_v11 = vmul.f32 %v1320_v56, %v2021_v57  ;;  %s2071_s6 = sld [smem:[#allocation2 + $0x67]]  ;;  %s2076_s7 = sld [smem:[#allocation2 + $0x15]]  ;;  %v1348_v60 = vld [vmem:[%s3604_s0 + $0x32] sm:$0x1f] }
  0x3f   :  { %v225_v10 = vadd.f32 %v223_v53, %v211_v62  ;;  %v2059_v15 = vsel %vm41_vm1, %v277_v8, %v276_v7  ;;  %v289_v16 = vstv %s1973_s9  ;;  %v265_v17 = vmul.f32 %v1325_v0, %v2043_v4  ;;  %s2078_s8 = sld [smem:[#allocation2 + $0xb8]]  ;;  %s2091_s11 = sld [smem:[#allocation2 + $0x16]]  ;;  %v1353_v0 = vld [vmem:[%s3604_s0 + $0x62] sm:$0x1f] }
  0x40   :  { %v290_v18 = vsel %vm42_vm0, %v288_v9, %v289_v16  ;;  %v291_v19 = vstv %s1984_s12  ;;  %v302_v20 = vstv %s1986_s14  ;;  %v279_v24 = vmul.f32 %v1330_v5, %v2059_v15  ;;  %s2093_s12 = sld [smem:[#allocation2 + $0x68]]  ;;  %s2126_s1 = sld [smem:[#allocation2 + $0xba]] }
  0x41   :  { %v239_v21 = vadd.f32 %v237_v63, %v225_v10  ;;  %v303_v25 = vstv %s1994_s13  ;;  %v305_v26 = vstv %s1992_s15  ;;  %v2085_v28 = vsel %vm41_vm1, %v291_v19, %v290_v18  ;;  %s2105_s13 = sld [smem:[#allocation2 + $0xb9]]  ;;  %s2132_s2 = sld [smem:[#allocation2 + $0x6a]] }
  0x42   :  { %v304_v30 = vsel %vm42_vm0, %v302_v20, %v303_v25  ;;  %v316_v31 = vstv %s2006_s18  ;;  %v317_v32 = vstv %s2008_s19  ;;  %v319_v40 = vstv %s2014_s20  ;;  %s2116_s18 = sld [smem:[#allocation2 + $0x17]]  ;;  %s2118_s19 = sld [smem:[#allocation2 + $0x69]] }
  0x43   :  { %v253_v34 = vadd.f32 %v251_v11, %v239_v21  ;;  %v2100_v36 = vsel %vm41_vm1, %v305_v26, %v304_v30  ;;  %v318_v39 = vsel %vm42_vm0, %v316_v31, %v317_v32  ;;  %v330_v44 = vstv %s2026_s22  ;;  %s2124_s20 = sld [smem:[#allocation2 + $0x18]]  ;;  %s2134_s22 = sld [smem:[#allocation2 + $0xbb]]  ;;  %v1363_v32 = vld [vmem:[%s3604_s0 + $0xc2] sm:$0x1f] }
  0x44   :  { %v2112_v43 = vsel %vm41_vm1, %v319_v40, %v318_v39  ;;  %v331_v45 = vstv %s2028_s21  ;;  %v293_v48 = vmul.f32 %v1335_v27, %v2085_v28  ;;  %v333_v51 = vstv %s2037_s25  ;;  %s2143_s24 = sld [smem:[#allocation2 + $0x19]]  ;;  %s2158_s26 = sld [smem:[#allocation2 + $0x6b]]  ;;  %v1368_v40 = vld [vmem:[%s3604_s0 + $0xf2] sm:$0x1f] }
  0x45   :  { %v267_v46 = vadd.f32 %v265_v17, %v253_v34  ;;  %v332_v49 = vsel %vm42_vm0, %v330_v44, %v331_v45  ;;  %v307_v52 = vmul.f32 %v1340_v35, %v2100_v36  ;;  %v344_v53 = vstv %s2052_s29  ;;  %s2160_s28 = sld [smem:[#allocation2 + $0xbc]]  ;;  %s2194_s9 = sld [smem:[#allocation2 + $0xbe]] }
  0x46   :  { %v345_v54 = vstv %s2054_s30  ;;  %v347_v55 = vstv %s2039_s27  ;;  %v321_v58 = vmul.f32 %v2112_v43, %v311_v41  ;;  %v358_v62 = vstv %s2062_s5  ;;  %s2170_s29 = sld [smem:[#allocation2 + $0x6c]]  ;;  %s2172_s30 = sld [smem:[#allocation2 + $0xbd]] }
  0x47   :  { %v281_v56 = vadd.f32 %v279_v24, %v267_v46  ;;  %v346_v61 = vsel %vm42_vm0, %v344_v53, %v345_v54  ;;  %v2147_v63 = vsel %vm41_vm1, %v333_v51, %v332_v49  ;;  %v359_v3 = vstv %s2069_s4  ;;  %s2177_s5 = sld [smem:[#allocation2 + $0x1a]]  ;;  %s2179_s4 = sld [smem:[#allocation2 + $0x1b]]  ;;  %v1358_v24 = vld [vmem:[%s3604_s0 + $0x92] sm:$0x1f] }
  0x48   :  { %v2154_v2 = vsel %vm41_vm1, %v347_v55, %v346_v61  ;;  %v372_v5 = vstv %s2071_s6  ;;  %v360_v8 = vsel %vm42_vm0, %v358_v62, %v359_v3  ;;  %v361_v9 = vstv %s2076_s7  ;;  %s2210_s14 = sld [smem:[#allocation2 + $0xbf]]  ;;  %s2226_s17 = sld [smem:[#allocation2 + $0x1c]]  ;;  %v1373_v61 = vld [vmem:[%s3604_s0 + $0x122] sm:$0x1f] }
  0x49   :  { %v295_v7 = vadd.f32 %v293_v48, %v281_v56  ;;  %v373_v10 = vstv %s2078_s8  ;;  %v375_v16 = vstv %s2091_s11  ;;  %v386_v17 = vstv %s2093_s12  ;;  %s2192_s8 = sld [smem:[#allocation2 + $0x6d]]  ;;  %s2208_s12 = sld [smem:[#allocation2 + $0x6e]] }
  0x4a   :  { %v374_v11 = vsel %vm42_vm0, %v372_v5, %v373_v10  ;;  %v335_v19 = vmul.f32 %v1348_v60, %v2147_v63  ;;  %v349_v20 = vmul.f32 %v1353_v0, %v2154_v2  ;;  %v387_v21 = vstv %s2105_s13  ;;  %s2220_s16 = sld [smem:[#allocation2 + $0x6f]]  ;;  %s2257_s23 = sld [smem:[#allocation2 + $0x71]] }
  0x4b   :  { %v309_v18 = vadd.f32 %v307_v52, %v295_v7  ;;  %v2186_v25 = vsel %vm41_vm1, %v361_v9, %v360_v8  ;;  %v388_v26 = vsel %vm42_vm0, %v386_v17, %v387_v21  ;;  %v389_v27 = vstv %s2116_s18  ;;  %s2228_s18 = sld [smem:[#allocation2 + $0xc0]]  ;;  %v1378_v8 = vld [vmem:[%s3604_s0 + $0x152] sm:$0x1f]  ;;  %s2294_s6 = sld [smem:[#allocation2 + $0x73]] }
  0x4c   :  { %v400_v30 = vstv %s2118_s19  ;;  %v2201_v34 = vsel %vm41_vm1, %v375_v16, %v374_v11  ;;  %v2205_v35 = vsel %vm41_vm1, %v389_v27, %v388_v26  ;;  %v401_v39 = vstv %s2126_s1  ;;  %s2232_s19 = sld [smem:[#allocation2 + $0x1d]]  ;;  %s2242_s1 = sld [smem:[#allocation2 + $0x70]]  ;;  %v1383_v26 = vld [vmem:[%s3604_s0 + $0x182] sm:$0x1f] }
  0x4d   :  { %v323_v31 = vadd.f32 %v321_v58, %v309_v18  ;;  %v402_v41 = vsel %vm42_vm0, %v400_v30, %v401_v39  ;;  %v403_v44 = vstv %s2124_s20  ;;  %v414_v45 = vstv %s2132_s2  ;;  %s2234_s20 = sld [smem:[#allocation2 + $0x1e]]  ;;  %s2244_s2 = sld [smem:[#allocation2 + $0xc1]] }
  0x4e   :  { %v415_v46 = vstv %s2134_s22  ;;  %v363_v49 = vmul.f32 %v1358_v24, %v2186_v25  ;;  %v417_v52 = vstv %s2143_s24  ;;  %v428_v53 = vstv %s2158_s26  ;;  %s2259_s24 = sld [smem:[#allocation2 + $0xc2]]  ;;  %s2270_s26 = sld [smem:[#allocation2 + $0x1f]] }
  0x4f   :  { %v337_v48 = vadd.f32 %v335_v19, %v323_v31  ;;  %v416_v51 = vsel %vm42_vm0, %v414_v45, %v415_v46  ;;  %v429_v54 = vstv %s2160_s28  ;;  %v377_v56 = vmul.f32 %v1363_v32, %v2201_v34  ;;  %s2272_s28 = sld [smem:[#allocation2 + $0x20]]  ;;  %s2296_s7 = sld [smem:[#allocation2 + $0xc4]] }
  0x50   :  { %v391_v58 = vmul.f32 %v1368_v40, %v2205_v35  ;;  %v2240_v60 = vsel %vm41_vm1, %v403_v44, %v402_v41  ;;  %v2251_v62 = vsel %vm41_vm1, %v417_v52, %v416_v51  ;;  %v430_v0 = vsel %vm42_vm0, %v428_v53, %v429_v54  ;;  %v1388_v44 = vld [vmem:[%s3604_s0 + $0x10] sm:$0x1f]  ;;  %v1393_v53 = vld [vmem:[%s3604_s0 + $0x40] sm:$0x1f]  ;;  %s2354_s21 = sld [smem:[#allocation2 + $0x76]]  ;;  %s2369_s25 = sld [smem:[#allocation2 + $0xc8]] }
  0x51   :  { %v351_v55 = vadd.f32 %v349_v20, %v337_v48  ;;  %v443_v3 = vstv %s2170_s29  ;;  %v444_v5 = vstv %s2172_s30  ;;  %v431_v9 = vstv %s2177_s5  ;;  %s2277_s29 = sld [smem:[#allocation2 + $0x72]]  ;;  %s2279_s30 = sld [smem:[#allocation2 + $0xc3]] }
  0x52   :  { %v445_v10 = vsel %vm42_vm0, %v443_v3, %v444_v5  ;;  %v446_v11 = vstv %s2179_s4  ;;  %v458_v16 = vstv %s2192_s8  ;;  %v459_v17 = vstv %s2194_s9  ;;  %s2302_s8 = sld [smem:[#allocation2 + $0x21]]  ;;  %s2304_s9 = sld [smem:[#allocation2 + $0x74]] }
  0x53   :  { %v365_v7 = vadd.f32 %v363_v49, %v351_v55  ;;  %v405_v19 = vmul.f32 %v1373_v61, %v2240_v60  ;;  %v473_v20 = vstv %s2208_s12  ;;  %v474_v21 = vstv %s2210_s14  ;;  %s2315_s12 = sld [smem:[#allocation2 + $0xc5]]  ;;  %s2400_s4 = sld [smem:[#allocation2 + $0x79]] }
  0x54   :  { %v419_v24 = vmul.f32 %v1378_v8, %v2251_v62  ;;  %v2287_v27 = vsel %vm41_vm1, %v431_v9, %v430_v0  ;;  %v2291_v30 = vsel %vm41_vm1, %v446_v11, %v445_v10  ;;  %v488_v31 = vstv %s2220_s16  ;;  %s2317_s14 = sld [smem:[#allocation2 + $0x75]]  ;;  %s2325_s16 = sld [smem:[#allocation2 + $0x22]]  ;;  %v1403_v8 = vld [vmem:[%s3604_s0 + $0xa0] sm:$0x1f] }
  0x55   :  { %v379_v18 = vadd.f32 %v377_v56, %v365_v7  ;;  %v460_v39 = vsel %vm42_vm0, %v458_v16, %v459_v17  ;;  %v461_v40 = vstv %s2226_s17  ;;  %v489_v41 = vstv %s2228_s18  ;;  %s2327_s17 = sld [smem:[#allocation2 + $0xc6]]  ;;  %s2375_s27 = sld [smem:[#allocation2 + $0x25]] }
  0x56   :  { %v475_v45 = vsel %vm42_vm0, %v473_v20, %v474_v21  ;;  %v476_v46 = vstv %s2232_s19  ;;  %v490_v48 = vsel %vm42_vm0, %v488_v31, %v489_v41  ;;  %v491_v49 = vstv %s2234_s20  ;;  %s2338_s20 = sld [smem:[#allocation2 + $0x23]]  ;;  %s2411_s10 = sld [smem:[#allocation2 + $0x27]] }
  0x57   :  { %v393_v32 = vadd.f32 %v391_v58, %v379_v18  ;;  %v433_v52 = vmul.f32 %v1383_v26, %v2287_v27  ;;  %v503_v54 = vstv %s2242_s1  ;;  %v504_v55 = vstv %s2244_s2  ;;  %v1398_v58 = vld [vmem:[%s3604_s0 + $0x70] sm:$0x1f]  ;;  %s2340_s1 = sld [smem:[#allocation2 + $0x24]]  ;;  %s2421_s11 = sld [smem:[#allocation2 + $0x7a]] }
  0x58   :  { %v2331_v56 = vsel %vm41_vm1, %v461_v40, %v460_v39  ;;  %v518_v61 = vstv %s2257_s23  ;;  %v519_v0 = vstv %s2259_s24  ;;  %v448_v5 = vmul.f32 %v1388_v44, %v2291_v30  ;;  %s2356_s23 = sld [smem:[#allocation2 + $0xc7]]  ;;  %s2431_s13 = sld [smem:[#allocation2 + $0x29]] }
  0x59   :  { %v407_v51 = vadd.f32 %v405_v19, %v393_v32  ;;  %v2345_v7 = vsel %vm41_vm1, %v476_v46, %v475_v45  ;;  %v2352_v9 = vsel %vm41_vm1, %v491_v49, %v490_v48  ;;  %v505_v10 = vsel %vm42_vm0, %v503_v54, %v504_v55  ;;  %s2364_s24 = sld [smem:[#allocation2 + $0x77]]  ;;  %v1408_v45 = vld [vmem:[%s3604_s0 + $0xd0] sm:$0x1f]  ;;  %s2448_s19 = sld [smem:[#allocation2 + $0x2a]] }
  0x5a   :  { %v506_v11 = vstv %s2270_s26  ;;  %v520_v16 = vsel %vm42_vm0, %v518_v61, %v519_v0  ;;  %v521_v17 = vstv %s2272_s28  ;;  %v463_v19 = vmul.f32 %v1393_v53, %v2331_v56  ;;  %s2377_s26 = sld [smem:[#allocation2 + $0x26]]  ;;  %s2388_s28 = sld [smem:[#allocation2 + $0x78]]  ;;  %v1413_v53 = vld [vmem:[%s3604_s0 + $0x100] sm:$0x1f] }
  0x5b   :  { %v421_v3 = vadd.f32 %v419_v24, %v407_v51  ;;  %v533_v20 = vstv %s2277_s29  ;;  %v534_v21 = vstv %s2279_s30  ;;  %v478_v24 = vmul.f32 %v1398_v58, %v2345_v7  ;;  %s2390_s29 = sld [smem:[#allocation2 + $0xc9]]  ;;  %s2464_s22 = sld [smem:[#allocation2 + $0x7c]] }
  0x5c   :  { %v493_v26 = vmul.f32 %v1403_v8, %v2352_v9  ;;  %v548_v31 = vstv %s2294_s6  ;;  %v549_v32 = vstv %s2296_s7  ;;  %v2381_v40 = vsel %vm41_vm1, %v506_v11, %v505_v10  ;;  %s2402_s6 = sld [smem:[#allocation2 + $0xca]]  ;;  %v1418_v11 = vld [vmem:[%s3604_s0 + $0x130] sm:$0x1f]  ;;  %s2523_s7 = sld [smem:[#allocation2 + $0x2c]] }
  0x5d   :  { %v435_v18 = vadd.f32 %v433_v52, %v421_v3  ;;  %v2385_v41 = vsel %vm41_vm1, %v521_v17, %v520_v16  ;;  %v563_v44 = vstv %s2304_s9  ;;  %v535_v46 = vsel %vm42_vm0, %v533_v20, %v534_v21  ;;  %v1423_v20 = vld [vmem:[%s3604_s0 + $0x160] sm:$0x1f]  ;;  %s2525_s9 = sld [smem:[#allocation2 + $0x2d]]  ;;  %s2540_s15 = sld [smem:[#allocation2 + $0xd1]] }
  0x5e   :  { %v536_v48 = vstv %s2302_s8  ;;  %v564_v49 = vstv %s2315_s12  ;;  %v577_v51 = vstv %s2317_s14  ;;  %v550_v54 = vsel %vm42_vm0, %v548_v31, %v549_v32  ;;  %s2413_s8 = sld [smem:[#allocation2 + $0x28]]  ;;  %s2423_s12 = sld [smem:[#allocation2 + $0xcb]]  ;;  %v1428_v32 = vld [vmem:[%s3604_s0 + $0x190] sm:$0x1f] }
  0x5f   :  { %v450_v39 = vadd.f32 %v448_v5, %v435_v18  ;;  %v551_v55 = vstv %s2325_s16  ;;  %v578_v58 = vstv %s2327_s17  ;;  %v565_v61 = vsel %vm42_vm0, %v563_v44, %v564_v49  ;;  %s2433_s16 = sld [smem:[#allocation2 + $0x7b]]  ;;  %s2538_s14 = sld [smem:[#allocation2 + $0x80]] }
  0x60   :  { %v566_v0 = vstv %s2338_s20  ;;  %v579_v3 = vsel %vm42_vm0, %v577_v51, %v578_v58  ;;  %v580_v5 = vstv %s2340_s1  ;;  %v508_v10 = vmul.f32 %v1408_v45, %v2381_v40  ;;  %s2450_s20 = sld [smem:[#allocation2 + $0xcc]]  ;;  %s2551_s17 = sld [smem:[#allocation2 + $0x81]] }
  0x61   :  { %v465_v52 = vadd.f32 %v463_v19, %v450_v39  ;;  %v591_v16 = vstv %s2354_s21  ;;  %v592_v17 = vstv %s2356_s23  ;;  %v523_v18 = vmul.f32 %v1413_v53, %v2385_v41  ;;  %s2466_s21 = sld [smem:[#allocation2 + $0xcd]]  ;;  %s2553_s18 = sld [smem:[#allocation2 + $0xd2]] }
  0x62   :  { %v2438_v19 = vsel %vm41_vm1, %v536_v48, %v535_v46  ;;  %v2445_v21 = vsel %vm41_vm1, %v551_v55, %v550_v54  ;;  %v2457_v39 = vsel %vm41_vm1, %v566_v0, %v565_v61  ;;  %v2461_v44 = vsel %vm41_vm1, %v580_v5, %v579_v3  ;;  %s2572_s1 = sld [smem:[#allocation2 + $0x82]]  ;;  %s2574_s2 = sld [smem:[#allocation2 + $0xd3]] }
  0x63   :  { %v480_v8 = vadd.f32 %v478_v24, %v465_v52  ;;  %v605_v24 = vstv %s2364_s24  ;;  %v606_v45 = vstv %s2369_s25  ;;  %v593_v46 = vsel %vm42_vm0, %v591_v16, %v592_v17  ;;  %s2484_s25 = sld [smem:[#allocation2 + $0x2b]]  ;;  %s2582_s23 = sld [smem:[#allocation2 + $0x2e]] }
  0x64   :  { %v594_v48 = vstv %s2375_s27  ;;  %v607_v49 = vsel %vm42_vm0, %v605_v24, %v606_v45  ;;  %v608_v51 = vstv %s2377_s26  ;;  %v538_v53 = vmul.f32 %v1418_v11, %v2438_v19  ;;  %s2495_s27 = sld [smem:[#allocation2 + $0x7d]]  ;;  %s2497_s26 = sld [smem:[#allocation2 + $0xce]] }
  0x65   :  { %v495_v31 = vadd.f32 %v493_v26, %v480_v8  ;;  %v1433_v26 = vld [vmem:[%s3604_s0 + $0x11] sm:$0x1f]  ;;  %v619_v54 = vstv %s2388_s28  ;;  %v620_v55 = vstv %s2390_s29  ;;  %v553_v58 = vmul.f32 %v1423_v20, %v2445_v21  ;;  %s2504_s28 = sld [smem:[#allocation2 + $0x7e]]  ;;  %s2506_s29 = sld [smem:[#allocation2 + $0xcf]] }
  0x66   :  { %v568_v61 = vmul.f32 %v1428_v32, %v2457_v39  ;;  %v633_v0 = vstv %s2400_s4  ;;  %v634_v3 = vstv %s2402_s6  ;;  %v582_v8 = vmul.f32 %v1433_v26, %v2461_v44  ;;  %s2584_s24 = sld [smem:[#allocation2 + $0x2f]]  ;;  %s2588_s30 = sld [smem:[#allocation2 + $0x30]] }
  0x67   :  { %v510_v52 = vadd.f32 %v508_v10, %v495_v31  ;;  %v2489_v10 = vsel %vm41_vm1, %v594_v48, %v593_v46  ;;  %v2493_v11 = vsel %vm41_vm1, %v608_v51, %v607_v49  ;;  %v621_v16 = vsel %vm42_vm0, %v619_v54, %v620_v55  ;;  %v1438_v31 = vld [vmem:[%s3604_s0 + $0x41] sm:$0x1f]  ;;  %v1443_v46 = vld [vmem:[%s3604_s0 + $0x71] sm:$0x1f]  ;;  %s2590_s5 = sld [smem:[#allocation2 + $0x31]]  ;;  %s2622_s4 = sld [smem:[#allocation2 + $0x84]] }
  0x68   :  { %3643 = vst [vmem:[#allocation8_spill] sm:$0xff] %v2489_v10  ;;  %3644 = vst [vmem:[#allocation9_spill] sm:$0xff] %v2493_v11  ;;  %v622_v17 = vstv %s2411_s10  ;;  %v648_v20 = vstv %s2423_s12  ;;  %v635_v32 = vsel %vm42_vm0, %v633_v0, %v634_v3  ;;  %v636_v45 = vstv %s2413_s8  ;;  %s2531_s10 = sld [smem:[#allocation2 + $0x7f]]  ;;  %s2533_s8 = sld [smem:[#allocation2 + $0xd0]]  ;;  %v1448_v3 = vld [vmem:[%s3604_s0 + $0xa1] sm:$0x1f] }
  0x69   :  { %v525_v5 = vadd.f32 %v523_v18, %v510_v52  ;;  %v647_v18 = vstv %s2421_s11  ;;  %v661_v26 = vstv %s2433_s16  ;;  %v650_v49 = vstv %s2431_s13  ;;  %s2624_s6 = sld [smem:[#allocation2 + $0xd5]]  ;;  %s2664_s13 = sld [smem:[#allocation2 + $0x86]] }
  0x6a   :  { %v649_v48 = vsel %vm42_vm0, %v647_v18, %v648_v20  ;;  %v662_v51 = vstv %s2450_s20  ;;  %v664_v52 = vstv %s2448_s19  ;;  %v675_v55 = vstv %s2464_s22  ;;  %s2666_s16 = sld [smem:[#allocation2 + $0xd7]]  ;;  %s2673_s20 = sld [smem:[#allocation2 + $0xd8]] }
  0x6b   :  { %v540_v24 = vadd.f32 %v538_v53, %v525_v5  ;;  %v663_v54 = vsel %vm42_vm0, %v661_v26, %v662_v51  ;;  %v676_v0 = vstv %s2466_s21  ;;  %v610_v18 = vmul.f32 %v1443_v46, %v2493_v11  ;;  %s2671_s19 = sld [smem:[#allocation2 + $0x87]]  ;;  %s2684_s22 = sld [smem:[#allocation2 + $0x88]] }
  0x6c   :  { %v2546_v20 = vsel %vm41_vm1, %v622_v17, %v621_v16  ;;  %v2564_v16 = vsel %vm41_vm1, %v650_v49, %v649_v48  ;;  %v2568_v17 = vsel %vm41_vm1, %v664_v52, %v663_v54  ;;  %v677_v26 = vsel %vm42_vm0, %v675_v55, %v676_v0  ;;  %s2686_s21 = sld [smem:[#allocation2 + $0xd9]]  ;;  %s2755_s11 = sld [smem:[#allocation2 + $0x8b]] }
  0x6d   :  { %v555_v53 = vadd.f32 %v553_v58, %v540_v24  ;;  %v596_v58 = vmul.f32 %v1438_v31, %v2489_v10  ;;  %3645 = vst [vmem:[#allocation10_spill] sm:$0xff] %v2546_v20  ;;  %v1453_v24 = vld [vmem:[%s3604_s0 + $0xd1] sm:$0x1f]  ;;  %v1458_v31 = vld [vmem:[%s3604_s0 + $0x101] sm:$0x1f]  ;;  %3647 = vst [vmem:[#allocation12_spill] sm:$0xff] %v2564_v16  ;;  %v678_v46 = vstv %s2484_s25  ;;  %v689_v51 = vstv %s2495_s27 }
  0x6e   :  { %3648 = vst [vmem:[#allocation13_spill] sm:$0xff] %v2568_v17  ;;  %v690_v48 = vstv %s2497_s26  ;;  %v703_v49 = vstv %s2504_s28  ;;  %v704_v52 = vstv %s2506_s29  ;;  %s2594_s25 = sld [smem:[#allocation2 + $0x83]]  ;;  %s2596_s27 = sld [smem:[#allocation2 + $0xd4]]  ;;  %v652_v55 = vmul.f32 %v1458_v31, %v2564_v16 }
  0x6f   :  { %v570_v5 = vadd.f32 %v568_v61, %v555_v53  ;;  %v2557_v61 = vsel %vm41_vm1, %v636_v45, %v635_v32  ;;  %v1463_v45 = vld [vmem:[%s3604_s0 + $0x131] sm:$0x1f]  ;;  %v624_v53 = vmul.f32 %v1448_v3, %v2546_v20  ;;  %v2605_v3 = vsel %vm41_vm1, %v678_v46, %v677_v26  ;;  %s2617_s29 = sld [smem:[#allocation2 + $0x32]]  ;;  %s2715_s26 = sld [smem:[#allocation2 + $0x35]] }
  0x70   :  { %3646 = vst [vmem:[#allocation11_spill] sm:$0xff] %v2557_v61  ;;  %v638_v54 = vmul.f32 %v1453_v24, %v2557_v61  ;;  %v666_v0 = vmul.f32 %v1463_v45, %v2568_v17  ;;  %3649 = vst [vmem:[#allocation14_spill] sm:$0xff] %v2605_v3  ;;  %v705_v31 = vsel %vm42_vm0, %v703_v49, %v704_v52  ;;  %v706_v45 = vstv %s2525_s9  ;;  %s2638_s9 = sld [smem:[#allocation2 + $0xd6]]  ;;  %s2757_s12 = sld [smem:[#allocation2 + $0xdc]] }
  0x71   :  { %v584_v32 = vadd.f32 %v582_v8, %v570_v5  ;;  %v1468_v5 = vld [vmem:[%s3604_s0 + $0x161] sm:$0x1f]  ;;  %v717_v17 = vstv %s2531_s10  ;;  %v718_v16 = vstv %s2533_s8  ;;  %v731_v61 = vstv %s2538_s14  ;;  %s2656_s14 = sld [smem:[#allocation2 + $0x33]]  ;;  %s2717_s28 = sld [smem:[#allocation2 + $0x36]] }
  0x72   :  { %v732_v20 = vstv %s2540_s15  ;;  %v680_v46 = vmul.f32 %v1468_v5, %v2605_v3  ;;  %v745_v11 = vstv %s2551_s17  ;;  %v759_v49 = vstv %s2572_s1  ;;  %s2658_s15 = sld [smem:[#allocation2 + $0x34]]  ;;  %s2721_s10 = sld [smem:[#allocation2 + $0x37]] }
  0x73   :  { %v598_v8 = vadd.f32 %v596_v58, %v584_v32  ;;  %v691_v58 = vsel %vm42_vm0, %v689_v51, %v690_v48  ;;  %v692_v32 = vstv %s2523_s7  ;;  %v2632_v48 = vsel %vm41_vm1, %v706_v45, %v705_v31  ;;  %s2636_s7 = sld [smem:[#allocation2 + $0x85]]  ;;  %s2723_s8 = sld [smem:[#allocation2 + $0x38]] }
  0x74   :  { %v2628_v51 = vsel %vm41_vm1, %v692_v32, %v691_v58  ;;  %3651 = vst [vmem:[#allocation16_spill] sm:$0xff] %v2632_v48  ;;  %v760_v52 = vstv %s2574_s2  ;;  %v719_v5 = vsel %vm42_vm0, %v717_v17, %v718_v16  ;;  %v720_v58 = vstv %s2582_s23  ;;  %v1478_v32 = vld [vmem:[%s3604_s0 + $0x12] sm:$0x1f]  ;;  %s2797_s1 = sld [smem:[#allocation2 + $0x8d]]  ;;  %s2799_s2 = sld [smem:[#allocation2 + $0xde]] }
  0x75   :  { %v612_v24 = vadd.f32 %v610_v18, %v598_v8  ;;  %v746_v18 = vstv %s2553_s18  ;;  %3650 = vst [vmem:[#allocation15_spill] sm:$0xff] %v2628_v51  ;;  %v734_v31 = vstv %s2584_s24  ;;  %v761_v16 = vsel %vm42_vm0, %v759_v49, %v760_v52  ;;  %v1488_v52 = vld [vmem:[%s3604_s0 + $0x72] sm:$0x1f]  ;;  %s2804_s23 = sld [smem:[#allocation2 + $0x8e]]  ;;  %s2806_s24 = sld [smem:[#allocation2 + $0xdf]] }
  0x76   :  { %v747_v45 = vsel %vm42_vm0, %v745_v11, %v746_v18  ;;  %v773_v17 = vstv %s2594_s25  ;;  %v1483_v11 = vld [vmem:[%s3604_s0 + $0x42] sm:$0x1f]  ;;  %v708_v18 = vmul.f32 %v1478_v32, %v2632_v48  ;;  %v2679_v49 = vsel %vm41_vm1, %v720_v58, %v719_v5  ;;  %s2817_s25 = sld [smem:[#allocation2 + $0x8f]]  ;;  %s2888_s17 = sld [smem:[#allocation2 + $0x92]] }
  0x77   :  { %v626_v26 = vadd.f32 %v624_v53, %v612_v24  ;;  %v1473_v53 = vld [vmem:[%s3604_s0 + $0x191] sm:$0x1f]  ;;  %v733_v24 = vsel %vm42_vm0, %v731_v61, %v732_v20  ;;  %v774_v20 = vstv %s2596_s27  ;;  %3652 = vst [vmem:[#allocation17_spill] sm:$0xff] %v2679_v49  ;;  %v776_v32 = vstv %s2617_s29  ;;  %s2727_s29 = sld [smem:[#allocation2 + $0x8a]]  ;;  %s2819_s27 = sld [smem:[#allocation2 + $0xe0]] }
  0x78   :  { %v775_v5 = vsel %vm42_vm0, %v773_v17, %v774_v20  ;;  %v831_v48 = vstv %s2673_s20  ;;  %s2791_s20 = sld [smem:[#allocation2 + $0x3b]] }
  0x79   :  { %v640_v8 = vadd.f32 %v638_v54, %v626_v26  ;;  %v748_v54 = vstv %s2588_s30  ;;  %v762_v26 = vstv %s2590_s5  ;;  %s2705_s30 = sld [smem:[#allocation2 + $0x89]]  ;;  %s2707_s5 = sld [smem:[#allocation2 + $0xda]] }
  0x7a   :  { %s2890_s18 = sld [smem:[#allocation2 + $0xe3]] }
  0x7b   :  { %v654_v3 = vadd.f32 %v652_v55, %v640_v8  ;;  %v694_v55 = vmul.f32 %v1473_v53, %v2628_v51  ;;  %v2697_v8 = vsel %vm41_vm1, %v748_v54, %v747_v45  ;;  %v2701_v53 = vsel %vm41_vm1, %v762_v26, %v761_v16 }
  0x7c   :  { %3654 = vst [vmem:[#allocation19_spill] sm:$0xff] %v2697_v8  ;;  %3655 = vst [vmem:[#allocation20_spill] sm:$0xff] %v2701_v53  ;;  %v788_v45 = vstv %s2624_s6  ;;  %v801_v54 = vstv %s2636_s7  ;;  %v802_v26 = vstv %s2638_s9  ;;  %v722_v16 = vmul.f32 %v1483_v11, %v2679_v49  ;;  %s2750_s9 = sld [smem:[#allocation2 + $0x39]]  ;;  %s2848_s6 = sld [smem:[#allocation2 + $0x3c]] }
  0x7d   :  { %v668_v61 = vadd.f32 %v666_v0, %v654_v3  ;;  %v2690_v0 = vsel %vm41_vm1, %v734_v31, %v733_v24  ;;  %v1493_v3 = vld [vmem:[%s3604_s0 + $0xa2] sm:$0x1f]  ;;  %v1498_v24 = vld [vmem:[%s3604_s0 + $0xd2] sm:$0x1f]  ;;  %v787_v31 = vstv %s2622_s4  ;;  %s2729_s4 = sld [smem:[#allocation2 + $0xdb]]  ;;  %v2738_v11 = vsel %vm41_vm1, %v776_v32, %v775_v5  ;;  %s2850_s7 = sld [smem:[#allocation2 + $0x3d]] }
  0x7e   :  { %3653 = vst [vmem:[#allocation18_spill] sm:$0xff] %v2690_v0  ;;  %v736_v17 = vmul.f32 %v1488_v52, %v2690_v0  ;;  %v750_v20 = vmul.f32 %v1493_v3, %v2697_v8  ;;  %3656 = vst [vmem:[#allocation21_spill] sm:$0xff] %v2738_v11  ;;  %v789_v52 = vsel %vm42_vm0, %v787_v31, %v788_v45  ;;  %v790_v0 = vstv %s2656_s14  ;;  %s2769_s14 = sld [smem:[#allocation2 + $0x8c]] }
  0x7f   :  { %v682_v58 = vadd.f32 %v680_v46, %v668_v61  ;;  %v764_v61 = vmul.f32 %v1498_v24, %v2701_v53  ;;  %v803_v3 = vsel %vm42_vm0, %v801_v54, %v802_v26  ;;  %v804_v24 = vstv %s2658_s15  ;;  %s2771_s15 = sld [smem:[#allocation2 + $0xdd]] }
  0x80   :  { %v815_v53 = vstv %s2664_s13  ;;  %v816_v8 = vstv %s2666_s16  ;;  %v830_v49 = vstv %s2671_s19  ;;  %v845_v51 = vstv %s2684_s22  ;;  %s2789_s19 = sld [smem:[#allocation2 + $0x3a]]  ;;  %s2854_s13 = sld [smem:[#allocation2 + $0x3e]] }
  0x81   :  { %v696_v46 = vadd.f32 %v694_v55, %v682_v58  ;;  %v1503_v55 = vld [vmem:[%s3604_s0 + $0x102] sm:$0x1f]  ;;  %v2761_v31 = vsel %vm41_vm1, %v790_v0, %v789_v52  ;;  %v2765_v45 = vsel %vm41_vm1, %v804_v24, %v803_v3  ;;  %v860_v54 = vstv %s2705_s30  ;;  %s2856_s16 = sld [smem:[#allocation2 + $0x3f]]  ;;  %s2930_s30 = sld [smem:[#allocation2 + $0x94]] }
  0x82   :  { %v778_v32 = vmul.f32 %v1503_v55, %v2738_v11  ;;  %3657 = vst [vmem:[#allocation22_spill] sm:$0xff] %v2761_v31  ;;  %3658 = vst [vmem:[#allocation23_spill] sm:$0xff] %v2765_v45  ;;  %v861_v26 = vstv %s2707_s5  ;;  %v817_v0 = vsel %vm42_vm0, %v815_v53, %v816_v8  ;;  %v818_v55 = vstv %s2715_s26  ;;  %s2932_s5 = sld [smem:[#allocation2 + $0xe5]]  ;;  %s3021_s22 = sld [smem:[#allocation2 + $0x99]] }
  0x83   :  { %v710_v58 = vadd.f32 %v708_v18, %v696_v46  ;;  %v846_v18 = vstv %s2686_s21  ;;  %v832_v52 = vsel %vm42_vm0, %v830_v49, %v831_v48  ;;  %v833_v3 = vstv %s2717_s28  ;;  %s2937_s26 = sld [smem:[#allocation2 + $0x95]]  ;;  %s2939_s28 = sld [smem:[#allocation2 + $0xe6]] }
  0x84   :  { %v847_v24 = vsel %vm42_vm0, %v845_v51, %v846_v18  ;;  %v862_v8 = vsel %vm42_vm0, %v860_v54, %v861_v26  ;;  %v875_v53 = vstv %s2727_s29  ;;  %v876_v48 = vstv %s2729_s4  ;;  %v1518_v51 = vld [vmem:[%s3604_s0 + $0x192] sm:$0x1f]  ;;  %v1523_v26 = vld [vmem:[%s3604_s0 + $0x20] sm:$0x1f]  ;;  %s2950_s29 = sld [smem:[#allocation2 + $0x96]]  ;;  %s2952_s4 = sld [smem:[#allocation2 + $0xe7]] }
  0x85   :  { %v724_v5 = vadd.f32 %v722_v16, %v710_v58  ;;  %v1508_v16 = vld [vmem:[%s3604_s0 + $0x132] sm:$0x1f]  ;;  %v1513_v58 = vld [vmem:[%s3604_s0 + $0x162] sm:$0x1f]  ;;  %v2812_v54 = vsel %vm41_vm1, %v818_v55, %v817_v0  ;;  %v877_v0 = vsel %vm42_vm0, %v875_v53, %v876_v48  ;;  %s3023_s21 = sld [smem:[#allocation2 + $0xea]] }
  0x86   :  { %v806_v18 = vmul.f32 %v1513_v58, %v2765_v45  ;;  %3659 = vst [vmem:[#allocation24_spill] sm:$0xff] %v2812_v54  ;;  %v878_v58 = vstv %s2750_s9  ;;  %s2860_s9 = sld [smem:[#allocation2 + $0x91]]  ;;  %v936_v45 = vstv %s2806_s24  ;;  %s2924_s24 = sld [smem:[#allocation2 + $0x42]] }
  0x87   :  { %v738_v46 = vadd.f32 %v736_v17, %v724_v5  ;;  %v848_v17 = vstv %s2721_s10  ;;  %v863_v5 = vstv %s2723_s8  ;;  %s2838_s10 = sld [smem:[#allocation2 + $0x90]]  ;;  %s2840_s8 = sld [smem:[#allocation2 + $0xe1]] }
  0x89   :  { %v752_v11 = vadd.f32 %v750_v20, %v738_v46  ;;  %v792_v20 = vmul.f32 %v1508_v16, %v2761_v31  ;;  %v2830_v46 = vsel %vm41_vm1, %v848_v17, %v847_v24  ;;  %v2834_v16 = vsel %vm41_vm1, %v863_v5, %v862_v8 }
  0x8a   :  { %3661 = vst [vmem:[#allocation26_spill] sm:$0xff] %v2830_v46  ;;  %3662 = vst [vmem:[#allocation27_spill] sm:$0xff] %v2834_v16  ;;  %v891_v24 = vstv %s2757_s12  ;;  %v905_v17 = vstv %s2769_s14  ;;  %v906_v5 = vstv %s2771_s15  ;;  %v820_v8 = vmul.f32 %v1518_v51, %v2812_v54  ;;  %s2883_s15 = sld [smem:[#allocation2 + $0x40]]  ;;  %s2981_s12 = sld [smem:[#allocation2 + $0x43]] }
  0x8b   :  { %v766_v49 = vadd.f32 %v764_v61, %v752_v11  ;;  %v2823_v61 = vsel %vm41_vm1, %v833_v3, %v832_v52  ;;  %v1528_v11 = vld [vmem:[%s3604_s0 + $0x50] sm:$0x1f]  ;;  %v1533_v52 = vld [vmem:[%s3604_s0 + $0x80] sm:$0x1f]  ;;  %v890_v3 = vstv %s2755_s11  ;;  %s2862_s11 = sld [smem:[#allocation2 + $0xe2]]  ;;  %v2871_v51 = vsel %vm41_vm1, %v878_v58, %v877_v0  ;;  %s2983_s14 = sld [smem:[#allocation2 + $0x44]] }
  0x8c   :  { %3660 = vst [vmem:[#allocation25_spill] sm:$0xff] %v2823_v61  ;;  %v835_v53 = vmul.f32 %v1523_v26, %v2823_v61  ;;  %v850_v48 = vmul.f32 %v1528_v11, %v2830_v46  ;;  %3663 = vst [vmem:[#allocation28_spill] sm:$0xff] %v2871_v51  ;;  %v892_v26 = vsel %vm42_vm0, %v890_v3, %v891_v24  ;;  %v893_v61 = vstv %s2789_s19  ;;  %s2902_s19 = sld [smem:[#allocation2 + $0x93]] }
  0x8d   :  { %v780_v55 = vadd.f32 %v778_v32, %v766_v49  ;;  %v865_v49 = vmul.f32 %v1533_v52, %v2834_v16  ;;  %v907_v11 = vsel %vm42_vm0, %v905_v17, %v906_v5  ;;  %v908_v52 = vstv %s2791_s20  ;;  %s2904_s20 = sld [smem:[#allocation2 + $0xe4]] }
  0x8e   :  { %v920_v16 = vstv %s2797_s1  ;;  %v921_v46 = vstv %s2799_s2  ;;  %v935_v54 = vstv %s2804_s23  ;;  %v950_v31 = vstv %s2817_s25  ;;  %s2922_s23 = sld [smem:[#allocation2 + $0x41]]  ;;  %s2987_s1 = sld [smem:[#allocation2 + $0x45]] }
  0x8f   :  { %v794_v32 = vadd.f32 %v792_v20, %v780_v55  ;;  %v1538_v20 = vld [vmem:[%s3604_s0 + $0xb0] sm:$0x1f]  ;;  %v2894_v3 = vsel %vm41_vm1, %v893_v61, %v892_v26  ;;  %v2898_v24 = vsel %vm41_vm1, %v908_v52, %v907_v11  ;;  %v964_v17 = vstv %s2838_s10  ;;  %s2989_s2 = sld [smem:[#allocation2 + $0x46]]  ;;  %s3051_s25 = sld [smem:[#allocation2 + $0x48]] }
  0x90   :  { %v880_v58 = vmul.f32 %v1538_v20, %v2871_v51  ;;  %3664 = vst [vmem:[#allocation29_spill] sm:$0xff] %v2894_v3  ;;  %3665 = vst [vmem:[#allocation30_spill] sm:$0xff] %v2898_v24  ;;  %v965_v5 = vstv %s2840_s8  ;;  %v922_v61 = vsel %vm42_vm0, %v920_v16, %v921_v46  ;;  %v923_v20 = vstv %s2848_s6  ;;  %s3063_s10 = sld [smem:[#allocation2 + $0xec]]  ;;  %s3076_s6 = sld [smem:[#allocation2 + $0xed]] }
  0x91   :  { %v808_v55 = vadd.f32 %v806_v18, %v794_v32  ;;  %v951_v18 = vstv %s2819_s27  ;;  %v937_v26 = vsel %vm42_vm0, %v935_v54, %v936_v45  ;;  %v938_v11 = vstv %s2850_s7  ;;  %s3057_s27 = sld [smem:[#allocation2 + $0x9a]] }
  0x92   :  { %v952_v52 = vsel %vm42_vm0, %v950_v31, %v951_v18  ;;  %v966_v46 = vsel %vm42_vm0, %v964_v17, %v965_v5  ;;  %v978_v16 = vstv %s2860_s9  ;;  %v979_v45 = vstv %s2862_s11  ;;  %v1553_v31 = vld [vmem:[%s3604_s0 + $0x140] sm:$0x1f]  ;;  %v1558_v5 = vld [vmem:[%s3604_s0 + $0x170] sm:$0x1f]  ;;  %s3098_s11 = sld [smem:[#allocation2 + $0x49]] }
  0x93   :  { %v822_v0 = vadd.f32 %v820_v8, %v808_v55  ;;  %v1543_v8 = vld [vmem:[%s3604_s0 + $0xe0] sm:$0x1f]  ;;  %v1548_v55 = vld [vmem:[%s3604_s0 + $0x110] sm:$0x1f]  ;;  %v2945_v17 = vsel %vm41_vm1, %v923_v20, %v922_v61  ;;  %v980_v61 = vsel %vm42_vm0, %v978_v16, %v979_v45  ;;  %s3184_s9 = sld [smem:[#allocation2 + $0xf1]] }
  0x94   :  { %v910_v18 = vmul.f32 %v1548_v55, %v2898_v24  ;;  %3666 = vst [vmem:[#allocation31_spill] sm:$0xff] %v2945_v17  ;;  %v981_v55 = vstv %s2883_s15  ;;  %s2993_s15 = sld [smem:[#allocation2 + $0x98]]  ;;  %v1035_v24 = vstv %s2939_s28  ;;  %s3061_s28 = sld [smem:[#allocation2 + $0x9b]] }
  0x95   :  { %v837_v32 = vadd.f32 %v835_v53, %v822_v0  ;;  %v953_v53 = vstv %s2854_s13  ;;  %v967_v0 = vstv %s2856_s16  ;;  %s2971_s13 = sld [smem:[#allocation2 + $0x97]]  ;;  %s2973_s16 = sld [smem:[#allocation2 + $0xe8]] }
  0x97   :  { %v852_v51 = vadd.f32 %v850_v48, %v837_v32  ;;  %v895_v48 = vmul.f32 %v1543_v8, %v2894_v3  ;;  %v2963_v32 = vsel %vm41_vm1, %v953_v53, %v952_v52  ;;  %v2967_v8 = vsel %vm41_vm1, %v967_v0, %v966_v46 }
  0x98   :  { %3668 = vst [vmem:[#allocation33_spill] sm:$0xff] %v2963_v32  ;;  %3669 = vst [vmem:[#allocation34_spill] sm:$0xff] %v2967_v8  ;;  %v993_v52 = vstv %s2890_s18  ;;  %v1006_v53 = vstv %s2902_s19  ;;  %v1007_v0 = vstv %s2904_s20  ;;  %v925_v46 = vmul.f32 %v1553_v31, %v2945_v17  ;;  %s3016_s20 = sld [smem:[#allocation2 + $0x47]]  ;;  %s3115_s18 = sld [smem:[#allocation2 + $0x9d]] }
  0x99   :  { %v867_v54 = vadd.f32 %v865_v49, %v852_v51  ;;  %v2956_v49 = vsel %vm41_vm1, %v938_v11, %v937_v26  ;;  %v1563_v51 = vld [vmem:[%s3604_s0 + $0x1a0] sm:$0x1f]  ;;  %v992_v11 = vstv %s2888_s17  ;;  %s2995_s17 = sld [smem:[#allocation2 + $0xe9]]  ;;  %v3004_v31 = vsel %vm41_vm1, %v981_v55, %v980_v61  ;;  %s3117_s19 = sld [smem:[#allocation2 + $0xee]] }
  0x9a   :  { %3667 = vst [vmem:[#allocation32_spill] sm:$0xff] %v2956_v49  ;;  %v1568_v26 = vld [vmem:[%s3604_s0 + $0x21] sm:$0x1f]  ;;  %v940_v16 = vmul.f32 %v1558_v5, %v2956_v49  ;;  %v955_v45 = vmul.f32 %v1563_v51, %v2963_v32  ;;  %3670 = vst [vmem:[#allocation35_spill] sm:$0xff] %v3004_v31  ;;  %v994_v5 = vsel %vm42_vm0, %v992_v11, %v993_v52  ;;  %v995_v49 = vstv %s2922_s23 }
  0x9b   :  { %v882_v20 = vadd.f32 %v880_v58, %v867_v54  ;;  %v969_v54 = vmul.f32 %v1568_v26, %v2967_v8  ;;  %v1008_v51 = vsel %vm42_vm0, %v1006_v53, %v1007_v0  ;;  %v1009_v26 = vstv %s2924_s24  ;;  %s3136_s24 = sld [smem:[#allocation2 + $0x9e]] }
  0x9c   :  { %v1020_v8 = vstv %s2930_s30  ;;  %v1021_v32 = vstv %s2932_s5  ;;  %v1034_v17 = vstv %s2937_s26  ;;  %v1048_v11 = vstv %s2950_s29  ;;  %s3059_s26 = sld [smem:[#allocation2 + $0xeb]]  ;;  %s3138_s30 = sld [smem:[#allocation2 + $0xef]] }
  0x9d   :  { %v897_v58 = vadd.f32 %v895_v48, %v882_v20  ;;  %v1573_v48 = vld [vmem:[%s3604_s0 + $0x51] sm:$0x1f]  ;;  %v3027_v52 = vsel %vm41_vm1, %v995_v49, %v994_v5  ;;  %v3031_v53 = vsel %vm41_vm1, %v1009_v26, %v1008_v51  ;;  %v1062_v0 = vstv %s2971_s13  ;;  %s3145_s29 = sld [smem:[#allocation2 + $0x4c]]  ;;  %s1692_s13 = smov 127  }
  0x9e   :  { %v983_v55 = vmul.f32 %v1573_v48, %v3004_v31  ;;  %3671 = vst [vmem:[#allocation36_spill] sm:$0xff] %v3027_v52  ;;  %3672 = vst [vmem:[#allocation37_spill] sm:$0xff] %v3031_v53  ;;  %v1578_v48 = vld [vmem:[%s3604_s0 + $0x81] sm:$0x1f]  ;;  %v1023_v31 = vstv %s2981_s12  ;;  %v1036_v49 = vsel %vm42_vm0, %v1034_v17, %v1035_v24  ;;  %v1583_v5 = vld [vmem:[%s3604_s0 + $0xb1] sm:$0x1f]  ;;  %v1037_v51 = vstv %s2983_s14 }
  0x9f   :  { %v912_v20 = vadd.f32 %v910_v18, %v897_v58  ;;  %v1049_v18 = vstv %s2952_s4  ;;  %v1063_v58 = vstv %s2973_s16  ;;  %v1077_v10 = vstv %s2995_s17  ;;  %s3074_s4 = sld [smem:[#allocation2 + $0x9c]]  ;;  %s3182_s16 = sld [smem:[#allocation2 + $0xa0]] }
  0xa0   :  { %v1050_v26 = vsel %vm42_vm0, %v1048_v11, %v1049_v18  ;;  %v997_v17 = vmul.f32 %v1578_v48, %v3027_v52  ;;  %v1588_v11 = vld [vmem:[%s3604_s0 + $0xe1] sm:$0x1f]  ;;  %s3208_s17 = sld [smem:[#allocation2 + $0xf2]] }
  0xa1   :  { %v927_v61 = vadd.f32 %v925_v46, %v912_v20  ;;  %v1022_v20 = vsel %vm42_vm0, %v1020_v8, %v1021_v32  ;;  %v1064_v32 = vsel %vm42_vm0, %v1062_v0, %v1063_v58  ;;  %v1076_v8 = vstv %s2993_s15  ;;  %v1598_v0 = vld [vmem:[%s3604_s0 + $0x141] sm:$0x1f]  ;;  %s3206_s15 = sld [smem:[#allocation2 + $0xa1]] }
  0xa2   :  { %v3072_v18 = vsel %vm41_vm1, %v1023_v31, %v1022_v20  ;;  %v1603_v20 = vld [vmem:[%s3604_s0 + $0x171] sm:$0x1f] }
  0xa3   :  { %v942_v46 = vadd.f32 %v940_v16, %v927_v61  ;;  %v1051_v16 = vstv %s2987_s1  ;;  %v1065_v61 = vstv %s2989_s2  ;;  %3673 = vst [vmem:[#allocation38_spill] sm:$0xff] %v3072_v18  ;;  %s3106_s1 = sld [smem:[#allocation2 + $0x4a]]  ;;  %s3108_s2 = sld [smem:[#allocation2 + $0x4b]] }
  0xa4   :  { %v3090_v31 = vsel %vm41_vm1, %v1051_v16, %v1050_v26  ;;  %v3094_v58 = vsel %vm41_vm1, %v1065_v61, %v1064_v32  ;;  %v1263_v61 = vld [vmem:[%s3604_s0 + $0x38] sm:$0x1f] }
  0xa5   :  { %v957_v3 = vadd.f32 %v955_v45, %v942_v46  ;;  %v1011_v45 = vmul.f32 %v1583_v5, %v3031_v53  ;;  %3675 = vst [vmem:[#allocation40_spill] sm:$0xff] %v3090_v31  ;;  %3676 = vst [vmem:[#allocation41_spill] sm:$0xff] %v3094_v58  ;;  %v1078_v46 = vsel %vm42_vm0, %v1076_v8, %v1077_v10  ;;  %v1090_v5 = vstv %s3021_s22  ;;  %v52_v10 = vld [vmem:[%s3604_s0 + $0x8] sm:$0x1f] }
  0xa6   :  { %v1053_v32 = vmul.f32 %v1598_v0, %v3090_v31  ;;  %v1067_v8 = vmul.f32 %v1603_v20, %v3094_v58  ;;  %v1268_v0 = vld [vmem:[%s3604_s0 + $0x68] sm:$0x1f]  ;;  %v1119_v20 = vstv %s3063_s10  ;;  %v1133_v58 = vstv %s3076_s6  ;;  %v1273_v31 = vld [vmem:[%s3604_s0 + $0x98] sm:$0x1f] }
  0xa7   :  { %v971_v24 = vadd.f32 %v969_v54, %v957_v3  ;;  %v1593_v3 = vld [vmem:[%s3604_s0 + $0x111] sm:$0x1f]  ;;  %v3083_v54 = vsel %vm41_vm1, %v1037_v51, %v1036_v49  ;;  %v1079_v49 = vstv %s3016_s20  ;;  %v1091_v51 = vstv %s3023_s21 }
  0xa8   :  { %3674 = vst [vmem:[#allocation39_spill] sm:$0xff] %v3083_v54  ;;  %v1039_v16 = vmul.f32 %v1593_v3, %v3083_v54  ;;  %v1104_v54 = vstv %s3057_s27  ;;  %s3154_s27 = sld [smem:[#allocation2 + $0x9f]] }
  0xa9   :  { %v985_v48 = vadd.f32 %v983_v55, %v971_v24  ;;  %v1025_v55 = vmul.f32 %v1588_v11, %v3072_v18  ;;  %v1608_v24 = vld [vmem:[%s3604_s0 + $0x1a1] sm:$0x1f]  ;;  %v1092_v11 = vsel %vm42_vm0, %v1090_v5, %v1091_v51  ;;  %v1105_v18 = vstv %s3059_s26 }
  0xaa   :  { %v1121_v53 = vstv %s3106_s1  ;;  %v1135_v52 = vstv %s3108_s2  ;;  %s1693_s2 = smov 121  }
  0xab   :  { %v999_v26 = vadd.f32 %v997_v17, %v985_v48  ;;  %v3129_v17 = vsel %vm41_vm1, %v1079_v49, %v1078_v46  ;;  %v1093_v48 = vstv %s3051_s25  ;;  %v1118_v46 = vstv %s3061_s28  ;;  %s3152_s25 = sld [smem:[#allocation2 + $0x4d]] }
  0xac   :  { %3677 = vst [vmem:[#allocation42_spill] sm:$0xff] %v3129_v17  ;;  %v62_v49 = vmul.f32 %v1773_v14, %v52_v10  ;;  %v1081_v51 = vmul.f32 %v1608_v24, %v3129_v17  ;;  %v1613_v14 = vld [vmem:[%s3604_s0 + $0x22] sm:$0x1f]  ;;  %v1107_v10 = vstv %s3098_s11  ;;  %v1120_v17 = vsel %vm42_vm0, %v1118_v46, %v1119_v20  ;;  %s3190_s11 = sld [smem:[#allocation2 + $0x4e]]  ;;  %v1618_v46 = vld [vmem:[%s3604_s0 + $0x52] sm:$0x1f] }
  0xad   :  { %v1013_v3 = vadd.f32 %v1011_v45, %v999_v26  ;;  %v77_v45 = vmul.f32 %v1263_v61, %v1798_v23  ;;  %v1132_v26 = vstv %s3074_s4  ;;  %v3164_v23 = vsel %vm41_vm1, %v1093_v48, %v1092_v11  ;;  %s3167_s4 = sld [smem:[#allocation2 + $0xf0]]  ;;  %v1278_v11 = vld [vmem:[%s3604_s0 + $0xc8] sm:$0x1f] }
  0xae   :  { %v92_v61 = vmul.f32 %v1268_v0, %v1812_v29  ;;  %v1134_v48 = vsel %vm42_vm0, %v1132_v26, %v1133_v58  ;;  %v107_v29 = vmul.f32 %v1273_v31, %v1836_v38  ;;  %v1147_v0 = vstv %s3117_s19  ;;  %v1283_v58 = vld [vmem:[%s3604_s0 + $0xf8] sm:$0x1f] }
  0xaf   :  { %v1027_v5 = vadd.f32 %v1025_v55, %v1013_v3  ;;  %v64_v55 = vadd.f32 %v62_v49, %v1769_v13  ;;  %v1106_v3 = vsel %vm42_vm0, %v1104_v54, %v1105_v18  ;;  %v1095_v54 = vmul.f32 %v1613_v14, %v3164_v23 }
  0xb0   :  { %v3200_v38 = vsel %vm41_vm1, %v1107_v10, %v1106_v3  ;;  %v3204_v31 = vsel %vm41_vm1, %v1121_v53, %v1120_v17  ;;  %v122_v20 = vmul.f32 %v1278_v11, %v1848_v42  ;;  %v1161_v26 = vstv %s3138_s30  ;;  %v1288_v53 = vld [vmem:[%s3604_s0 + $0x128] sm:$0x1f]  ;;  %v1623_v17 = vld [vmem:[%s3604_s0 + $0x82] sm:$0x1f]  ;;  %v1628_v42 = vld [vmem:[%s3604_s0 + $0xb2] sm:$0x1f] }
  0xb1   :  { %v1041_v24 = vadd.f32 %v1039_v16, %v1027_v5  ;;  %v79_v13 = vadd.f32 %v77_v45, %v64_v55  ;;  %v1146_v16 = vstv %s3115_s18  ;;  %v3213_v45 = vsel %vm41_vm1, %v1135_v52, %v1134_v48  ;;  %s3217_s18 = sld [smem:[#allocation2 + $0x4f]]  ;;  %v1293_v11 = vld [vmem:[%s3604_s0 + $0x158] sm:$0x1f] }
  0xb2   :  { %v1160_v5 = vstv %s3136_s24  ;;  %v1148_v52 = vsel %vm42_vm0, %v1146_v16, %v1147_v0  ;;  %v137_v10 = vmul.f32 %v1283_v58, %v1869_v50  ;;  %v1174_v3 = vstv %s3154_s27  ;;  %s3235_s24 = sld [smem:[#allocation2 + $0x50]]  ;;  %v1298_v58 = vld [vmem:[%s3604_s0 + $0x188] sm:$0x1f] }
  0xb3   :  { %v1055_v18 = vadd.f32 %v1053_v32, %v1041_v24  ;;  %v94_v32 = vadd.f32 %v92_v61, %v79_v13  ;;  %v1109_v61 = vmul.f32 %v1618_v46, %v3200_v38  ;;  %v1163_v24 = vstv %s3152_s25  ;;  %v1633_v46 = vld [vmem:[%s3604_s0 + $0xe2] sm:$0x1f] }
  0xb4   :  { %v1162_v48 = vsel %vm42_vm0, %v1160_v5, %v1161_v26  ;;  %v1175_v13 = vstv %s3167_s4  ;;  %v152_v50 = vmul.f32 %v1288_v53, %v1889_v59  ;;  %v1137_v16 = vmul.f32 %v1628_v42, %v3213_v45  ;;  %v1638_v42 = vld [vmem:[%s3604_s0 + $0x112] sm:$0x1f] }
  0xb5   :  { %v1069_v49 = vadd.f32 %v1067_v8, %v1055_v18  ;;  %v1149_v8 = vstv %s3145_s29  ;;  %v109_v14 = vadd.f32 %v107_v29, %v94_v32  ;;  %v1123_v18 = vmul.f32 %v1623_v17, %v3204_v31  ;;  %v186_v17 = vld [vmem:[%s3604_s0 + $0x9] sm:$0x1f] }
  0xb6   :  { %v3248_v0 = vsel %vm41_vm1, %v1149_v8, %v1148_v52  ;;  %v1188_v59 = vstv %s3182_s16  ;;  %v3261_v5 = vsel %vm41_vm1, %v1163_v24, %v1162_v48  ;;  %v1176_v26 = vsel %vm42_vm0, %v1174_v3, %v1175_v13  ;;  %v1306_v3 = vld [vmem:[%s3604_s0 + $0x39] sm:$0x1f] }
  0xb7   :  { %v1083_v55 = vadd.f32 %v1081_v51, %v1069_v49  ;;  %v124_v29 = vadd.f32 %v122_v20, %v109_v14  ;;  %v167_v20 = vmul.f32 %v1293_v11, %v1914_v6  ;;  %v1177_v53 = vstv %s3190_s11  ;;  %v1643_v11 = vld [vmem:[%s3604_s0 + $0x142] sm:$0x1f] }
  0xb8   :  { %v1202_v52 = vstv %s3206_s15  ;;  %v1203_v6 = vstv %s3208_s17  ;;  %v182_v14 = vmul.f32 %v1298_v58, %v1927_v12  ;;  %v1191_v24 = vstv %s3217_s18  ;;  %v1311_v58 = vld [vmem:[%s3604_s0 + $0x69] sm:$0x1f] }
  0xb9   :  { %v1097_v51 = vadd.f32 %v1095_v54, %v1083_v55  ;;  %v1189_v54 = vstv %s3184_s9  ;;  %v139_v32 = vadd.f32 %v137_v10, %v124_v29  ;;  %v1151_v55 = vmul.f32 %v1633_v46, %v3248_v0  ;;  %v1648_v46 = vld [vmem:[%s3604_s0 + $0x172] sm:$0x1f] }
  0xba   :  { %v3287_v48 = vsel %vm41_vm1, %v1177_v53, %v1176_v26  ;;  %v196_v13 = vmul.f32 %v1948_v22, %v186_v17  ;;  %v224_v17 = vmul.f32 %v1311_v58, %v1980_v37 }
  0xbb   :  { %v1111_v49 = vadd.f32 %v1109_v61, %v1097_v51  ;;  %v154_v8 = vadd.f32 %v152_v50, %v139_v32  ;;  %v1190_v61 = vsel %vm42_vm0, %v1188_v59, %v1189_v54  ;;  %v1165_v50 = vmul.f32 %v1638_v42, %v3261_v5 }
  0xbc   :  { %v1204_v51 = vsel %vm42_vm0, %v1202_v52, %v1203_v6  ;;  %v3302_v59 = vsel %vm41_vm1, %v1191_v24, %v1190_v61  ;;  %v1179_v32 = vmul.f32 %v1643_v11, %v3287_v48  ;;  %v1321_v52 = vld [vmem:[%s3604_s0 + $0xc9] sm:$0x1f]  ;;  %v266_v11 = vmul.f32 %v1326_v1, %v2043_v4 }
  0xbd   :  { %v1125_v10 = vadd.f32 %v1123_v18, %v1111_v49  ;;  %v169_v12 = vadd.f32 %v167_v20, %v154_v8  ;;  %v1205_v18 = vstv %s3235_s24  ;;  %v1316_v20 = vld [vmem:[%s3604_s0 + $0x99] sm:$0x1f]  ;;  %v1653_v49 = vld [vmem:[%s3604_s0 + $0x1a2] sm:$0x1f]  ;;  %v252_v37 = vmul.f32 %v1321_v52, %v2021_v57  ;;  %v1331_v24 = vld [vmem:[%s3604_s0 + $0x129] sm:$0x1f] }
  0xbe   :  { %v3314_v26 = vsel %vm41_vm1, %v1205_v18, %v1204_v51  ;;  %v238_v8 = vmul.f32 %v1316_v20, %v2001_v47  ;;  %v1336_v47 = vld [vmem:[%s3604_s0 + $0x159] sm:$0x1f]  ;;  %v1341_v57 = vld [vmem:[%s3604_s0 + $0x189] sm:$0x1f] }
  0xbf   :  { %v1139_v29 = vadd.f32 %v1137_v16, %v1125_v10  ;;  %v184_v22 = vadd.f32 %v182_v14, %v169_v12  ;;  %v210_v16 = vmul.f32 %v1306_v3, %v1968_v33  ;;  %v1193_v33 = vmul.f32 %v1648_v46, %v3302_v59  ;;  %v312_v4 = vld [vmem:[%s3604_s0 + $0xa] sm:$0x1f] }
  0xc0   :  { %v1207_v10 = vmul.f32 %v1653_v49, %v3314_v26  ;;  %v294_v18 = vmul.f32 %v1336_v47, %v2085_v28  ;;  %v1354_v28 = vld [vmem:[%s3604_s0 + $0x6a] sm:$0x1f] }
  0xc1   :  { %v1153_v54 = vadd.f32 %v1151_v55, %v1139_v29  ;;  %v198_v53 = vadd.f32 %v196_v13, %v184_v22  ;;  %v280_v29 = vmul.f32 %v1331_v24, %v2059_v15  ;;  %v308_v22 = vmul.f32 %v1341_v57, %v2100_v36  ;;  %v1349_v15 = vld [vmem:[%s3604_s0 + $0x3a] sm:$0x1f] }
  0xc2   :  { %v1359_v36 = vld [vmem:[%s3604_s0 + $0x9a] sm:$0x1f] }
  0xc3   :  { %v1167_v42 = vadd.f32 %v1165_v50, %v1153_v54  ;;  %v212_v6 = vadd.f32 %v210_v16, %v198_v53  ;;  %v336_v53 = vmul.f32 %v1349_v15, %v2147_v63  ;;  %v364_v63 = vmul.f32 %v1359_v36, %v2186_v25  ;;  %v1444_v36 = vld [vmem:[%s3604_s0 + $0x79] sm:$0x1f] }
  0xc5   :  { %v1181_v14 = vadd.f32 %v1179_v32, %v1167_v42  ;;  %v226_v55 = vadd.f32 %v224_v17, %v212_v6  ;;  %v322_v32 = vmul.f32 %v2112_v43, %v312_v4  ;;  %v1364_v43 = vld [vmem:[%s3604_s0 + $0xca] sm:$0x1f]  ;;  %v1369_v6 = vld [vmem:[%s3604_s0 + $0xfa] sm:$0x1f] }
  0xc6   :  { %v392_v1 = vmul.f32 %v1369_v6, %v2205_v35  ;;  %v1454_v6 = vld [vmem:[%s3604_s0 + $0xd9] sm:$0x1f] }
  0xc7   :  { %v1195_v61 = vadd.f32 %v1193_v33, %v1181_v14  ;;  %v240_v3 = vadd.f32 %v238_v8, %v226_v55  ;;  %v350_v33 = vmul.f32 %v1354_v28, %v2154_v2  ;;  %v378_v14 = vmul.f32 %v1364_v43, %v2201_v34  ;;  %v1374_v2 = vld [vmem:[%s3604_s0 + $0x12a] sm:$0x1f]  ;;  %v1379_v55 = vld [vmem:[%s3604_s0 + $0x15a] sm:$0x1f] }
  0xc8   :  { %v406_v25 = vmul.f32 %v1374_v2, %v2240_v60  ;;  %v420_v34 = vmul.f32 %v1379_v55, %v2251_v62  ;;  %v1449_v43 = vld [vmem:[%s3604_s0 + $0xa9] sm:$0x1f] }
  0xc9   :  { %v1209_v12 = vadd.f32 %v1207_v10, %v1195_v61  ;;  %v254_v13 = vadd.f32 %v252_v37, %v240_v3  ;;  %v1384_v61 = vld [vmem:[%s3604_s0 + $0x18a] sm:$0x1f]  ;;  %v1389_v3 = vld [vmem:[%s3604_s0 + $0x18] sm:$0x1f] }
  0xca   :  { %v434_v35 = vmul.f32 %v1384_v61, %v2287_v27  ;;  %v449_v60 = vmul.f32 %v1389_v3, %v2291_v30  ;;  %v1459_v2 = vld [vmem:[%s3604_s0 + $0x109] sm:$0x1f]  ;;  %v3682_v61 = vld [vmem:[#allocation12_spill] sm:$0xff] }
  0xcb   :  { %v1211_v50 = vadd.f32 3.0, %v1209_v12  ;;  %v268_v51 = vadd.f32 %v266_v11, %v254_v13  ;;  %v1399_v13 = vld [vmem:[%s3604_s0 + $0x78] sm:$0x1f] }
  0xcc   :  { %v479_v27 = vmul.f32 %v1399_v13, %v2345_v7 }
  0xcd   :  { %v1213_v58 = vmax.f32 %v1211_v50, 0.0  ;;  %v282_v46 = vadd.f32 %v280_v29, %v268_v51  ;;  %v1404_v50 = vld [vmem:[%s3604_s0 + $0xa8] sm:$0x1f]  ;;  %v1409_v51 = vld [vmem:[%s3604_s0 + $0xd8] sm:$0x1f] }
  0xce   :  { %v494_v30 = vmul.f32 %v1404_v50, %v2352_v9  ;;  %v3685_v50 = vld [vmem:[#allocation15_spill] sm:$0xff] }
  0xcf   :  { %v1215_v16 = vmin.f32 %v1213_v58, 6.0  ;;  %v296_v54 = vadd.f32 %v294_v18, %v282_v46  ;;  %v1414_v58 = vld [vmem:[%s3604_s0 + $0x108] sm:$0x1f]  ;;  %v1419_v46 = vld [vmem:[%s3604_s0 + $0x138] sm:$0x1f] }
  0xd0   :  { %v524_v7 = vmul.f32 %v1414_v58, %v2385_v41  ;;  %v539_v9 = vmul.f32 %v1419_v46, %v2438_v19  ;;  %v1489_v58 = vld [vmem:[%s3604_s0 + $0x7a] sm:$0x1f] }
  0xd1   :  { %v1217_v20 = vmul.f32 %v1215_v16, %v1209_v12  ;;  %v310_v49 = vadd.f32 %v308_v22, %v296_v54  ;;  %v1394_v12 = vld [vmem:[%s3604_s0 + $0x48] sm:$0x1f]  ;;  %v1429_v54 = vld [vmem:[%s3604_s0 + $0x198] sm:$0x1f] }
  0xd2   :  { %v464_v62 = vmul.f32 %v1394_v12, %v2331_v56  ;;  %v509_v56 = vmul.f32 %v1409_v51, %v2381_v40  ;;  %v1424_v16 = vld [vmem:[%s3604_s0 + $0x168] sm:$0x1f]  ;;  %v569_v41 = vmul.f32 %v1429_v54, %v2457_v39  ;;  %v1474_v12 = vld [vmem:[%s3604_s0 + $0x199] sm:$0x1f] }
  0xd3   :  { %v3351_v17 = vmul.f32 0.16666667, %v1217_v20  ;;  %v324_v42 = vadd.f32 %v322_v32, %v310_v49  ;;  %v554_v40 = vmul.f32 %v1424_v16, %v2445_v21  ;;  %v1434_v20 = vld [vmem:[%s3604_s0 + $0x19] sm:$0x1f]  ;;  %v1439_v49 = vld [vmem:[%s3604_s0 + $0x49] sm:$0x1f] }
  0xd4   :  { %v583_v19 = vmul.f32 %v1434_v20, %v2461_v44  ;;  %v3678_v21 = vld [vmem:[#allocation8_spill] sm:$0xff]  ;;  %v3679_v39 = vld [vmem:[#allocation9_spill] sm:$0xff]  ;;  %v3680_v44 = vld [vmem:[#allocation10_spill] sm:$0xff] }
  0xd5   :  { %1223 = vrot.lane.b32.xlu0 %v3351_v17, %s1692_s13  ;;  %v338_v52 = vadd.f32 %v336_v53, %v324_v42  ;;  %v3688_v16 = vld [vmem:[#allocation18_spill] sm:$0xff]  ;;  %v1504_v20 = vld [vmem:[%s3604_s0 + $0x10a] sm:$0x1f] }
  0xd7   :  { %v352_v8 = vadd.f32 %v350_v33, %v338_v52  ;;  %v597_v33 = vmul.f32 %v1439_v49, %v3678_v21  ;;  %v1514_v21 = vld [vmem:[%s3604_s0 + $0x16a] sm:$0x1f] }
  0xd9   :  { %v366_v10 = vadd.f32 %v364_v63, %v352_v8  ;;  %v611_v63 = vmul.f32 %v1444_v36, %v3679_v39  ;;  %v3691_v36 = vld [vmem:[#allocation21_spill] sm:$0xff]  ;;  %v1519_v39 = vld [vmem:[%s3604_s0 + $0x19a] sm:$0x1f] }
  0xdb   :  { %v380_v37 = vadd.f32 %v378_v14, %v366_v10  ;;  %v625_v14 = vmul.f32 %v1449_v43, %v3680_v44  ;;  %v3692_v43 = vld [vmem:[#allocation22_spill] sm:$0xff]  ;;  %v1524_v44 = vld [vmem:[%s3604_s0 + $0x28] sm:$0x1f] }
  0xdd   :  { %v394_v24 = vadd.f32 %v392_v1, %v380_v37  ;;  %v3681_v1 = vld [vmem:[#allocation11_spill] sm:$0xff] }
  0xde   :  { %v639_v55 = vmul.f32 %v1454_v6, %v3681_v1  ;;  %v1464_v37 = vld [vmem:[%s3604_s0 + $0x139] sm:$0x1f] }
  0xdf   :  { %v408_v11 = vadd.f32 %v406_v25, %v394_v24  ;;  %v653_v24 = vmul.f32 %v1459_v2, %v3682_v61  ;;  %v3693_v6 = vld [vmem:[#allocation23_spill] sm:$0xff]  ;;  %v3694_v2 = vld [vmem:[#allocation24_spill] sm:$0xff]  ;;  %v1534_v61 = vld [vmem:[%s3604_s0 + $0x88] sm:$0x1f] }
  0xe0   :  { %v1529_v1 = vld [vmem:[%s3604_s0 + $0x58] sm:$0x1f] }
  0xe1   :  { %v422_v47 = vadd.f32 %v420_v34, %v408_v11  ;;  %v1469_v34 = vld [vmem:[%s3604_s0 + $0x169] sm:$0x1f] }
  0xe2   :  { %v3683_v11 = vld [vmem:[#allocation13_spill] sm:$0xff] }
  0xe3   :  { %v436_v29 = vadd.f32 %v434_v35, %v422_v47  ;;  %v667_v35 = vmul.f32 %v1464_v37, %v3683_v11  ;;  %v3695_v37 = vld [vmem:[#allocation25_spill] sm:$0xff]  ;;  %v1539_v11 = vld [vmem:[%s3604_s0 + $0xb8] sm:$0x1f] }
  0xe5   :  { %v451_v57 = vadd.f32 %v449_v60, %v436_v29  ;;  %v3684_v60 = vld [vmem:[#allocation14_spill] sm:$0xff]  ;;  %v1479_v29 = vld [vmem:[%s3604_s0 + $0x1a] sm:$0x1f] }
  0xe6   :  { %v681_v13 = vmul.f32 %v1469_v34, %v3684_v60  ;;  %v3696_v34 = vld [vmem:[#allocation26_spill] sm:$0xff]  ;;  %v1544_v60 = vld [vmem:[%s3604_s0 + $0xe8] sm:$0x1f] }
  0xe7   :  { %v466_v18 = vadd.f32 %v464_v62, %v451_v57  ;;  %v695_v57 = vmul.f32 %v1474_v12, %v3685_v50  ;;  %v3697_v12 = vld [vmem:[#allocation27_spill] sm:$0xff] }
  0xe8   :  { %v1549_v50 = vld [vmem:[%s3604_s0 + $0x118] sm:$0x1f] }
  0xe9   :  { %v481_v4 = vadd.f32 %v479_v27, %v466_v18  ;;  %v1484_v27 = vld [vmem:[%s3604_s0 + $0x4a] sm:$0x1f]  ;;  %v3686_v18 = vld [vmem:[#allocation16_spill] sm:$0xff] }
  0xeb   :  { %v496_v22 = vadd.f32 %v494_v30, %v481_v4  ;;  %v709_v30 = vmul.f32 %v1479_v29, %v3686_v18  ;;  %v3698_v29 = vld [vmem:[#allocation28_spill] sm:$0xff]  ;;  %v1554_v18 = vld [vmem:[%s3604_s0 + $0x148] sm:$0x1f] }
  0xed   :  { %v511_v15 = vadd.f32 %v509_v56, %v496_v22  ;;  %v3687_v56 = vld [vmem:[#allocation17_spill] sm:$0xff] }
  0xee   :  { %v723_v46 = vmul.f32 %v1484_v27, %v3687_v56  ;;  %v1494_v22 = vld [vmem:[%s3604_s0 + $0xaa] sm:$0x1f]  ;;  %v1559_v56 = vld [vmem:[%s3604_s0 + $0x178] sm:$0x1f] }
  0xef   :  { %v526_v32 = vadd.f32 %v524_v7, %v511_v15  ;;  %v737_v15 = vmul.f32 %v1489_v58, %v3688_v16  ;;  %v3699_v27 = vld [vmem:[#allocation29_spill] sm:$0xff]  ;;  %v3700_v58 = vld [vmem:[#allocation30_spill] sm:$0xff] }
  0xf0   :  { %v1564_v16 = vld [vmem:[%s3604_s0 + $0x1a8] sm:$0x1f] }
  0xf1   :  { %v541_v28 = vadd.f32 %v539_v9, %v526_v32  ;;  %v1499_v9 = vld [vmem:[%s3604_s0 + $0xda] sm:$0x1f] }
  0xf2   :  { %v3689_v32 = vld [vmem:[#allocation19_spill] sm:$0xff] }
  0xf3   :  { %v556_v53 = vadd.f32 %v554_v40, %v541_v28  ;;  %v751_v40 = vmul.f32 %v1494_v22, %v3689_v32  ;;  %v3701_v22 = vld [vmem:[#allocation31_spill] sm:$0xff]  ;;  %v1569_v32 = vld [vmem:[%s3604_s0 + $0x29] sm:$0x1f] }
  0xf5   :  { %v571_v42 = vadd.f32 %v569_v41, %v556_v53  ;;  %v3690_v41 = vld [vmem:[#allocation20_spill] sm:$0xff]  ;;  %v1509_v53 = vld [vmem:[%s3604_s0 + $0x13a] sm:$0x1f] }
  0xf6   :  { %v765_v49 = vmul.f32 %v1499_v9, %v3690_v41  ;;  %v3702_v9 = vld [vmem:[#allocation32_spill] sm:$0xff]  ;;  %v1574_v41 = vld [vmem:[%s3604_s0 + $0x59] sm:$0x1f] }
  0xf7   :  { %v585_v52 = vadd.f32 %v583_v19, %v571_v42  ;;  %v779_v42 = vmul.f32 %v1504_v20, %v3691_v36  ;;  %v3703_v20 = vld [vmem:[#allocation33_spill] sm:$0xff] }
  0xf8   :  { %v1579_v36 = vld [vmem:[%s3604_s0 + $0x89] sm:$0x1f] }
  0xf9   :  { %v599_v8 = vadd.f32 %v597_v33, %v585_v52  ;;  %v793_v52 = vmul.f32 %v1509_v53, %v3692_v43  ;;  %v3704_v53 = vld [vmem:[#allocation34_spill] sm:$0xff]  ;;  %v1584_v43 = vld [vmem:[%s3604_s0 + $0xb9] sm:$0x1f] }
  0xfb   :  { %v613_v10 = vadd.f32 %v611_v63, %v599_v8  ;;  %v807_v8 = vmul.f32 %v1514_v21, %v3693_v6  ;;  %v3705_v21 = vld [vmem:[#allocation35_spill] sm:$0xff]  ;;  %v1589_v6 = vld [vmem:[%s3604_s0 + $0xe9] sm:$0x1f] }
  0xfd   :  { %v627_v25 = vadd.f32 %v625_v14, %v613_v10  ;;  %v821_v10 = vmul.f32 %v1519_v39, %v3694_v2  ;;  %v3706_v39 = vld [vmem:[#allocation36_spill] sm:$0xff]  ;;  %v1594_v2 = vld [vmem:[%s3604_s0 + $0x119] sm:$0x1f] }
  0xff   :  { %v641_v3 = vadd.f32 %v639_v55, %v627_v25  ;;  %v836_v25 = vmul.f32 %v1524_v44, %v3695_v37  ;;  %v3707_v44 = vld [vmem:[#allocation37_spill] sm:$0xff] }
 0x100   :  { %v1599_v37 = vld [vmem:[%s3604_s0 + $0x149] sm:$0x1f] }
 0x101   :  { %v655_v47 = vadd.f32 %v653_v24, %v641_v3  ;;  %v851_v3 = vmul.f32 %v1529_v1, %v3696_v34  ;;  %v3708_v1 = vld [vmem:[#allocation38_spill] sm:$0xff]  ;;  %v1604_v34 = vld [vmem:[%s3604_s0 + $0x179] sm:$0x1f] }
 0x103   :  { %v669_v62 = vadd.f32 %v667_v35, %v655_v47  ;;  %v866_v47 = vmul.f32 %v1534_v61, %v3697_v12  ;;  %v3709_v61 = vld [vmem:[#allocation39_spill] sm:$0xff]  ;;  %v1609_v12 = vld [vmem:[%s3604_s0 + $0x1a9] sm:$0x1f] }
 0x105   :  { %v683_v51 = vadd.f32 %v681_v13, %v669_v62  ;;  %v881_v62 = vmul.f32 %v1539_v11, %v3698_v29  ;;  %v3710_v11 = vld [vmem:[#allocation40_spill] sm:$0xff]  ;;  %v1614_v29 = vld [vmem:[%s3604_s0 + $0x2a] sm:$0x1f] }
 0x107   :  { %v697_v4 = vadd.f32 %v695_v57, %v683_v51  ;;  %v896_v51 = vmul.f32 %v1544_v60, %v3699_v27  ;;  %v3711_v60 = vld [vmem:[#allocation41_spill] sm:$0xff]  ;;  %v1619_v27 = vld [vmem:[%s3604_s0 + $0x5a] sm:$0x1f] }
 0x109   :  { %v711_v7 = vadd.f32 %v709_v30, %v697_v4  ;;  %v911_v4 = vmul.f32 %v1549_v50, %v3700_v58  ;;  %v3712_v50 = vld [vmem:[#allocation42_spill] sm:$0xff] }
 0x10b   :  { %v725_v54 = vadd.f32 %v723_v46, %v711_v7  ;;  %v926_v7 = vmul.f32 %v1554_v18, %v3701_v22  ;;  %v1096_v18 = vmul.f32 %v1614_v29, %v3164_v23 }
 0x10d   :  { %v739_v28 = vadd.f32 %v737_v15, %v725_v54  ;;  %v941_v54 = vmul.f32 %v1559_v56, %v3702_v9  ;;  %v1629_v56 = vld [vmem:[%s3604_s0 + $0xba] sm:$0x1f] }
 0x10e   :  { %v1138_v23 = vmul.f32 %v1629_v56, %v3213_v45 }
 0x10f   :  { %v753_v19 = vadd.f32 %v751_v40, %v739_v28  ;;  %v956_v28 = vmul.f32 %v1564_v16, %v3703_v20 }
 0x111   :  { %v767_v33 = vadd.f32 %v765_v49, %v753_v19  ;;  %v970_v19 = vmul.f32 %v1569_v32, %v3704_v53 }
 0x113   :  { %v781_v63 = vadd.f32 %v779_v42, %v767_v33  ;;  %v984_v33 = vmul.f32 %v1574_v41, %v3705_v21 }
 0x115   :  { %v795_v14 = vadd.f32 %v793_v52, %v781_v63  ;;  %v998_v63 = vmul.f32 %v1579_v36, %v3706_v39 }
 0x117   :  { %v809_v55 = vadd.f32 %v807_v8, %v795_v14  ;;  %v1012_v14 = vmul.f32 %v1584_v43, %v3707_v44 }
 0x119   :  { %v823_v24 = vadd.f32 %v821_v10, %v809_v55  ;;  %v1026_v55 = vmul.f32 %v1589_v6, %v3708_v1 }
 0x11b   :  { %v838_v35 = vadd.f32 %v836_v25, %v823_v24  ;;  %v1040_v24 = vmul.f32 %v1594_v2, %v3709_v61 }
 0x11d   :  { %v853_v13 = vadd.f32 %v851_v3, %v838_v35  ;;  %v1054_v35 = vmul.f32 %v1599_v37, %v3710_v11 }
 0x11f   :  { %v868_v57 = vadd.f32 %v866_v47, %v853_v13  ;;  %v1068_v13 = vmul.f32 %v1604_v34, %v3711_v60 }
 0x121   :  { %v883_v30 = vadd.f32 %v881_v62, %v868_v57  ;;  %v1082_v57 = vmul.f32 %v1609_v12, %v3712_v50 }
 0x123   :  { %v898_v46 = vadd.f32 %v896_v51, %v883_v30  ;;  %v1624_v30 = vld [vmem:[%s3604_s0 + $0x8a] sm:$0x1f] }
 0x124   :  { %v1124_v22 = vmul.f32 %v1624_v30, %v3204_v31 }
 0x125   :  { %v913_v15 = vadd.f32 %v911_v4, %v898_v46  ;;  %v1110_v4 = vmul.f32 %v1619_v27, %v3200_v38 }
 0x127   :  { %v928_v40 = vadd.f32 %v926_v7, %v913_v15  ;;  %v1634_v7 = vld [vmem:[%s3604_s0 + $0xea] sm:$0x1f]  ;;  %v1639_v15 = vld [vmem:[%s3604_s0 + $0x11a] sm:$0x1f] }
 0x128   :  { %v1152_v38 = vmul.f32 %v1634_v7, %v3248_v0  ;;  %v1166_v31 = vmul.f32 %v1639_v15, %v3261_v5  ;;  %v1654_v0 = vld [vmem:[%s3604_s0 + $0x1aa] sm:$0x1f] }
 0x129   :  { %v943_v49 = vadd.f32 %v941_v54, %v928_v40  ;;  %v1644_v54 = vld [vmem:[%s3604_s0 + $0x14a] sm:$0x1f]  ;;  %v1649_v40 = vld [vmem:[%s3604_s0 + $0x17a] sm:$0x1f] }
 0x12a   :  { %v1194_v53 = vmul.f32 %v1649_v40, %v3302_v59 }
 0x12b   :  { %v958_v42 = vadd.f32 %v956_v28, %v943_v49  ;;  %v1180_v28 = vmul.f32 %v1644_v54, %v3287_v48 }
 0x12d   :  { %v972_v52 = vadd.f32 %v970_v19, %v958_v42  ;;  %v1208_v19 = vmul.f32 %v1654_v0, %v3314_v26 }
 0x12f   :  { %v986_v8 = vadd.f32 %v984_v33, %v972_v52 }
 0x131   :  { %v1000_v10 = vadd.f32 %v998_v63, %v986_v8 }
 0x133   :  { %v1014_v25 = vadd.f32 %v1012_v14, %v1000_v10 }
 0x135   :  { %v1028_v3 = vadd.f32 %v1026_v55, %v1014_v25 }
 0x137   :  { %v1042_v47 = vadd.f32 %v1040_v24, %v1028_v3 }
 0x139   :  { %v1056_v62 = vadd.f32 %v1054_v35, %v1042_v47 }
 0x13b   :  { %v1070_v51 = vadd.f32 %v1068_v13, %v1056_v62 }
 0x13d   :  { %v1084_v58 = vadd.f32 %v1082_v57, %v1070_v51 }
 0x13f   :  { %v1098_v46 = vadd.f32 %v1096_v18, %v1084_v58 }
 0x141   :  { %v1112_v16 = vadd.f32 %v1110_v4, %v1098_v46 }
 0x143   :  { %v1126_v9 = vadd.f32 %v1124_v22, %v1112_v16 }
 0x145   :  { %v1140_v32 = vadd.f32 %v1138_v23, %v1126_v9 }
 0x147   :  { %v1224_v20 = vpop.permute.xlu0 %1223  ;;  %v1154_v45 = vadd.f32 %v1152_v38, %v1140_v32 }
 0x148   :  { %v1229_v41 = vmax.f32 %v3351_v17, %v1224_v20 }
 0x149   :  { %v1168_v49 = vadd.f32 %v1166_v31, %v1154_v45 }
 0x14a   :  { %1233 = vrot.lane.b32.xlu1 %v1229_v41, %s1693_s2 }
 0x14b   :  { %v1182_v5 = vadd.f32 %v1180_v28, %v1168_v49 }
 0x14d   :  { %v1196_v36 = vadd.f32 %v1194_v53, %v1182_v5 }
 0x14f   :  { %v1210_v42 = vadd.f32 %v1208_v19, %v1196_v36 }
 0x151   :  { %v1212_v21 = vadd.f32 3.0, %v1210_v42 }
 0x153   :  { %v1214_v33 = vmax.f32 %v1212_v21, 0.0 }
 0x155   :  { %v1216_v43 = vmin.f32 %v1214_v33, 6.0 }
 0x157   :  { %v1218_v48 = vmul.f32 %v1216_v43, %v1210_v42 }
 0x159   :  { %v1220_v52 = vmul.f32 0.16666667, %v1218_v48 }
 0x15b   :  { %1225 = vrot.lane.b32.xlu0 %v1220_v52, %s1692_s13 }
 0x1bc   :  { %v1234_v17 = vpop.permute.xlu1 %1233 }
 0x1bd   :  { %v1239_v39 = vmax.f32 %v1229_v41, %v1234_v17 }
 0x1bf   :  { %v1243_v63 = vrot.slane %v1239_v39, 1 }
 0x1c1   :  { %v1247_v6 = vmax.f32 %v1239_v39, %v1243_v63 }
 0x1c3   :  { %1250 = vst.msk [vmem:[%s3607_s3] sm:$0xf] %vm1249_vm2, %v1247_v6 }
 0x1cd   :  { %v1226_v59 = vpop.permute.xlu0 %1225 }
 0x1ce   :  { %v1230_v26 = vmax.f32 %v1220_v52, %v1226_v59 }
 0x1d0   :  { %1235 = vrot.lane.b32.xlu1 %v1230_v26, %s1693_s2 }
 0x242   :  { %v1236_v8 = vpop.permute.xlu1 %1235 }
 0x243   :  { %v1240_v44 = vmax.f32 %v1230_v26, %v1236_v8 }
 0x245   :  { %v1244_v14 = vrot.slane %v1240_v44, 1 }
 0x247   :  { %v1248_v2 = vmax.f32 %v1240_v44, %v1244_v14 }
 0x249   :  { %1251 = vst.msk [vmem:[%s3607_s3 + $0x4] sm:$0xf] %vm1249_vm2, %v1248_v2 }
 0x24a   :  { %1256 = vsyncpa [#allocation3], 1 }
 0x24b   :  { %1257 = vsyncpa [#allocation5], 1 }

</bundles_post_ra>
